<compile_context>
chip_gen: v6e
topology: v6e:2x2x1
jax: 0.10.0
libtpu: 0.0.40
codegen_flags: <defaults>
</compile_context>

<pallas_src>
import math

import numpy as np
import jax
import jax.numpy as jnp
from jax.experimental import pallas as pl
from jax.experimental.pallas import tpu as pltpu

# ----------------------------- model hyper-params (small synthetic CLIP) -----
BATCH = 2
IMG_RES = 16          # clip_model.visual.input_resolution
PATCH = 4             # -> 4x4 = 16 patches, +1 class token = 17 visual tokens
VISION_WIDTH = 32
VISION_HEADS = 4
VISION_LAYERS = 2
VIS_TOKENS = (IMG_RES // PATCH) ** 2 + 1   # 17
VIS_T_PAD = 24                             # padded to a sublane multiple

CTX_LEN = 16          # text context length
N_CTX = 4             # cfg.TRAINER.PLOTPP.N_CTX
N_CLS = 3
TEXT_WIDTH = 32
TEXT_HEADS = 4
TEXT_LAYERS = 2

EMBED_DIM = 32        # joint embedding dim
DTYPE = jnp.float32   # clip_model.dtype (fp32 variant)


# ----------------------------- in-kernel building blocks ---------------------
def _mm(x2d, w, b=None):
    """(N, K) @ (K, M) [+ b] -- bf16 MXU operands (weights already bf16), f32 acc."""
    out = jnp.dot(x2d.astype(jnp.bfloat16), w.astype(jnp.bfloat16),
                  preferred_element_type=jnp.float32)
    if b is not None:
        out = out + b
    return out


def _layernorm(x, g, b, eps=1e-5):
    x = x.astype(jnp.float32)
    mu = jnp.mean(x, axis=-1, keepdims=True)
    var = jnp.mean(jnp.square(x - mu), axis=-1, keepdims=True)
    y = (x - mu) * jax.lax.rsqrt(var + eps)
    return y * g.astype(jnp.float32) + b.astype(jnp.float32)


def _mha(y2d, B, T, w_attn_ref, b_attn_ref, w_o_ref, b_o_ref, n_heads, mask):
    """Multi-head attention on a (B*T, W) f32 activation.

    Head split is done on the weight side at init time (w_attn: (3H, W, Dh),
    w_o: (H, Dh, W)); no lane-axis slicing of activations and no head
    concatenate is needed.  The 1/sqrt(Dh) scale is folded into w_q at init.
    """
    N, W = y2d.shape
    y_bf = y2d.astype(jnp.bfloat16)
    out = None
    for h in range(n_heads):                          # static unroll (n_heads=4)
        qh = (jnp.dot(y_bf, w_attn_ref[0, h],
                      preferred_element_type=jnp.float32)
              + b_attn_ref[0, h]).reshape(B, T, -1)
        kh = (jnp.dot(y_bf, w_attn_ref[0, n_heads + h],
                      preferred_element_type=jnp.float32)
              + b_attn_ref[0, n_heads + h]).reshape(B, T, -1)
        vh = (jnp.dot(y_bf, w_attn_ref[0, 2 * n_heads + h],
                      preferred_element_type=jnp.float32)
              + b_attn_ref[0, 2 * n_heads + h]).reshape(B, T, -1)
        s = jnp.einsum("bqd,bkd->bqk", qh.astype(jnp.bfloat16),
                       kh.astype(jnp.bfloat16),
                       preferred_element_type=jnp.float32)
        s = s + mask[None]                            # additive mask (causal / key-pad)
        s = s - jnp.max(s, axis=-1, keepdims=True)
        p = jnp.exp(s)
        p = p * pl.reciprocal(jnp.sum(p, axis=-1, keepdims=True), approx=True)
        oh = jnp.einsum("bqk,bkd->bqd", p.astype(jnp.bfloat16),
                        vh.astype(jnp.bfloat16),
                        preferred_element_type=jnp.float32)
        c = jnp.dot(oh.reshape(N, -1).astype(jnp.bfloat16), w_o_ref[0, h],
                    preferred_element_type=jnp.float32)
        out = c if out is None else out + c           # == concat(heads) @ W_o
    return out + b_o_ref[0]


def _transformer_block(x, refs, n_heads, mask):
    """CLIP ResidualAttentionBlock: x += attn(ln_1(x)); x += mlp(ln_2(x))."""
    (ln1_g, ln1_b, w_attn, b_attn, w_o, b_o,
     ln2_g, ln2_b, w1, b1, w2, b2) = refs
    B, T, W = x.shape
    y = _layernorm(x.reshape(B * T, W), ln1_g[0], ln1_b[0])
    x = x + _mha(y, B, T, w_attn, b_attn, w_o, b_o, n_heads, mask).reshape(B, T, W)
    y = _layernorm(x.reshape(B * T, W), ln2_g[0], ln2_b[0])
    h = _mm(y, w1[0], b1[0])
    h = h * jax.nn.sigmoid(1.702 * h)                 # QuickGELU (f32, VPU/EUP)
    x = x + _mm(h, w2[0], b2[0]).reshape(B, T, W)
    return x


# ----------------------------- fused tower kernels ---------------------------
def _vision_tower_kernel(patches_ref, conv_w_ref, class_emb_ref, pos_emb_ref,
                         ln_pre_g_ref, ln_pre_b_ref,
                         ln1_g_ref, ln1_b_ref, w_attn_ref, b_attn_ref,
                         w_o_ref, b_o_ref, ln2_g_ref, ln2_b_ref,
                         w1_ref, b1_ref, w2_ref, b2_ref,
                         ln_post_g_ref, ln_post_b_ref, proj_ref,
                         out_ref, x_state, mask_state):
    layer = pl.program_id(0)
    B, T, W = x_state.shape
    NP = patches_ref.shape[1]

    @pl.when(layer == 0)
    def _embed():
        patch_emb = _mm(patches_ref[...].reshape(B * NP, -1), conv_w_ref[...])
        # write cls / patches / pad directly into the padded VMEM scratch
        x_state[:, 0:1, :] = jnp.broadcast_to(class_emb_ref[...], (B, 1, W))
        x_state[:, 1:1 + NP, :] = patch_emb.reshape(B, NP, W)
        x_state[:, 1 + NP:, :] = jnp.zeros((B, T - 1 - NP, W), jnp.float32)
        x = x_state[...] + pos_emb_ref[...][None]     # pos_emb zero-padded to T
        x_state[...] = _layernorm(x.reshape(B * T, W), ln_pre_g_ref[...],
                                  ln_pre_b_ref[...]).reshape(B, T, W)
        # key-padding mask (pad tokens never attended to); built once, reused
        col = jax.lax.broadcasted_iota(jnp.int32, (T, T), 1)
        mask_state[...] = jnp.where(col >= 1 + NP, -1e9, 0.0).astype(jnp.float32)

    blk = (ln1_g_ref, ln1_b_ref, w_attn_ref, b_attn_ref, w_o_ref, b_o_ref,
           ln2_g_ref, ln2_b_ref, w1_ref, b1_ref, w2_ref, b2_ref)
    x_state[...] = _transformer_block(x_state[...], blk, VISION_HEADS,
                                      mask_state[...])

    @pl.when(layer == pl.num_programs(0) - 1)
    def _head():
        xv = x_state[...]
        cls_tok = xv[:, 0, :]                                         # (B, W)
        y = _layernorm(cls_tok, ln_post_g_ref[...], ln_post_b_ref[...])
        out_ref[...] = _mm(y, proj_ref[...]).astype(out_ref.dtype)


def _text_tower_kernel(prompts_ref, pos_emb_ref,
                       ln1_g_ref, ln1_b_ref, w_attn_ref, b_attn_ref,
                       w_o_ref, b_o_ref, ln2_g_ref, ln2_b_ref,
                       w1_ref, b1_ref, w2_ref, b2_ref,
                       ln_final_g_ref, ln_final_b_ref, text_proj_ref, eot_ref,
                       img_ref, scale_ref,
                       out_ref, x_state, mask_state):
    layer = pl.program_id(0)
    C, T, W = x_state.shape

    @pl.when(layer == 0)
    def _embed():
        x_state[...] = prompts_ref[...].astype(jnp.float32) + pos_emb_ref[...][None]
        # causal mask built once into VMEM scratch (not per layer)
        row = jax.lax.broadcasted_iota(jnp.int32, (T, T), 0)
        col = jax.lax.broadcasted_iota(jnp.int32, (T, T), 1)
        mask_state[...] = jnp.where(col > row, -1e9, 0.0).astype(jnp.float32)

    blk = (ln1_g_ref, ln1_b_ref, w_attn_ref, b_attn_ref, w_o_ref, b_o_ref,
           ln2_g_ref, ln2_b_ref, w1_ref, b1_ref, w2_ref, b2_ref)
    x_state[...] = _transformer_block(x_state[...], blk, TEXT_HEADS,
                                      mask_state[...])

    @pl.when(layer == pl.num_programs(0) - 1)
    def _head():
        x = _layernorm(x_state[...].reshape(C * T, W), ln_final_g_ref[...],
                       ln_final_b_ref[...]).reshape(C, T, W)
        eot = eot_ref[...]                                            # (C, T) one-hot
        pooled = jnp.sum(eot[:, :, None] * x, axis=1)                 # EOT gather (C, W)
        txt = _mm(pooled, text_proj_ref[...])                         # (C, D) f32
        # fused CLIP logit head
        img = img_ref[...].astype(jnp.float32)                        # (B, D)
        img = img * jax.lax.rsqrt(jnp.sum(img * img, axis=-1, keepdims=True))
        txt = txt * jax.lax.rsqrt(jnp.sum(txt * txt, axis=-1, keepdims=True))
        logits = jax.lax.dot_general(img, txt, (((1,), (1,)), ((), ())),
                                     preferred_element_type=jnp.float32)
        scale = jnp.exp(jnp.broadcast_to(scale_ref[0, 0], logits.shape))
        out_ref[...] = (scale * logits).astype(out_ref.dtype)


# ----------------------------- pallas_call wrappers ---------------------------
def _const_spec(shape):
    # same (whole-array) block every layer iteration -> DMA'd once, stays resident
    return pl.BlockSpec(shape, lambda l: (0,) * len(shape))


def _layer_spec(shape):
    # stacked per-layer param (L, *shape); block is one layer's slice
    return pl.BlockSpec((1,) + shape, lambda l: (l,) + (0,) * len(shape))


def _block_specs(width, heads):
    w, H = width, heads
    Dh = w // H
    return [
        _layer_spec((1, w)), _layer_spec((1, w)),                 # ln1 g,b
        _layer_spec((3 * H, w, Dh)), _layer_spec((3 * H, 1, Dh)),  # head-split qkv
        _layer_spec((H, Dh, w)), _layer_spec((1, w)),             # head-split out proj
        _layer_spec((1, w)), _layer_spec((1, w)),                 # ln2 g,b
        _layer_spec((w, 4 * w)), _layer_spec((1, 4 * w)),         # mlp w1
        _layer_spec((4 * w, w)), _layer_spec((1, w)),             # mlp w2
    ]


def _block_args(blocks):
    return (blocks["ln1_g"], blocks["ln1_b"], blocks["w_attn"], blocks["b_attn"],
            blocks["w_o"], blocks["b_o"], blocks["ln2_g"], blocks["ln2_b"],
            blocks["w1"], blocks["b1"], blocks["w2"], blocks["b2"])


_COMPILER_PARAMS = pltpu.CompilerParams(
    dimension_semantics=("arbitrary",),        # layer axis is a sequential reduction
    vmem_limit_bytes=32 * 1024 * 1024,
)


def vision_tower(patches, vp):
    B, NP, CPP = patches.shape
    W = VISION_WIDTH
    T = VIS_T_PAD
    in_specs = ([_const_spec((B, NP, CPP)), _const_spec((CPP, W)),
                 _const_spec((1, W)), _const_spec((T, W)),
                 _const_spec((1, W)), _const_spec((1, W))]
                + _block_specs(W, VISION_HEADS)
                + [_const_spec((1, W)), _const_spec((1, W)),
                   _const_spec((W, EMBED_DIM))])
    return pl.pallas_call(
        _vision_tower_kernel,
        out_shape=jax.ShapeDtypeStruct((B, EMBED_DIM), DTYPE),
        grid=(VISION_LAYERS,),
        in_specs=in_specs,
        out_specs=pl.BlockSpec((B, EMBED_DIM), lambda l: (0, 0)),
        scratch_shapes=[pltpu.VMEM((B, T, W), jnp.float32),
                        pltpu.VMEM((T, T), jnp.float32)],
        compiler_params=_COMPILER_PARAMS,
    )(patches, vp["conv_w"], vp["class_emb"], vp["pos_emb"],
      vp["ln_pre_g"], vp["ln_pre_b"],
      *_block_args(vp["blocks"]),
      vp["ln_post_g"], vp["ln_post_b"], vp["proj"])


def text_tower_and_logits(prompts, eot_onehot, img_feat, logit_scale, tp):
    C, T, W = prompts.shape
    B, D = img_feat.shape
    in_specs = ([_const_spec((C, T, W)), _const_spec((T, W))]
                + _block_specs(W, TEXT_HEADS)
                + [_const_spec((1, W)), _const_spec((1, W)),
                   _const_spec((W, EMBED_DIM)), _const_spec((C, T)),
                   _const_spec((B, D)),
                   pl.BlockSpec(memory_space=pltpu.MemorySpace.SMEM)])
    return pl.pallas_call(
        _text_tower_kernel,
        out_shape=jax.ShapeDtypeStruct((B, C), DTYPE),
        grid=(TEXT_LAYERS,),
        in_specs=in_specs,
        out_specs=pl.BlockSpec((B, C), lambda l: (0, 0)),
        scratch_shapes=[pltpu.VMEM((C, T, W), jnp.float32),
                        pltpu.VMEM((T, T), jnp.float32)],
        compiler_params=_COMPILER_PARAMS,
    )(prompts, tp["pos_emb"], *_block_args(tp["blocks"]),
      tp["ln_final_g"], tp["ln_final_b"], tp["text_proj"], eot_onehot,
      img_feat, logit_scale)


# ----------------------------- CustomCLIP forward ------------------------------
def prompt_learner_forward(p):
    """class_token_position == 'end': cat([prefix, ctx, suffix], dim=1)."""
    ctx = jnp.broadcast_to(p["ctx"][None], (N_CLS, N_CTX, p["ctx"].shape[-1]))
    return jnp.concatenate([p["token_prefix"], ctx, p["token_suffix"]], axis=1)


def custom_clip_forward(image, params):
    # conv1 (stride=patch, no bias) as patch extraction; the matmul runs in-kernel
    B, Cin, H, Wimg = image.shape
    P = PATCH
    x = image.astype(jnp.float32).reshape(B, Cin, H // P, P, Wimg // P, P)
    patches = x.transpose(0, 2, 4, 1, 3, 5).reshape(
        B, (H // P) * (Wimg // P), Cin * P * P)
    image_features = vision_tower(patches, params["visual"])

    prompts = prompt_learner_forward(params["prompt"])
    eot_onehot = jax.nn.one_hot(jnp.argmax(params["tokenized_prompts"], axis=-1),
                                CTX_LEN, dtype=jnp.float32)
    logits = text_tower_and_logits(prompts, eot_onehot, image_features,
                                   params["logit_scale"], params["text"])
    return logits


# ----------------------------- deterministic parameter init --------------------
def _nrm(key, shape, std=0.02):
    return std * jax.random.normal(key, shape, jnp.float32)


def _split_heads_cols(w, n_heads):
    W = w.shape[0]
    Dh = w.shape[1] // n_heads
    return jnp.transpose(w.reshape(W, n_heads, Dh), (1, 0, 2))   # (H, W, Dh)


def _init_block(key, width, n_heads):
    Dh = width // n_heads
    ks = jax.random.split(key, 6)
    wq = _nrm(ks[0], (width, width)) * (1.0 / math.sqrt(Dh))     # attn scale folded into q
    wk = _nrm(ks[1], (width, width))
    wv = _nrm(ks[2], (width, width))
    w_attn = jnp.concatenate([_split_heads_cols(w, n_heads) for w in (wq, wk, wv)],
                             axis=0).astype(jnp.bfloat16)        # (3H, W, Dh)
    wo = _nrm(ks[3], (width, width))
    return dict(
        ln1_g=jnp.ones((1, width), jnp.float32), ln1_b=jnp.zeros((1, width), jnp.float32),
        w_attn=w_attn,
        b_attn=jnp.zeros((3 * n_heads, 1, Dh), jnp.float32),
        w_o=wo.reshape(n_heads, Dh, width).astype(jnp.bfloat16),  # (H, Dh, W)
        b_o=jnp.zeros((1, width), jnp.float32),
        ln2_g=jnp.ones((1, width), jnp.float32), ln2_b=jnp.zeros((1, width), jnp.float32),
        w1=_nrm(ks[4], (width, 4 * width)).astype(jnp.bfloat16),
        b1=jnp.zeros((1, 4 * width), jnp.float32),
        w2=_nrm(ks[5], (4 * width, width)).astype(jnp.bfloat16),
        b2=jnp.zeros((1, width), jnp.float32),
    )


def _stack_blocks(blocks):
    return {k: jnp.stack([b[k] for b in blocks], axis=0) for k in blocks[0]}


def init_params(key):
    kv, kt, kp = jax.random.split(key, 3)

    # --- vision tower ---
    kvs = jax.random.split(kv, 4 + VISION_LAYERS)
    n_patch = (IMG_RES // PATCH) ** 2
    pos = _nrm(kvs[2], (n_patch + 1, VISION_WIDTH))
    pos_pad = jnp.zeros((VIS_T_PAD, VISION_WIDTH), jnp.float32).at[:n_patch + 1].set(pos)
    visual = dict(
        conv_w=_nrm(kvs[0], (3 * PATCH * PATCH, VISION_WIDTH)).astype(jnp.bfloat16),
        class_emb=_nrm(kvs[1], (1, VISION_WIDTH)),
        pos_emb=pos_pad,
        ln_pre_g=jnp.ones((1, VISION_WIDTH), jnp.float32),
        ln_pre_b=jnp.zeros((1, VISION_WIDTH), jnp.float32),
        blocks=_stack_blocks([_init_block(kvs[4 + i], VISION_WIDTH, VISION_HEADS)
                              for i in range(VISION_LAYERS)]),
        ln_post_g=jnp.ones((1, VISION_WIDTH), jnp.float32),
        ln_post_b=jnp.zeros((1, VISION_WIDTH), jnp.float32),
        proj=_nrm(kvs[3], (VISION_WIDTH, EMBED_DIM)).astype(jnp.bfloat16),
    )

    # --- text tower ---
    kts = jax.random.split(kt, 2 + TEXT_LAYERS)
    text = dict(
        pos_emb=_nrm(kts[0], (CTX_LEN, TEXT_WIDTH)),
        blocks=_stack_blocks([_init_block(kts[2 + i], TEXT_WIDTH, TEXT_HEADS)
                              for i in range(TEXT_LAYERS)]),
        ln_final_g=jnp.ones((1, TEXT_WIDTH), jnp.float32),
        ln_final_b=jnp.zeros((1, TEXT_WIDTH), jnp.float32),
        text_proj=_nrm(kts[1], (TEXT_WIDTH, EMBED_DIM)).astype(jnp.bfloat16),
    )

    # --- prompt learner (generic context, class_token_position='end') ---
    kps = jax.random.split(kp, 3)
    name_lens = [1, 2, 3]
    prompt = dict(
        ctx=_nrm(kps[0], (N_CTX, TEXT_WIDTH)),                                 # std=0.02
        token_prefix=_nrm(kps[1], (N_CLS, 1, TEXT_WIDTH)),                     # SOT embedding
        token_suffix=_nrm(kps[2], (N_CLS, CTX_LEN - 1 - N_CTX, TEXT_WIDTH)),   # class+EOT+pad
    )

    # tokenized prompts: only argmax (EOT position) matters downstream
    tok = np.zeros((N_CLS, CTX_LEN), dtype=np.int32)
    for i, L in enumerate(name_lens):
        eot_pos = 1 + N_CTX + L
        tok[i, :eot_pos] = np.arange(1, eot_pos + 1)
        tok[i, eot_pos] = 49407  # EOT id is the max token id in CLIP's vocab
    tokenized_prompts = jnp.asarray(tok)

    logit_scale = jnp.full((1, 1), math.log(1.0 / 0.07), jnp.float32)

    return dict(visual=visual, text=text, prompt=prompt,
                tokenized_prompts=tokenized_prompts, logit_scale=logit_scale)


# ----------------------------- main --------------------------------------------
if __name__ == "__main__":
    key = jax.random.PRNGKey(0)
    k_params, k_img = jax.random.split(key)
    params = init_params(k_params)
    image = jax.random.normal(k_img, (BATCH, 3, IMG_RES, IMG_RES), jnp.float32)  # NCHW

    fwd = jax.jit(custom_clip_forward)
    logits = jax.block_until_ready(fwd(image, params))

    assert logits.shape == (BATCH, N_CLS), logits.shape
    assert bool(jnp.all(jnp.isfinite(logits)))
    print("KERNEL_OK")
</pallas_src>

<mosaic_0001>
module attributes {stable_mosaic.version = 11 : i64} {
  func.func @_vision_tower_kernel(%arg0: i32, %arg1: memref<2x16x48xf32, #tpu.memory_space<vmem>>, %arg2: memref<48x32xbf16, #tpu.memory_space<vmem>>, %arg3: memref<1x32xf32, #tpu.memory_space<vmem>>, %arg4: memref<24x32xf32, #tpu.memory_space<vmem>>, %arg5: memref<1x32xf32, #tpu.memory_space<vmem>>, %arg6: memref<1x32xf32, #tpu.memory_space<vmem>>, %arg7: memref<1x1x32xf32, #tpu.memory_space<vmem>>, %arg8: memref<1x1x32xf32, #tpu.memory_space<vmem>>, %arg9: memref<1x12x32x8xbf16, #tpu.memory_space<vmem>>, %arg10: memref<1x12x1x8xf32, #tpu.memory_space<vmem>>, %arg11: memref<1x4x8x32xbf16, #tpu.memory_space<vmem>>, %arg12: memref<1x1x32xf32, #tpu.memory_space<vmem>>, %arg13: memref<1x1x32xf32, #tpu.memory_space<vmem>>, %arg14: memref<1x1x32xf32, #tpu.memory_space<vmem>>, %arg15: memref<1x32x128xbf16, #tpu.memory_space<vmem>>, %arg16: memref<1x1x128xf32, #tpu.memory_space<vmem>>, %arg17: memref<1x128x32xbf16, #tpu.memory_space<vmem>>, %arg18: memref<1x1x32xf32, #tpu.memory_space<vmem>>, %arg19: memref<1x32xf32, #tpu.memory_space<vmem>>, %arg20: memref<1x32xf32, #tpu.memory_space<vmem>>, %arg21: memref<32x32xbf16, #tpu.memory_space<vmem>>, %arg22: memref<2x32xf32, #tpu.memory_space<vmem>>, %arg23: memref<2x24x32xf32, #tpu.memory_space<vmem>>, %arg24: memref<24x24xf32, #tpu.memory_space<vmem>>) attributes {dimension_semantics = [#tpu.dimension_semantics<arbitrary>], iteration_bounds = array<i64: 2>, scalar_prefetch = 0 : i64, scratch_operands = 2 : i64, tpu.core_type = #tpu.core_type<tc>, window_params = [{pipeline_mode = #tpu.pipeline_mode<synchronous>, transform_indices = @transform_0, window_bounds = array<i64: 2, 16, 48>}, {pipeline_mode = #tpu.pipeline_mode<synchronous>, transform_indices = @transform_1, window_bounds = array<i64: 48, 32>}, {pipeline_mode = #tpu.pipeline_mode<synchronous>, transform_indices = @transform_2, window_bounds = array<i64: 1, 32>}, {pipeline_mode = #tpu.pipeline_mode<synchronous>, transform_indices = @transform_3, window_bounds = array<i64: 24, 32>}, {pipeline_mode = #tpu.pipeline_mode<synchronous>, transform_indices = @transform_4, window_bounds = array<i64: 1, 32>}, {pipeline_mode = #tpu.pipeline_mode<synchronous>, transform_indices = @transform_5, window_bounds = array<i64: 1, 32>}, {transform_indices = @transform_6, window_bounds = array<i64: 1, 1, 32>}, {transform_indices = @transform_7, window_bounds = array<i64: 1, 1, 32>}, {transform_indices = @transform_8, window_bounds = array<i64: 1, 12, 32, 8>}, {transform_indices = @transform_9, window_bounds = array<i64: 1, 12, 1, 8>}, {transform_indices = @transform_10, window_bounds = array<i64: 1, 4, 8, 32>}, {transform_indices = @transform_11, window_bounds = array<i64: 1, 1, 32>}, {transform_indices = @transform_12, window_bounds = array<i64: 1, 1, 32>}, {transform_indices = @transform_13, window_bounds = array<i64: 1, 1, 32>}, {transform_indices = @transform_14, window_bounds = array<i64: 1, 32, 128>}, {transform_indices = @transform_15, window_bounds = array<i64: 1, 1, 128>}, {transform_indices = @transform_16, window_bounds = array<i64: 1, 128, 32>}, {transform_indices = @transform_17, window_bounds = array<i64: 1, 1, 32>}, {pipeline_mode = #tpu.pipeline_mode<synchronous>, transform_indices = @transform_18, window_bounds = array<i64: 1, 32>}, {pipeline_mode = #tpu.pipeline_mode<synchronous>, transform_indices = @transform_19, window_bounds = array<i64: 1, 32>}, {pipeline_mode = #tpu.pipeline_mode<synchronous>, transform_indices = @transform_20, window_bounds = array<i64: 32, 32>}, {pipeline_mode = #tpu.pipeline_mode<synchronous>, transform_indices = @transform_21, window_bounds = array<i64: 2, 32>}]} {
    %c0_i32 = arith.constant 0 : i32
    %0 = arith.cmpi eq, %arg0, %c0_i32 : i32
    %1 = arith.extui %0 : i1 to i32
    %c0_i32_0 = arith.constant 0 : i32
    %2 = arith.cmpi ne, %1, %c0_i32_0 : i32
    scf.if %2 {
      %c0_182 = arith.constant 0 : index
      %c0_183 = arith.constant 0 : index
      %c0_184 = arith.constant 0 : index
      %291 = vector.load %arg1[%c0_182, %c0_183, %c0_184] : memref<2x16x48xf32, #tpu.memory_space<vmem>>, vector<2x16x48xf32>
      %292 = vector.shape_cast %291 : vector<2x16x48xf32> to vector<32x48xf32>
      %c0_185 = arith.constant 0 : index
      %c0_186 = arith.constant 0 : index
      %293 = vector.load %arg2[%c0_185, %c0_186] : memref<48x32xbf16, #tpu.memory_space<vmem>>, vector<48x32xbf16>
      %294 = arith.truncf %292 : vector<32x48xf32> to vector<32x48xbf16>
      %cst_187 = arith.constant dense<0.000000e+00> : vector<32x32xf32>
      %295 = tpu.matmul %294, %293, %cst_187 {dimension_numbers = #tpu.dot_dimension_numbers<[1], [0], [0], [1], [0, 0, 1, 1], [], []>} : vector<32x48xbf16>, vector<48x32xbf16>, vector<32x32xf32> -> vector<32x32xf32>
      %c0_188 = arith.constant 0 : index
      %c0_189 = arith.constant 0 : index
      %296 = vector.load %arg3[%c0_188, %c0_189] : memref<1x32xf32, #tpu.memory_space<vmem>>, vector<1x32xf32>
      %297 = vector.shape_cast %296 : vector<1x32xf32> to vector<1x1x32xf32>
      %298 = vector.broadcast %297 : vector<1x1x32xf32> to vector<2x1x32xf32>
      %c0_190 = arith.constant 0 : index
      %c0_191 = arith.constant 0 : index
      %c0_192 = arith.constant 0 : index
      %299 = vector.load %arg23[%c0_190, %c0_191, %c0_192] : memref<2x24x32xf32, #tpu.memory_space<vmem>>, vector<2x1x32xf32>
      tpu.vector_store %arg23[%c0_190, %c0_191, %c0_192], %298 {strides = array<i32>} : memref<2x24x32xf32, #tpu.memory_space<vmem>>, vector<2x1x32xf32>,
      %300 = vector.shape_cast %295 : vector<32x32xf32> to vector<2x16x32xf32>
      %c0_193 = arith.constant 0 : index
      %c1_194 = arith.constant 1 : index
      %c0_195 = arith.constant 0 : index
      %301 = vector.load %arg23[%c0_193, %c1_194, %c0_195] : memref<2x24x32xf32, #tpu.memory_space<vmem>>, vector<2x16x32xf32>
      tpu.vector_store %arg23[%c0_193, %c1_194, %c0_195], %300 {strides = array<i32>} : memref<2x24x32xf32, #tpu.memory_space<vmem>>, vector<2x16x32xf32>,
      %cst_196 = arith.constant 0.000000e+00 : f32
      %302 = vector.broadcast %cst_196 : f32 to vector<2x7x32xf32>
      %c0_197 = arith.constant 0 : index
      %c17 = arith.constant 17 : index
      %c0_198 = arith.constant 0 : index
      %303 = vector.load %arg23[%c0_197, %c17, %c0_198] : memref<2x24x32xf32, #tpu.memory_space<vmem>>, vector<2x7x32xf32>
      tpu.vector_store %arg23[%c0_197, %c17, %c0_198], %302 {strides = array<i32>} : memref<2x24x32xf32, #tpu.memory_space<vmem>>, vector<2x7x32xf32>,
      %c0_199 = arith.constant 0 : index
      %c0_200 = arith.constant 0 : index
      %c0_201 = arith.constant 0 : index
      %304 = vector.load %arg23[%c0_199, %c0_200, %c0_201] : memref<2x24x32xf32, #tpu.memory_space<vmem>>, vector<2x24x32xf32>
      %c0_202 = arith.constant 0 : index
      %c0_203 = arith.constant 0 : index
      %305 = vector.load %arg4[%c0_202, %c0_203] : memref<24x32xf32, #tpu.memory_space<vmem>>, vector<24x32xf32>
      %306 = vector.shape_cast %305 : vector<24x32xf32> to vector<1x24x32xf32>
      %307 = vector.broadcast %306 : vector<1x24x32xf32> to vector<2x24x32xf32>
      %308 = arith.addf %304, %307 : vector<2x24x32xf32>
      %309 = vector.shape_cast %308 : vector<2x24x32xf32> to vector<48x32xf32>
      %c0_204 = arith.constant 0 : index
      %c0_205 = arith.constant 0 : index
      %310 = vector.load %arg5[%c0_204, %c0_205] : memref<1x32xf32, #tpu.memory_space<vmem>>, vector<1x32xf32>
      %c0_206 = arith.constant 0 : index
      %c0_207 = arith.constant 0 : index
      %311 = vector.load %arg6[%c0_206, %c0_207] : memref<1x32xf32, #tpu.memory_space<vmem>>, vector<1x32xf32>
      %cst_208 = arith.constant dense<0.000000e+00> : vector<48xf32>
      %312 = vector.multi_reduction <add>, %309, %cst_208 [1] : vector<48x32xf32> to vector<48xf32>
      %313 = vector.shape_cast %312 : vector<48xf32> to vector<48x1xf32>
      %cst_209 = arith.constant 3.200000e+01 : f32
      %314 = vector.broadcast %cst_209 : f32 to vector<48x1xf32>
      %315 = arith.divf %313, %314 : vector<48x1xf32>
      %316 = vector.broadcast %315 : vector<48x1xf32> to vector<48x32xf32>
      %317 = arith.subf %309, %316 : vector<48x32xf32>
      %318 = arith.mulf %317, %317 : vector<48x32xf32>
      %cst_210 = arith.constant dense<0.000000e+00> : vector<48xf32>
      %319 = vector.multi_reduction <add>, %318, %cst_210 [1] : vector<48x32xf32> to vector<48xf32>
      %320 = vector.shape_cast %319 : vector<48xf32> to vector<48x1xf32>
      %cst_211 = arith.constant 3.200000e+01 : f32
      %321 = vector.broadcast %cst_211 : f32 to vector<48x1xf32>
      %322 = arith.divf %320, %321 : vector<48x1xf32>
      %323 = vector.broadcast %315 : vector<48x1xf32> to vector<48x32xf32>
      %324 = arith.subf %309, %323 : vector<48x32xf32>
      %cst_212 = arith.constant 9.99999974E-6 : f32
      %325 = vector.broadcast %cst_212 : f32 to vector<48x1xf32>
      %326 = arith.addf %322, %325 : vector<48x1xf32>
      %327 = math.rsqrt %326 : vector<48x1xf32>
      %328 = vector.broadcast %327 : vector<48x1xf32> to vector<48x32xf32>
      %329 = arith.mulf %324, %328 : vector<48x32xf32>
      %330 = vector.broadcast %310 : vector<1x32xf32> to vector<48x32xf32>
      %331 = arith.mulf %329, %330 : vector<48x32xf32>
      %332 = vector.broadcast %311 : vector<1x32xf32> to vector<48x32xf32>
      %333 = arith.addf %331, %332 : vector<48x32xf32>
      %334 = vector.shape_cast %333 : vector<48x32xf32> to vector<2x24x32xf32>
      %c0_213 = arith.constant 0 : index
      %c0_214 = arith.constant 0 : index
      %c0_215 = arith.constant 0 : index
      %335 = vector.load %arg23[%c0_213, %c0_214, %c0_215] : memref<2x24x32xf32, #tpu.memory_space<vmem>>, vector<2x24x32xf32>
      tpu.vector_store %arg23[%c0_213, %c0_214, %c0_215], %334 {strides = array<i32>} : memref<2x24x32xf32, #tpu.memory_space<vmem>>, vector<2x24x32xf32>,
      %336 = tpu.iota {dimensions = array<i32: 1>} : vector<24x24xi32>
      %c17_i32 = arith.constant 17 : i32
      %337 = vector.broadcast %c17_i32 : i32 to vector<24x24xi32>
      %338 = arith.cmpi sge, %336, %337 : vector<24x24xi32>
      %cst_216 = arith.constant -1.000000e+09 : f32
      %cst_217 = arith.constant 0.000000e+00 : f32
      %339 = vector.broadcast %cst_216 : f32 to vector<24x24xf32>
      %340 = vector.broadcast %cst_217 : f32 to vector<24x24xf32>
      %341 = arith.select %338, %339, %340 : vector<24x24xi1>, vector<24x24xf32>
      %c0_218 = arith.constant 0 : index
      %c0_219 = arith.constant 0 : index
      %342 = vector.load %arg24[%c0_218, %c0_219] : memref<24x24xf32, #tpu.memory_space<vmem>>, vector<24x24xf32>
      tpu.vector_store %arg24[%c0_218, %c0_219], %341 {strides = array<i32>} : memref<24x24xf32, #tpu.memory_space<vmem>>, vector<24x24xf32>,
    } else {
    }
    %c0 = arith.constant 0 : index
    %c0_1 = arith.constant 0 : index
    %c0_2 = arith.constant 0 : index
    %3 = vector.load %arg23[%c0, %c0_1, %c0_2] : memref<2x24x32xf32, #tpu.memory_space<vmem>>, vector<2x24x32xf32>
    %c0_3 = arith.constant 0 : index
    %c0_4 = arith.constant 0 : index
    %4 = vector.load %arg24[%c0_3, %c0_4] : memref<24x24xf32, #tpu.memory_space<vmem>>, vector<24x24xf32>
    %5 = vector.shape_cast %3 : vector<2x24x32xf32> to vector<48x32xf32>
    %c0_5 = arith.constant 0 : index
    %c0_6 = arith.constant 0 : index
    %c0_7 = arith.constant 0 : index
    %6 = vector.load %arg7[%c0_5, %c0_6, %c0_7] : memref<1x1x32xf32, #tpu.memory_space<vmem>>, vector<1x1x32xf32>
    %7 = vector.shape_cast %6 : vector<1x1x32xf32> to vector<1x32xf32>
    %c0_8 = arith.constant 0 : index
    %c0_9 = arith.constant 0 : index
    %c0_10 = arith.constant 0 : index
    %8 = vector.load %arg8[%c0_8, %c0_9, %c0_10] : memref<1x1x32xf32, #tpu.memory_space<vmem>>, vector<1x1x32xf32>
    %9 = vector.shape_cast %8 : vector<1x1x32xf32> to vector<1x32xf32>
    %cst = arith.constant dense<0.000000e+00> : vector<48xf32>
    %10 = vector.multi_reduction <add>, %5, %cst [1] : vector<48x32xf32> to vector<48xf32>
    %11 = vector.shape_cast %10 : vector<48xf32> to vector<48x1xf32>
    %cst_11 = arith.constant 3.200000e+01 : f32
    %12 = vector.broadcast %cst_11 : f32 to vector<48x1xf32>
    %13 = arith.divf %11, %12 : vector<48x1xf32>
    %14 = vector.broadcast %13 : vector<48x1xf32> to vector<48x32xf32>
    %15 = arith.subf %5, %14 : vector<48x32xf32>
    %16 = arith.mulf %15, %15 : vector<48x32xf32>
    %cst_12 = arith.constant dense<0.000000e+00> : vector<48xf32>
    %17 = vector.multi_reduction <add>, %16, %cst_12 [1] : vector<48x32xf32> to vector<48xf32>
    %18 = vector.shape_cast %17 : vector<48xf32> to vector<48x1xf32>
    %cst_13 = arith.constant 3.200000e+01 : f32
    %19 = vector.broadcast %cst_13 : f32 to vector<48x1xf32>
    %20 = arith.divf %18, %19 : vector<48x1xf32>
    %21 = vector.broadcast %13 : vector<48x1xf32> to vector<48x32xf32>
    %22 = arith.subf %5, %21 : vector<48x32xf32>
    %cst_14 = arith.constant 9.99999974E-6 : f32
    %23 = vector.broadcast %cst_14 : f32 to vector<48x1xf32>
    %24 = arith.addf %20, %23 : vector<48x1xf32>
    %25 = math.rsqrt %24 : vector<48x1xf32>
    %26 = vector.broadcast %25 : vector<48x1xf32> to vector<48x32xf32>
    %27 = arith.mulf %22, %26 : vector<48x32xf32>
    %28 = vector.broadcast %7 : vector<1x32xf32> to vector<48x32xf32>
    %29 = arith.mulf %27, %28 : vector<48x32xf32>
    %30 = vector.broadcast %9 : vector<1x32xf32> to vector<48x32xf32>
    %31 = arith.addf %29, %30 : vector<48x32xf32>
    %32 = arith.truncf %31 : vector<48x32xf32> to vector<48x32xbf16>
    %c0_15 = arith.constant 0 : index
    %c0_16 = arith.constant 0 : index
    %c0_17 = arith.constant 0 : index
    %c0_18 = arith.constant 0 : index
    %33 = vector.load %arg9[%c0_15, %c0_16, %c0_17, %c0_18] : memref<1x12x32x8xbf16, #tpu.memory_space<vmem>>, vector<1x1x32x8xbf16>
    %34 = vector.shape_cast %33 : vector<1x1x32x8xbf16> to vector<32x8xbf16>
    %cst_19 = arith.constant dense<0.000000e+00> : vector<48x8xf32>
    %35 = tpu.matmul %32, %34, %cst_19 {dimension_numbers = #tpu.dot_dimension_numbers<[1], [0], [0], [1], [0, 0, 1, 1], [], []>} : vector<48x32xbf16>, vector<32x8xbf16>, vector<48x8xf32> -> vector<48x8xf32>
    %c0_20 = arith.constant 0 : index
    %c0_21 = arith.constant 0 : index
    %c0_22 = arith.constant 0 : index
    %c0_23 = arith.constant 0 : index
    %36 = vector.load %arg10[%c0_20, %c0_21, %c0_22, %c0_23] : memref<1x12x1x8xf32, #tpu.memory_space<vmem>>, vector<1x1x1x8xf32>
    %37 = vector.shape_cast %36 : vector<1x1x1x8xf32> to vector<1x8xf32>
    %38 = vector.broadcast %37 : vector<1x8xf32> to vector<48x8xf32>
    %39 = arith.addf %35, %38 : vector<48x8xf32>
    %40 = vector.shape_cast %39 : vector<48x8xf32> to vector<2x24x8xf32>
    %c0_24 = arith.constant 0 : index
    %c4 = arith.constant 4 : index
    %c0_25 = arith.constant 0 : index
    %c0_26 = arith.constant 0 : index
    %41 = vector.load %arg9[%c0_24, %c4, %c0_25, %c0_26] : memref<1x12x32x8xbf16, #tpu.memory_space<vmem>>, vector<1x1x32x8xbf16>
    %42 = vector.shape_cast %41 : vector<1x1x32x8xbf16> to vector<32x8xbf16>
    %cst_27 = arith.constant dense<0.000000e+00> : vector<48x8xf32>
    %43 = tpu.matmul %32, %42, %cst_27 {dimension_numbers = #tpu.dot_dimension_numbers<[1], [0], [0], [1], [0, 0, 1, 1], [], []>} : vector<48x32xbf16>, vector<32x8xbf16>, vector<48x8xf32> -> vector<48x8xf32>
    %c0_28 = arith.constant 0 : index
    %c4_29 = arith.constant 4 : index
    %c0_30 = arith.constant 0 : index
    %c0_31 = arith.constant 0 : index
    %44 = vector.load %arg10[%c0_28, %c4_29, %c0_30, %c0_31] : memref<1x12x1x8xf32, #tpu.memory_space<vmem>>, vector<1x1x1x8xf32>
    %45 = vector.shape_cast %44 : vector<1x1x1x8xf32> to vector<1x8xf32>
    %46 = vector.broadcast %45 : vector<1x8xf32> to vector<48x8xf32>
    %47 = arith.addf %43, %46 : vector<48x8xf32>
    %48 = vector.shape_cast %47 : vector<48x8xf32> to vector<2x24x8xf32>
    %c0_32 = arith.constant 0 : index
    %c8 = arith.constant 8 : index
    %c0_33 = arith.constant 0 : index
    %c0_34 = arith.constant 0 : index
    %49 = vector.load %arg9[%c0_32, %c8, %c0_33, %c0_34] : memref<1x12x32x8xbf16, #tpu.memory_space<vmem>>, vector<1x1x32x8xbf16>
    %50 = vector.shape_cast %49 : vector<1x1x32x8xbf16> to vector<32x8xbf16>
    %cst_35 = arith.constant dense<0.000000e+00> : vector<48x8xf32>
    %51 = tpu.matmul %32, %50, %cst_35 {dimension_numbers = #tpu.dot_dimension_numbers<[1], [0], [0], [1], [0, 0, 1, 1], [], []>} : vector<48x32xbf16>, vector<32x8xbf16>, vector<48x8xf32> -> vector<48x8xf32>
    %c0_36 = arith.constant 0 : index
    %c8_37 = arith.constant 8 : index
    %c0_38 = arith.constant 0 : index
    %c0_39 = arith.constant 0 : index
    %52 = vector.load %arg10[%c0_36, %c8_37, %c0_38, %c0_39] : memref<1x12x1x8xf32, #tpu.memory_space<vmem>>, vector<1x1x1x8xf32>
    %53 = vector.shape_cast %52 : vector<1x1x1x8xf32> to vector<1x8xf32>
    %54 = vector.broadcast %53 : vector<1x8xf32> to vector<48x8xf32>
    %55 = arith.addf %51, %54 : vector<48x8xf32>
    %56 = vector.shape_cast %55 : vector<48x8xf32> to vector<2x24x8xf32>
    %57 = arith.truncf %40 : vector<2x24x8xf32> to vector<2x24x8xbf16>
    %58 = arith.truncf %48 : vector<2x24x8xf32> to vector<2x24x8xbf16>
    "tpu.trace_start"() <{level = 10 : i32, message = "bqd,bkd->bqk"}> : () -> ()
    %cst_40 = arith.constant dense<0.000000e+00> : vector<2x24x24xf32>
    %59 = tpu.matmul %57, %58, %cst_40 {dimension_numbers = #tpu.dot_dimension_numbers<[2], [2], [1], [1], [0, 0, 0, 1, 1, 1], [0], [0]>} : vector<2x24x8xbf16>, vector<2x24x8xbf16>, vector<2x24x24xf32> -> vector<2x24x24xf32>
    "tpu.trace_stop"() : () -> ()
    %60 = vector.shape_cast %4 : vector<24x24xf32> to vector<1x24x24xf32>
    %61 = vector.broadcast %60 : vector<1x24x24xf32> to vector<2x24x24xf32>
    %62 = arith.addf %59, %61 : vector<2x24x24xf32>
    %cst_41 = arith.constant dense<0xFF800000> : vector<2x24xf32>
    %63 = vector.multi_reduction <maximumf>, %62, %cst_41 [2] : vector<2x24x24xf32> to vector<2x24xf32>
    %64 = vector.shape_cast %63 : vector<2x24xf32> to vector<2x24x1xf32>
    %65 = vector.broadcast %64 : vector<2x24x1xf32> to vector<2x24x24xf32>
    %66 = arith.subf %62, %65 : vector<2x24x24xf32>
    %67 = math.exp %66 : vector<2x24x24xf32>
    %cst_42 = arith.constant dense<0.000000e+00> : vector<2x24xf32>
    %68 = vector.multi_reduction <add>, %67, %cst_42 [2] : vector<2x24x24xf32> to vector<2x24xf32>
    %69 = vector.shape_cast %68 : vector<2x24xf32> to vector<2x24x1xf32>
    %70 = tpu.reciprocal %69 {approx = true} : vector<2x24x1xf32> -> vector<2x24x1xf32>
    %71 = vector.broadcast %70 : vector<2x24x1xf32> to vector<2x24x24xf32>
    %72 = arith.mulf %67, %71 : vector<2x24x24xf32>
    %73 = arith.truncf %72 : vector<2x24x24xf32> to vector<2x24x24xbf16>
    %74 = arith.truncf %56 : vector<2x24x8xf32> to vector<2x24x8xbf16>
    "tpu.trace_start"() <{level = 10 : i32, message = "bqk,bkd->bqd"}> : () -> ()
    %cst_43 = arith.constant dense<0.000000e+00> : vector<2x24x8xf32>
    %75 = tpu.matmul %73, %74, %cst_43 {dimension_numbers = #tpu.dot_dimension_numbers<[2], [1], [1], [2], [0, 0, 0, 1, 1, 2], [0], [0]>} : vector<2x24x24xbf16>, vector<2x24x8xbf16>, vector<2x24x8xf32> -> vector<2x24x8xf32>
    "tpu.trace_stop"() : () -> ()
    %76 = vector.shape_cast %75 : vector<2x24x8xf32> to vector<48x8xf32>
    %77 = arith.truncf %76 : vector<48x8xf32> to vector<48x8xbf16>
    %c0_44 = arith.constant 0 : index
    %c0_45 = arith.constant 0 : index
    %c0_46 = arith.constant 0 : index
    %c0_47 = arith.constant 0 : index
    %78 = vector.load %arg11[%c0_44, %c0_45, %c0_46, %c0_47] : memref<1x4x8x32xbf16, #tpu.memory_space<vmem>>, vector<1x1x8x32xbf16>
    %79 = vector.shape_cast %78 : vector<1x1x8x32xbf16> to vector<8x32xbf16>
    %cst_48 = arith.constant dense<0.000000e+00> : vector<48x32xf32>
    %80 = tpu.matmul %77, %79, %cst_48 {dimension_numbers = #tpu.dot_dimension_numbers<[1], [0], [0], [1], [0, 0, 1, 1], [], []>} : vector<48x8xbf16>, vector<8x32xbf16>, vector<48x32xf32> -> vector<48x32xf32>
    %c0_49 = arith.constant 0 : index
    %c1 = arith.constant 1 : index
    %c0_50 = arith.constant 0 : index
    %c0_51 = arith.constant 0 : index
    %81 = vector.load %arg9[%c0_49, %c1, %c0_50, %c0_51] : memref<1x12x32x8xbf16, #tpu.memory_space<vmem>>, vector<1x1x32x8xbf16>
    %82 = vector.shape_cast %81 : vector<1x1x32x8xbf16> to vector<32x8xbf16>
    %cst_52 = arith.constant dense<0.000000e+00> : vector<48x8xf32>
    %83 = tpu.matmul %32, %82, %cst_52 {dimension_numbers = #tpu.dot_dimension_numbers<[1], [0], [0], [1], [0, 0, 1, 1], [], []>} : vector<48x32xbf16>, vector<32x8xbf16>, vector<48x8xf32> -> vector<48x8xf32>
    %c0_53 = arith.constant 0 : index
    %c1_54 = arith.constant 1 : index
    %c0_55 = arith.constant 0 : index
    %c0_56 = arith.constant 0 : index
    %84 = vector.load %arg10[%c0_53, %c1_54, %c0_55, %c0_56] : memref<1x12x1x8xf32, #tpu.memory_space<vmem>>, vector<1x1x1x8xf32>
    %85 = vector.shape_cast %84 : vector<1x1x1x8xf32> to vector<1x8xf32>
    %86 = vector.broadcast %85 : vector<1x8xf32> to vector<48x8xf32>
    %87 = arith.addf %83, %86 : vector<48x8xf32>
    %88 = vector.shape_cast %87 : vector<48x8xf32> to vector<2x24x8xf32>
    %c0_57 = arith.constant 0 : index
    %c5 = arith.constant 5 : index
    %c0_58 = arith.constant 0 : index
    %c0_59 = arith.constant 0 : index
    %89 = vector.load %arg9[%c0_57, %c5, %c0_58, %c0_59] : memref<1x12x32x8xbf16, #tpu.memory_space<vmem>>, vector<1x1x32x8xbf16>
    %90 = vector.shape_cast %89 : vector<1x1x32x8xbf16> to vector<32x8xbf16>
    %cst_60 = arith.constant dense<0.000000e+00> : vector<48x8xf32>
    %91 = tpu.matmul %32, %90, %cst_60 {dimension_numbers = #tpu.dot_dimension_numbers<[1], [0], [0], [1], [0, 0, 1, 1], [], []>} : vector<48x32xbf16>, vector<32x8xbf16>, vector<48x8xf32> -> vector<48x8xf32>
    %c0_61 = arith.constant 0 : index
    %c5_62 = arith.constant 5 : index
    %c0_63 = arith.constant 0 : index
    %c0_64 = arith.constant 0 : index
    %92 = vector.load %arg10[%c0_61, %c5_62, %c0_63, %c0_64] : memref<1x12x1x8xf32, #tpu.memory_space<vmem>>, vector<1x1x1x8xf32>
    %93 = vector.shape_cast %92 : vector<1x1x1x8xf32> to vector<1x8xf32>
    %94 = vector.broadcast %93 : vector<1x8xf32> to vector<48x8xf32>
    %95 = arith.addf %91, %94 : vector<48x8xf32>
    %96 = vector.shape_cast %95 : vector<48x8xf32> to vector<2x24x8xf32>
    %c0_65 = arith.constant 0 : index
    %c9 = arith.constant 9 : index
    %c0_66 = arith.constant 0 : index
    %c0_67 = arith.constant 0 : index
    %97 = vector.load %arg9[%c0_65, %c9, %c0_66, %c0_67] : memref<1x12x32x8xbf16, #tpu.memory_space<vmem>>, vector<1x1x32x8xbf16>
    %98 = vector.shape_cast %97 : vector<1x1x32x8xbf16> to vector<32x8xbf16>
    %cst_68 = arith.constant dense<0.000000e+00> : vector<48x8xf32>
    %99 = tpu.matmul %32, %98, %cst_68 {dimension_numbers = #tpu.dot_dimension_numbers<[1], [0], [0], [1], [0, 0, 1, 1], [], []>} : vector<48x32xbf16>, vector<32x8xbf16>, vector<48x8xf32> -> vector<48x8xf32>
    %c0_69 = arith.constant 0 : index
    %c9_70 = arith.constant 9 : index
    %c0_71 = arith.constant 0 : index
    %c0_72 = arith.constant 0 : index
    %100 = vector.load %arg10[%c0_69, %c9_70, %c0_71, %c0_72] : memref<1x12x1x8xf32, #tpu.memory_space<vmem>>, vector<1x1x1x8xf32>
    %101 = vector.shape_cast %100 : vector<1x1x1x8xf32> to vector<1x8xf32>
    %102 = vector.broadcast %101 : vector<1x8xf32> to vector<48x8xf32>
    %103 = arith.addf %99, %102 : vector<48x8xf32>
    %104 = vector.shape_cast %103 : vector<48x8xf32> to vector<2x24x8xf32>
    %105 = arith.truncf %88 : vector<2x24x8xf32> to vector<2x24x8xbf16>
    %106 = arith.truncf %96 : vector<2x24x8xf32> to vector<2x24x8xbf16>
    "tpu.trace_start"() <{level = 10 : i32, message = "bqd,bkd->bqk"}> : () -> ()
    %cst_73 = arith.constant dense<0.000000e+00> : vector<2x24x24xf32>
    %107 = tpu.matmul %105, %106, %cst_73 {dimension_numbers = #tpu.dot_dimension_numbers<[2], [2], [1], [1], [0, 0, 0, 1, 1, 1], [0], [0]>} : vector<2x24x8xbf16>, vector<2x24x8xbf16>, vector<2x24x24xf32> -> vector<2x24x24xf32>
    "tpu.trace_stop"() : () -> ()
    %108 = vector.shape_cast %4 : vector<24x24xf32> to vector<1x24x24xf32>
    %109 = vector.broadcast %108 : vector<1x24x24xf32> to vector<2x24x24xf32>
    %110 = arith.addf %107, %109 : vector<2x24x24xf32>
    %cst_74 = arith.constant dense<0xFF800000> : vector<2x24xf32>
    %111 = vector.multi_reduction <maximumf>, %110, %cst_74 [2] : vector<2x24x24xf32> to vector<2x24xf32>
    %112 = vector.shape_cast %111 : vector<2x24xf32> to vector<2x24x1xf32>
    %113 = vector.broadcast %112 : vector<2x24x1xf32> to vector<2x24x24xf32>
    %114 = arith.subf %110, %113 : vector<2x24x24xf32>
    %115 = math.exp %114 : vector<2x24x24xf32>
    %cst_75 = arith.constant dense<0.000000e+00> : vector<2x24xf32>
    %116 = vector.multi_reduction <add>, %115, %cst_75 [2] : vector<2x24x24xf32> to vector<2x24xf32>
    %117 = vector.shape_cast %116 : vector<2x24xf32> to vector<2x24x1xf32>
    %118 = tpu.reciprocal %117 {approx = true} : vector<2x24x1xf32> -> vector<2x24x1xf32>
    %119 = vector.broadcast %118 : vector<2x24x1xf32> to vector<2x24x24xf32>
    %120 = arith.mulf %115, %119 : vector<2x24x24xf32>
    %121 = arith.truncf %120 : vector<2x24x24xf32> to vector<2x24x24xbf16>
    %122 = arith.truncf %104 : vector<2x24x8xf32> to vector<2x24x8xbf16>
    "tpu.trace_start"() <{level = 10 : i32, message = "bqk,bkd->bqd"}> : () -> ()
    %cst_76 = arith.constant dense<0.000000e+00> : vector<2x24x8xf32>
    %123 = tpu.matmul %121, %122, %cst_76 {dimension_numbers = #tpu.dot_dimension_numbers<[2], [1], [1], [2], [0, 0, 0, 1, 1, 2], [0], [0]>} : vector<2x24x24xbf16>, vector<2x24x8xbf16>, vector<2x24x8xf32> -> vector<2x24x8xf32>
    "tpu.trace_stop"() : () -> ()
    %124 = vector.shape_cast %123 : vector<2x24x8xf32> to vector<48x8xf32>
    %125 = arith.truncf %124 : vector<48x8xf32> to vector<48x8xbf16>
    %c0_77 = arith.constant 0 : index
    %c1_78 = arith.constant 1 : index
    %c0_79 = arith.constant 0 : index
    %c0_80 = arith.constant 0 : index
    %126 = vector.load %arg11[%c0_77, %c1_78, %c0_79, %c0_80] : memref<1x4x8x32xbf16, #tpu.memory_space<vmem>>, vector<1x1x8x32xbf16>
    %127 = vector.shape_cast %126 : vector<1x1x8x32xbf16> to vector<8x32xbf16>
    %cst_81 = arith.constant dense<0.000000e+00> : vector<48x32xf32>
    %128 = tpu.matmul %125, %127, %cst_81 {dimension_numbers = #tpu.dot_dimension_numbers<[1], [0], [0], [1], [0, 0, 1, 1], [], []>} : vector<48x8xbf16>, vector<8x32xbf16>, vector<48x32xf32> -> vector<48x32xf32>
    %129 = arith.addf %80, %128 : vector<48x32xf32>
    %c0_82 = arith.constant 0 : index
    %c2 = arith.constant 2 : index
    %c0_83 = arith.constant 0 : index
    %c0_84 = arith.constant 0 : index
    %130 = vector.load %arg9[%c0_82, %c2, %c0_83, %c0_84] : memref<1x12x32x8xbf16, #tpu.memory_space<vmem>>, vector<1x1x32x8xbf16>
    %131 = vector.shape_cast %130 : vector<1x1x32x8xbf16> to vector<32x8xbf16>
    %cst_85 = arith.constant dense<0.000000e+00> : vector<48x8xf32>
    %132 = tpu.matmul %32, %131, %cst_85 {dimension_numbers = #tpu.dot_dimension_numbers<[1], [0], [0], [1], [0, 0, 1, 1], [], []>} : vector<48x32xbf16>, vector<32x8xbf16>, vector<48x8xf32> -> vector<48x8xf32>
    %c0_86 = arith.constant 0 : index
    %c2_87 = arith.constant 2 : index
    %c0_88 = arith.constant 0 : index
    %c0_89 = arith.constant 0 : index
    %133 = vector.load %arg10[%c0_86, %c2_87, %c0_88, %c0_89] : memref<1x12x1x8xf32, #tpu.memory_space<vmem>>, vector<1x1x1x8xf32>
    %134 = vector.shape_cast %133 : vector<1x1x1x8xf32> to vector<1x8xf32>
    %135 = vector.broadcast %134 : vector<1x8xf32> to vector<48x8xf32>
    %136 = arith.addf %132, %135 : vector<48x8xf32>
    %137 = vector.shape_cast %136 : vector<48x8xf32> to vector<2x24x8xf32>
    %c0_90 = arith.constant 0 : index
    %c6 = arith.constant 6 : index
    %c0_91 = arith.constant 0 : index
    %c0_92 = arith.constant 0 : index
    %138 = vector.load %arg9[%c0_90, %c6, %c0_91, %c0_92] : memref<1x12x32x8xbf16, #tpu.memory_space<vmem>>, vector<1x1x32x8xbf16>
    %139 = vector.shape_cast %138 : vector<1x1x32x8xbf16> to vector<32x8xbf16>
    %cst_93 = arith.constant dense<0.000000e+00> : vector<48x8xf32>
    %140 = tpu.matmul %32, %139, %cst_93 {dimension_numbers = #tpu.dot_dimension_numbers<[1], [0], [0], [1], [0, 0, 1, 1], [], []>} : vector<48x32xbf16>, vector<32x8xbf16>, vector<48x8xf32> -> vector<48x8xf32>
    %c0_94 = arith.constant 0 : index
    %c6_95 = arith.constant 6 : index
    %c0_96 = arith.constant 0 : index
    %c0_97 = arith.constant 0 : index
    %141 = vector.load %arg10[%c0_94, %c6_95, %c0_96, %c0_97] : memref<1x12x1x8xf32, #tpu.memory_space<vmem>>, vector<1x1x1x8xf32>
    %142 = vector.shape_cast %141 : vector<1x1x1x8xf32> to vector<1x8xf32>
    %143 = vector.broadcast %142 : vector<1x8xf32> to vector<48x8xf32>
    %144 = arith.addf %140, %143 : vector<48x8xf32>
    %145 = vector.shape_cast %144 : vector<48x8xf32> to vector<2x24x8xf32>
    %c0_98 = arith.constant 0 : index
    %c10 = arith.constant 10 : index
    %c0_99 = arith.constant 0 : index
    %c0_100 = arith.constant 0 : index
    %146 = vector.load %arg9[%c0_98, %c10, %c0_99, %c0_100] : memref<1x12x32x8xbf16, #tpu.memory_space<vmem>>, vector<1x1x32x8xbf16>
    %147 = vector.shape_cast %146 : vector<1x1x32x8xbf16> to vector<32x8xbf16>
    %cst_101 = arith.constant dense<0.000000e+00> : vector<48x8xf32>
    %148 = tpu.matmul %32, %147, %cst_101 {dimension_numbers = #tpu.dot_dimension_numbers<[1], [0], [0], [1], [0, 0, 1, 1], [], []>} : vector<48x32xbf16>, vector<32x8xbf16>, vector<48x8xf32> -> vector<48x8xf32>
    %c0_102 = arith.constant 0 : index
    %c10_103 = arith.constant 10 : index
    %c0_104 = arith.constant 0 : index
    %c0_105 = arith.constant 0 : index
    %149 = vector.load %arg10[%c0_102, %c10_103, %c0_104, %c0_105] : memref<1x12x1x8xf32, #tpu.memory_space<vmem>>, vector<1x1x1x8xf32>
    %150 = vector.shape_cast %149 : vector<1x1x1x8xf32> to vector<1x8xf32>
    %151 = vector.broadcast %150 : vector<1x8xf32> to vector<48x8xf32>
    %152 = arith.addf %148, %151 : vector<48x8xf32>
    %153 = vector.shape_cast %152 : vector<48x8xf32> to vector<2x24x8xf32>
    %154 = arith.truncf %137 : vector<2x24x8xf32> to vector<2x24x8xbf16>
    %155 = arith.truncf %145 : vector<2x24x8xf32> to vector<2x24x8xbf16>
    "tpu.trace_start"() <{level = 10 : i32, message = "bqd,bkd->bqk"}> : () -> ()
    %cst_106 = arith.constant dense<0.000000e+00> : vector<2x24x24xf32>
    %156 = tpu.matmul %154, %155, %cst_106 {dimension_numbers = #tpu.dot_dimension_numbers<[2], [2], [1], [1], [0, 0, 0, 1, 1, 1], [0], [0]>} : vector<2x24x8xbf16>, vector<2x24x8xbf16>, vector<2x24x24xf32> -> vector<2x24x24xf32>
    "tpu.trace_stop"() : () -> ()
    %157 = vector.shape_cast %4 : vector<24x24xf32> to vector<1x24x24xf32>
    %158 = vector.broadcast %157 : vector<1x24x24xf32> to vector<2x24x24xf32>
    %159 = arith.addf %156, %158 : vector<2x24x24xf32>
    %cst_107 = arith.constant dense<0xFF800000> : vector<2x24xf32>
    %160 = vector.multi_reduction <maximumf>, %159, %cst_107 [2] : vector<2x24x24xf32> to vector<2x24xf32>
    %161 = vector.shape_cast %160 : vector<2x24xf32> to vector<2x24x1xf32>
    %162 = vector.broadcast %161 : vector<2x24x1xf32> to vector<2x24x24xf32>
    %163 = arith.subf %159, %162 : vector<2x24x24xf32>
    %164 = math.exp %163 : vector<2x24x24xf32>
    %cst_108 = arith.constant dense<0.000000e+00> : vector<2x24xf32>
    %165 = vector.multi_reduction <add>, %164, %cst_108 [2] : vector<2x24x24xf32> to vector<2x24xf32>
    %166 = vector.shape_cast %165 : vector<2x24xf32> to vector<2x24x1xf32>
    %167 = tpu.reciprocal %166 {approx = true} : vector<2x24x1xf32> -> vector<2x24x1xf32>
    %168 = vector.broadcast %167 : vector<2x24x1xf32> to vector<2x24x24xf32>
    %169 = arith.mulf %164, %168 : vector<2x24x24xf32>
    %170 = arith.truncf %169 : vector<2x24x24xf32> to vector<2x24x24xbf16>
    %171 = arith.truncf %153 : vector<2x24x8xf32> to vector<2x24x8xbf16>
    "tpu.trace_start"() <{level = 10 : i32, message = "bqk,bkd->bqd"}> : () -> ()
    %cst_109 = arith.constant dense<0.000000e+00> : vector<2x24x8xf32>
    %172 = tpu.matmul %170, %171, %cst_109 {dimension_numbers = #tpu.dot_dimension_numbers<[2], [1], [1], [2], [0, 0, 0, 1, 1, 2], [0], [0]>} : vector<2x24x24xbf16>, vector<2x24x8xbf16>, vector<2x24x8xf32> -> vector<2x24x8xf32>
    "tpu.trace_stop"() : () -> ()
    %173 = vector.shape_cast %172 : vector<2x24x8xf32> to vector<48x8xf32>
    %174 = arith.truncf %173 : vector<48x8xf32> to vector<48x8xbf16>
    %c0_110 = arith.constant 0 : index
    %c2_111 = arith.constant 2 : index
    %c0_112 = arith.constant 0 : index
    %c0_113 = arith.constant 0 : index
    %175 = vector.load %arg11[%c0_110, %c2_111, %c0_112, %c0_113] : memref<1x4x8x32xbf16, #tpu.memory_space<vmem>>, vector<1x1x8x32xbf16>
    %176 = vector.shape_cast %175 : vector<1x1x8x32xbf16> to vector<8x32xbf16>
    %cst_114 = arith.constant dense<0.000000e+00> : vector<48x32xf32>
    %177 = tpu.matmul %174, %176, %cst_114 {dimension_numbers = #tpu.dot_dimension_numbers<[1], [0], [0], [1], [0, 0, 1, 1], [], []>} : vector<48x8xbf16>, vector<8x32xbf16>, vector<48x32xf32> -> vector<48x32xf32>
    %178 = arith.addf %129, %177 : vector<48x32xf32>
    %c0_115 = arith.constant 0 : index
    %c3 = arith.constant 3 : index
    %c0_116 = arith.constant 0 : index
    %c0_117 = arith.constant 0 : index
    %179 = vector.load %arg9[%c0_115, %c3, %c0_116, %c0_117] : memref<1x12x32x8xbf16, #tpu.memory_space<vmem>>, vector<1x1x32x8xbf16>
    %180 = vector.shape_cast %179 : vector<1x1x32x8xbf16> to vector<32x8xbf16>
    %cst_118 = arith.constant dense<0.000000e+00> : vector<48x8xf32>
    %181 = tpu.matmul %32, %180, %cst_118 {dimension_numbers = #tpu.dot_dimension_numbers<[1], [0], [0], [1], [0, 0, 1, 1], [], []>} : vector<48x32xbf16>, vector<32x8xbf16>, vector<48x8xf32> -> vector<48x8xf32>
    %c0_119 = arith.constant 0 : index
    %c3_120 = arith.constant 3 : index
    %c0_121 = arith.constant 0 : index
    %c0_122 = arith.constant 0 : index
    %182 = vector.load %arg10[%c0_119, %c3_120, %c0_121, %c0_122] : memref<1x12x1x8xf32, #tpu.memory_space<vmem>>, vector<1x1x1x8xf32>
    %183 = vector.shape_cast %182 : vector<1x1x1x8xf32> to vector<1x8xf32>
    %184 = vector.broadcast %183 : vector<1x8xf32> to vector<48x8xf32>
    %185 = arith.addf %181, %184 : vector<48x8xf32>
    %186 = vector.shape_cast %185 : vector<48x8xf32> to vector<2x24x8xf32>
    %c0_123 = arith.constant 0 : index
    %c7 = arith.constant 7 : index
    %c0_124 = arith.constant 0 : index
    %c0_125 = arith.constant 0 : index
    %187 = vector.load %arg9[%c0_123, %c7, %c0_124, %c0_125] : memref<1x12x32x8xbf16, #tpu.memory_space<vmem>>, vector<1x1x32x8xbf16>
    %188 = vector.shape_cast %187 : vector<1x1x32x8xbf16> to vector<32x8xbf16>
    %cst_126 = arith.constant dense<0.000000e+00> : vector<48x8xf32>
    %189 = tpu.matmul %32, %188, %cst_126 {dimension_numbers = #tpu.dot_dimension_numbers<[1], [0], [0], [1], [0, 0, 1, 1], [], []>} : vector<48x32xbf16>, vector<32x8xbf16>, vector<48x8xf32> -> vector<48x8xf32>
    %c0_127 = arith.constant 0 : index
    %c7_128 = arith.constant 7 : index
    %c0_129 = arith.constant 0 : index
    %c0_130 = arith.constant 0 : index
    %190 = vector.load %arg10[%c0_127, %c7_128, %c0_129, %c0_130] : memref<1x12x1x8xf32, #tpu.memory_space<vmem>>, vector<1x1x1x8xf32>
    %191 = vector.shape_cast %190 : vector<1x1x1x8xf32> to vector<1x8xf32>
    %192 = vector.broadcast %191 : vector<1x8xf32> to vector<48x8xf32>
    %193 = arith.addf %189, %192 : vector<48x8xf32>
    %194 = vector.shape_cast %193 : vector<48x8xf32> to vector<2x24x8xf32>
    %c0_131 = arith.constant 0 : index
    %c11 = arith.constant 11 : index
    %c0_132 = arith.constant 0 : index
    %c0_133 = arith.constant 0 : index
    %195 = vector.load %arg9[%c0_131, %c11, %c0_132, %c0_133] : memref<1x12x32x8xbf16, #tpu.memory_space<vmem>>, vector<1x1x32x8xbf16>
    %196 = vector.shape_cast %195 : vector<1x1x32x8xbf16> to vector<32x8xbf16>
    %cst_134 = arith.constant dense<0.000000e+00> : vector<48x8xf32>
    %197 = tpu.matmul %32, %196, %cst_134 {dimension_numbers = #tpu.dot_dimension_numbers<[1], [0], [0], [1], [0, 0, 1, 1], [], []>} : vector<48x32xbf16>, vector<32x8xbf16>, vector<48x8xf32> -> vector<48x8xf32>
    %c0_135 = arith.constant 0 : index
    %c11_136 = arith.constant 11 : index
    %c0_137 = arith.constant 0 : index
    %c0_138 = arith.constant 0 : index
    %198 = vector.load %arg10[%c0_135, %c11_136, %c0_137, %c0_138] : memref<1x12x1x8xf32, #tpu.memory_space<vmem>>, vector<1x1x1x8xf32>
    %199 = vector.shape_cast %198 : vector<1x1x1x8xf32> to vector<1x8xf32>
    %200 = vector.broadcast %199 : vector<1x8xf32> to vector<48x8xf32>
    %201 = arith.addf %197, %200 : vector<48x8xf32>
    %202 = vector.shape_cast %201 : vector<48x8xf32> to vector<2x24x8xf32>
    %203 = arith.truncf %186 : vector<2x24x8xf32> to vector<2x24x8xbf16>
    %204 = arith.truncf %194 : vector<2x24x8xf32> to vector<2x24x8xbf16>
    "tpu.trace_start"() <{level = 10 : i32, message = "bqd,bkd->bqk"}> : () -> ()
    %cst_139 = arith.constant dense<0.000000e+00> : vector<2x24x24xf32>
    %205 = tpu.matmul %203, %204, %cst_139 {dimension_numbers = #tpu.dot_dimension_numbers<[2], [2], [1], [1], [0, 0, 0, 1, 1, 1], [0], [0]>} : vector<2x24x8xbf16>, vector<2x24x8xbf16>, vector<2x24x24xf32> -> vector<2x24x24xf32>
    "tpu.trace_stop"() : () -> ()
    %206 = vector.shape_cast %4 : vector<24x24xf32> to vector<1x24x24xf32>
    %207 = vector.broadcast %206 : vector<1x24x24xf32> to vector<2x24x24xf32>
    %208 = arith.addf %205, %207 : vector<2x24x24xf32>
    %cst_140 = arith.constant dense<0xFF800000> : vector<2x24xf32>
    %209 = vector.multi_reduction <maximumf>, %208, %cst_140 [2] : vector<2x24x24xf32> to vector<2x24xf32>
    %210 = vector.shape_cast %209 : vector<2x24xf32> to vector<2x24x1xf32>
    %211 = vector.broadcast %210 : vector<2x24x1xf32> to vector<2x24x24xf32>
    %212 = arith.subf %208, %211 : vector<2x24x24xf32>
    %213 = math.exp %212 : vector<2x24x24xf32>
    %cst_141 = arith.constant dense<0.000000e+00> : vector<2x24xf32>
    %214 = vector.multi_reduction <add>, %213, %cst_141 [2] : vector<2x24x24xf32> to vector<2x24xf32>
    %215 = vector.shape_cast %214 : vector<2x24xf32> to vector<2x24x1xf32>
    %216 = tpu.reciprocal %215 {approx = true} : vector<2x24x1xf32> -> vector<2x24x1xf32>
    %217 = vector.broadcast %216 : vector<2x24x1xf32> to vector<2x24x24xf32>
    %218 = arith.mulf %213, %217 : vector<2x24x24xf32>
    %219 = arith.truncf %218 : vector<2x24x24xf32> to vector<2x24x24xbf16>
    %220 = arith.truncf %202 : vector<2x24x8xf32> to vector<2x24x8xbf16>
    "tpu.trace_start"() <{level = 10 : i32, message = "bqk,bkd->bqd"}> : () -> ()
    %cst_142 = arith.constant dense<0.000000e+00> : vector<2x24x8xf32>
    %221 = tpu.matmul %219, %220, %cst_142 {dimension_numbers = #tpu.dot_dimension_numbers<[2], [1], [1], [2], [0, 0, 0, 1, 1, 2], [0], [0]>} : vector<2x24x24xbf16>, vector<2x24x8xbf16>, vector<2x24x8xf32> -> vector<2x24x8xf32>
    "tpu.trace_stop"() : () -> ()
    %222 = vector.shape_cast %221 : vector<2x24x8xf32> to vector<48x8xf32>
    %223 = arith.truncf %222 : vector<48x8xf32> to vector<48x8xbf16>
    %c0_143 = arith.constant 0 : index
    %c3_144 = arith.constant 3 : index
    %c0_145 = arith.constant 0 : index
    %c0_146 = arith.constant 0 : index
    %224 = vector.load %arg11[%c0_143, %c3_144, %c0_145, %c0_146] : memref<1x4x8x32xbf16, #tpu.memory_space<vmem>>, vector<1x1x8x32xbf16>
    %225 = vector.shape_cast %224 : vector<1x1x8x32xbf16> to vector<8x32xbf16>
    %cst_147 = arith.constant dense<0.000000e+00> : vector<48x32xf32>
    %226 = tpu.matmul %223, %225, %cst_147 {dimension_numbers = #tpu.dot_dimension_numbers<[1], [0], [0], [1], [0, 0, 1, 1], [], []>} : vector<48x8xbf16>, vector<8x32xbf16>, vector<48x32xf32> -> vector<48x32xf32>
    %227 = arith.addf %178, %226 : vector<48x32xf32>
    %c0_148 = arith.constant 0 : index
    %c0_149 = arith.constant 0 : index
    %c0_150 = arith.constant 0 : index
    %228 = vector.load %arg12[%c0_148, %c0_149, %c0_150] : memref<1x1x32xf32, #tpu.memory_space<vmem>>, vector<1x1x32xf32>
    %229 = vector.shape_cast %228 : vector<1x1x32xf32> to vector<1x32xf32>
    %230 = vector.broadcast %229 : vector<1x32xf32> to vector<48x32xf32>
    %231 = arith.addf %227, %230 : vector<48x32xf32>
    %232 = vector.shape_cast %231 : vector<48x32xf32> to vector<2x24x32xf32>
    %233 = arith.addf %3, %232 : vector<2x24x32xf32>
    %234 = vector.shape_cast %233 : vector<2x24x32xf32> to vector<48x32xf32>
    %c0_151 = arith.constant 0 : index
    %c0_152 = arith.constant 0 : index
    %c0_153 = arith.constant 0 : index
    %235 = vector.load %arg13[%c0_151, %c0_152, %c0_153] : memref<1x1x32xf32, #tpu.memory_space<vmem>>, vector<1x1x32xf32>
    %236 = vector.shape_cast %235 : vector<1x1x32xf32> to vector<1x32xf32>
    %c0_154 = arith.constant 0 : index
    %c0_155 = arith.constant 0 : index
    %c0_156 = arith.constant 0 : index
    %237 = vector.load %arg14[%c0_154, %c0_155, %c0_156] : memref<1x1x32xf32, #tpu.memory_space<vmem>>, vector<1x1x32xf32>
    %238 = vector.shape_cast %237 : vector<1x1x32xf32> to vector<1x32xf32>
    %cst_157 = arith.constant dense<0.000000e+00> : vector<48xf32>
    %239 = vector.multi_reduction <add>, %234, %cst_157 [1] : vector<48x32xf32> to vector<48xf32>
    %240 = vector.shape_cast %239 : vector<48xf32> to vector<48x1xf32>
    %cst_158 = arith.constant 3.200000e+01 : f32
    %241 = vector.broadcast %cst_158 : f32 to vector<48x1xf32>
    %242 = arith.divf %240, %241 : vector<48x1xf32>
    %243 = vector.broadcast %242 : vector<48x1xf32> to vector<48x32xf32>
    %244 = arith.subf %234, %243 : vector<48x32xf32>
    %245 = arith.mulf %244, %244 : vector<48x32xf32>
    %cst_159 = arith.constant dense<0.000000e+00> : vector<48xf32>
    %246 = vector.multi_reduction <add>, %245, %cst_159 [1] : vector<48x32xf32> to vector<48xf32>
    %247 = vector.shape_cast %246 : vector<48xf32> to vector<48x1xf32>
    %cst_160 = arith.constant 3.200000e+01 : f32
    %248 = vector.broadcast %cst_160 : f32 to vector<48x1xf32>
    %249 = arith.divf %247, %248 : vector<48x1xf32>
    %250 = vector.broadcast %242 : vector<48x1xf32> to vector<48x32xf32>
    %251 = arith.subf %234, %250 : vector<48x32xf32>
    %cst_161 = arith.constant 9.99999974E-6 : f32
    %252 = vector.broadcast %cst_161 : f32 to vector<48x1xf32>
    %253 = arith.addf %249, %252 : vector<48x1xf32>
    %254 = math.rsqrt %253 : vector<48x1xf32>
    %255 = vector.broadcast %254 : vector<48x1xf32> to vector<48x32xf32>
    %256 = arith.mulf %251, %255 : vector<48x32xf32>
    %257 = vector.broadcast %236 : vector<1x32xf32> to vector<48x32xf32>
    %258 = arith.mulf %256, %257 : vector<48x32xf32>
    %259 = vector.broadcast %238 : vector<1x32xf32> to vector<48x32xf32>
    %260 = arith.addf %258, %259 : vector<48x32xf32>
    %c0_162 = arith.constant 0 : index
    %c0_163 = arith.constant 0 : index
    %c0_164 = arith.constant 0 : index
    %261 = vector.load %arg15[%c0_162, %c0_163, %c0_164] : memref<1x32x128xbf16, #tpu.memory_space<vmem>>, vector<1x32x128xbf16>
    %262 = vector.shape_cast %261 : vector<1x32x128xbf16> to vector<32x128xbf16>
    %c0_165 = arith.constant 0 : index
    %c0_166 = arith.constant 0 : index
    %c0_167 = arith.constant 0 : index
    %263 = vector.load %arg16[%c0_165, %c0_166, %c0_167] : memref<1x1x128xf32, #tpu.memory_space<vmem>>, vector<1x1x128xf32>
    %264 = vector.shape_cast %263 : vector<1x1x128xf32> to vector<1x128xf32>
    %265 = arith.truncf %260 : vector<48x32xf32> to vector<48x32xbf16>
    %cst_168 = arith.constant dense<0.000000e+00> : vector<48x128xf32>
    %266 = tpu.matmul %265, %262, %cst_168 {dimension_numbers = #tpu.dot_dimension_numbers<[1], [0], [0], [1], [0, 0, 1, 1], [], []>} : vector<48x32xbf16>, vector<32x128xbf16>, vector<48x128xf32> -> vector<48x128xf32>
    %267 = vector.broadcast %264 : vector<1x128xf32> to vector<48x128xf32>
    %268 = arith.addf %266, %267 : vector<48x128xf32>
    %cst_169 = arith.constant 1.702000e+00 : f32
    %269 = vector.broadcast %cst_169 : f32 to vector<48x128xf32>
    %270 = arith.mulf %269, %268 : vector<48x128xf32>
    %271 = arith.negf %270 : vector<48x128xf32>
    %272 = math.exp %271 : vector<48x128xf32>
    %cst_170 = arith.constant 1.000000e+00 : f32
    %273 = vector.broadcast %cst_170 : f32 to vector<48x128xf32>
    %274 = arith.addf %273, %272 : vector<48x128xf32>
    %275 = arith.divf %273, %274 : vector<48x128xf32>
    %276 = arith.mulf %268, %275 : vector<48x128xf32>
    %c0_171 = arith.constant 0 : index
    %c0_172 = arith.constant 0 : index
    %c0_173 = arith.constant 0 : index
    %277 = vector.load %arg17[%c0_171, %c0_172, %c0_173] : memref<1x128x32xbf16, #tpu.memory_space<vmem>>, vector<1x128x32xbf16>
    %278 = vector.shape_cast %277 : vector<1x128x32xbf16> to vector<128x32xbf16>
    %c0_174 = arith.constant 0 : index
    %c0_175 = arith.constant 0 : index
    %c0_176 = arith.constant 0 : index
    %279 = vector.load %arg18[%c0_174, %c0_175, %c0_176] : memref<1x1x32xf32, #tpu.memory_space<vmem>>, vector<1x1x32xf32>
    %280 = vector.shape_cast %279 : vector<1x1x32xf32> to vector<1x32xf32>
    %281 = arith.truncf %276 : vector<48x128xf32> to vector<48x128xbf16>
    %cst_177 = arith.constant dense<0.000000e+00> : vector<48x32xf32>
    %282 = tpu.matmul %281, %278, %cst_177 {dimension_numbers = #tpu.dot_dimension_numbers<[1], [0], [0], [1], [0, 0, 1, 1], [], []>} : vector<48x128xbf16>, vector<128x32xbf16>, vector<48x32xf32> -> vector<48x32xf32>
    %283 = vector.broadcast %280 : vector<1x32xf32> to vector<48x32xf32>
    %284 = arith.addf %282, %283 : vector<48x32xf32>
    %285 = vector.shape_cast %284 : vector<48x32xf32> to vector<2x24x32xf32>
    %286 = arith.addf %233, %285 : vector<2x24x32xf32>
    %c0_178 = arith.constant 0 : index
    %c0_179 = arith.constant 0 : index
    %c0_180 = arith.constant 0 : index
    %287 = vector.load %arg23[%c0_178, %c0_179, %c0_180] : memref<2x24x32xf32, #tpu.memory_space<vmem>>, vector<2x24x32xf32>
    tpu.vector_store %arg23[%c0_178, %c0_179, %c0_180], %286 {strides = array<i32>} : memref<2x24x32xf32, #tpu.memory_space<vmem>>, vector<2x24x32xf32>,
    %c1_i32 = arith.constant 1 : i32
    %288 = arith.cmpi eq, %arg0, %c1_i32 : i32
    %289 = arith.extui %288 : i1 to i32
    %c0_i32_181 = arith.constant 0 : i32
    %290 = arith.cmpi ne, %289, %c0_i32_181 : i32
    scf.if %290 {
      %c0_182 = arith.constant 0 : index
      %c0_183 = arith.constant 0 : index
      %c0_184 = arith.constant 0 : index
      %291 = vector.load %arg23[%c0_182, %c0_183, %c0_184] : memref<2x24x32xf32, #tpu.memory_space<vmem>>, vector<2x24x32xf32>
      %292 = vector.extract_strided_slice %291 {offsets = [0, 0, 0], sizes = [2, 1, 32], strides = [1, 1, 1]} : vector<2x24x32xf32> to vector<2x1x32xf32>
      %293 = vector.shape_cast %292 : vector<2x1x32xf32> to vector<2x32xf32>
      %c0_185 = arith.constant 0 : index
      %c0_186 = arith.constant 0 : index
      %294 = vector.load %arg19[%c0_185, %c0_186] : memref<1x32xf32, #tpu.memory_space<vmem>>, vector<1x32xf32>
      %c0_187 = arith.constant 0 : index
      %c0_188 = arith.constant 0 : index
      %295 = vector.load %arg20[%c0_187, %c0_188] : memref<1x32xf32, #tpu.memory_space<vmem>>, vector<1x32xf32>
      %cst_189 = arith.constant dense<0.000000e+00> : vector<2xf32>
      %296 = vector.multi_reduction <add>, %293, %cst_189 [1] : vector<2x32xf32> to vector<2xf32>
      %297 = vector.shape_cast %296 : vector<2xf32> to vector<2x1xf32>
      %cst_190 = arith.constant 3.200000e+01 : f32
      %298 = vector.broadcast %cst_190 : f32 to vector<2x1xf32>
      %299 = arith.divf %297, %298 : vector<2x1xf32>
      %300 = vector.broadcast %299 : vector<2x1xf32> to vector<2x32xf32>
      %301 = arith.subf %293, %300 : vector<2x32xf32>
      %302 = arith.mulf %301, %301 : vector<2x32xf32>
      %cst_191 = arith.constant dense<0.000000e+00> : vector<2xf32>
      %303 = vector.multi_reduction <add>, %302, %cst_191 [1] : vector<2x32xf32> to vector<2xf32>
      %304 = vector.shape_cast %303 : vector<2xf32> to vector<2x1xf32>
      %cst_192 = arith.constant 3.200000e+01 : f32
      %305 = vector.broadcast %cst_192 : f32 to vector<2x1xf32>
      %306 = arith.divf %304, %305 : vector<2x1xf32>
      %307 = vector.broadcast %299 : vector<2x1xf32> to vector<2x32xf32>
      %308 = arith.subf %293, %307 : vector<2x32xf32>
      %cst_193 = arith.constant 9.99999974E-6 : f32
      %309 = vector.broadcast %cst_193 : f32 to vector<2x1xf32>
      %310 = arith.addf %306, %309 : vector<2x1xf32>
      %311 = math.rsqrt %310 : vector<2x1xf32>
      %312 = vector.broadcast %311 : vector<2x1xf32> to vector<2x32xf32>
      %313 = arith.mulf %308, %312 : vector<2x32xf32>
      %314 = vector.broadcast %294 : vector<1x32xf32> to vector<2x32xf32>
      %315 = arith.mulf %313, %314 : vector<2x32xf32>
      %316 = vector.broadcast %295 : vector<1x32xf32> to vector<2x32xf32>
      %317 = arith.addf %315, %316 : vector<2x32xf32>
      %c0_194 = arith.constant 0 : index
      %c0_195 = arith.constant 0 : index
      %318 = vector.load %arg21[%c0_194, %c0_195] : memref<32x32xbf16, #tpu.memory_space<vmem>>, vector<32x32xbf16>
      %319 = arith.truncf %317 : vector<2x32xf32> to vector<2x32xbf16>
      %cst_196 = arith.constant dense<0.000000e+00> : vector<2x32xf32>
      %320 = tpu.matmul %319, %318, %cst_196 {dimension_numbers = #tpu.dot_dimension_numbers<[1], [0], [0], [1], [0, 0, 1, 1], [], []>} : vector<2x32xbf16>, vector<32x32xbf16>, vector<2x32xf32> -> vector<2x32xf32>
      %c0_197 = arith.constant 0 : index
      %c0_198 = arith.constant 0 : index
      %321 = vector.load %arg22[%c0_197, %c0_198] : memref<2x32xf32, #tpu.memory_space<vmem>>, vector<2x32xf32>
      tpu.vector_store %arg22[%c0_197, %c0_198], %320 {strides = array<i32>} : memref<2x32xf32, #tpu.memory_space<vmem>>, vector<2x32xf32>,
    } else {
    }
    return
  }
  func.func @transform_0(%arg0: i32) -> (i32, i32, i32) {
    %c0_i32 = arith.constant 0 : i32
    %c0_i32_0 = arith.constant 0 : i32
    %c0_i32_1 = arith.constant 0 : i32
    %c0_i32_2 = arith.constant 0 : i32
    return %c0_i32, %c0_i32_0, %c0_i32_1 : i32, i32, i32
  }
  func.func @transform_1(%arg0: i32) -> (i32, i32) {
    %c0_i32 = arith.constant 0 : i32
    %c0_i32_0 = arith.constant 0 : i32
    %c0_i32_1 = arith.constant 0 : i32
    return %c0_i32, %c0_i32_0 : i32, i32
  }
  func.func @transform_2(%arg0: i32) -> (i32, i32) {
    %c0_i32 = arith.constant 0 : i32
    %c0_i32_0 = arith.constant 0 : i32
    %c0_i32_1 = arith.constant 0 : i32
    return %c0_i32, %c0_i32_0 : i32, i32
  }
  func.func @transform_3(%arg0: i32) -> (i32, i32) {
    %c0_i32 = arith.constant 0 : i32
    %c0_i32_0 = arith.constant 0 : i32
    %c0_i32_1 = arith.constant 0 : i32
    return %c0_i32, %c0_i32_0 : i32, i32
  }
  func.func @transform_4(%arg0: i32) -> (i32, i32) {
    %c0_i32 = arith.constant 0 : i32
    %c0_i32_0 = arith.constant 0 : i32
    %c0_i32_1 = arith.constant 0 : i32
    return %c0_i32, %c0_i32_0 : i32, i32
  }
  func.func @transform_5(%arg0: i32) -> (i32, i32) {
    %c0_i32 = arith.constant 0 : i32
    %c0_i32_0 = arith.constant 0 : i32
    %c0_i32_1 = arith.constant 0 : i32
    return %c0_i32, %c0_i32_0 : i32, i32
  }
  func.func @transform_6(%arg0: i32) -> (i32, i32, i32) {
    %c0_i32 = arith.constant 0 : i32
    %c0_i32_0 = arith.constant 0 : i32
    %c0_i32_1 = arith.constant 0 : i32
    return %arg0, %c0_i32, %c0_i32_0 : i32, i32, i32
  }
  func.func @transform_7(%arg0: i32) -> (i32, i32, i32) {
    %c0_i32 = arith.constant 0 : i32
    %c0_i32_0 = arith.constant 0 : i32
    %c0_i32_1 = arith.constant 0 : i32
    return %arg0, %c0_i32, %c0_i32_0 : i32, i32, i32
  }
  func.func @transform_8(%arg0: i32) -> (i32, i32, i32, i32) {
    %c0_i32 = arith.constant 0 : i32
    %c0_i32_0 = arith.constant 0 : i32
    %c0_i32_1 = arith.constant 0 : i32
    %c0_i32_2 = arith.constant 0 : i32
    return %arg0, %c0_i32, %c0_i32_0, %c0_i32_1 : i32, i32, i32, i32
  }
  func.func @transform_9(%arg0: i32) -> (i32, i32, i32, i32) {
    %c0_i32 = arith.constant 0 : i32
    %c0_i32_0 = arith.constant 0 : i32
    %c0_i32_1 = arith.constant 0 : i32
    %c0_i32_2 = arith.constant 0 : i32
    return %arg0, %c0_i32, %c0_i32_0, %c0_i32_1 : i32, i32, i32, i32
  }
  func.func @transform_10(%arg0: i32) -> (i32, i32, i32, i32) {
    %c0_i32 = arith.constant 0 : i32
    %c0_i32_0 = arith.constant 0 : i32
    %c0_i32_1 = arith.constant 0 : i32
    %c0_i32_2 = arith.constant 0 : i32
    return %arg0, %c0_i32, %c0_i32_0, %c0_i32_1 : i32, i32, i32, i32
  }
  func.func @transform_11(%arg0: i32) -> (i32, i32, i32) {
    %c0_i32 = arith.constant 0 : i32
    %c0_i32_0 = arith.constant 0 : i32
    %c0_i32_1 = arith.constant 0 : i32
    return %arg0, %c0_i32, %c0_i32_0 : i32, i32, i32
  }
  func.func @transform_12(%arg0: i32) -> (i32, i32, i32) {
    %c0_i32 = arith.constant 0 : i32
    %c0_i32_0 = arith.constant 0 : i32
    %c0_i32_1 = arith.constant 0 : i32
    return %arg0, %c0_i32, %c0_i32_0 : i32, i32, i32
  }
  func.func @transform_13(%arg0: i32) -> (i32, i32, i32) {
    %c0_i32 = arith.constant 0 : i32
    %c0_i32_0 = arith.constant 0 : i32
    %c0_i32_1 = arith.constant 0 : i32
    return %arg0, %c0_i32, %c0_i32_0 : i32, i32, i32
  }
  func.func @transform_14(%arg0: i32) -> (i32, i32, i32) {
    %c0_i32 = arith.constant 0 : i32
    %c0_i32_0 = arith.constant 0 : i32
    %c0_i32_1 = arith.constant 0 : i32
    return %arg0, %c0_i32, %c0_i32_0 : i32, i32, i32
  }
  func.func @transform_15(%arg0: i32) -> (i32, i32, i32) {
    %c0_i32 = arith.constant 0 : i32
    %c0_i32_0 = arith.constant 0 : i32
    %c0_i32_1 = arith.constant 0 : i32
    return %arg0, %c0_i32, %c0_i32_0 : i32, i32, i32
  }
  func.func @transform_16(%arg0: i32) -> (i32, i32, i32) {
    %c0_i32 = arith.constant 0 : i32
    %c0_i32_0 = arith.constant 0 : i32
    %c0_i32_1 = arith.constant 0 : i32
    return %arg0, %c0_i32, %c0_i32_0 : i32, i32, i32
  }
  func.func @transform_17(%arg0: i32) -> (i32, i32, i32) {
    %c0_i32 = arith.constant 0 : i32
    %c0_i32_0 = arith.constant 0 : i32
    %c0_i32_1 = arith.constant 0 : i32
    return %arg0, %c0_i32, %c0_i32_0 : i32, i32, i32
  }
  func.func @transform_18(%arg0: i32) -> (i32, i32) {
    %c0_i32 = arith.constant 0 : i32
    %c0_i32_0 = arith.constant 0 : i32
    %c0_i32_1 = arith.constant 0 : i32
    return %c0_i32, %c0_i32_0 : i32, i32
  }
  func.func @transform_19(%arg0: i32) -> (i32, i32) {
    %c0_i32 = arith.constant 0 : i32
    %c0_i32_0 = arith.constant 0 : i32
    %c0_i32_1 = arith.constant 0 : i32
    return %c0_i32, %c0_i32_0 : i32, i32
  }
  func.func @transform_20(%arg0: i32) -> (i32, i32) {
    %c0_i32 = arith.constant 0 : i32
    %c0_i32_0 = arith.constant 0 : i32
    %c0_i32_1 = arith.constant 0 : i32
    return %c0_i32, %c0_i32_0 : i32, i32
  }
  func.func @transform_21(%arg0: i32) -> (i32, i32) {
    %c0_i32 = arith.constant 0 : i32
    %c0_i32_0 = arith.constant 0 : i32
    %c0_i32_1 = arith.constant 0 : i32
    return %c0_i32, %c0_i32_0 : i32, i32
  }
}

module attributes {stable_mosaic.version = 11 : i64} {
  func.func @_text_tower_kernel(%arg0: i32, %arg1: memref<3x16x32xf32, #tpu.memory_space<vmem>>, %arg2: memref<16x32xf32, #tpu.memory_space<vmem>>, %arg3: memref<1x1x32xf32, #tpu.memory_space<vmem>>, %arg4: memref<1x1x32xf32, #tpu.memory_space<vmem>>, %arg5: memref<1x12x32x8xbf16, #tpu.memory_space<vmem>>, %arg6: memref<1x12x1x8xf32, #tpu.memory_space<vmem>>, %arg7: memref<1x4x8x32xbf16, #tpu.memory_space<vmem>>, %arg8: memref<1x1x32xf32, #tpu.memory_space<vmem>>, %arg9: memref<1x1x32xf32, #tpu.memory_space<vmem>>, %arg10: memref<1x1x32xf32, #tpu.memory_space<vmem>>, %arg11: memref<1x32x128xbf16, #tpu.memory_space<vmem>>, %arg12: memref<1x1x128xf32, #tpu.memory_space<vmem>>, %arg13: memref<1x128x32xbf16, #tpu.memory_space<vmem>>, %arg14: memref<1x1x32xf32, #tpu.memory_space<vmem>>, %arg15: memref<1x32xf32, #tpu.memory_space<vmem>>, %arg16: memref<1x32xf32, #tpu.memory_space<vmem>>, %arg17: memref<32x32xbf16, #tpu.memory_space<vmem>>, %arg18: memref<3x16xf32, #tpu.memory_space<vmem>>, %arg19: memref<2x32xf32, #tpu.memory_space<vmem>>, %arg20: memref<1x1xf32, #tpu.memory_space<smem>>, %arg21: memref<2x3xf32, #tpu.memory_space<vmem>>, %arg22: memref<3x16x32xf32, #tpu.memory_space<vmem>>, %arg23: memref<16x16xf32, #tpu.memory_space<vmem>>) attributes {dimension_semantics = [#tpu.dimension_semantics<arbitrary>], iteration_bounds = array<i64: 2>, scalar_prefetch = 0 : i64, scratch_operands = 2 : i64, tpu.core_type = #tpu.core_type<tc>, window_params = [{pipeline_mode = #tpu.pipeline_mode<synchronous>, transform_indices = @transform_0, window_bounds = array<i64: 3, 16, 32>}, {pipeline_mode = #tpu.pipeline_mode<synchronous>, transform_indices = @transform_1, window_bounds = array<i64: 16, 32>}, {transform_indices = @transform_2, window_bounds = array<i64: 1, 1, 32>}, {transform_indices = @transform_3, window_bounds = array<i64: 1, 1, 32>}, {transform_indices = @transform_4, window_bounds = array<i64: 1, 12, 32, 8>}, {transform_indices = @transform_5, window_bounds = array<i64: 1, 12, 1, 8>}, {transform_indices = @transform_6, window_bounds = array<i64: 1, 4, 8, 32>}, {transform_indices = @transform_7, window_bounds = array<i64: 1, 1, 32>}, {transform_indices = @transform_8, window_bounds = array<i64: 1, 1, 32>}, {transform_indices = @transform_9, window_bounds = array<i64: 1, 1, 32>}, {transform_indices = @transform_10, window_bounds = array<i64: 1, 32, 128>}, {transform_indices = @transform_11, window_bounds = array<i64: 1, 1, 128>}, {transform_indices = @transform_12, window_bounds = array<i64: 1, 128, 32>}, {transform_indices = @transform_13, window_bounds = array<i64: 1, 1, 32>}, {pipeline_mode = #tpu.pipeline_mode<synchronous>, transform_indices = @transform_14, window_bounds = array<i64: 1, 32>}, {pipeline_mode = #tpu.pipeline_mode<synchronous>, transform_indices = @transform_15, window_bounds = array<i64: 1, 32>}, {pipeline_mode = #tpu.pipeline_mode<synchronous>, transform_indices = @transform_16, window_bounds = array<i64: 32, 32>}, {pipeline_mode = #tpu.pipeline_mode<synchronous>, transform_indices = @transform_17, window_bounds = array<i64: 3, 16>}, {pipeline_mode = #tpu.pipeline_mode<synchronous>, transform_indices = @transform_18, window_bounds = array<i64: 2, 32>}, {transform_indices = @transform_19, window_bounds = array<i64: 1, 1>}, {pipeline_mode = #tpu.pipeline_mode<synchronous>, transform_indices = @transform_20, window_bounds = array<i64: 2, 3>}]} {
    %c0_i32 = arith.constant 0 : i32
    %0 = arith.cmpi eq, %arg0, %c0_i32 : i32
    %1 = arith.extui %0 : i1 to i32
    %c0_i32_0 = arith.constant 0 : i32
    %2 = arith.cmpi ne, %1, %c0_i32_0 : i32
    scf.if %2 {
      %c0_182 = arith.constant 0 : index
      %c0_183 = arith.constant 0 : index
      %c0_184 = arith.constant 0 : index
      %291 = vector.load %arg1[%c0_182, %c0_183, %c0_184] : memref<3x16x32xf32, #tpu.memory_space<vmem>>, vector<3x16x32xf32>
      %c0_185 = arith.constant 0 : index
      %c0_186 = arith.constant 0 : index
      %292 = vector.load %arg2[%c0_185, %c0_186] : memref<16x32xf32, #tpu.memory_space<vmem>>, vector<16x32xf32>
      %293 = vector.shape_cast %292 : vector<16x32xf32> to vector<1x16x32xf32>
      %294 = vector.broadcast %293 : vector<1x16x32xf32> to vector<3x16x32xf32>
      %295 = arith.addf %291, %294 : vector<3x16x32xf32>
      %c0_187 = arith.constant 0 : index
      %c0_188 = arith.constant 0 : index
      %c0_189 = arith.constant 0 : index
      %296 = vector.load %arg22[%c0_187, %c0_188, %c0_189] : memref<3x16x32xf32, #tpu.memory_space<vmem>>, vector<3x16x32xf32>
      tpu.vector_store %arg22[%c0_187, %c0_188, %c0_189], %295 {strides = array<i32>} : memref<3x16x32xf32, #tpu.memory_space<vmem>>, vector<3x16x32xf32>,
      %297 = tpu.iota {dimensions = array<i32: 0>} : vector<16x16xi32>
      %298 = tpu.iota {dimensions = array<i32: 1>} : vector<16x16xi32>
      %299 = arith.cmpi sgt, %298, %297 : vector<16x16xi32>
      %cst_190 = arith.constant -1.000000e+09 : f32
      %cst_191 = arith.constant 0.000000e+00 : f32
      %300 = vector.broadcast %cst_190 : f32 to vector<16x16xf32>
      %301 = vector.broadcast %cst_191 : f32 to vector<16x16xf32>
      %302 = arith.select %299, %300, %301 : vector<16x16xi1>, vector<16x16xf32>
      %c0_192 = arith.constant 0 : index
      %c0_193 = arith.constant 0 : index
      %303 = vector.load %arg23[%c0_192, %c0_193] : memref<16x16xf32, #tpu.memory_space<vmem>>, vector<16x16xf32>
      tpu.vector_store %arg23[%c0_192, %c0_193], %302 {strides = array<i32>} : memref<16x16xf32, #tpu.memory_space<vmem>>, vector<16x16xf32>,
    } else {
    }
    %c0 = arith.constant 0 : index
    %c0_1 = arith.constant 0 : index
    %c0_2 = arith.constant 0 : index
    %3 = vector.load %arg22[%c0, %c0_1, %c0_2] : memref<3x16x32xf32, #tpu.memory_space<vmem>>, vector<3x16x32xf32>
    %c0_3 = arith.constant 0 : index
    %c0_4 = arith.constant 0 : index
    %4 = vector.load %arg23[%c0_3, %c0_4] : memref<16x16xf32, #tpu.memory_space<vmem>>, vector<16x16xf32>
    %5 = vector.shape_cast %3 : vector<3x16x32xf32> to vector<48x32xf32>
    %c0_5 = arith.constant 0 : index
    %c0_6 = arith.constant 0 : index
    %c0_7 = arith.constant 0 : index
    %6 = vector.load %arg3[%c0_5, %c0_6, %c0_7] : memref<1x1x32xf32, #tpu.memory_space<vmem>>, vector<1x1x32xf32>
    %7 = vector.shape_cast %6 : vector<1x1x32xf32> to vector<1x32xf32>
    %c0_8 = arith.constant 0 : index
    %c0_9 = arith.constant 0 : index
    %c0_10 = arith.constant 0 : index
    %8 = vector.load %arg4[%c0_8, %c0_9, %c0_10] : memref<1x1x32xf32, #tpu.memory_space<vmem>>, vector<1x1x32xf32>
    %9 = vector.shape_cast %8 : vector<1x1x32xf32> to vector<1x32xf32>
    %cst = arith.constant dense<0.000000e+00> : vector<48xf32>
    %10 = vector.multi_reduction <add>, %5, %cst [1] : vector<48x32xf32> to vector<48xf32>
    %11 = vector.shape_cast %10 : vector<48xf32> to vector<48x1xf32>
    %cst_11 = arith.constant 3.200000e+01 : f32
    %12 = vector.broadcast %cst_11 : f32 to vector<48x1xf32>
    %13 = arith.divf %11, %12 : vector<48x1xf32>
    %14 = vector.broadcast %13 : vector<48x1xf32> to vector<48x32xf32>
    %15 = arith.subf %5, %14 : vector<48x32xf32>
    %16 = arith.mulf %15, %15 : vector<48x32xf32>
    %cst_12 = arith.constant dense<0.000000e+00> : vector<48xf32>
    %17 = vector.multi_reduction <add>, %16, %cst_12 [1] : vector<48x32xf32> to vector<48xf32>
    %18 = vector.shape_cast %17 : vector<48xf32> to vector<48x1xf32>
    %cst_13 = arith.constant 3.200000e+01 : f32
    %19 = vector.broadcast %cst_13 : f32 to vector<48x1xf32>
    %20 = arith.divf %18, %19 : vector<48x1xf32>
    %21 = vector.broadcast %13 : vector<48x1xf32> to vector<48x32xf32>
    %22 = arith.subf %5, %21 : vector<48x32xf32>
    %cst_14 = arith.constant 9.99999974E-6 : f32
    %23 = vector.broadcast %cst_14 : f32 to vector<48x1xf32>
    %24 = arith.addf %20, %23 : vector<48x1xf32>
    %25 = math.rsqrt %24 : vector<48x1xf32>
    %26 = vector.broadcast %25 : vector<48x1xf32> to vector<48x32xf32>
    %27 = arith.mulf %22, %26 : vector<48x32xf32>
    %28 = vector.broadcast %7 : vector<1x32xf32> to vector<48x32xf32>
    %29 = arith.mulf %27, %28 : vector<48x32xf32>
    %30 = vector.broadcast %9 : vector<1x32xf32> to vector<48x32xf32>
    %31 = arith.addf %29, %30 : vector<48x32xf32>
    %32 = arith.truncf %31 : vector<48x32xf32> to vector<48x32xbf16>
    %c0_15 = arith.constant 0 : index
    %c0_16 = arith.constant 0 : index
    %c0_17 = arith.constant 0 : index
    %c0_18 = arith.constant 0 : index
    %33 = vector.load %arg5[%c0_15, %c0_16, %c0_17, %c0_18] : memref<1x12x32x8xbf16, #tpu.memory_space<vmem>>, vector<1x1x32x8xbf16>
    %34 = vector.shape_cast %33 : vector<1x1x32x8xbf16> to vector<32x8xbf16>
    %cst_19 = arith.constant dense<0.000000e+00> : vector<48x8xf32>
    %35 = tpu.matmul %32, %34, %cst_19 {dimension_numbers = #tpu.dot_dimension_numbers<[1], [0], [0], [1], [0, 0, 1, 1], [], []>} : vector<48x32xbf16>, vector<32x8xbf16>, vector<48x8xf32> -> vector<48x8xf32>
    %c0_20 = arith.constant 0 : index
    %c0_21 = arith.constant 0 : index
    %c0_22 = arith.constant 0 : index
    %c0_23 = arith.constant 0 : index
    %36 = vector.load %arg6[%c0_20, %c0_21, %c0_22, %c0_23] : memref<1x12x1x8xf32, #tpu.memory_space<vmem>>, vector<1x1x1x8xf32>
    %37 = vector.shape_cast %36 : vector<1x1x1x8xf32> to vector<1x8xf32>
    %38 = vector.broadcast %37 : vector<1x8xf32> to vector<48x8xf32>
    %39 = arith.addf %35, %38 : vector<48x8xf32>
    %40 = vector.shape_cast %39 : vector<48x8xf32> to vector<3x16x8xf32>
    %c0_24 = arith.constant 0 : index
    %c4 = arith.constant 4 : index
    %c0_25 = arith.constant 0 : index
    %c0_26 = arith.constant 0 : index
    %41 = vector.load %arg5[%c0_24, %c4, %c0_25, %c0_26] : memref<1x12x32x8xbf16, #tpu.memory_space<vmem>>, vector<1x1x32x8xbf16>
    %42 = vector.shape_cast %41 : vector<1x1x32x8xbf16> to vector<32x8xbf16>
    %cst_27 = arith.constant dense<0.000000e+00> : vector<48x8xf32>
    %43 = tpu.matmul %32, %42, %cst_27 {dimension_numbers = #tpu.dot_dimension_numbers<[1], [0], [0], [1], [0, 0, 1, 1], [], []>} : vector<48x32xbf16>, vector<32x8xbf16>, vector<48x8xf32> -> vector<48x8xf32>
    %c0_28 = arith.constant 0 : index
    %c4_29 = arith.constant 4 : index
    %c0_30 = arith.constant 0 : index
    %c0_31 = arith.constant 0 : index
    %44 = vector.load %arg6[%c0_28, %c4_29, %c0_30, %c0_31] : memref<1x12x1x8xf32, #tpu.memory_space<vmem>>, vector<1x1x1x8xf32>
    %45 = vector.shape_cast %44 : vector<1x1x1x8xf32> to vector<1x8xf32>
    %46 = vector.broadcast %45 : vector<1x8xf32> to vector<48x8xf32>
    %47 = arith.addf %43, %46 : vector<48x8xf32>
    %48 = vector.shape_cast %47 : vector<48x8xf32> to vector<3x16x8xf32>
    %c0_32 = arith.constant 0 : index
    %c8 = arith.constant 8 : index
    %c0_33 = arith.constant 0 : index
    %c0_34 = arith.constant 0 : index
    %49 = vector.load %arg5[%c0_32, %c8, %c0_33, %c0_34] : memref<1x12x32x8xbf16, #tpu.memory_space<vmem>>, vector<1x1x32x8xbf16>
    %50 = vector.shape_cast %49 : vector<1x1x32x8xbf16> to vector<32x8xbf16>
    %cst_35 = arith.constant dense<0.000000e+00> : vector<48x8xf32>
    %51 = tpu.matmul %32, %50, %cst_35 {dimension_numbers = #tpu.dot_dimension_numbers<[1], [0], [0], [1], [0, 0, 1, 1], [], []>} : vector<48x32xbf16>, vector<32x8xbf16>, vector<48x8xf32> -> vector<48x8xf32>
    %c0_36 = arith.constant 0 : index
    %c8_37 = arith.constant 8 : index
    %c0_38 = arith.constant 0 : index
    %c0_39 = arith.constant 0 : index
    %52 = vector.load %arg6[%c0_36, %c8_37, %c0_38, %c0_39] : memref<1x12x1x8xf32, #tpu.memory_space<vmem>>, vector<1x1x1x8xf32>
    %53 = vector.shape_cast %52 : vector<1x1x1x8xf32> to vector<1x8xf32>
    %54 = vector.broadcast %53 : vector<1x8xf32> to vector<48x8xf32>
    %55 = arith.addf %51, %54 : vector<48x8xf32>
    %56 = vector.shape_cast %55 : vector<48x8xf32> to vector<3x16x8xf32>
    %57 = arith.truncf %40 : vector<3x16x8xf32> to vector<3x16x8xbf16>
    %58 = arith.truncf %48 : vector<3x16x8xf32> to vector<3x16x8xbf16>
    "tpu.trace_start"() <{level = 10 : i32, message = "bqd,bkd->bqk"}> : () -> ()
    %cst_40 = arith.constant dense<0.000000e+00> : vector<3x16x16xf32>
    %59 = tpu.matmul %57, %58, %cst_40 {dimension_numbers = #tpu.dot_dimension_numbers<[2], [2], [1], [1], [0, 0, 0, 1, 1, 1], [0], [0]>} : vector<3x16x8xbf16>, vector<3x16x8xbf16>, vector<3x16x16xf32> -> vector<3x16x16xf32>
    "tpu.trace_stop"() : () -> ()
    %60 = vector.shape_cast %4 : vector<16x16xf32> to vector<1x16x16xf32>
    %61 = vector.broadcast %60 : vector<1x16x16xf32> to vector<3x16x16xf32>
    %62 = arith.addf %59, %61 : vector<3x16x16xf32>
    %cst_41 = arith.constant dense<0xFF800000> : vector<3x16xf32>
    %63 = vector.multi_reduction <maximumf>, %62, %cst_41 [2] : vector<3x16x16xf32> to vector<3x16xf32>
    %64 = vector.shape_cast %63 : vector<3x16xf32> to vector<3x16x1xf32>
    %65 = vector.broadcast %64 : vector<3x16x1xf32> to vector<3x16x16xf32>
    %66 = arith.subf %62, %65 : vector<3x16x16xf32>
    %67 = math.exp %66 : vector<3x16x16xf32>
    %cst_42 = arith.constant dense<0.000000e+00> : vector<3x16xf32>
    %68 = vector.multi_reduction <add>, %67, %cst_42 [2] : vector<3x16x16xf32> to vector<3x16xf32>
    %69 = vector.shape_cast %68 : vector<3x16xf32> to vector<3x16x1xf32>
    %70 = tpu.reciprocal %69 {approx = true} : vector<3x16x1xf32> -> vector<3x16x1xf32>
    %71 = vector.broadcast %70 : vector<3x16x1xf32> to vector<3x16x16xf32>
    %72 = arith.mulf %67, %71 : vector<3x16x16xf32>
    %73 = arith.truncf %72 : vector<3x16x16xf32> to vector<3x16x16xbf16>
    %74 = arith.truncf %56 : vector<3x16x8xf32> to vector<3x16x8xbf16>
    "tpu.trace_start"() <{level = 10 : i32, message = "bqk,bkd->bqd"}> : () -> ()
    %cst_43 = arith.constant dense<0.000000e+00> : vector<3x16x8xf32>
    %75 = tpu.matmul %73, %74, %cst_43 {dimension_numbers = #tpu.dot_dimension_numbers<[2], [1], [1], [2], [0, 0, 0, 1, 1, 2], [0], [0]>} : vector<3x16x16xbf16>, vector<3x16x8xbf16>, vector<3x16x8xf32> -> vector<3x16x8xf32>
    "tpu.trace_stop"() : () -> ()
    %76 = vector.shape_cast %75 : vector<3x16x8xf32> to vector<48x8xf32>
    %77 = arith.truncf %76 : vector<48x8xf32> to vector<48x8xbf16>
    %c0_44 = arith.constant 0 : index
    %c0_45 = arith.constant 0 : index
    %c0_46 = arith.constant 0 : index
    %c0_47 = arith.constant 0 : index
    %78 = vector.load %arg7[%c0_44, %c0_45, %c0_46, %c0_47] : memref<1x4x8x32xbf16, #tpu.memory_space<vmem>>, vector<1x1x8x32xbf16>
    %79 = vector.shape_cast %78 : vector<1x1x8x32xbf16> to vector<8x32xbf16>
    %cst_48 = arith.constant dense<0.000000e+00> : vector<48x32xf32>
    %80 = tpu.matmul %77, %79, %cst_48 {dimension_numbers = #tpu.dot_dimension_numbers<[1], [0], [0], [1], [0, 0, 1, 1], [], []>} : vector<48x8xbf16>, vector<8x32xbf16>, vector<48x32xf32> -> vector<48x32xf32>
    %c0_49 = arith.constant 0 : index
    %c1 = arith.constant 1 : index
    %c0_50 = arith.constant 0 : index
    %c0_51 = arith.constant 0 : index
    %81 = vector.load %arg5[%c0_49, %c1, %c0_50, %c0_51] : memref<1x12x32x8xbf16, #tpu.memory_space<vmem>>, vector<1x1x32x8xbf16>
    %82 = vector.shape_cast %81 : vector<1x1x32x8xbf16> to vector<32x8xbf16>
    %cst_52 = arith.constant dense<0.000000e+00> : vector<48x8xf32>
    %83 = tpu.matmul %32, %82, %cst_52 {dimension_numbers = #tpu.dot_dimension_numbers<[1], [0], [0], [1], [0, 0, 1, 1], [], []>} : vector<48x32xbf16>, vector<32x8xbf16>, vector<48x8xf32> -> vector<48x8xf32>
    %c0_53 = arith.constant 0 : index
    %c1_54 = arith.constant 1 : index
    %c0_55 = arith.constant 0 : index
    %c0_56 = arith.constant 0 : index
    %84 = vector.load %arg6[%c0_53, %c1_54, %c0_55, %c0_56] : memref<1x12x1x8xf32, #tpu.memory_space<vmem>>, vector<1x1x1x8xf32>
    %85 = vector.shape_cast %84 : vector<1x1x1x8xf32> to vector<1x8xf32>
    %86 = vector.broadcast %85 : vector<1x8xf32> to vector<48x8xf32>
    %87 = arith.addf %83, %86 : vector<48x8xf32>
    %88 = vector.shape_cast %87 : vector<48x8xf32> to vector<3x16x8xf32>
    %c0_57 = arith.constant 0 : index
    %c5 = arith.constant 5 : index
    %c0_58 = arith.constant 0 : index
    %c0_59 = arith.constant 0 : index
    %89 = vector.load %arg5[%c0_57, %c5, %c0_58, %c0_59] : memref<1x12x32x8xbf16, #tpu.memory_space<vmem>>, vector<1x1x32x8xbf16>
    %90 = vector.shape_cast %89 : vector<1x1x32x8xbf16> to vector<32x8xbf16>
    %cst_60 = arith.constant dense<0.000000e+00> : vector<48x8xf32>
    %91 = tpu.matmul %32, %90, %cst_60 {dimension_numbers = #tpu.dot_dimension_numbers<[1], [0], [0], [1], [0, 0, 1, 1], [], []>} : vector<48x32xbf16>, vector<32x8xbf16>, vector<48x8xf32> -> vector<48x8xf32>
    %c0_61 = arith.constant 0 : index
    %c5_62 = arith.constant 5 : index
    %c0_63 = arith.constant 0 : index
    %c0_64 = arith.constant 0 : index
    %92 = vector.load %arg6[%c0_61, %c5_62, %c0_63, %c0_64] : memref<1x12x1x8xf32, #tpu.memory_space<vmem>>, vector<1x1x1x8xf32>
    %93 = vector.shape_cast %92 : vector<1x1x1x8xf32> to vector<1x8xf32>
    %94 = vector.broadcast %93 : vector<1x8xf32> to vector<48x8xf32>
    %95 = arith.addf %91, %94 : vector<48x8xf32>
    %96 = vector.shape_cast %95 : vector<48x8xf32> to vector<3x16x8xf32>
    %c0_65 = arith.constant 0 : index
    %c9 = arith.constant 9 : index
    %c0_66 = arith.constant 0 : index
    %c0_67 = arith.constant 0 : index
    %97 = vector.load %arg5[%c0_65, %c9, %c0_66, %c0_67] : memref<1x12x32x8xbf16, #tpu.memory_space<vmem>>, vector<1x1x32x8xbf16>
    %98 = vector.shape_cast %97 : vector<1x1x32x8xbf16> to vector<32x8xbf16>
    %cst_68 = arith.constant dense<0.000000e+00> : vector<48x8xf32>
    %99 = tpu.matmul %32, %98, %cst_68 {dimension_numbers = #tpu.dot_dimension_numbers<[1], [0], [0], [1], [0, 0, 1, 1], [], []>} : vector<48x32xbf16>, vector<32x8xbf16>, vector<48x8xf32> -> vector<48x8xf32>
    %c0_69 = arith.constant 0 : index
    %c9_70 = arith.constant 9 : index
    %c0_71 = arith.constant 0 : index
    %c0_72 = arith.constant 0 : index
    %100 = vector.load %arg6[%c0_69, %c9_70, %c0_71, %c0_72] : memref<1x12x1x8xf32, #tpu.memory_space<vmem>>, vector<1x1x1x8xf32>
    %101 = vector.shape_cast %100 : vector<1x1x1x8xf32> to vector<1x8xf32>
    %102 = vector.broadcast %101 : vector<1x8xf32> to vector<48x8xf32>
    %103 = arith.addf %99, %102 : vector<48x8xf32>
    %104 = vector.shape_cast %103 : vector<48x8xf32> to vector<3x16x8xf32>
    %105 = arith.truncf %88 : vector<3x16x8xf32> to vector<3x16x8xbf16>
    %106 = arith.truncf %96 : vector<3x16x8xf32> to vector<3x16x8xbf16>
    "tpu.trace_start"() <{level = 10 : i32, message = "bqd,bkd->bqk"}> : () -> ()
    %cst_73 = arith.constant dense<0.000000e+00> : vector<3x16x16xf32>
    %107 = tpu.matmul %105, %106, %cst_73 {dimension_numbers = #tpu.dot_dimension_numbers<[2], [2], [1], [1], [0, 0, 0, 1, 1, 1], [0], [0]>} : vector<3x16x8xbf16>, vector<3x16x8xbf16>, vector<3x16x16xf32> -> vector<3x16x16xf32>
    "tpu.trace_stop"() : () -> ()
    %108 = vector.shape_cast %4 : vector<16x16xf32> to vector<1x16x16xf32>
    %109 = vector.broadcast %108 : vector<1x16x16xf32> to vector<3x16x16xf32>
    %110 = arith.addf %107, %109 : vector<3x16x16xf32>
    %cst_74 = arith.constant dense<0xFF800000> : vector<3x16xf32>
    %111 = vector.multi_reduction <maximumf>, %110, %cst_74 [2] : vector<3x16x16xf32> to vector<3x16xf32>
    %112 = vector.shape_cast %111 : vector<3x16xf32> to vector<3x16x1xf32>
    %113 = vector.broadcast %112 : vector<3x16x1xf32> to vector<3x16x16xf32>
    %114 = arith.subf %110, %113 : vector<3x16x16xf32>
    %115 = math.exp %114 : vector<3x16x16xf32>
    %cst_75 = arith.constant dense<0.000000e+00> : vector<3x16xf32>
    %116 = vector.multi_reduction <add>, %115, %cst_75 [2] : vector<3x16x16xf32> to vector<3x16xf32>
    %117 = vector.shape_cast %116 : vector<3x16xf32> to vector<3x16x1xf32>
    %118 = tpu.reciprocal %117 {approx = true} : vector<3x16x1xf32> -> vector<3x16x1xf32>
    %119 = vector.broadcast %118 : vector<3x16x1xf32> to vector<3x16x16xf32>
    %120 = arith.mulf %115, %119 : vector<3x16x16xf32>
    %121 = arith.truncf %120 : vector<3x16x16xf32> to vector<3x16x16xbf16>
    %122 = arith.truncf %104 : vector<3x16x8xf32> to vector<3x16x8xbf16>
    "tpu.trace_start"() <{level = 10 : i32, message = "bqk,bkd->bqd"}> : () -> ()
    %cst_76 = arith.constant dense<0.000000e+00> : vector<3x16x8xf32>
    %123 = tpu.matmul %121, %122, %cst_76 {dimension_numbers = #tpu.dot_dimension_numbers<[2], [1], [1], [2], [0, 0, 0, 1, 1, 2], [0], [0]>} : vector<3x16x16xbf16>, vector<3x16x8xbf16>, vector<3x16x8xf32> -> vector<3x16x8xf32>
    "tpu.trace_stop"() : () -> ()
    %124 = vector.shape_cast %123 : vector<3x16x8xf32> to vector<48x8xf32>
    %125 = arith.truncf %124 : vector<48x8xf32> to vector<48x8xbf16>
    %c0_77 = arith.constant 0 : index
    %c1_78 = arith.constant 1 : index
    %c0_79 = arith.constant 0 : index
    %c0_80 = arith.constant 0 : index
    %126 = vector.load %arg7[%c0_77, %c1_78, %c0_79, %c0_80] : memref<1x4x8x32xbf16, #tpu.memory_space<vmem>>, vector<1x1x8x32xbf16>
    %127 = vector.shape_cast %126 : vector<1x1x8x32xbf16> to vector<8x32xbf16>
    %cst_81 = arith.constant dense<0.000000e+00> : vector<48x32xf32>
    %128 = tpu.matmul %125, %127, %cst_81 {dimension_numbers = #tpu.dot_dimension_numbers<[1], [0], [0], [1], [0, 0, 1, 1], [], []>} : vector<48x8xbf16>, vector<8x32xbf16>, vector<48x32xf32> -> vector<48x32xf32>
    %129 = arith.addf %80, %128 : vector<48x32xf32>
    %c0_82 = arith.constant 0 : index
    %c2 = arith.constant 2 : index
    %c0_83 = arith.constant 0 : index
    %c0_84 = arith.constant 0 : index
    %130 = vector.load %arg5[%c0_82, %c2, %c0_83, %c0_84] : memref<1x12x32x8xbf16, #tpu.memory_space<vmem>>, vector<1x1x32x8xbf16>
    %131 = vector.shape_cast %130 : vector<1x1x32x8xbf16> to vector<32x8xbf16>
    %cst_85 = arith.constant dense<0.000000e+00> : vector<48x8xf32>
    %132 = tpu.matmul %32, %131, %cst_85 {dimension_numbers = #tpu.dot_dimension_numbers<[1], [0], [0], [1], [0, 0, 1, 1], [], []>} : vector<48x32xbf16>, vector<32x8xbf16>, vector<48x8xf32> -> vector<48x8xf32>
    %c0_86 = arith.constant 0 : index
    %c2_87 = arith.constant 2 : index
    %c0_88 = arith.constant 0 : index
    %c0_89 = arith.constant 0 : index
    %133 = vector.load %arg6[%c0_86, %c2_87, %c0_88, %c0_89] : memref<1x12x1x8xf32, #tpu.memory_space<vmem>>, vector<1x1x1x8xf32>
    %134 = vector.shape_cast %133 : vector<1x1x1x8xf32> to vector<1x8xf32>
    %135 = vector.broadcast %134 : vector<1x8xf32> to vector<48x8xf32>
    %136 = arith.addf %132, %135 : vector<48x8xf32>
    %137 = vector.shape_cast %136 : vector<48x8xf32> to vector<3x16x8xf32>
    %c0_90 = arith.constant 0 : index
    %c6 = arith.constant 6 : index
    %c0_91 = arith.constant 0 : index
    %c0_92 = arith.constant 0 : index
    %138 = vector.load %arg5[%c0_90, %c6, %c0_91, %c0_92] : memref<1x12x32x8xbf16, #tpu.memory_space<vmem>>, vector<1x1x32x8xbf16>
    %139 = vector.shape_cast %138 : vector<1x1x32x8xbf16> to vector<32x8xbf16>
    %cst_93 = arith.constant dense<0.000000e+00> : vector<48x8xf32>
    %140 = tpu.matmul %32, %139, %cst_93 {dimension_numbers = #tpu.dot_dimension_numbers<[1], [0], [0], [1], [0, 0, 1, 1], [], []>} : vector<48x32xbf16>, vector<32x8xbf16>, vector<48x8xf32> -> vector<48x8xf32>
    %c0_94 = arith.constant 0 : index
    %c6_95 = arith.constant 6 : index
    %c0_96 = arith.constant 0 : index
    %c0_97 = arith.constant 0 : index
    %141 = vector.load %arg6[%c0_94, %c6_95, %c0_96, %c0_97] : memref<1x12x1x8xf32, #tpu.memory_space<vmem>>, vector<1x1x1x8xf32>
    %142 = vector.shape_cast %141 : vector<1x1x1x8xf32> to vector<1x8xf32>
    %143 = vector.broadcast %142 : vector<1x8xf32> to vector<48x8xf32>
    %144 = arith.addf %140, %143 : vector<48x8xf32>
    %145 = vector.shape_cast %144 : vector<48x8xf32> to vector<3x16x8xf32>
    %c0_98 = arith.constant 0 : index
    %c10 = arith.constant 10 : index
    %c0_99 = arith.constant 0 : index
    %c0_100 = arith.constant 0 : index
    %146 = vector.load %arg5[%c0_98, %c10, %c0_99, %c0_100] : memref<1x12x32x8xbf16, #tpu.memory_space<vmem>>, vector<1x1x32x8xbf16>
    %147 = vector.shape_cast %146 : vector<1x1x32x8xbf16> to vector<32x8xbf16>
    %cst_101 = arith.constant dense<0.000000e+00> : vector<48x8xf32>
    %148 = tpu.matmul %32, %147, %cst_101 {dimension_numbers = #tpu.dot_dimension_numbers<[1], [0], [0], [1], [0, 0, 1, 1], [], []>} : vector<48x32xbf16>, vector<32x8xbf16>, vector<48x8xf32> -> vector<48x8xf32>
    %c0_102 = arith.constant 0 : index
    %c10_103 = arith.constant 10 : index
    %c0_104 = arith.constant 0 : index
    %c0_105 = arith.constant 0 : index
    %149 = vector.load %arg6[%c0_102, %c10_103, %c0_104, %c0_105] : memref<1x12x1x8xf32, #tpu.memory_space<vmem>>, vector<1x1x1x8xf32>
    %150 = vector.shape_cast %149 : vector<1x1x1x8xf32> to vector<1x8xf32>
    %151 = vector.broadcast %150 : vector<1x8xf32> to vector<48x8xf32>
    %152 = arith.addf %148, %151 : vector<48x8xf32>
    %153 = vector.shape_cast %152 : vector<48x8xf32> to vector<3x16x8xf32>
    %154 = arith.truncf %137 : vector<3x16x8xf32> to vector<3x16x8xbf16>
    %155 = arith.truncf %145 : vector<3x16x8xf32> to vector<3x16x8xbf16>
    "tpu.trace_start"() <{level = 10 : i32, message = "bqd,bkd->bqk"}> : () -> ()
    %cst_106 = arith.constant dense<0.000000e+00> : vector<3x16x16xf32>
    %156 = tpu.matmul %154, %155, %cst_106 {dimension_numbers = #tpu.dot_dimension_numbers<[2], [2], [1], [1], [0, 0, 0, 1, 1, 1], [0], [0]>} : vector<3x16x8xbf16>, vector<3x16x8xbf16>, vector<3x16x16xf32> -> vector<3x16x16xf32>
    "tpu.trace_stop"() : () -> ()
    %157 = vector.shape_cast %4 : vector<16x16xf32> to vector<1x16x16xf32>
    %158 = vector.broadcast %157 : vector<1x16x16xf32> to vector<3x16x16xf32>
    %159 = arith.addf %156, %158 : vector<3x16x16xf32>
    %cst_107 = arith.constant dense<0xFF800000> : vector<3x16xf32>
    %160 = vector.multi_reduction <maximumf>, %159, %cst_107 [2] : vector<3x16x16xf32> to vector<3x16xf32>
    %161 = vector.shape_cast %160 : vector<3x16xf32> to vector<3x16x1xf32>
    %162 = vector.broadcast %161 : vector<3x16x1xf32> to vector<3x16x16xf32>
    %163 = arith.subf %159, %162 : vector<3x16x16xf32>
    %164 = math.exp %163 : vector<3x16x16xf32>
    %cst_108 = arith.constant dense<0.000000e+00> : vector<3x16xf32>
    %165 = vector.multi_reduction <add>, %164, %cst_108 [2] : vector<3x16x16xf32> to vector<3x16xf32>
    %166 = vector.shape_cast %165 : vector<3x16xf32> to vector<3x16x1xf32>
    %167 = tpu.reciprocal %166 {approx = true} : vector<3x16x1xf32> -> vector<3x16x1xf32>
    %168 = vector.broadcast %167 : vector<3x16x1xf32> to vector<3x16x16xf32>
    %169 = arith.mulf %164, %168 : vector<3x16x16xf32>
    %170 = arith.truncf %169 : vector<3x16x16xf32> to vector<3x16x16xbf16>
    %171 = arith.truncf %153 : vector<3x16x8xf32> to vector<3x16x8xbf16>
    "tpu.trace_start"() <{level = 10 : i32, message = "bqk,bkd->bqd"}> : () -> ()
    %cst_109 = arith.constant dense<0.000000e+00> : vector<3x16x8xf32>
    %172 = tpu.matmul %170, %171, %cst_109 {dimension_numbers = #tpu.dot_dimension_numbers<[2], [1], [1], [2], [0, 0, 0, 1, 1, 2], [0], [0]>} : vector<3x16x16xbf16>, vector<3x16x8xbf16>, vector<3x16x8xf32> -> vector<3x16x8xf32>
    "tpu.trace_stop"() : () -> ()
    %173 = vector.shape_cast %172 : vector<3x16x8xf32> to vector<48x8xf32>
    %174 = arith.truncf %173 : vector<48x8xf32> to vector<48x8xbf16>
    %c0_110 = arith.constant 0 : index
    %c2_111 = arith.constant 2 : index
    %c0_112 = arith.constant 0 : index
    %c0_113 = arith.constant 0 : index
    %175 = vector.load %arg7[%c0_110, %c2_111, %c0_112, %c0_113] : memref<1x4x8x32xbf16, #tpu.memory_space<vmem>>, vector<1x1x8x32xbf16>
    %176 = vector.shape_cast %175 : vector<1x1x8x32xbf16> to vector<8x32xbf16>
    %cst_114 = arith.constant dense<0.000000e+00> : vector<48x32xf32>
    %177 = tpu.matmul %174, %176, %cst_114 {dimension_numbers = #tpu.dot_dimension_numbers<[1], [0], [0], [1], [0, 0, 1, 1], [], []>} : vector<48x8xbf16>, vector<8x32xbf16>, vector<48x32xf32> -> vector<48x32xf32>
    %178 = arith.addf %129, %177 : vector<48x32xf32>
    %c0_115 = arith.constant 0 : index
    %c3 = arith.constant 3 : index
    %c0_116 = arith.constant 0 : index
    %c0_117 = arith.constant 0 : index
    %179 = vector.load %arg5[%c0_115, %c3, %c0_116, %c0_117] : memref<1x12x32x8xbf16, #tpu.memory_space<vmem>>, vector<1x1x32x8xbf16>
    %180 = vector.shape_cast %179 : vector<1x1x32x8xbf16> to vector<32x8xbf16>
    %cst_118 = arith.constant dense<0.000000e+00> : vector<48x8xf32>
    %181 = tpu.matmul %32, %180, %cst_118 {dimension_numbers = #tpu.dot_dimension_numbers<[1], [0], [0], [1], [0, 0, 1, 1], [], []>} : vector<48x32xbf16>, vector<32x8xbf16>, vector<48x8xf32> -> vector<48x8xf32>
    %c0_119 = arith.constant 0 : index
    %c3_120 = arith.constant 3 : index
    %c0_121 = arith.constant 0 : index
    %c0_122 = arith.constant 0 : index
    %182 = vector.load %arg6[%c0_119, %c3_120, %c0_121, %c0_122] : memref<1x12x1x8xf32, #tpu.memory_space<vmem>>, vector<1x1x1x8xf32>
    %183 = vector.shape_cast %182 : vector<1x1x1x8xf32> to vector<1x8xf32>
    %184 = vector.broadcast %183 : vector<1x8xf32> to vector<48x8xf32>
    %185 = arith.addf %181, %184 : vector<48x8xf32>
    %186 = vector.shape_cast %185 : vector<48x8xf32> to vector<3x16x8xf32>
    %c0_123 = arith.constant 0 : index
    %c7 = arith.constant 7 : index
    %c0_124 = arith.constant 0 : index
    %c0_125 = arith.constant 0 : index
    %187 = vector.load %arg5[%c0_123, %c7, %c0_124, %c0_125] : memref<1x12x32x8xbf16, #tpu.memory_space<vmem>>, vector<1x1x32x8xbf16>
    %188 = vector.shape_cast %187 : vector<1x1x32x8xbf16> to vector<32x8xbf16>
    %cst_126 = arith.constant dense<0.000000e+00> : vector<48x8xf32>
    %189 = tpu.matmul %32, %188, %cst_126 {dimension_numbers = #tpu.dot_dimension_numbers<[1], [0], [0], [1], [0, 0, 1, 1], [], []>} : vector<48x32xbf16>, vector<32x8xbf16>, vector<48x8xf32> -> vector<48x8xf32>
    %c0_127 = arith.constant 0 : index
    %c7_128 = arith.constant 7 : index
    %c0_129 = arith.constant 0 : index
    %c0_130 = arith.constant 0 : index
    %190 = vector.load %arg6[%c0_127, %c7_128, %c0_129, %c0_130] : memref<1x12x1x8xf32, #tpu.memory_space<vmem>>, vector<1x1x1x8xf32>
    %191 = vector.shape_cast %190 : vector<1x1x1x8xf32> to vector<1x8xf32>
    %192 = vector.broadcast %191 : vector<1x8xf32> to vector<48x8xf32>
    %193 = arith.addf %189, %192 : vector<48x8xf32>
    %194 = vector.shape_cast %193 : vector<48x8xf32> to vector<3x16x8xf32>
    %c0_131 = arith.constant 0 : index
    %c11 = arith.constant 11 : index
    %c0_132 = arith.constant 0 : index
    %c0_133 = arith.constant 0 : index
    %195 = vector.load %arg5[%c0_131, %c11, %c0_132, %c0_133] : memref<1x12x32x8xbf16, #tpu.memory_space<vmem>>, vector<1x1x32x8xbf16>
    %196 = vector.shape_cast %195 : vector<1x1x32x8xbf16> to vector<32x8xbf16>
    %cst_134 = arith.constant dense<0.000000e+00> : vector<48x8xf32>
    %197 = tpu.matmul %32, %196, %cst_134 {dimension_numbers = #tpu.dot_dimension_numbers<[1], [0], [0], [1], [0, 0, 1, 1], [], []>} : vector<48x32xbf16>, vector<32x8xbf16>, vector<48x8xf32> -> vector<48x8xf32>
    %c0_135 = arith.constant 0 : index
    %c11_136 = arith.constant 11 : index
    %c0_137 = arith.constant 0 : index
    %c0_138 = arith.constant 0 : index
    %198 = vector.load %arg6[%c0_135, %c11_136, %c0_137, %c0_138] : memref<1x12x1x8xf32, #tpu.memory_space<vmem>>, vector<1x1x1x8xf32>
    %199 = vector.shape_cast %198 : vector<1x1x1x8xf32> to vector<1x8xf32>
    %200 = vector.broadcast %199 : vector<1x8xf32> to vector<48x8xf32>
    %201 = arith.addf %197, %200 : vector<48x8xf32>
    %202 = vector.shape_cast %201 : vector<48x8xf32> to vector<3x16x8xf32>
    %203 = arith.truncf %186 : vector<3x16x8xf32> to vector<3x16x8xbf16>
    %204 = arith.truncf %194 : vector<3x16x8xf32> to vector<3x16x8xbf16>
    "tpu.trace_start"() <{level = 10 : i32, message = "bqd,bkd->bqk"}> : () -> ()
    %cst_139 = arith.constant dense<0.000000e+00> : vector<3x16x16xf32>
    %205 = tpu.matmul %203, %204, %cst_139 {dimension_numbers = #tpu.dot_dimension_numbers<[2], [2], [1], [1], [0, 0, 0, 1, 1, 1], [0], [0]>} : vector<3x16x8xbf16>, vector<3x16x8xbf16>, vector<3x16x16xf32> -> vector<3x16x16xf32>
    "tpu.trace_stop"() : () -> ()
    %206 = vector.shape_cast %4 : vector<16x16xf32> to vector<1x16x16xf32>
    %207 = vector.broadcast %206 : vector<1x16x16xf32> to vector<3x16x16xf32>
    %208 = arith.addf %205, %207 : vector<3x16x16xf32>
    %cst_140 = arith.constant dense<0xFF800000> : vector<3x16xf32>
    %209 = vector.multi_reduction <maximumf>, %208, %cst_140 [2] : vector<3x16x16xf32> to vector<3x16xf32>
    %210 = vector.shape_cast %209 : vector<3x16xf32> to vector<3x16x1xf32>
    %211 = vector.broadcast %210 : vector<3x16x1xf32> to vector<3x16x16xf32>
    %212 = arith.subf %208, %211 : vector<3x16x16xf32>
    %213 = math.exp %212 : vector<3x16x16xf32>
    %cst_141 = arith.constant dense<0.000000e+00> : vector<3x16xf32>
    %214 = vector.multi_reduction <add>, %213, %cst_141 [2] : vector<3x16x16xf32> to vector<3x16xf32>
    %215 = vector.shape_cast %214 : vector<3x16xf32> to vector<3x16x1xf32>
    %216 = tpu.reciprocal %215 {approx = true} : vector<3x16x1xf32> -> vector<3x16x1xf32>
    %217 = vector.broadcast %216 : vector<3x16x1xf32> to vector<3x16x16xf32>
    %218 = arith.mulf %213, %217 : vector<3x16x16xf32>
    %219 = arith.truncf %218 : vector<3x16x16xf32> to vector<3x16x16xbf16>
    %220 = arith.truncf %202 : vector<3x16x8xf32> to vector<3x16x8xbf16>
    "tpu.trace_start"() <{level = 10 : i32, message = "bqk,bkd->bqd"}> : () -> ()
    %cst_142 = arith.constant dense<0.000000e+00> : vector<3x16x8xf32>
    %221 = tpu.matmul %219, %220, %cst_142 {dimension_numbers = #tpu.dot_dimension_numbers<[2], [1], [1], [2], [0, 0, 0, 1, 1, 2], [0], [0]>} : vector<3x16x16xbf16>, vector<3x16x8xbf16>, vector<3x16x8xf32> -> vector<3x16x8xf32>
    "tpu.trace_stop"() : () -> ()
    %222 = vector.shape_cast %221 : vector<3x16x8xf32> to vector<48x8xf32>
    %223 = arith.truncf %222 : vector<48x8xf32> to vector<48x8xbf16>
    %c0_143 = arith.constant 0 : index
    %c3_144 = arith.constant 3 : index
    %c0_145 = arith.constant 0 : index
    %c0_146 = arith.constant 0 : index
    %224 = vector.load %arg7[%c0_143, %c3_144, %c0_145, %c0_146] : memref<1x4x8x32xbf16, #tpu.memory_space<vmem>>, vector<1x1x8x32xbf16>
    %225 = vector.shape_cast %224 : vector<1x1x8x32xbf16> to vector<8x32xbf16>
    %cst_147 = arith.constant dense<0.000000e+00> : vector<48x32xf32>
    %226 = tpu.matmul %223, %225, %cst_147 {dimension_numbers = #tpu.dot_dimension_numbers<[1], [0], [0], [1], [0, 0, 1, 1], [], []>} : vector<48x8xbf16>, vector<8x32xbf16>, vector<48x32xf32> -> vector<48x32xf32>
    %227 = arith.addf %178, %226 : vector<48x32xf32>
    %c0_148 = arith.constant 0 : index
    %c0_149 = arith.constant 0 : index
    %c0_150 = arith.constant 0 : index
    %228 = vector.load %arg8[%c0_148, %c0_149, %c0_150] : memref<1x1x32xf32, #tpu.memory_space<vmem>>, vector<1x1x32xf32>
    %229 = vector.shape_cast %228 : vector<1x1x32xf32> to vector<1x32xf32>
    %230 = vector.broadcast %229 : vector<1x32xf32> to vector<48x32xf32>
    %231 = arith.addf %227, %230 : vector<48x32xf32>
    %232 = vector.shape_cast %231 : vector<48x32xf32> to vector<3x16x32xf32>
    %233 = arith.addf %3, %232 : vector<3x16x32xf32>
    %234 = vector.shape_cast %233 : vector<3x16x32xf32> to vector<48x32xf32>
    %c0_151 = arith.constant 0 : index
    %c0_152 = arith.constant 0 : index
    %c0_153 = arith.constant 0 : index
    %235 = vector.load %arg9[%c0_151, %c0_152, %c0_153] : memref<1x1x32xf32, #tpu.memory_space<vmem>>, vector<1x1x32xf32>
    %236 = vector.shape_cast %235 : vector<1x1x32xf32> to vector<1x32xf32>
    %c0_154 = arith.constant 0 : index
    %c0_155 = arith.constant 0 : index
    %c0_156 = arith.constant 0 : index
    %237 = vector.load %arg10[%c0_154, %c0_155, %c0_156] : memref<1x1x32xf32, #tpu.memory_space<vmem>>, vector<1x1x32xf32>
    %238 = vector.shape_cast %237 : vector<1x1x32xf32> to vector<1x32xf32>
    %cst_157 = arith.constant dense<0.000000e+00> : vector<48xf32>
    %239 = vector.multi_reduction <add>, %234, %cst_157 [1] : vector<48x32xf32> to vector<48xf32>
    %240 = vector.shape_cast %239 : vector<48xf32> to vector<48x1xf32>
    %cst_158 = arith.constant 3.200000e+01 : f32
    %241 = vector.broadcast %cst_158 : f32 to vector<48x1xf32>
    %242 = arith.divf %240, %241 : vector<48x1xf32>
    %243 = vector.broadcast %242 : vector<48x1xf32> to vector<48x32xf32>
    %244 = arith.subf %234, %243 : vector<48x32xf32>
    %245 = arith.mulf %244, %244 : vector<48x32xf32>
    %cst_159 = arith.constant dense<0.000000e+00> : vector<48xf32>
    %246 = vector.multi_reduction <add>, %245, %cst_159 [1] : vector<48x32xf32> to vector<48xf32>
    %247 = vector.shape_cast %246 : vector<48xf32> to vector<48x1xf32>
    %cst_160 = arith.constant 3.200000e+01 : f32
    %248 = vector.broadcast %cst_160 : f32 to vector<48x1xf32>
    %249 = arith.divf %247, %248 : vector<48x1xf32>
    %250 = vector.broadcast %242 : vector<48x1xf32> to vector<48x32xf32>
    %251 = arith.subf %234, %250 : vector<48x32xf32>
    %cst_161 = arith.constant 9.99999974E-6 : f32
    %252 = vector.broadcast %cst_161 : f32 to vector<48x1xf32>
    %253 = arith.addf %249, %252 : vector<48x1xf32>
    %254 = math.rsqrt %253 : vector<48x1xf32>
    %255 = vector.broadcast %254 : vector<48x1xf32> to vector<48x32xf32>
    %256 = arith.mulf %251, %255 : vector<48x32xf32>
    %257 = vector.broadcast %236 : vector<1x32xf32> to vector<48x32xf32>
    %258 = arith.mulf %256, %257 : vector<48x32xf32>
    %259 = vector.broadcast %238 : vector<1x32xf32> to vector<48x32xf32>
    %260 = arith.addf %258, %259 : vector<48x32xf32>
    %c0_162 = arith.constant 0 : index
    %c0_163 = arith.constant 0 : index
    %c0_164 = arith.constant 0 : index
    %261 = vector.load %arg11[%c0_162, %c0_163, %c0_164] : memref<1x32x128xbf16, #tpu.memory_space<vmem>>, vector<1x32x128xbf16>
    %262 = vector.shape_cast %261 : vector<1x32x128xbf16> to vector<32x128xbf16>
    %c0_165 = arith.constant 0 : index
    %c0_166 = arith.constant 0 : index
    %c0_167 = arith.constant 0 : index
    %263 = vector.load %arg12[%c0_165, %c0_166, %c0_167] : memref<1x1x128xf32, #tpu.memory_space<vmem>>, vector<1x1x128xf32>
    %264 = vector.shape_cast %263 : vector<1x1x128xf32> to vector<1x128xf32>
    %265 = arith.truncf %260 : vector<48x32xf32> to vector<48x32xbf16>
    %cst_168 = arith.constant dense<0.000000e+00> : vector<48x128xf32>
    %266 = tpu.matmul %265, %262, %cst_168 {dimension_numbers = #tpu.dot_dimension_numbers<[1], [0], [0], [1], [0, 0, 1, 1], [], []>} : vector<48x32xbf16>, vector<32x128xbf16>, vector<48x128xf32> -> vector<48x128xf32>
    %267 = vector.broadcast %264 : vector<1x128xf32> to vector<48x128xf32>
    %268 = arith.addf %266, %267 : vector<48x128xf32>
    %cst_169 = arith.constant 1.702000e+00 : f32
    %269 = vector.broadcast %cst_169 : f32 to vector<48x128xf32>
    %270 = arith.mulf %269, %268 : vector<48x128xf32>
    %271 = arith.negf %270 : vector<48x128xf32>
    %272 = math.exp %271 : vector<48x128xf32>
    %cst_170 = arith.constant 1.000000e+00 : f32
    %273 = vector.broadcast %cst_170 : f32 to vector<48x128xf32>
    %274 = arith.addf %273, %272 : vector<48x128xf32>
    %275 = arith.divf %273, %274 : vector<48x128xf32>
    %276 = arith.mulf %268, %275 : vector<48x128xf32>
    %c0_171 = arith.constant 0 : index
    %c0_172 = arith.constant 0 : index
    %c0_173 = arith.constant 0 : index
    %277 = vector.load %arg13[%c0_171, %c0_172, %c0_173] : memref<1x128x32xbf16, #tpu.memory_space<vmem>>, vector<1x128x32xbf16>
    %278 = vector.shape_cast %277 : vector<1x128x32xbf16> to vector<128x32xbf16>
    %c0_174 = arith.constant 0 : index
    %c0_175 = arith.constant 0 : index
    %c0_176 = arith.constant 0 : index
    %279 = vector.load %arg14[%c0_174, %c0_175, %c0_176] : memref<1x1x32xf32, #tpu.memory_space<vmem>>, vector<1x1x32xf32>
    %280 = vector.shape_cast %279 : vector<1x1x32xf32> to vector<1x32xf32>
    %281 = arith.truncf %276 : vector<48x128xf32> to vector<48x128xbf16>
    %cst_177 = arith.constant dense<0.000000e+00> : vector<48x32xf32>
    %282 = tpu.matmul %281, %278, %cst_177 {dimension_numbers = #tpu.dot_dimension_numbers<[1], [0], [0], [1], [0, 0, 1, 1], [], []>} : vector<48x128xbf16>, vector<128x32xbf16>, vector<48x32xf32> -> vector<48x32xf32>
    %283 = vector.broadcast %280 : vector<1x32xf32> to vector<48x32xf32>
    %284 = arith.addf %282, %283 : vector<48x32xf32>
    %285 = vector.shape_cast %284 : vector<48x32xf32> to vector<3x16x32xf32>
    %286 = arith.addf %233, %285 : vector<3x16x32xf32>
    %c0_178 = arith.constant 0 : index
    %c0_179 = arith.constant 0 : index
    %c0_180 = arith.constant 0 : index
    %287 = vector.load %arg22[%c0_178, %c0_179, %c0_180] : memref<3x16x32xf32, #tpu.memory_space<vmem>>, vector<3x16x32xf32>
    tpu.vector_store %arg22[%c0_178, %c0_179, %c0_180], %286 {strides = array<i32>} : memref<3x16x32xf32, #tpu.memory_space<vmem>>, vector<3x16x32xf32>,
    %c1_i32 = arith.constant 1 : i32
    %288 = arith.cmpi eq, %arg0, %c1_i32 : i32
    %289 = arith.extui %288 : i1 to i32
    %c0_i32_181 = arith.constant 0 : i32
    %290 = arith.cmpi ne, %289, %c0_i32_181 : i32
    scf.if %290 {
      %c0_182 = arith.constant 0 : index
      %c0_183 = arith.constant 0 : index
      %c0_184 = arith.constant 0 : index
      %291 = vector.load %arg22[%c0_182, %c0_183, %c0_184] : memref<3x16x32xf32, #tpu.memory_space<vmem>>, vector<3x16x32xf32>
      %292 = vector.shape_cast %291 : vector<3x16x32xf32> to vector<48x32xf32>
      %c0_185 = arith.constant 0 : index
      %c0_186 = arith.constant 0 : index
      %293 = vector.load %arg15[%c0_185, %c0_186] : memref<1x32xf32, #tpu.memory_space<vmem>>, vector<1x32xf32>
      %c0_187 = arith.constant 0 : index
      %c0_188 = arith.constant 0 : index
      %294 = vector.load %arg16[%c0_187, %c0_188] : memref<1x32xf32, #tpu.memory_space<vmem>>, vector<1x32xf32>
      %cst_189 = arith.constant dense<0.000000e+00> : vector<48xf32>
      %295 = vector.multi_reduction <add>, %292, %cst_189 [1] : vector<48x32xf32> to vector<48xf32>
      %296 = vector.shape_cast %295 : vector<48xf32> to vector<48x1xf32>
      %cst_190 = arith.constant 3.200000e+01 : f32
      %297 = vector.broadcast %cst_190 : f32 to vector<48x1xf32>
      %298 = arith.divf %296, %297 : vector<48x1xf32>
      %299 = vector.broadcast %298 : vector<48x1xf32> to vector<48x32xf32>
      %300 = arith.subf %292, %299 : vector<48x32xf32>
      %301 = arith.mulf %300, %300 : vector<48x32xf32>
      %cst_191 = arith.constant dense<0.000000e+00> : vector<48xf32>
      %302 = vector.multi_reduction <add>, %301, %cst_191 [1] : vector<48x32xf32> to vector<48xf32>
      %303 = vector.shape_cast %302 : vector<48xf32> to vector<48x1xf32>
      %cst_192 = arith.constant 3.200000e+01 : f32
      %304 = vector.broadcast %cst_192 : f32 to vector<48x1xf32>
      %305 = arith.divf %303, %304 : vector<48x1xf32>
      %306 = vector.broadcast %298 : vector<48x1xf32> to vector<48x32xf32>
      %307 = arith.subf %292, %306 : vector<48x32xf32>
      %cst_193 = arith.constant 9.99999974E-6 : f32
      %308 = vector.broadcast %cst_193 : f32 to vector<48x1xf32>
      %309 = arith.addf %305, %308 : vector<48x1xf32>
      %310 = math.rsqrt %309 : vector<48x1xf32>
      %311 = vector.broadcast %310 : vector<48x1xf32> to vector<48x32xf32>
      %312 = arith.mulf %307, %311 : vector<48x32xf32>
      %313 = vector.broadcast %293 : vector<1x32xf32> to vector<48x32xf32>
      %314 = arith.mulf %312, %313 : vector<48x32xf32>
      %315 = vector.broadcast %294 : vector<1x32xf32> to vector<48x32xf32>
      %316 = arith.addf %314, %315 : vector<48x32xf32>
      %317 = vector.shape_cast %316 : vector<48x32xf32> to vector<3x16x32xf32>
      %c0_194 = arith.constant 0 : index
      %c0_195 = arith.constant 0 : index
      %318 = vector.load %arg18[%c0_194, %c0_195] : memref<3x16xf32, #tpu.memory_space<vmem>>, vector<3x16xf32>
      %319 = vector.shape_cast %318 : vector<3x16xf32> to vector<3x16x1xf32>
      %320 = vector.broadcast %319 : vector<3x16x1xf32> to vector<3x16x32xf32>
      %321 = arith.mulf %320, %317 : vector<3x16x32xf32>
      %cst_196 = arith.constant dense<0.000000e+00> : vector<3x32xf32>
      %322 = vector.multi_reduction <add>, %321, %cst_196 [1] : vector<3x16x32xf32> to vector<3x32xf32>
      %c0_197 = arith.constant 0 : index
      %c0_198 = arith.constant 0 : index
      %323 = vector.load %arg17[%c0_197, %c0_198] : memref<32x32xbf16, #tpu.memory_space<vmem>>, vector<32x32xbf16>
      %324 = arith.truncf %322 : vector<3x32xf32> to vector<3x32xbf16>
      %cst_199 = arith.constant dense<0.000000e+00> : vector<3x32xf32>
      %325 = tpu.matmul %324, %323, %cst_199 {dimension_numbers = #tpu.dot_dimension_numbers<[1], [0], [0], [1], [0, 0, 1, 1], [], []>} : vector<3x32xbf16>, vector<32x32xbf16>, vector<3x32xf32> -> vector<3x32xf32>
      %c0_200 = arith.constant 0 : index
      %c0_201 = arith.constant 0 : index
      %326 = vector.load %arg19[%c0_200, %c0_201] : memref<2x32xf32, #tpu.memory_space<vmem>>, vector<2x32xf32>
      %327 = arith.mulf %326, %326 : vector<2x32xf32>
      %cst_202 = arith.constant dense<0.000000e+00> : vector<2xf32>
      %328 = vector.multi_reduction <add>, %327, %cst_202 [1] : vector<2x32xf32> to vector<2xf32>
      %329 = vector.shape_cast %328 : vector<2xf32> to vector<2x1xf32>
      %330 = math.rsqrt %329 : vector<2x1xf32>
      %331 = vector.broadcast %330 : vector<2x1xf32> to vector<2x32xf32>
      %332 = arith.mulf %326, %331 : vector<2x32xf32>
      %333 = arith.mulf %325, %325 : vector<3x32xf32>
      %cst_203 = arith.constant dense<0.000000e+00> : vector<3xf32>
      %334 = vector.multi_reduction <add>, %333, %cst_203 [1] : vector<3x32xf32> to vector<3xf32>
      %335 = vector.shape_cast %334 : vector<3xf32> to vector<3x1xf32>
      %336 = math.rsqrt %335 : vector<3x1xf32>
      %337 = vector.broadcast %336 : vector<3x1xf32> to vector<3x32xf32>
      %338 = arith.mulf %325, %337 : vector<3x32xf32>
      %cst_204 = arith.constant dense<0.000000e+00> : vector<2x3xf32>
      %339 = tpu.matmul %332, %338, %cst_204 {dimension_numbers = #tpu.dot_dimension_numbers<[1], [1], [0], [0], [0, 0, 1, 0], [], []>} : vector<2x32xf32>, vector<3x32xf32>, vector<2x3xf32> -> vector<2x3xf32>
      %c0_205 = arith.constant 0 : index
      %c0_206 = arith.constant 0 : index
      %340 = memref.load %arg20[%c0_205, %c0_206] : memref<1x1xf32, #tpu.memory_space<smem>>
      %341 = vector.broadcast %340 : f32 to vector<2x3xf32>
      %342 = math.exp %341 : vector<2x3xf32>
      %343 = arith.mulf %342, %339 : vector<2x3xf32>
      %c0_207 = arith.constant 0 : index
      %c0_208 = arith.constant 0 : index
      %344 = vector.load %arg21[%c0_207, %c0_208] : memref<2x3xf32, #tpu.memory_space<vmem>>, vector<2x3xf32>
      tpu.vector_store %arg21[%c0_207, %c0_208], %343 {strides = array<i32>} : memref<2x3xf32, #tpu.memory_space<vmem>>, vector<2x3xf32>,
    } else {
    }
    return
  }
  func.func @transform_0(%arg0: i32) -> (i32, i32, i32) {
    %c0_i32 = arith.constant 0 : i32
    %c0_i32_0 = arith.constant 0 : i32
    %c0_i32_1 = arith.constant 0 : i32
    %c0_i32_2 = arith.constant 0 : i32
    return %c0_i32, %c0_i32_0, %c0_i32_1 : i32, i32, i32
  }
  func.func @transform_1(%arg0: i32) -> (i32, i32) {
    %c0_i32 = arith.constant 0 : i32
    %c0_i32_0 = arith.constant 0 : i32
    %c0_i32_1 = arith.constant 0 : i32
    return %c0_i32, %c0_i32_0 : i32, i32
  }
  func.func @transform_2(%arg0: i32) -> (i32, i32, i32) {
    %c0_i32 = arith.constant 0 : i32
    %c0_i32_0 = arith.constant 0 : i32
    %c0_i32_1 = arith.constant 0 : i32
    return %arg0, %c0_i32, %c0_i32_0 : i32, i32, i32
  }
  func.func @transform_3(%arg0: i32) -> (i32, i32, i32) {
    %c0_i32 = arith.constant 0 : i32
    %c0_i32_0 = arith.constant 0 : i32
    %c0_i32_1 = arith.constant 0 : i32
    return %arg0, %c0_i32, %c0_i32_0 : i32, i32, i32
  }
  func.func @transform_4(%arg0: i32) -> (i32, i32, i32, i32) {
    %c0_i32 = arith.constant 0 : i32
    %c0_i32_0 = arith.constant 0 : i32
    %c0_i32_1 = arith.constant 0 : i32
    %c0_i32_2 = arith.constant 0 : i32
    return %arg0, %c0_i32, %c0_i32_0, %c0_i32_1 : i32, i32, i32, i32
  }
  func.func @transform_5(%arg0: i32) -> (i32, i32, i32, i32) {
    %c0_i32 = arith.constant 0 : i32
    %c0_i32_0 = arith.constant 0 : i32
    %c0_i32_1 = arith.constant 0 : i32
    %c0_i32_2 = arith.constant 0 : i32
    return %arg0, %c0_i32, %c0_i32_0, %c0_i32_1 : i32, i32, i32, i32
  }
  func.func @transform_6(%arg0: i32) -> (i32, i32, i32, i32) {
    %c0_i32 = arith.constant 0 : i32
    %c0_i32_0 = arith.constant 0 : i32
    %c0_i32_1 = arith.constant 0 : i32
    %c0_i32_2 = arith.constant 0 : i32
    return %arg0, %c0_i32, %c0_i32_0, %c0_i32_1 : i32, i32, i32, i32
  }
  func.func @transform_7(%arg0: i32) -> (i32, i32, i32) {
    %c0_i32 = arith.constant 0 : i32
    %c0_i32_0 = arith.constant 0 : i32
    %c0_i32_1 = arith.constant 0 : i32
    return %arg0, %c0_i32, %c0_i32_0 : i32, i32, i32
  }
  func.func @transform_8(%arg0: i32) -> (i32, i32, i32) {
    %c0_i32 = arith.constant 0 : i32
    %c0_i32_0 = arith.constant 0 : i32
    %c0_i32_1 = arith.constant 0 : i32
    return %arg0, %c0_i32, %c0_i32_0 : i32, i32, i32
  }
  func.func @transform_9(%arg0: i32) -> (i32, i32, i32) {
    %c0_i32 = arith.constant 0 : i32
    %c0_i32_0 = arith.constant 0 : i32
    %c0_i32_1 = arith.constant 0 : i32
    return %arg0, %c0_i32, %c0_i32_0 : i32, i32, i32
  }
  func.func @transform_10(%arg0: i32) -> (i32, i32, i32) {
    %c0_i32 = arith.constant 0 : i32
    %c0_i32_0 = arith.constant 0 : i32
    %c0_i32_1 = arith.constant 0 : i32
    return %arg0, %c0_i32, %c0_i32_0 : i32, i32, i32
  }
  func.func @transform_11(%arg0: i32) -> (i32, i32, i32) {
    %c0_i32 = arith.constant 0 : i32
    %c0_i32_0 = arith.constant 0 : i32
    %c0_i32_1 = arith.constant 0 : i32
    return %arg0, %c0_i32, %c0_i32_0 : i32, i32, i32
  }
  func.func @transform_12(%arg0: i32) -> (i32, i32, i32) {
    %c0_i32 = arith.constant 0 : i32
    %c0_i32_0 = arith.constant 0 : i32
    %c0_i32_1 = arith.constant 0 : i32
    return %arg0, %c0_i32, %c0_i32_0 : i32, i32, i32
  }
  func.func @transform_13(%arg0: i32) -> (i32, i32, i32) {
    %c0_i32 = arith.constant 0 : i32
    %c0_i32_0 = arith.constant 0 : i32
    %c0_i32_1 = arith.constant 0 : i32
    return %arg0, %c0_i32, %c0_i32_0 : i32, i32, i32
  }
  func.func @transform_14(%arg0: i32) -> (i32, i32) {
    %c0_i32 = arith.constant 0 : i32
    %c0_i32_0 = arith.constant 0 : i32
    %c0_i32_1 = arith.constant 0 : i32
    return %c0_i32, %c0_i32_0 : i32, i32
  }
  func.func @transform_15(%arg0: i32) -> (i32, i32) {
    %c0_i32 = arith.constant 0 : i32
    %c0_i32_0 = arith.constant 0 : i32
    %c0_i32_1 = arith.constant 0 : i32
    return %c0_i32, %c0_i32_0 : i32, i32
  }
  func.func @transform_16(%arg0: i32) -> (i32, i32) {
    %c0_i32 = arith.constant 0 : i32
    %c0_i32_0 = arith.constant 0 : i32
    %c0_i32_1 = arith.constant 0 : i32
    return %c0_i32, %c0_i32_0 : i32, i32
  }
  func.func @transform_17(%arg0: i32) -> (i32, i32) {
    %c0_i32 = arith.constant 0 : i32
    %c0_i32_0 = arith.constant 0 : i32
    %c0_i32_1 = arith.constant 0 : i32
    return %c0_i32, %c0_i32_0 : i32, i32
  }
  func.func @transform_18(%arg0: i32) -> (i32, i32) {
    %c0_i32 = arith.constant 0 : i32
    %c0_i32_0 = arith.constant 0 : i32
    %c0_i32_1 = arith.constant 0 : i32
    return %c0_i32, %c0_i32_0 : i32, i32
  }
  func.func @transform_19(%arg0: i32) -> (i32, i32) {
    %c0_i32 = arith.constant 0 : i32
    %c0_i32_0 = arith.constant 0 : i32
    %c0_i32_1 = arith.constant 0 : i32
    return %c0_i32, %c0_i32_0 : i32, i32
  }
  func.func @transform_20(%arg0: i32) -> (i32, i32) {
    %c0_i32 = arith.constant 0 : i32
    %c0_i32_0 = arith.constant 0 : i32
    %c0_i32_1 = arith.constant 0 : i32
    return %c0_i32, %c0_i32_0 : i32, i32
  }
}

</mosaic_0001>

<bundles_post_ra>
// kernel: custom_clip_forward.2
= control target key start
LH: loop header
LB: loop body
LE: loop exit
PB: predicated region body
PF: predicated region fallthrough
CT: control target
= control target key end

     0   :  { %s6496_s0 = inlined_call_operand.vmem [shape: f32[2,16,48], index: 0, kind: input, shape index: {}]   ;;  %s6497_s1 = inlined_call_operand.vmem [shape: bf16[48,32], index: 1, kind: input, shape index: {}]   ;;  %s6498_s2 = inlined_call_operand.vmem [shape: f32[1,32], index: 2, kind: input, shape index: {}]   ;;  %s6499_s3 = inlined_call_operand.vmem [shape: f32[24,32], index: 3, kind: input, shape index: {}]   ;;  %s6500_s4 = inlined_call_operand.vmem [shape: f32[1,32], index: 4, kind: input, shape index: {}]   ;;  %s6501_s5 = inlined_call_operand.vmem [shape: f32[1,32], index: 5, kind: input, shape index: {}]   ;;  %s6502_s6 = inlined_call_operand.vmem [shape: f32[2,1,32], index: 6, kind: input, shape index: {}]   ;;  %s6503_s7 = inlined_call_operand.vmem [shape: f32[2,1,32], index: 7, kind: input, shape index: {}]   ;;  %s6504_s8 = inlined_call_operand.vmem [shape: bf16[2,12,32,8], index: 8, kind: input, shape index: {}]   ;;  %s6505_s9 = inlined_call_operand.vmem [shape: f32[2,12,1,8], index: 9, kind: input, shape index: {}]   ;;  %s6506_s10 = inlined_call_operand.vmem [shape: bf16[2,4,8,32], index: 10, kind: input, shape index: {}]   ;;  %s6507_s11 = inlined_call_operand.vmem [shape: f32[2,1,32], index: 11, kind: input, shape index: {}]   ;;  %s6508_s12 = inlined_call_operand.vmem [shape: f32[2,1,32], index: 12, kind: input, shape index: {}]   ;;  %s6509_s13 = inlined_call_operand.vmem [shape: f32[2,1,32], index: 13, kind: input, shape index: {}]   ;;  %s6510_s14 = inlined_call_operand.vmem [shape: bf16[2,32,128], index: 14, kind: input, shape index: {}]   ;;  %s6511_s15 = inlined_call_operand.vmem [shape: f32[2,1,128], index: 15, kind: input, shape index: {}]   ;;  %s6512_s16 = inlined_call_operand.vmem [shape: bf16[2,128,32], index: 16, kind: input, shape index: {}]   ;;  %s6513_s17 = inlined_call_operand.vmem [shape: f32[2,1,32], index: 17, kind: input, shape index: {}]   ;;  %s6514_s18 = inlined_call_operand.vmem [shape: f32[1,32], index: 18, kind: input, shape index: {}]   ;;  %s6515_s19 = inlined_call_operand.vmem [shape: f32[1,32], index: 19, kind: input, shape index: {}]   ;;  %s6516_s20 = inlined_call_operand.vmem [shape: bf16[32,32], index: 20, kind: input, shape index: {}]   ;;  %s6517_s21 = inlined_call_operand.vmem [shape: f32[2,32], index: 21, kind: output, shape index: {}]  }
   0x1   :  { %6524 = sst [smem:[#allocation6_spill]] %s6496_s0 }
   0x2   :  { %6525 = sst [smem:[#allocation7_spill]] %s6497_s1 }
   0x3   :  { %6526 = sst [smem:[#allocation8_spill]] %s6498_s2  ;;  %s5615_s2 = smov 0  }
   0x4   :  { %6527 = sst [smem:[#allocation9_spill]] %s6499_s3 }
   0x5   :  { %6528 = sst [smem:[#allocation10_spill]] %s6500_s4 }
   0x6   :  { %6529 = sst [smem:[#allocation11_spill]] %s6501_s5 }
   0x7   :  { %6530 = sst [smem:[#allocation12_spill]] %s6504_s8 }
   0x8   :  { %6531 = sst [smem:[#allocation13_spill]] %s6506_s10 }
   0x9   :  { %6532 = sst [smem:[#allocation14_spill]] %s6514_s18 }
   0xa   :  { %6533 = sst [smem:[#allocation15_spill]] %s6515_s19 }
   0xb   :  { %6534 = sst [smem:[#allocation16_spill]] %s6516_s20 }
   0xc   :  { %6535 = sst [smem:[#allocation17_spill]] %s6517_s21 }
   0xd LB: > { %6536 = sst [smem:[#allocation4_spill]] %s5498_s2  ;;  %s5621_s25 = sadd.s32 4294967295, %s5498_s2   ;;  %s5498_s2 = sphi %s5615_s2, %s31_s2  }
   0xe   : > { %p4414_p0 = scmp.ge.s32.totalorder %s5498_s2, 1  ;;  %p677_p1 = scmp.lt.s32.totalorder %s5498_s2, 3 }
  0x10   : > { %p678_p2 = pnand %p4414_p0, %p677_p1 }
  0x12   : > { %681 = sbr.rel (%p678_p2) target bundleno = 6019 (0x1783), region = 104 }
  0x17   : > { %p772_p3 = scmp.lt.s32.totalorder %s5621_s25, 1  ;;  %s6537_s10 = sld [smem:[#allocation13_spill]] }
  0x18   : > { %s6539_s8 = sld [smem:[#allocation12_spill]]  ;;  %p4422_p4 = scmp.ne.s32.totalorder %s5621_s25, 0 }
  0x19   : > { %s5627_s26 = scalar_select %p772_p3, %s5621_s25, 1 }
  0x1a   : > { %s6540_s27 = sld [smem:[#allocation7_spill]] (!%p4422_p4) }
  0x1b   : > { %s5271_s30 = smul.u32 192, %s5627_s26  ;;  %s4638_s5 = sshll.u32 %s5627_s26, 4 }
  0x1c   : > { %s5272_s22 = smul.u32 12, %s5627_s26  ;;  %s797_s23 = scalar_lea.vmem %s6508_s12, %s5627_s26 }
  0x1d   : > { %s5643_s24 = scalar_lea.vmem %s6537_s10, %s4638_s5  ;;  %s5670_s3 = scalar_lea.vmem %s6510_s14, %s4638_s5 }
  0x1e   : > { %6538 = sst [smem:[#allocation5_spill]] %s5643_s24  ;;  %s5648_s2 = scalar_lea.vmem %s6539_s8, %s5271_s30 }
  0x1f   : > { %s5657_s0 = scalar_lea.vmem %s6505_s9, %s5272_s22  ;;  %s800_s24 = scalar_lea.vmem %s6509_s13, %s5627_s26 }
  0x20   : > { %s808_s28 = scalar_lea.vmem %s6511_s15, %s5627_s26  ;;  %s4640_s18 = sshll.u32 %s5627_s26, 6 }
  0x21   : > { %s5680_s8 = scalar_lea.vmem %s6512_s16, %s4640_s18  ;;  %821 = sbr.rel (%p4422_p4) target bundleno = 574 (0x23e), region = 108 }
  0x22   : > { %s6541_s22 = sld [smem:[#allocation6_spill]] (!%p4422_p4) }
  0x23   : > { %s6542_s29 = sld [smem:[#allocation8_spill]] (!%p4422_p4) }
  0x24   : > { %s6543_s4 = sld [smem:[#allocation9_spill]] (!%p4422_p4) }
  0x25   : > { %s6545_s1 = sld [smem:[#allocation11_spill]] (!%p4422_p4) }
  0x26   : > { %v5286_v0 = vld [vmem:[%s6540_s27 + $0x10] sm:$0xff]   ;;  %v5287_v1 = vld [vmem:[%s6540_s27 + $0x8] sm:$0xff]   ;;  %vm852_vm0 = vcmask 392192   ;;  %v5288_v4 = vld [vmem:[%s6540_s27] sm:$0xff]   ;;  %vm909_vm1 = vcmask 253952   ;;  %vm917_vm2 = vcmask 260096   ;;  %v1046_v11 = vlaneseq }
  0x27   : > { %4805 = vmatprep.subr.bf16.mxu0 %v5286_v0  ;;  %v5500_v10 = vmov 0.0   ;;  %vm1050_vm3 = vcmask 195584   ;;  %vm912_vm5 = vcmask 261120  }
  0x28   : > { %4806 = vmatpush3.bf16.msra.mxu0 %v5286_v0  ;;  %v822_v2 = vld [vmem:[%s6541_s22] sm:$0xff]  ;;  %v823_v3 = vld [vmem:[%s6541_s22 + $0x8] sm:$0xff]  ;;  %v824_v6 = vld [vmem:[%s6541_s22 + $0x10] sm:$0xff]  ;;  %918 = vst.msk [vmem:[#allocation2 + $0x11] sm:$0x7f] %vm917_vm2, %v5500_v10  ;;  %v1047_v12 = vand.u32 127, %v1046_v11 }
  0x29   : > { %4807 = vmatprep.subr.bf16.mxu0 %v5287_v1  ;;  %v832_v5 = vpack.c.bf16 %v823_v3, %v822_v2  ;;  %v825_v7 = vld [vmem:[%s6541_s22 + $0x18] sm:$0xff]  ;;  %v908_v9 = vld [vmem:[%s6542_s29] sm:$0x1]  ;;  %919 = vst.msk [vmem:[#allocation2 + $0x29] sm:$0x7f] %vm917_vm2, %v5500_v10  ;;  %s6544_s29 = sld [smem:[#allocation10_spill]] }
  0x2a   : > { %v833_v8 = vpack.c.bf16 %v825_v7, %v824_v6  ;;  %911 = vst.msk [vmem:[#allocation2 + $0x18] sm:$0x1] %vm909_vm1, %v908_v9  ;;  %910 = vst.msk [vmem:[#allocation2] sm:$0x1] %vm909_vm1, %v908_v9  ;;  %vm1048_vm4 = vcmp.ge.s32.totalorder %v1047_v12, 17  ;;  %v926_v18 = vld [vmem:[%s6543_s4] sm:$0xff] }
  0x2b   : > { %4811 = vmatprep.mubr.msk.bf16.mxu0 %vm852_vm0, %v832_v5  ;;  %v1049_v13 = vsel %vm1048_vm4, -1e+09, %v5500_v10  ;;  %v928_v25 = vld [vmem:[%s6543_s4 + $0x10] sm:$0xff]  ;;  %v927_v26 = vld [vmem:[%s6543_s4 + $0x8] sm:$0xff] }
  0x2c   : > { %4808 = vmatpush3.bf16.msra.mxu0 %v5287_v1  ;;  %1051 = vst.msk [vmem:[#allocation3] sm:$0xff] %vm1050_vm3, %v1049_v13  ;;  %1052 = vst.msk [vmem:[#allocation3 + $0x8] sm:$0xff] %vm1050_vm3, %v1049_v13 }
  0x2d   : > { %4809 = vmatprep.subr.bf16.mxu0 %v5288_v4  ;;  %1053 = vst.msk [vmem:[#allocation3 + $0x10] sm:$0xff] %vm1050_vm3, %v1049_v13 }
  0x30   : > { %4810 = vmatpush3.bf16.msra.mxu0 %v5288_v4 }
  0x33   : > { %4812 = vmatmul.mubr.msk.bf16.vlgmr.msra.gmra.mxu0 %vm852_vm0, %v833_v8 }
  0xf3   : > { %v4813_v14 = vpop.f32.mrf.mxu0 }
  0xf4   : > { %915 = vst.msk [vmem:[#allocation2 + $0x19] sm:$0xff] %vm912_vm5, %v4813_v14 }
  0xf5   : > { %v893_v15 = vpop.f32.mrf.mxu0 }
  0xf6   : > { %913 = vst.msk [vmem:[#allocation2 + $0x1] sm:$0xff] %vm912_vm5, %v893_v15 }
  0xf7   : > { %v4814_v16 = vpop.f32.mrf.mxu0 }
  0xf8   : > { %916 = vst.msk [vmem:[#allocation2 + $0x21] sm:$0xff] %vm912_vm5, %v4814_v16 }
  0xf9   : > { %v896_v17 = vpop.f32.mrf.mxu0 }
  0xfa   : > { %914 = vst.msk [vmem:[#allocation2 + $0x9] sm:$0xff] %vm912_vm5, %v896_v17 }
  0xfb   : > { %v923_v19 = vld [vmem:[#allocation2 + $0x18] sm:$0xff] }
  0xfc   : > { %v932_v20 = vadd.f32 %v926_v18, %v923_v19 }
  0xfd   : > { %v920_v21 = vld [vmem:[#allocation2] sm:$0xff] }
  0xfe   : > { %v946_v22 = vsel %vm912_vm5, %v932_v20, 0.0  ;;  %v929_v23 = vadd.f32 %v926_v18, %v920_v21 }
  0xff   : > { %947 = vadd.xlane.f32.xlu1 %v946_v22  ;;  %v925_v27 = vld [vmem:[#allocation2 + $0x28] sm:$0xff]  ;;  %v924_v30 = vld [vmem:[#allocation2 + $0x20] sm:$0xff] }
 0x100   : > { %v937_v24 = vsel %vm912_vm5, %v929_v23, 0.0  ;;  %v934_v35 = vadd.f32 %v928_v25, %v925_v27  ;;  %v933_v36 = vadd.f32 %v927_v26, %v924_v30  ;;  %v4429_v27 = vld [vmem:[%s6545_s1] ss:$0 sm:$0xff] }
 0x101   : > { %938 = vadd.xlane.f32.xlu0 %v937_v24  ;;  %v922_v28 = vld [vmem:[#allocation2 + $0x10] sm:$0xff]  ;;  %v921_v29 = vld [vmem:[#allocation2 + $0x8] sm:$0xff]  ;;  %v4428_v24 = vld [vmem:[%s6544_s29] ss:$0 sm:$0xff] }
 0x102   : > { %v931_v31 = vadd.f32 %v928_v25, %v922_v28  ;;  %v930_v32 = vadd.f32 %v927_v26, %v921_v29  ;;  %v952_v37 = vsel %vm912_vm5, %v934_v35, 0.0  ;;  %v949_v38 = vsel %vm912_vm5, %v933_v36, 0.0 }
 0x104   : > { %v943_v33 = vsel %vm912_vm5, %v931_v31, 0.0  ;;  %v940_v34 = vsel %vm912_vm5, %v930_v32, 0.0 }
 0x105   : > { %944 = vadd.xlane.f32.xlu1 %v943_v33  ;;  %941 = vadd.xlane.f32.xlu0 %v940_v34 }
 0x109   : > { %953 = vadd.xlane.f32.xlu1 %v952_v37  ;;  %950 = vadd.xlane.f32.xlu0 %v949_v38 }
 0x188   : > { %v948_v39 = vpop.xlane.xlu1 %947 }
 0x189   : > { %v959_v40 = vmul.f32 0.03125, %v948_v39 }
 0x18a   : > { %v939_v41 = vpop.xlane.xlu0 %938 }
 0x18b   : > { %v965_v42 = vsub.f32 %v932_v20, %v959_v40  ;;  %v956_v43 = vmul.f32 0.03125, %v939_v41 }
 0x18d   : > { %v962_v44 = vsub.f32 %v929_v23, %v956_v43  ;;  %v971_v45 = vmul.f32 %v965_v42, %v965_v42 }
 0x18e   : > { %v945_v46 = vpop.xlane.xlu1 %944  ;;  %v942_v47 = vpop.xlane.xlu0 %941 }
 0x18f   : > { %v958_v48 = vmul.f32 0.03125, %v945_v46  ;;  %v957_v49 = vmul.f32 0.03125, %v942_v47  ;;  %v983_v50 = vsel %vm912_vm5, %v971_v45, 0.0  ;;  %v968_v51 = vmul.f32 %v962_v44, %v962_v44 }
 0x190   : > { %984 = vadd.xlane.f32.xlu1 %v983_v50 }
 0x191   : > { %v964_v52 = vsub.f32 %v931_v31, %v958_v48  ;;  %v963_v53 = vsub.f32 %v930_v32, %v957_v49  ;;  %v974_v54 = vsel %vm912_vm5, %v968_v51, 0.0 }
 0x192   : > { %v954_v55 = vpop.xlane.xlu1 %953  ;;  %975 = vadd.xlane.f32.xlu0 %v974_v54  ;;  %v951_v56 = vpop.xlane.xlu0 %950 }
 0x193   : > { %v961_v57 = vmul.f32 0.03125, %v954_v55  ;;  %v960_v58 = vmul.f32 0.03125, %v951_v56  ;;  %v970_v59 = vmul.f32 %v964_v52, %v964_v52  ;;  %v969_v60 = vmul.f32 %v963_v53, %v963_v53 }
 0x195   : > { %v967_v61 = vsub.f32 %v934_v35, %v961_v57  ;;  %v966_v62 = vsub.f32 %v933_v36, %v960_v58  ;;  %v980_v63 = vsel %vm912_vm5, %v970_v59, 0.0  ;;  %v977_v0 = vsel %vm912_vm5, %v969_v60, 0.0 }
 0x196   : > { %981 = vadd.xlane.f32.xlu0 %v980_v63  ;;  %978 = vadd.xlane.f32.xlu1 %v977_v0 }
 0x197   : > { %v973_v1 = vmul.f32 %v967_v61, %v967_v61  ;;  %v972_v2 = vmul.f32 %v966_v62, %v966_v62 }
 0x199   : > { %v989_v3 = vsel %vm912_vm5, %v973_v1, 0.0  ;;  %v986_v4 = vsel %vm912_vm5, %v972_v2, 0.0 }
 0x19a   : > { %990 = vadd.xlane.f32.xlu1 %v989_v3  ;;  %987 = vadd.xlane.f32.xlu0 %v986_v4 }
 0x219   : > { %v985_v5 = vpop.xlane.xlu1 %984 }
 0x21a   : > { %v995_v6 = vmul.f32 0.03125, %v985_v5 }
 0x21b   : > { %v976_v7 = vpop.xlane.xlu0 %975 }
 0x21c   : > { %v1001_v8 = vadd.f32 1e-05, %v995_v6  ;;  %v992_v9 = vmul.f32 0.03125, %v976_v7 }
 0x21e   : > { %5289 = vrsqrt.f32 %v1001_v8  ;;  %v998_v10 = vadd.f32 1e-05, %v992_v9 }
 0x21f   : > { %v979_v11 = vpop.xlane.xlu1 %978  ;;  %v982_v12 = vpop.xlane.xlu0 %981 }
 0x220   : > { %5291 = vrsqrt.f32 %v998_v10  ;;  %v993_v13 = vmul.f32 0.03125, %v979_v11  ;;  %v994_v14 = vmul.f32 0.03125, %v982_v12 }
 0x222   : > { %v999_v15 = vadd.f32 1e-05, %v993_v13  ;;  %v1000_v16 = vadd.f32 1e-05, %v994_v14 }
 0x223   : > { %v991_v17 = vpop.xlane.xlu1 %990  ;;  %v988_v18 = vpop.xlane.xlu0 %987 }
 0x224   : > { %5293 = vrsqrt.f32 %v999_v15  ;;  %v997_v19 = vmul.f32 0.03125, %v991_v17  ;;  %v996_v20 = vmul.f32 0.03125, %v988_v18 }
 0x225   : > { %5295 = vrsqrt.f32 %v1000_v16 }
 0x226   : > { %v1003_v21 = vadd.f32 1e-05, %v997_v19  ;;  %v1002_v22 = vadd.f32 1e-05, %v996_v20 }
 0x228   : > { %5297 = vrsqrt.f32 %v1003_v21 }
 0x229   : > { %5299 = vrsqrt.f32 %v1002_v22 }
 0x22b   : > { %v5290_v23 = vpop.eup %5289 }
 0x22c   : > { %v1013_v25 = vmul.f32 %v5290_v23, %v965_v42 }
 0x22d   : > { %v5292_v26 = vpop.eup %5291 }
 0x22e   : > { %v1025_v28 = vmul.f32 %v4428_v24, %v1013_v25  ;;  %v1010_v29 = vmul.f32 %v5292_v26, %v962_v44 }
 0x230   : > { %v1037_v30 = vadd.f32 %v4429_v27, %v1025_v28  ;;  %v1022_v31 = vmul.f32 %v4428_v24, %v1010_v29 }
 0x231   : > { %v5294_v32 = vpop.eup %5293 }
 0x232   : > { %v5296_v33 = vpop.eup %5295  ;;  %1043 = vst.msk [vmem:[#allocation2 + $0x18] sm:$0xff] %vm912_vm5, %v1037_v30  ;;  %v1034_v34 = vadd.f32 %v4429_v27, %v1022_v31  ;;  %v1011_v35 = vmul.f32 %v5294_v32, %v963_v53 }
 0x233   : > { %v1012_v36 = vmul.f32 %v5296_v33, %v964_v52 }
 0x234   : > { %1040 = vst.msk [vmem:[#allocation2] sm:$0xff] %vm912_vm5, %v1034_v34  ;;  %v1023_v37 = vmul.f32 %v4428_v24, %v1011_v35 }
 0x235   : > { %v5298_v38 = vpop.eup %5297  ;;  %v1024_v39 = vmul.f32 %v4428_v24, %v1012_v36 }
 0x236   : > { %v5300_v40 = vpop.eup %5299  ;;  %v1035_v41 = vadd.f32 %v4429_v27, %v1023_v37  ;;  %v1015_v42 = vmul.f32 %v5298_v38, %v967_v61 }
 0x237   : > { %v1036_v43 = vadd.f32 %v4429_v27, %v1024_v39  ;;  %v1014_v45 = vmul.f32 %v5300_v40, %v966_v62 }
 0x238   : > { %1041 = vst.msk [vmem:[#allocation2 + $0x8] sm:$0xff] %vm912_vm5, %v1035_v41  ;;  %v1027_v44 = vmul.f32 %v4428_v24, %v1015_v42 }
 0x239   : > { %1042 = vst.msk [vmem:[#allocation2 + $0x10] sm:$0xff] %vm912_vm5, %v1036_v43  ;;  %v1026_v46 = vmul.f32 %v4428_v24, %v1014_v45 }
 0x23a   : > { %v1039_v47 = vadd.f32 %v4429_v27, %v1027_v44 }
 0x23b   : > { %v1038_v48 = vadd.f32 %v4429_v27, %v1026_v46 }
 0x23c   : > { %1045 = vst.msk [vmem:[#allocation2 + $0x28] sm:$0xff] %vm912_vm5, %v1039_v47 }
 0x23d   : > { %1044 = vst.msk [vmem:[#allocation2 + $0x20] sm:$0xff] %vm912_vm5, %v1038_v48 }
 0x23e PF: > { %vm1065_vm6 = vcmask 261120   ;;  %v1057_v51 = vld [vmem:[#allocation2 + $0x18] sm:$0xff]  ;;  %v1054_v55 = vld [vmem:[#allocation2] sm:$0xff]  ;;  %v5301_v27 = vld [vmem:[%s5648_s2 + $0x8] sm:$0xff]   ;;  %v5501_v28 = vmov 0.0   ;;  %vm5502_vm7 = vmmov 0   ;;  %s6546_s19 = scalar_lea.vmem %s6502_s6, %s5627_s26  ;;  %s6547_s29 = scalar_lea.vmem %s6503_s7, %s5627_s26 }
 0x23f   : > { %v1055_v56 = vld [vmem:[#allocation2 + $0x8] sm:$0xff]  ;;  %v1075_v57 = vsel %vm1065_vm6, %v1057_v51, 0.0  ;;  %v1066_v59 = vsel %vm1065_vm6, %v1054_v55, 0.0  ;;  %5243 = vmatprep.subr.bf16.mxu1 %v5501_v28  ;;  %4815 = vmatprep.subr.bf16.mxu0 %v5501_v28  ;;  %v5302_v29 = vld [vmem:[%s5648_s2] sm:$0xff]   ;;  %vm1433_vm8 = vcmask 64512   ;;  %vm1635_vm9 = vcmask 1043456   ;;  %s6549_s20 = scalar_lea.vmem %s6507_s11, %s5627_s26 }
 0x240   : > { %v1056_v49 = vld [vmem:[#allocation2 + $0x10] sm:$0xff]  ;;  %v1069_v60 = vsel %vm1065_vm6, %v1055_v56, 0.0  ;;  %5245 = vmatpush3.bf16.msra.mxu1 %v5301_v27  ;;  %4816 = vmatpush3.bf16.msra.mxu0 %v5301_v27  ;;  %vm1554_vm10 = vcmask 195584   ;;  %s6548_s10 = sld [smem:[#allocation5_spill]]  ;;  %p4630_p5 = scmp.ne.s32.totalorder %s5621_s25, 1 }
 0x241   : > { %v1072_v52 = vsel %vm1065_vm6, %v1056_v49, 0.0  ;;  %5244 = vmatprep.subr.bf16.mxu1 %v5501_v28  ;;  %4817 = vmatprep.subr.bf16.mxu0 %v5501_v28  ;;  %s6551_s21 = sld [smem:[#allocation16_spill]] (!%p4630_p5) }
 0x242   : > { %1073 = vadd.xlane.f32.xlu0 %v1072_v52  ;;  %4823 = vmatprep.mubr.msk.bf16.mxu1 %vm5502_vm7, %v5501_v28  ;;  %s6553_s1 = sld [smem:[#allocation15_spill]] (!%p4630_p5) }
 0x243   : > { %v1059_v54 = vld [vmem:[#allocation2 + $0x28] sm:$0xff]  ;;  %4819 = vmatprep.mubr.msk.bf16.mxu0 %vm5502_vm7, %v5501_v28 }
 0x244   : > { %v1058_v50 = vld [vmem:[#allocation2 + $0x20] sm:$0xff]  ;;  %v1081_v58 = vsel %vm1065_vm6, %v1059_v54, 0.0  ;;  %5246 = vmatpush3.bf16.msra.mxu1 %v5302_v29  ;;  %4818 = vmatpush3.bf16.msra.mxu0 %v5302_v29 }
 0x245   : > { %v1078_v53 = vsel %vm1065_vm6, %v1058_v50, 0.0  ;;  %4831 = vmatprep.subr.bf16.mxu1 %v5501_v28  ;;  %4847 = vmatprep.subr.bf16.mxu0 %v5501_v28 }
 0x246   : > { %1079 = vadd.xlane.f32.xlu1 %v1078_v53  ;;  %1076 = vadd.xlane.f32.xlu0 %v1075_v57 }
 0x24a   : > { %1082 = vadd.xlane.f32.xlu1 %v1081_v58  ;;  %1067 = vadd.xlane.f32.xlu0 %v1066_v59 }
 0x24e   : > { %1070 = vadd.xlane.f32.xlu1 %v1069_v60 }
 0x2cb   : > { %v1074_v61 = vpop.xlane.xlu0 %1073 }
 0x2cc   : > { %v1087_v63 = vmul.f32 0.03125, %v1074_v61 }
 0x2ce   : > { %v5754_v1 = vsub.f32 %v1056_v49, %v1087_v63 }
 0x2cf   : > { %v1080_v62 = vpop.xlane.xlu1 %1079  ;;  %v1077_v3 = vpop.xlane.xlu0 %1076 }
 0x2d0   : > { %v1089_v0 = vmul.f32 0.03125, %v1080_v62  ;;  %v1088_v5 = vmul.f32 0.03125, %v1077_v3  ;;  %v1099_v7 = vmul.f32 %v5754_v1, %v5754_v1 }
 0x2d2   : > { %v5756_v2 = vsub.f32 %v1058_v50, %v1089_v0  ;;  %v5762_v9 = vsub.f32 %v1057_v51, %v1088_v5  ;;  %v1109_v11 = vsel %vm1065_vm6, %v1099_v7, 0.0  ;;  %v4430_v50 = vld [vmem:[%s6546_s19] ss:$0 sm:$0xff]  ;;  %v5303_v0 = vld [vmem:[%s5648_s2 + $0x48] sm:$0xff]   ;;  %s6550_s19 = scalar_lea.vmem %s6513_s17, %s5627_s26 }
 0x2d3   : > { %v1083_v4 = vpop.xlane.xlu1 %1082  ;;  %1110 = vadd.xlane.f32.xlu0 %v1109_v11  ;;  %v1068_v12 = vpop.xlane.xlu0 %1067 }
 0x2d4   : > { %v1090_v6 = vmul.f32 0.03125, %v1083_v4  ;;  %v1101_v8 = vmul.f32 %v5756_v2, %v5756_v2  ;;  %v1085_v15 = vmul.f32 0.03125, %v1068_v12  ;;  %v1100_v16 = vmul.f32 %v5762_v9, %v5762_v9 }
 0x2d6   : > { %v5764_v10 = vsub.f32 %v1059_v54, %v1090_v6  ;;  %v1115_v14 = vsel %vm1065_vm6, %v1101_v8, 0.0  ;;  %v5772_v19 = vsub.f32 %v1054_v55, %v1085_v15  ;;  %v1112_v20 = vsel %vm1065_vm6, %v1100_v16, 0.0  ;;  %v4431_v55 = vld [vmem:[%s6547_s29] ss:$0 sm:$0xff] }
 0x2d7   : > { %v1071_v13 = vpop.xlane.xlu1 %1070  ;;  %1113 = vadd.xlane.f32.xlu1 %v1112_v20  ;;  %1116 = vadd.xlane.f32.xlu0 %v1115_v14  ;;  %v5306_v16 = vld [vmem:[%s5648_s2 + $0x80] sm:$0xff]  }
 0x2d8   : > { %v1086_v17 = vmul.f32 0.03125, %v1071_v13  ;;  %v1102_v18 = vmul.f32 %v5764_v10, %v5764_v10  ;;  %v1097_v23 = vmul.f32 %v5772_v19, %v5772_v19  ;;  %v5304_v13 = vld [vmem:[%s5648_s2 + $0x88] sm:$0xff]  }
 0x2da   : > { %v5775_v21 = vsub.f32 %v1055_v56, %v1086_v17  ;;  %v1118_v22 = vsel %vm1065_vm6, %v1102_v18, 0.0  ;;  %v1103_v25 = vsel %vm1065_vm6, %v1097_v23, 0.0 }
 0x2db   : > { %1119 = vadd.xlane.f32.xlu1 %v1118_v22  ;;  %1104 = vadd.xlane.f32.xlu0 %v1103_v25  ;;  %v5863_v25 = vld [vmem:[%s5657_s0] ss:$0 sm:$0xff] }
 0x2dc   : > { %v1098_v24 = vmul.f32 %v5775_v21, %v5775_v21 }
 0x2de   : > { %v1106_v26 = vsel %vm1065_vm6, %v1098_v24, 0.0 }
 0x2df   : > { %1107 = vadd.xlane.f32.xlu1 %v1106_v26 }
 0x35c   : > { %v1111_v30 = vpop.xlane.xlu0 %1110 }
 0x35d   : > { %v1123_v31 = vmul.f32 0.03125, %v1111_v30 }
 0x35f   : > { %v1129_v32 = vadd.f32 1e-05, %v1123_v31 }
 0x360   : > { %v1114_v33 = vpop.xlane.xlu1 %1113  ;;  %v1117_v34 = vpop.xlane.xlu0 %1116 }
 0x361   : > { %5335 = vrsqrt.f32 %v1129_v32  ;;  %v1124_v35 = vmul.f32 0.03125, %v1114_v33  ;;  %v1125_v36 = vmul.f32 0.03125, %v1117_v34 }
 0x363   : > { %v1130_v37 = vadd.f32 1e-05, %v1124_v35  ;;  %v1131_v38 = vadd.f32 1e-05, %v1125_v36 }
 0x364   : > { %v1120_v39 = vpop.xlane.xlu1 %1119  ;;  %v1105_v40 = vpop.xlane.xlu0 %1104 }
 0x365   : > { %5337 = vrsqrt.f32 %v1130_v37  ;;  %v1126_v41 = vmul.f32 0.03125, %v1120_v39  ;;  %v1121_v42 = vmul.f32 0.03125, %v1105_v40 }
 0x366   : > { %5339 = vrsqrt.f32 %v1131_v38 }
 0x367   : > { %v1132_v43 = vadd.f32 1e-05, %v1126_v41  ;;  %v1127_v45 = vadd.f32 1e-05, %v1121_v42  ;;  %v4443_v42 = vld [vmem:[%s5657_s0 + $0x4] ss:$0 sm:$0xff] }
 0x368   : > { %v1108_v44 = vpop.xlane.xlu1 %1107 }
 0x369   : > { %5341 = vrsqrt.f32 %v1132_v43  ;;  %v1122_v46 = vmul.f32 0.03125, %v1108_v44  ;;  %v5872_v43 = vld [vmem:[%s5657_s0 + $0x8] ss:$0 sm:$0xff] }
 0x36a   : > { %5343 = vrsqrt.f32 %v1127_v45 }
 0x36b   : > { %v1128_v47 = vadd.f32 1e-05, %v1122_v46 }
 0x36d   : > { %5345 = vrsqrt.f32 %v1128_v47 }
 0x36e   : > { %v5336_v48 = vpop.eup %5335 }
 0x36f   : > { %v1141_v49 = vmul.f32 %v5336_v48, %v5754_v1 }
 0x371   : > { %v1153_v52 = vmul.f32 %v4430_v50, %v1141_v49 }
 0x372   : > { %v5338_v51 = vpop.eup %5337 }
 0x373   : > { %v1142_v53 = vmul.f32 %v5338_v51, %v5762_v9  ;;  %v5340_v54 = vpop.eup %5339  ;;  %v1165_v59 = vadd.f32 %v4431_v55, %v1153_v52 }
 0x374   : > { %v1143_v61 = vmul.f32 %v5340_v54, %v5756_v2  ;;  %v5305_v2 = vld [vmem:[%s5648_s2 + $0x40] sm:$0xff]  }
 0x375   : > { %v1154_v56 = vmul.f32 %v4430_v50, %v1142_v53 }
 0x376   : > { %v5342_v57 = vpop.eup %5341  ;;  %v1155_v5 = vmul.f32 %v4430_v50, %v1143_v61 }
 0x377   : > { %v5344_v58 = vpop.eup %5343  ;;  %v1166_v60 = vadd.f32 %v4431_v55, %v1154_v56  ;;  %v1144_v62 = vmul.f32 %v5342_v57, %v5764_v10 }
 0x378   : > { %v1139_v63 = vmul.f32 %v5344_v58, %v5772_v19  ;;  %v1167_v10 = vadd.f32 %v4431_v55, %v1155_v5 }
 0x379   : > { %v5812_v1 = vpack.c.bf16 %v1166_v60, %v1165_v59  ;;  %v1156_v3 = vmul.f32 %v4430_v50, %v1144_v62 }
 0x37a   : > { %v5346_v4 = vpop.eup %5345  ;;  %v1151_v6 = vmul.f32 %v4430_v50, %v1139_v63 }
 0x37b   : > { %v1140_v7 = vmul.f32 %v5346_v4, %v5775_v21  ;;  %4824 = vmatmul.mubr.msk.bf16.vlgmr.msra.gmra.mxu1 %vm1065_vm6, %v5812_v1  ;;  %v1168_v8 = vadd.f32 %v4431_v55, %v1156_v3 }
 0x37c   : > { %4827 = vmatprep.mubr.msk.bf16.mxu1 %vm5502_vm7, %v5501_v28  ;;  %4832 = vmatpush3.bf16.msra.mxu1 %v5303_v0  ;;  %v1163_v11 = vadd.f32 %v4431_v55, %v1151_v6 }
 0x37d   : > { %v1152_v9 = vmul.f32 %v4430_v50, %v1140_v7  ;;  %4833 = vmatprep.subr.bf16.mxu1 %v5501_v28  ;;  %v5822_v14 = vpack.c.bf16 %v1168_v8, %v1167_v10 }
 0x37f   : > { %v1164_v12 = vadd.f32 %v4431_v55, %v1152_v9 }
 0x380   : > { %4834 = vmatpush3.bf16.msra.mxu1 %v5305_v2 }
 0x381   : > { %v5824_v15 = vpack.c.bf16 %v1164_v12, %v1163_v11 }
 0x383   : > { %4820 = vmatmul.mubr.msk.bf16.vlgmr.msra.gmra.mxu0 %vm1065_vm6, %v5824_v15  ;;  %4828 = vmatmul.mubr.msk.bf16.gmra.mxu1 %vm1065_vm6, %v5822_v14 }
 0x384   : > { %4848 = vmatpush3.bf16.msra.mxu0 %v5304_v13  ;;  %4835 = vmatprep.mubr.msk.bf16.mxu1 %vm5502_vm7, %v5501_v28 }
 0x385   : > { %4849 = vmatprep.subr.bf16.mxu0 %v5501_v28  ;;  %4851 = vmatprep.mubr.msk.bf16.mxu0 %vm5502_vm7, %v5501_v28 }
 0x388   : > { %4850 = vmatpush3.bf16.msra.mxu0 %v5306_v16 }
 0x38b   : > { %4836 = vmatmul.mubr.msk.bf16.vlgmr.msra.gmra.mxu1 %vm1065_vm6, %v5824_v15  ;;  %4852 = vmatmul.mubr.msk.bf16.vlgmr.msra.gmra.mxu0 %vm1065_vm6, %v5824_v15 }
 0x38c   : > { %4839 = vmatprep.mubr.msk.bf16.mxu1 %vm5502_vm7, %v5501_v28  ;;  %4855 = vmatprep.mubr.msk.bf16.mxu0 %vm5502_vm7, %v5501_v28 }
 0x393   : > { %4840 = vmatmul.mubr.msk.bf16.gmra.mxu1 %vm1065_vm6, %v5812_v1  ;;  %4856 = vmatmul.mubr.msk.bf16.gmra.mxu0 %vm1065_vm6, %v5812_v1 }
 0x394   : > { %4843 = vmatprep.mubr.msk.bf16.mxu1 %vm5502_vm7, %v5501_v28  ;;  %4859 = vmatprep.mubr.msk.bf16.mxu0 %vm5502_vm7, %v5501_v28 }
 0x39b   : > { %4844 = vmatmul.mubr.msk.bf16.gmra.mxu1 %vm1065_vm6, %v5822_v14  ;;  %4860 = vmatmul.mubr.msk.bf16.gmra.mxu0 %vm1065_vm6, %v5822_v14 }
 0x43b   : > { %v5856_v17 = vpop.f32.mrf.mxu1 }
 0x43c   : > { %v1247_v11 = vadd.f32 %v5863_v25, %v5856_v17 }
 0x43d   : > { %v4825_v18 = vpop.f32.mrf.mxu1 }
 0x43f   : > { %v5858_v19 = vpop.f32.mrf.mxu1 }
 0x440   : > { %v1250_v18 = vadd.f32 %v5863_v25, %v5858_v19 }
 0x441   : > { %v4826_v20 = vpop.f32.mrf.mxu1 }
 0x442   : > { %v1426_v20 = vpack.c.bf16 %v1247_v11, %v1247_v11 }
 0x443   : > { %v1238_v21 = vpop.f32.mrf.mxu0  ;;  %v5860_v22 = vpop.f32.mrf.mxu1 }
 0x444   : > { %v1239_v29 = vadd.f32 %v5863_v25, %v1238_v21  ;;  %v1255_v13 = vadd.f32 %v5863_v25, %v5860_v22 }
 0x445   : > { %v4821_v23 = vpop.f32.mrf.mxu0  ;;  %v4829_v24 = vpop.f32.mrf.mxu1 }
 0x446   : > { %v1427_v23 = vpack.c.bf16 %v1255_v13, %v1250_v18 }
 0x447   : > { %v1241_v26 = vpop.f32.mrf.mxu0  ;;  %v5865_v27 = vpop.f32.mrf.mxu1 }
 0x448   : > { %v1242_v30 = vadd.f32 %v5863_v25, %v1241_v26  ;;  %v1258_v19 = vadd.f32 %v5863_v25, %v5865_v27 }
 0x449   : > { %v4822_v31 = vpop.f32.mrf.mxu0  ;;  %v4830_v32 = vpop.f32.mrf.mxu1 }
 0x44a   : > { %v1425_v33 = vpack.c.bf16 %v1242_v30, %v1239_v29  ;;  %v1428_v31 = vpack.c.bf16 %v1258_v19, %v1258_v19 }
 0x44b   : > { %v1320_v34 = vpop.f32.mrf.mxu1  ;;  %v1402_v35 = vpop.f32.mrf.mxu0 }
 0x44c   : > { %4867 = vmatprep.mubr.msk.bf16.mxu1 %vm1433_vm8, %v1425_v33  ;;  %v1321_v52 = vadd.f32 %v4443_v42, %v1320_v34  ;;  %v1403_v53 = vadd.f32 %v5872_v43, %v1402_v35 }
 0x44d   : > { %v4837_v36 = vpop.f32.mrf.mxu1  ;;  %v4853_v37 = vpop.f32.mrf.mxu0 }
 0x44f   : > { %v1323_v38 = vpop.f32.mrf.mxu1  ;;  %v1405_v39 = vpop.f32.mrf.mxu0 }
 0x450   : > { %v1324_v46 = vadd.f32 %v4443_v42, %v1323_v38  ;;  %v1406_v47 = vadd.f32 %v5872_v43, %v1405_v39  ;;  %v5905_v38 = vld [vmem:[#allocation3] sm:$0xff] }
 0x451   : > { %v4838_v40 = vpop.f32.mrf.mxu1  ;;  %v4854_v41 = vpop.f32.mrf.mxu0 }
 0x452   : > { %v1429_v58 = vpack.c.bf16 %v1324_v46, %v1321_v52  ;;  %v1625_v59 = vpack.c.bf16 %v1406_v47, %v1403_v53  ;;  %v5908_v41 = vld [vmem:[#allocation3 + $0x10] sm:$0xff] }
 0x453   : > { %v1328_v45 = vpop.f32.mrf.mxu1  ;;  %v1410_v44 = vpop.f32.mrf.mxu0 }
 0x454   : > { %v1329_v48 = vadd.f32 %v4443_v42, %v1328_v45  ;;  %v1411_v49 = vadd.f32 %v5872_v43, %v1410_v44  ;;  %v1441_v8 = vsel %vm1433_vm8, %v1429_v58, 0  ;;  %v5912_v44 = vld [vmem:[#allocation3 + $0x8] sm:$0xff] }
 0x455   : > { %v4841_v50 = vpop.f32.mrf.mxu1  ;;  %v4857_v51 = vpop.f32.mrf.mxu0 }
 0x456   : > { %v1430_v54 = vpack.c.bf16 %v1329_v48, %v1329_v48  ;;  %v1626_v55 = vpack.c.bf16 %v1411_v49, %v1411_v49 }
 0x457   : > { %v1331_v56 = vpop.f32.mrf.mxu1  ;;  %v1413_v57 = vpop.f32.mrf.mxu0 }
 0x458   : > { %v1444_v60 = vsel %vm1433_vm8, %v1430_v54, 0  ;;  %v1637_v61 = vsel %vm1635_vm9, %v1626_v55, 0  ;;  %5247 = vmatprep.subr.msk.bf16.mxu1 %vm1433_vm8, %v1430_v54  ;;  %5251 = vmatprep.subr.msk.bf16.mxu0 %vm1635_vm9, %v1626_v55  ;;  %v1332_v21 = vadd.f32 %v4443_v42, %v1331_v56  ;;  %v1414_v32 = vadd.f32 %v5872_v43, %v1413_v57 }
 0x459   : > { %v4842_v62 = vpop.f32.mrf.mxu1  ;;  %v4858_v63 = vpop.f32.mrf.mxu0  ;;  %4864 = vmatpush3.bf16.xpose.msra.mxu1 %v1444_v60  ;;  %4880 = vmatpush3.bf16.msra.mxu0 %v1637_v61 }
 0x45a   : > { %5248 = vmatprep.subr.msk.bf16.mxu1 %vm1433_vm8, %v1429_v58  ;;  %4881 = vmatprep.subr.bf16.mxu0 %v1625_v59 }
 0x45b   : > { %v1336_v0 = vpop.f32.mrf.mxu1  ;;  %v1418_v3 = vpop.f32.mrf.mxu0 }
 0x45c   : > { %v1337_v16 = vadd.f32 %v4443_v42, %v1336_v0  ;;  %v1419_v30 = vadd.f32 %v5872_v43, %v1418_v3 }
 0x45d   : > { %v4845_v4 = vpop.f32.mrf.mxu1  ;;  %v4861_v5 = vpop.f32.mrf.mxu0  ;;  %4882 = vmatpush3.bf16.msra.mxu0 %v1625_v59 }
 0x45e   : > { %4895 = vmatprep.subr.bf16.mxu0 %v5501_v28  ;;  %v1431_v24 = vpack.c.bf16 %v1337_v16, %v1332_v21  ;;  %v1627_v33 = vpack.c.bf16 %v1419_v30, %v1414_v32 }
 0x45f   : > { %v1339_v6 = vpop.f32.mrf.mxu1  ;;  %v1421_v7 = vpop.f32.mrf.mxu0 }
 0x460   : > { %v1340_v2 = vadd.f32 %v4443_v42, %v1339_v6  ;;  %v1422_v17 = vadd.f32 %v5872_v43, %v1421_v7  ;;  %v1501_v29 = vsel %vm1433_vm8, %v1431_v24, 0 }
 0x461   : > { %v4846_v9 = vpop.f32.mrf.mxu1  ;;  %v4862_v10 = vpop.f32.mrf.mxu0  ;;  %4866 = vmatpush3.bf16.xpose.msra.mxu1 %v1441_v8 }
 0x462   : > { %v1432_v12 = vpack.c.bf16 %v1340_v2, %v1340_v2  ;;  %v1628_v22 = vpack.c.bf16 %v1422_v17, %v1422_v17 }
 0x464   : > { %5249 = vmatprep.subr.msk.bf16.mxu1 %vm1433_vm8, %v1432_v12  ;;  %v1504_v26 = vsel %vm1433_vm8, %v1432_v12, 0  ;;  %v1694_v34 = vsel %vm1635_vm9, %v1628_v22, 0 }
 0x468   : > { %4868 = vmatmul.mubr.msk.bf16.vlgmr.msra.gmra.mxu1 %vm1433_vm8, %v1426_v20 }
 0x469   : > { %4872 = vmatpush3.bf16.xpose.msra.mxu1 %v1504_v26  ;;  %4875 = vmatprep.mubr.msk.bf16.mxu1 %vm1433_vm8, %v1427_v23 }
 0x46a   : > { %5250 = vmatprep.subr.msk.bf16.mxu1 %vm1433_vm8, %v1431_v24 }
 0x471   : > { %4874 = vmatpush3.bf16.xpose.msra.mxu1 %v1501_v29 }
 0x472   : > { %5252 = vmatprep.subr.msk.bf16.mxu1 %vm1635_vm9, %v1628_v22 }
 0x478   : > { %4876 = vmatmul.mubr.msk.bf16.vlgmr.msra.gmra.mxu1 %vm1433_vm8, %v1428_v31 }
 0x479   : > { %4888 = vmatpush3.bf16.msra.mxu1 %v1694_v34 }
 0x47a   : > { %4889 = vmatprep.subr.bf16.mxu1 %v1627_v33 }
 0x47d   : > { %4890 = vmatpush3.bf16.msra.mxu1 %v1627_v33 }
 0x47e   : > { %4911 = vmatprep.subr.bf16.mxu1 %v5501_v28 }
 0x528   : > { %v4869_v35 = vpop.f32.mrf.mxu1 }
 0x529   : > { %v1489_v52 = vadd.f32 %v4869_v35, %v5908_v41 }
 0x52a   : > { %v1480_v36 = vpop.f32.mrf.mxu1 }
 0x52b   : > { %v1481_v48 = vadd.f32 %v1480_v36, %v5905_v38  ;;  %v1561_v55 = vsel %vm1554_vm10, %v1489_v52, -inf }
 0x52c   : > { %v4870_v25 = vpop.f32.mrf.mxu1 }
 0x52d   : > { %v1555_v54 = vsel %vm1554_vm10, %v1481_v48, -inf }
 0x52e   : > { %v1483_v27 = vpop.f32.mrf.mxu1 }
 0x52f   : > { %v1484_v49 = vadd.f32 %v1483_v27, %v5912_v44 }
 0x531   : > { %v1558_v53 = vsel %vm1554_vm10, %v1484_v49, -inf }
 0x538   : > { %v4877_v37 = vpop.f32.mrf.mxu1 }
 0x539   : > { %v1549_v43 = vadd.f32 %v4877_v37, %v5908_v41 }
 0x53a   : > { %v1540_v39 = vpop.f32.mrf.mxu1 }
 0x53b   : > { %v1541_v40 = vadd.f32 %v1540_v39, %v5905_v38  ;;  %v1570_v51 = vsel %vm1554_vm10, %v1549_v43, -inf }
 0x53c   : > { %v4878_v42 = vpop.f32.mrf.mxu1 }
 0x53d   : > { %v1564_v45 = vsel %vm1554_vm10, %v1541_v40, -inf }
 0x53e   : > { %v1543_v46 = vpop.f32.mrf.mxu1  ;;  %1565 = vmax.xlane.f32.xlu0 %v1564_v45 }
 0x53f   : > { %v1544_v47 = vadd.f32 %v1543_v46, %v5912_v44 }
 0x541   : > { %v1567_v50 = vsel %vm1554_vm10, %v1544_v47, -inf }
 0x542   : > { %1568 = vmax.xlane.f32.xlu1 %v1567_v50  ;;  %1571 = vmax.xlane.f32.xlu0 %v1570_v51 }
 0x546   : > { %1559 = vmax.xlane.f32.xlu0 %v1558_v53  ;;  %1556 = vmax.xlane.f32.xlu1 %v1555_v54  ;;  %v5310_v54 = vld [vmem:[%s5648_s2 + $0x10] sm:$0xff]  }
 0x54a   : > { %1562 = vmax.xlane.f32.xlu1 %v1561_v55  ;;  %v5311_v55 = vld [vmem:[%s5648_s2 + $0x98] sm:$0xff]  }
 0x5c7   : > { %v1566_v56 = vpop.xlane.xlu0 %1565 }
 0x5c8   : > { %v1576_v57 = vsub.f32 %v1541_v40, %v1566_v56  ;;  %v5307_v40 = vld [vmem:[%s5648_s2 + $0x58] sm:$0xff]   ;;  %v5312_v56 = vld [vmem:[%s5648_s2 + $0x90] sm:$0xff]  }
 0x5ca   : > { %v1585_v58 = vmul.f32 1.442695, %v1576_v57 }
 0x5cb   : > { %v1569_v59 = vpop.xlane.xlu1 %1568  ;;  %v1572_v60 = vpop.xlane.xlu0 %1571 }
 0x5cc   : > { %5347 = vpow2.f32 %v1585_v58  ;;  %v1577_v61 = vsub.f32 %v1544_v47, %v1569_v59  ;;  %v1578_v62 = vsub.f32 %v1549_v43, %v1572_v60 }
 0x5ce   : > { %v1587_v63 = vmul.f32 1.442695, %v1577_v61  ;;  %v1589_v0 = vmul.f32 1.442695, %v1578_v62 }
 0x5cf   : > { %v1560_v3 = vpop.xlane.xlu0 %1559  ;;  %v1557_v4 = vpop.xlane.xlu1 %1556 }
 0x5d0   : > { %5349 = vpow2.f32 %v1587_v63  ;;  %v1574_v5 = vsub.f32 %v1484_v49, %v1560_v3  ;;  %v1573_v6 = vsub.f32 %v1481_v48, %v1557_v4  ;;  %v5308_v48 = vld [vmem:[%s5648_s2 + $0x50] sm:$0xff]  }
 0x5d1   : > { %5351 = vpow2.f32 %v1589_v0 }
 0x5d2   : > { %v1581_v7 = vmul.f32 1.442695, %v1574_v5  ;;  %v1579_v2 = vmul.f32 1.442695, %v1573_v6 }
 0x5d3   : > { %v1563_v8 = vpop.xlane.xlu1 %1562 }
 0x5d4   : > { %5353 = vpow2.f32 %v1581_v7  ;;  %v1575_v9 = vsub.f32 %v1489_v52, %v1563_v8  ;;  %v5309_v52 = vld [vmem:[%s5648_s2 + $0x18] sm:$0xff]   ;;  %v4484_v8 = vld [vmem:[%s5657_s0 + $0x5] ss:$0 sm:$0xff] }
 0x5d5   : > { %5355 = vpow2.f32 %v1579_v2 }
 0x5d6   : > { %v1583_v10 = vmul.f32 1.442695, %v1575_v9 }
 0x5d8   : > { %5357 = vpow2.f32 %v1583_v10 }
 0x5d9   : > { %v5348_v11 = vpop.eup %5347 }
 0x5da   : > { %v1600_v12 = vsel %vm1554_vm10, %v5348_v11, 0.0 }
 0x5db   : > { %1601 = vadd.xlane.f32.xlu0 %v1600_v12 }
 0x5dd   : > { %v5350_v13 = vpop.eup %5349 }
 0x5de   : > { %v5352_v16 = vpop.eup %5351  ;;  %v1603_v18 = vsel %vm1554_vm10, %v5350_v13, 0.0 }
 0x5df   : > { %v1606_v20 = vsel %vm1554_vm10, %v5352_v16, 0.0  ;;  %1604 = vadd.xlane.f32.xlu1 %v1603_v18 }
 0x5e0   : > { %1607 = vadd.xlane.f32.xlu0 %v1606_v20 }
 0x5e1   : > { %v5354_v21 = vpop.eup %5353 }
 0x5e2   : > { %v5356_v23 = vpop.eup %5355  ;;  %v1594_v24 = vsel %vm1554_vm10, %v5354_v21, 0.0 }
 0x5e3   : > { %v1591_v26 = vsel %vm1554_vm10, %v5356_v23, 0.0 }
 0x5e4   : > { %1595 = vadd.xlane.f32.xlu0 %v1594_v24  ;;  %1592 = vadd.xlane.f32.xlu1 %v1591_v26 }
 0x5e5   : > { %v5358_v17 = vpop.eup %5357 }
 0x5e6   : > { %v1597_v22 = vsel %vm1554_vm10, %v5358_v17, 0.0 }
 0x5e8   : > { %1598 = vadd.xlane.f32.xlu1 %v1597_v22 }
 0x664   : > { %v1602_v29 = vpop.xlane.xlu0 %1601 }
 0x665   : > { %5359 = vrcp.f32 %v1602_v29 }
 0x668   : > { %v1605_v19 = vpop.xlane.xlu1 %1604 }
 0x669   : > { %v1608_v30 = vpop.xlane.xlu0 %1607  ;;  %5361 = vrcp.f32 %v1605_v19 }
 0x66a   : > { %5363 = vrcp.f32 %v1608_v30 }
 0x66d   : > { %v1596_v31 = vpop.xlane.xlu0 %1595  ;;  %v1593_v32 = vpop.xlane.xlu1 %1592 }
 0x66e   : > { %5365 = vrcp.f32 %v1596_v31 }
 0x66f   : > { %5367 = vrcp.f32 %v1593_v32 }
 0x671   : > { %v1599_v33 = vpop.xlane.xlu1 %1598 }
 0x672   : > { %5369 = vrcp.f32 %v1599_v33  ;;  %v5360_v34 = vpop.eup %5359 }
 0x673   : > { %v1618_v25 = vmul.f32 %v5360_v34, %v5348_v11 }
 0x676   : > { %v5362_v35 = vpop.eup %5361 }
 0x677   : > { %v5364_v36 = vpop.eup %5363  ;;  %v1619_v27 = vmul.f32 %v5362_v35, %v5350_v13  ;;  %v4473_v13 = vld [vmem:[%s5657_s0 + $0x1] ss:$0 sm:$0xff] }
 0x678   : > { %v1620_v37 = vmul.f32 %v5364_v36, %v5352_v16 }
 0x679   : > { %v1623_v39 = vpack.c.bf16 %v1619_v27, %v1618_v25 }
 0x67a   : > { %v1624_v42 = vpack.c.bf16 %v1620_v37, %v1620_v37 }
 0x67b   : > { %v5366_v43 = vpop.eup %5365  ;;  %4891 = vmatprep.mubr.msk.bf16.mxu1 %vm1554_vm10, %v1623_v39 }
 0x67c   : > { %v5368_v45 = vpop.eup %5367  ;;  %4892 = vmatmul.mubr.msk.bf16.vlgmr.msra.gmra.mxu1 %vm1554_vm10, %v1624_v42  ;;  %v1616_v46 = vmul.f32 %v5366_v43, %v5354_v21 }
 0x67d   : > { %4912 = vmatpush3.bf16.msra.mxu1 %v5307_v40  ;;  %v1615_v47 = vmul.f32 %v5368_v45, %v5356_v23  ;;  %4915 = vmatprep.mubr.msk.bf16.mxu1 %vm5502_vm7, %v5501_v28 }
 0x67e   : > { %4913 = vmatprep.subr.bf16.mxu1 %v5501_v28 }
 0x67f   : > { %v5370_v49 = vpop.eup %5369  ;;  %v1621_v50 = vpack.c.bf16 %v1616_v46, %v1615_v47 }
 0x680   : > { %v1617_v51 = vmul.f32 %v5370_v49, %v5358_v17 }
 0x681   : > { %4883 = vmatprep.mubr.msk.bf16.mxu0 %vm1554_vm10, %v1621_v50  ;;  %4914 = vmatpush3.bf16.msra.mxu1 %v5308_v48 }
 0x682   : > { %v1622_v53 = vpack.c.bf16 %v1617_v51, %v1617_v51 }
 0x684   : > { %4884 = vmatmul.mubr.msk.bf16.vlgmr.msra.gmra.mxu0 %vm1554_vm10, %v1622_v53  ;;  %4916 = vmatmul.mubr.msk.bf16.vlgmr.msra.gmra.mxu1 %vm1065_vm6, %v5824_v15 }
 0x685   : > { %4896 = vmatpush3.bf16.msra.mxu0 %v5309_v52  ;;  %4899 = vmatprep.mubr.msk.bf16.mxu0 %vm5502_vm7, %v5501_v28 }
 0x686   : > { %4897 = vmatprep.subr.bf16.mxu0 %v5501_v28  ;;  %4919 = vmatprep.mubr.msk.bf16.mxu1 %vm5502_vm7, %v5501_v28 }
 0x689   : > { %4898 = vmatpush3.bf16.msra.mxu0 %v5310_v54 }
 0x68a   : > { %4927 = vmatprep.subr.bf16.mxu0 %v5501_v28 }
 0x68c   : > { %4900 = vmatmul.mubr.msk.bf16.vlgmr.msra.gmra.mxu0 %vm1065_vm6, %v5824_v15  ;;  %4920 = vmatmul.mubr.msk.bf16.gmra.mxu1 %vm1065_vm6, %v5812_v1 }
 0x68d   : > { %4903 = vmatprep.mubr.msk.bf16.mxu0 %vm5502_vm7, %v5501_v28  ;;  %4923 = vmatprep.mubr.msk.bf16.mxu1 %vm5502_vm7, %v5501_v28 }
 0x68e   : > { %4928 = vmatpush3.bf16.msra.mxu0 %v5311_v55 }
 0x68f   : > { %4929 = vmatprep.subr.bf16.mxu0 %v5501_v28 }
 0x692   : > { %4930 = vmatpush3.bf16.msra.mxu0 %v5312_v56 }
 0x694   : > { %4904 = vmatmul.mubr.msk.bf16.gmra.mxu0 %vm1065_vm6, %v5812_v1  ;;  %4924 = vmatmul.mubr.msk.bf16.gmra.mxu1 %vm1065_vm6, %v5822_v14 }
 0x695   : > { %4907 = vmatprep.mubr.msk.bf16.mxu0 %vm5502_vm7, %v5501_v28 }
 0x69c   : > { %4908 = vmatmul.mubr.msk.bf16.gmra.mxu0 %vm1065_vm6, %v5822_v14 }
 0x69d   : > { %4931 = vmatprep.mubr.msk.bf16.mxu0 %vm5502_vm7, %v5501_v28 }
 0x6a4   : > { %4932 = vmatmul.mubr.msk.bf16.vlgmr.msra.gmra.mxu0 %vm1065_vm6, %v5824_v15 }
 0x6a5   : > { %4935 = vmatprep.mubr.msk.bf16.mxu0 %vm5502_vm7, %v5501_v28 }
 0x6ac   : > { %4936 = vmatmul.mubr.msk.bf16.gmra.mxu0 %vm1065_vm6, %v5812_v1 }
 0x6ad   : > { %4939 = vmatprep.mubr.msk.bf16.mxu0 %vm5502_vm7, %v5501_v28 }
 0x6b4   : > { %4940 = vmatmul.mubr.msk.bf16.gmra.mxu0 %vm1065_vm6, %v5822_v14 }
 0x73c   : > { %v5979_v57 = vpop.f32.mrf.mxu1 }
 0x73e   : > { %v5981_v58 = vpop.f32.mrf.mxu1 }
 0x740   : > { %v4894_v59 = vpop.f32.mrf.mxu1 }
 0x742   : > { %v5983_v60 = vpop.f32.mrf.mxu1 }
 0x743   : > { %v1746_v61 = vpack.c.bf16 %v5979_v57, %v5983_v60  ;;  %v4509_v57 = vld [vmem:[%s6548_s10 + $0x4] sm:$0xf] }
 0x744   : > { %v5987_v62 = vpop.f32.mrf.mxu0  ;;  %v1889_v63 = vpop.f32.mrf.mxu1 }
 0x745   : > { %v1745_v0 = vpack.c.bf16 %v5981_v58, %v5987_v62  ;;  %v1890_v20 = vadd.f32 %v4484_v8, %v1889_v63  ;;  %v2325_v58 = vsel %vm1635_vm9, %v4509_v57, 0 }
 0x746   : > { %v5991_v3 = vpop.f32.mrf.mxu0  ;;  %v4917_v4 = vpop.f32.mrf.mxu1 }
 0x748   : > { %v4886_v5 = vpop.f32.mrf.mxu0  ;;  %v1892_v6 = vpop.f32.mrf.mxu1 }
 0x749   : > { %v1893_v11 = vadd.f32 %v4484_v8, %v1892_v6 }
 0x74a   : > { %v5993_v7 = vpop.f32.mrf.mxu0  ;;  %v4918_v2 = vpop.f32.mrf.mxu1 }
 0x74b   : > { %v1998_v26 = vpack.c.bf16 %v1893_v11, %v1890_v20 }
 0x74c   : > { %v1807_v9 = vpop.f32.mrf.mxu0  ;;  %v1897_v10 = vpop.f32.mrf.mxu1 }
 0x74d   : > { %v1898_v12 = vadd.f32 %v4484_v8, %v1897_v10  ;;  %v1808_v17 = vadd.f32 %v4473_v13, %v1807_v9  ;;  %v2009_v37 = vsel %vm1433_vm8, %v1998_v26, 0 }
 0x74e   : > { %v4901_v16 = vpop.f32.mrf.mxu0  ;;  %v4921_v18 = vpop.f32.mrf.mxu1 }
 0x74f   : > { %v1999_v21 = vpack.c.bf16 %v1898_v12, %v1898_v12 }
 0x750   : > { %v1810_v23 = vpop.f32.mrf.mxu0  ;;  %v1900_v24 = vpop.f32.mrf.mxu1 }
 0x751   : > { %v2012_v22 = vsel %vm1433_vm8, %v1999_v21, 0  ;;  %v1811_v29 = vadd.f32 %v4473_v13, %v1810_v23  ;;  %5253 = vmatprep.subr.msk.bf16.mxu1 %vm1433_vm8, %v1999_v21  ;;  %v1901_v50 = vadd.f32 %v4484_v8, %v1900_v24 }
 0x752   : > { %v4902_v19 = vpop.f32.mrf.mxu0  ;;  %v4922_v30 = vpop.f32.mrf.mxu1  ;;  %4944 = vmatpush3.bf16.xpose.msra.mxu1 %v2012_v22 }
 0x753   : > { %v1994_v31 = vpack.c.bf16 %v1811_v29, %v1808_v17  ;;  %5254 = vmatprep.subr.msk.bf16.mxu1 %vm1433_vm8, %v1998_v26 }
 0x754   : > { %v1815_v32 = vpop.f32.mrf.mxu0  ;;  %v1905_v33 = vpop.f32.mrf.mxu1 }
 0x755   : > { %4947 = vmatprep.mubr.msk.bf16.mxu1 %vm1433_vm8, %v1994_v31  ;;  %v1816_v42 = vadd.f32 %v4473_v13, %v1815_v32  ;;  %v1906_v46 = vadd.f32 %v4484_v8, %v1905_v33 }
 0x756   : > { %v4905_v34 = vpop.f32.mrf.mxu0  ;;  %v4925_v35 = vpop.f32.mrf.mxu1 }
 0x757   : > { %v1995_v51 = vpack.c.bf16 %v1816_v42, %v1816_v42  ;;  %v2000_v54 = vpack.c.bf16 %v1906_v46, %v1901_v50 }
 0x758   : > { %v1818_v36 = vpop.f32.mrf.mxu0  ;;  %v1908_v25 = vpop.f32.mrf.mxu1 }
 0x759   : > { %v1909_v27 = vadd.f32 %v4484_v8, %v1908_v25  ;;  %v1819_v48 = vadd.f32 %v4473_v13, %v1818_v36  ;;  %v2069_v5 = vsel %vm1433_vm8, %v2000_v54, 0  ;;  %v4495_v8 = vld [vmem:[%s5657_s0 + $0x9] ss:$0 sm:$0xff] }
 0x75a   : > { %v4906_v39 = vpop.f32.mrf.mxu0  ;;  %v4926_v40 = vpop.f32.mrf.mxu1  ;;  %4946 = vmatpush3.bf16.xpose.msra.mxu1 %v2009_v37 }
 0x75b   : > { %v2001_v43 = vpack.c.bf16 %v1909_v27, %v1909_v27 }
 0x75c   : > { %v1823_v45 = vpop.f32.mrf.mxu0 }
 0x75d   : > { %v1824_v47 = vadd.f32 %v4473_v13, %v1823_v45  ;;  %5255 = vmatprep.subr.msk.bf16.mxu1 %vm1433_vm8, %v2001_v43  ;;  %v2072_v55 = vsel %vm1433_vm8, %v2001_v43, 0 }
 0x75e   : > { %v4909_v49 = vpop.f32.mrf.mxu0 }
 0x75f   : > { %v1996_v52 = vpack.c.bf16 %v1824_v47, %v1819_v48 }
 0x760   : > { %v1826_v53 = vpop.f32.mrf.mxu0 }
 0x761   : > { %4948 = vmatmul.mubr.msk.bf16.vlgmr.msra.gmra.mxu1 %vm1433_vm8, %v1995_v51  ;;  %v1827_v2 = vadd.f32 %v4473_v13, %v1826_v53 }
 0x762   : > { %v4910_v56 = vpop.f32.mrf.mxu0  ;;  %4952 = vmatpush3.bf16.xpose.msra.mxu1 %v2072_v55  ;;  %4955 = vmatprep.mubr.msk.bf16.mxu1 %vm1433_vm8, %v1996_v52 }
 0x763   : > { %5256 = vmatprep.subr.msk.bf16.mxu1 %vm1433_vm8, %v2000_v54  ;;  %v1997_v16 = vpack.c.bf16 %v1827_v2, %v1827_v2 }
 0x764   : > { %v1971_v59 = vpop.f32.mrf.mxu0 }
 0x765   : > { %v1972_v18 = vadd.f32 %v4495_v8, %v1971_v59 }
 0x766   : > { %v4933_v63 = vpop.f32.mrf.mxu0 }
 0x768   : > { %v1974_v4 = vpop.f32.mrf.mxu0 }
 0x769   : > { %v1975_v10 = vadd.f32 %v4495_v8, %v1974_v4 }
 0x76a   : > { %v4934_v6 = vpop.f32.mrf.mxu0  ;;  %4954 = vmatpush3.bf16.xpose.msra.mxu1 %v2069_v5 }
 0x76b   : > { %v2192_v23 = vpack.c.bf16 %v1975_v10, %v1972_v18 }
 0x76c   : > { %v1979_v9 = vpop.f32.mrf.mxu0 }
 0x76d   : > { %v1980_v11 = vadd.f32 %v4495_v8, %v1979_v9 }
 0x76e   : > { %v4937_v12 = vpop.f32.mrf.mxu0 }
 0x76f   : > { %v2193_v20 = vpack.c.bf16 %v1980_v11, %v1980_v11 }
 0x770   : > { %v1982_v21 = vpop.f32.mrf.mxu0 }
 0x771   : > { %v2203_v24 = vsel %vm1635_vm9, %v2193_v20, 0  ;;  %5257 = vmatprep.subr.msk.bf16.mxu0 %vm1635_vm9, %v2193_v20  ;;  %4956 = vmatmul.mubr.msk.bf16.vlgmr.msra.gmra.mxu1 %vm1433_vm8, %v1997_v16  ;;  %v1983_v31 = vadd.f32 %v4495_v8, %v1982_v21 }
 0x772   : > { %v4938_v26 = vpop.f32.mrf.mxu0  ;;  %4960 = vmatpush3.bf16.msra.mxu0 %v2203_v24 }
 0x773   : > { %4961 = vmatprep.subr.bf16.mxu0 %v2192_v23 }
 0x774   : > { %v1987_v13 = vpop.f32.mrf.mxu0 }
 0x775   : > { %v1988_v29 = vadd.f32 %v4495_v8, %v1987_v13 }
 0x776   : > { %v4941_v17 = vpop.f32.mrf.mxu0  ;;  %4962 = vmatpush3.bf16.msra.mxu0 %v2192_v23 }
 0x777   : > { %4975 = vmatprep.subr.bf16.mxu0 %v5501_v28  ;;  %v2194_v33 = vpack.c.bf16 %v1988_v29, %v1983_v31 }
 0x778   : > { %v1990_v22 = vpop.f32.mrf.mxu0 }
 0x779   : > { %v1991_v19 = vadd.f32 %v4495_v8, %v1990_v22 }
 0x77a   : > { %v4942_v30 = vpop.f32.mrf.mxu0 }
 0x77b   : > { %v2195_v32 = vpack.c.bf16 %v1991_v19, %v1991_v19 }
 0x77d   : > { %v2260_v34 = vsel %vm1635_vm9, %v2195_v32, 0  ;;  %5258 = vmatprep.subr.msk.bf16.mxu1 %vm1635_vm9, %v2195_v32 }
 0x77e   : > { %4968 = vmatpush3.bf16.msra.mxu1 %v2260_v34 }
 0x77f   : > { %4969 = vmatprep.subr.bf16.mxu1 %v2194_v33 }
 0x782   : > { %4970 = vmatpush3.bf16.msra.mxu1 %v2194_v33 }
 0x783   : > { %4989 = vmatprep.subr.bf16.mxu1 %v5501_v28 }
 0x821   : > { %v4949_v35 = vpop.f32.mrf.mxu1 }
 0x822   : > { %v2057_v37 = vadd.f32 %v4949_v35, %v5908_v41 }
 0x823   : > { %v2048_v36 = vpop.f32.mrf.mxu1 }
 0x824   : > { %v2049_v25 = vadd.f32 %v2048_v36, %v5905_v38  ;;  %v2128_v45 = vsel %vm1554_vm10, %v2057_v37, -inf }
 0x825   : > { %v4950_v27 = vpop.f32.mrf.mxu1 }
 0x826   : > { %v2122_v39 = vsel %vm1554_vm10, %v2049_v25, -inf }
 0x827   : > { %v2051_v40 = vpop.f32.mrf.mxu1  ;;  %2123 = vmax.xlane.f32.xlu0 %v2122_v39 }
 0x828   : > { %v2052_v42 = vadd.f32 %v2051_v40, %v5912_v44 }
 0x82a   : > { %v2125_v43 = vsel %vm1554_vm10, %v2052_v42, -inf }
 0x82b   : > { %2126 = vmax.xlane.f32.xlu1 %v2125_v43  ;;  %2129 = vmax.xlane.f32.xlu0 %v2128_v45 }
 0x831   : > { %v4957_v46 = vpop.f32.mrf.mxu1 }
 0x832   : > { %v2117_v50 = vadd.f32 %v4957_v46, %v5908_v41 }
 0x833   : > { %v2108_v47 = vpop.f32.mrf.mxu1 }
 0x834   : > { %v2109_v48 = vadd.f32 %v2108_v47, %v5905_v38  ;;  %v2137_v55 = vsel %vm1554_vm10, %v2117_v50, -inf }
 0x835   : > { %v4958_v49 = vpop.f32.mrf.mxu1 }
 0x836   : > { %v2131_v51 = vsel %vm1554_vm10, %v2109_v48, -inf }
 0x837   : > { %v2111_v52 = vpop.f32.mrf.mxu1  ;;  %2132 = vmax.xlane.f32.xlu1 %v2131_v51 }
 0x838   : > { %v2112_v53 = vadd.f32 %v2111_v52, %v5912_v44 }
 0x83a   : > { %v2134_v54 = vsel %vm1554_vm10, %v2112_v53, -inf }
 0x83b   : > { %2135 = vmax.xlane.f32.xlu0 %v2134_v54  ;;  %2138 = vmax.xlane.f32.xlu1 %v2137_v55 }
 0x8b0   : > { %v2124_v56 = vpop.xlane.xlu0 %2123 }
 0x8b1   : > { %v2140_v59 = vsub.f32 %v2049_v25, %v2124_v56 }
 0x8b3   : > { %v2146_v63 = vmul.f32 1.442695, %v2140_v59 }
 0x8b4   : > { %v2127_v4 = vpop.xlane.xlu1 %2126  ;;  %v2130_v38 = vpop.xlane.xlu0 %2129 }
 0x8b5   : > { %5371 = vpow2.f32 %v2146_v63  ;;  %v2141_v5 = vsub.f32 %v2052_v42, %v2127_v4  ;;  %v2142_v41 = vsub.f32 %v2057_v37, %v2130_v38  ;;  %v5313_v63 = vld [vmem:[%s5648_s2 + $0x68] sm:$0xff]   ;;  %v1744_v4 = vpack.c.bf16 %v5993_v7, %v5991_v3  ;;  %v5314_v38 = vld [vmem:[%s5648_s2 + $0x60] sm:$0xff]  }
 0x8b6   : > { %v5315_v3 = vld [vmem:[%s5648_s2 + $0x28] sm:$0xff]  }
 0x8b7   : > { %v2148_v6 = vmul.f32 1.442695, %v2141_v5  ;;  %v2150_v2 = vmul.f32 1.442695, %v2142_v41  ;;  %v5316_v5 = vld [vmem:[%s5648_s2 + $0x20] sm:$0xff]  }
 0x8b9   : > { %5373 = vpow2.f32 %v2148_v6 }
 0x8ba   : > { %5375 = vpow2.f32 %v2150_v2 }
 0x8c0   : > { %v2133_v8 = vpop.xlane.xlu1 %2132 }
 0x8c1   : > { %v2143_v44 = vsub.f32 %v2109_v48, %v2133_v8 }
 0x8c2   : > { %v5372_v9 = vpop.eup %5371 }
 0x8c3   : > { %v2152_v10 = vmul.f32 1.442695, %v2143_v44  ;;  %v2158_v11 = vsel %vm1554_vm10, %v5372_v9, 0.0 }
 0x8c4   : > { %2159 = vadd.xlane.f32.xlu0 %v2158_v11  ;;  %v2136_v12 = vpop.xlane.xlu0 %2135  ;;  %v2139_v16 = vpop.xlane.xlu1 %2138 }
 0x8c5   : > { %5377 = vpow2.f32 %v2152_v10  ;;  %v2144_v18 = vsub.f32 %v2112_v53, %v2136_v12  ;;  %v2145_v20 = vsub.f32 %v2117_v50, %v2139_v16  ;;  %v1747_v53 = vld [vmem:[%s6548_s10] sm:$0xf] }
 0x8c6   : > { %v5374_v21 = vpop.eup %5373  ;;  %v2394_v59 = vsel %vm1635_vm9, %v1747_v53, 0 }
 0x8c7   : > { %v5376_v23 = vpop.eup %5375  ;;  %v2154_v24 = vmul.f32 1.442695, %v2144_v18  ;;  %v2156_v26 = vmul.f32 1.442695, %v2145_v20  ;;  %v2161_v13 = vsel %vm1554_vm10, %v5374_v21, 0.0 }
 0x8c8   : > { %v2164_v17 = vsel %vm1554_vm10, %v5376_v23, 0.0  ;;  %2162 = vadd.xlane.f32.xlu1 %v2161_v13 }
 0x8c9   : > { %5379 = vpow2.f32 %v2154_v24  ;;  %2165 = vadd.xlane.f32.xlu0 %v2164_v17 }
 0x8ca   : > { %5381 = vpow2.f32 %v2156_v26  ;;  %v5318_v26 = vld [vmem:[%s5648_s2 + $0xa0] sm:$0xff]  }
 0x8d2   : > { %v5378_v22 = vpop.eup %5377 }
 0x8d3   : > { %v2167_v29 = vsel %vm1554_vm10, %v5378_v22, 0.0 }
 0x8d4   : > { %2168 = vadd.xlane.f32.xlu1 %v2167_v29 }
 0x8d6   : > { %v5380_v19 = vpop.eup %5379 }
 0x8d7   : > { %v5382_v30 = vpop.eup %5381  ;;  %v2170_v31 = vsel %vm1554_vm10, %v5380_v19, 0.0 }
 0x8d8   : > { %2171 = vadd.xlane.f32.xlu0 %v2170_v31  ;;  %v2173_v32 = vsel %vm1554_vm10, %v5382_v30, 0.0 }
 0x8d9   : > { %2174 = vadd.xlane.f32.xlu1 %v2173_v32 }
 0x94d   : > { %v2160_v33 = vpop.xlane.xlu0 %2159 }
 0x94e   : > { %5383 = vrcp.f32 %v2160_v33  ;;  %v4532_v33 = vld [vmem:[%s5657_s0 + $0x6] ss:$0 sm:$0xff] }
 0x951   : > { %v2163_v34 = vpop.xlane.xlu1 %2162 }
 0x952   : > { %v2166_v35 = vpop.xlane.xlu0 %2165  ;;  %5385 = vrcp.f32 %v2163_v34 }
 0x953   : > { %5387 = vrcp.f32 %v2166_v35 }
 0x95b   : > { %v5384_v36 = vpop.eup %5383 }
 0x95c   : > { %v2182_v39 = vmul.f32 %v5384_v36, %v5372_v9 }
 0x95d   : > { %v2169_v25 = vpop.xlane.xlu1 %2168 }
 0x95e   : > { %5389 = vrcp.f32 %v2169_v25 }
 0x95f   : > { %v5386_v27 = vpop.eup %5385 }
 0x960   : > { %v5388_v37 = vpop.eup %5387  ;;  %v2183_v40 = vmul.f32 %v5386_v27, %v5374_v21  ;;  %v5317_v21 = vld [vmem:[%s5648_s2 + $0xa8] sm:$0xff]  }
 0x961   : > { %v2184_v42 = vmul.f32 %v5388_v37, %v5376_v23  ;;  %v2172_v43 = vpop.xlane.xlu0 %2171 }
 0x962   : > { %5391 = vrcp.f32 %v2172_v43  ;;  %v2175_v45 = vpop.xlane.xlu1 %2174  ;;  %v2188_v46 = vpack.c.bf16 %v2183_v40, %v2182_v39 }
 0x963   : > { %v2189_v47 = vpack.c.bf16 %v2184_v42, %v2184_v42  ;;  %5393 = vrcp.f32 %v2175_v45 }
 0x964   : > { %4963 = vmatprep.mubr.msk.bf16.mxu0 %vm1554_vm10, %v2188_v46 }
 0x965   : > { %4964 = vmatmul.mubr.msk.bf16.vlgmr.msra.gmra.mxu0 %vm1554_vm10, %v2189_v47 }
 0x966   : > { %4977 = vmatprep.mubr.msk.bf16.mxu0 %vm5502_vm7, %v5501_v28  ;;  %4976 = vmatpush3.bf16.msra.mxu0 %v2325_v58 }
 0x967   : > { %5003 = vmatprep.subr.bf16.mxu0 %v5501_v28 }
 0x96b   : > { %v5390_v48 = vpop.eup %5389 }
 0x96c   : > { %v2185_v51 = vmul.f32 %v5390_v48, %v5378_v22 }
 0x96f   : > { %v5392_v49 = vpop.eup %5391 }
 0x970   : > { %v5394_v50 = vpop.eup %5393  ;;  %v2186_v52 = vmul.f32 %v5392_v49, %v5380_v19 }
 0x971   : > { %v2187_v54 = vmul.f32 %v5394_v50, %v5382_v30 }
 0x972   : > { %v2190_v55 = vpack.c.bf16 %v2186_v52, %v2185_v51 }
 0x973   : > { %v2191_v56 = vpack.c.bf16 %v2187_v54, %v2187_v54 }
 0x974   : > { %4971 = vmatprep.mubr.msk.bf16.mxu1 %vm1554_vm10, %v2190_v55 }
 0x975   : > { %4972 = vmatmul.mubr.msk.bf16.vlgmr.msra.gmra.mxu1 %vm1554_vm10, %v2191_v56 }
 0x976   : > { %4990 = vmatpush3.bf16.msra.mxu1 %v2394_v59  ;;  %4991 = vmatprep.mubr.msk.bf16.mxu1 %vm5502_vm7, %v5501_v28 }
 0x977   : > { %5019 = vmatprep.subr.bf16.mxu1 %v5501_v28 }
 0x97d   : > { %4992 = vmatmul.mubr.msk.bf16.vlgmr.msra.gmra.mxu1 %vm1433_vm8, %v1744_v4 }
 0x97e   : > { %4995 = vmatprep.mubr.msk.bf16.mxu1 %vm5502_vm7, %v5501_v28  ;;  %5020 = vmatpush3.bf16.msra.mxu1 %v5313_v63 }
 0x97f   : > { %5021 = vmatprep.subr.bf16.mxu1 %v5501_v28 }
 0x982   : > { %5022 = vmatpush3.bf16.msra.mxu1 %v5314_v38 }
 0x985   : > { %4996 = vmatmul.mubr.msk.bf16.gmra.mxu1 %vm1433_vm8, %v1745_v0 }
 0x986   : > { %4999 = vmatprep.mubr.msk.bf16.mxu1 %vm5502_vm7, %v5501_v28 }
 0x98d   : > { %5000 = vmatmul.mubr.msk.bf16.gmra.mxu1 %vm1433_vm8, %v1746_v61 }
 0x98e   : > { %5023 = vmatprep.mubr.msk.bf16.mxu1 %vm5502_vm7, %v5501_v28 }
 0x995   : > { %5024 = vmatmul.mubr.msk.bf16.vlgmr.msra.gmra.mxu1 %vm1065_vm6, %v5824_v15 }
 0x996   : > { %5027 = vmatprep.mubr.msk.bf16.mxu1 %vm5502_vm7, %v5501_v28 }
 0x99d   : > { %5028 = vmatmul.mubr.msk.bf16.gmra.mxu1 %vm1065_vm6, %v5812_v1 }
 0x99e   : > { %5031 = vmatprep.mubr.msk.bf16.mxu1 %vm5502_vm7, %v5501_v28 }
 0x9a5   : > { %5032 = vmatmul.mubr.msk.bf16.gmra.mxu1 %vm1065_vm6, %v5822_v14 }
 0xa25   : > { %v4965_v60 = vpop.f32.mrf.mxu0 }
 0xa27   : > { %v2239_v61 = vpop.f32.mrf.mxu0 }
 0xa29   : > { %v4966_v62 = vpop.f32.mrf.mxu0 }
 0xa2b   : > { %v2242_v0 = vpop.f32.mrf.mxu0 }
 0xa2c   : > { %v2310_v7 = vpack.c.bf16 %v2242_v0, %v2239_v61 }
 0xa2e   : > { %4978 = vmatmul.mubr.msk.bf16.vlgmr.msra.gmra.mxu0 %vm1433_vm8, %v2310_v7  ;;  %v4521_v7 = vld [vmem:[%s5657_s0 + $0x2] ss:$0 sm:$0xff] }
 0xa2f   : > { %4981 = vmatprep.mubr.msk.bf16.mxu0 %vm5502_vm7, %v5501_v28  ;;  %5004 = vmatpush3.bf16.msra.mxu0 %v5315_v3 }
 0xa30   : > { %5005 = vmatprep.subr.bf16.mxu0 %v5501_v28 }
 0xa33   : > { %5006 = vmatpush3.bf16.msra.mxu0 %v5316_v5 }
 0xa34   : > { %5035 = vmatprep.subr.bf16.mxu0 %v5501_v28 }
 0xa35   : > { %v4973_v41 = vpop.f32.mrf.mxu1 }
 0xa37   : > { %v2296_v6 = vpop.f32.mrf.mxu1 }
 0xa38   : > { %v2311_v2 = vpack.c.bf16 %v2296_v6, %v4965_v60 }
 0xa39   : > { %v4974_v8 = vpop.f32.mrf.mxu1 }
 0xa3a   : > { %4982 = vmatmul.mubr.msk.bf16.gmra.mxu0 %vm1433_vm8, %v2311_v2 }
 0xa3b   : > { %v2299_v44 = vpop.f32.mrf.mxu1  ;;  %4985 = vmatprep.mubr.msk.bf16.mxu0 %vm5502_vm7, %v5501_v28 }
 0xa3c   : > { %v2312_v11 = vpack.c.bf16 %v4973_v41, %v2299_v44 }
 0xa3d   : > { %v6088_v9 = vpop.f32.mrf.mxu1 }
 0xa3f   : > { %v4993_v10 = vpop.f32.mrf.mxu1 }
 0xa41   : > { %v6090_v12 = vpop.f32.mrf.mxu1 }
 0xa42   : > { %4986 = vmatmul.mubr.msk.bf16.gmra.mxu0 %vm1433_vm8, %v2312_v11 }
 0xa43   : > { %v4994_v16 = vpop.f32.mrf.mxu1  ;;  %5007 = vmatprep.mubr.msk.bf16.mxu0 %vm5502_vm7, %v5501_v28 }
 0xa45   : > { %v6095_v18 = vpop.f32.mrf.mxu1 }
 0xa47   : > { %v4997_v20 = vpop.f32.mrf.mxu1 }
 0xa49   : > { %v6098_v23 = vpop.f32.mrf.mxu1 }
 0xa4a   : > { %5008 = vmatmul.mubr.msk.bf16.vlgmr.msra.gmra.mxu0 %vm1065_vm6, %v5824_v15 }
 0xa4b   : > { %v4998_v24 = vpop.f32.mrf.mxu1  ;;  %5011 = vmatprep.mubr.msk.bf16.mxu0 %vm5502_vm7, %v5501_v28  ;;  %5036 = vmatpush3.bf16.msra.mxu0 %v5317_v21 }
 0xa4c   : > { %5037 = vmatprep.subr.bf16.mxu0 %v5501_v28 }
 0xa4d   : > { %v6106_v13 = vpop.f32.mrf.mxu1 }
 0xa4f   : > { %v5001_v17 = vpop.f32.mrf.mxu1  ;;  %5038 = vmatpush3.bf16.msra.mxu0 %v5318_v26 }
 0xa51   : > { %v6108_v22 = vpop.f32.mrf.mxu1 }
 0xa52   : > { %5012 = vmatmul.mubr.msk.bf16.gmra.mxu0 %vm1065_vm6, %v5812_v1 }
 0xa53   : > { %v5002_v29 = vpop.f32.mrf.mxu1  ;;  %5015 = vmatprep.mubr.msk.bf16.mxu0 %vm5502_vm7, %v5501_v28 }
 0xa55   : > { %v2594_v19 = vpop.f32.mrf.mxu1 }
 0xa56   : > { %v2595_v27 = vadd.f32 %v4532_v33, %v2594_v19 }
 0xa57   : > { %v5025_v30 = vpop.f32.mrf.mxu1 }
 0xa59   : > { %v2597_v31 = vpop.f32.mrf.mxu1 }
 0xa5a   : > { %5016 = vmatmul.mubr.msk.bf16.gmra.mxu0 %vm1065_vm6, %v5822_v14  ;;  %v2598_v35 = vadd.f32 %v4532_v33, %v2597_v31 }
 0xa5b   : > { %v5026_v32 = vpop.f32.mrf.mxu1  ;;  %5039 = vmatprep.mubr.msk.bf16.mxu0 %vm5502_vm7, %v5501_v28 }
 0xa5c   : > { %v2703_v40 = vpack.c.bf16 %v2598_v35, %v2595_v27 }
 0xa5d   : > { %v2602_v34 = vpop.f32.mrf.mxu1 }
 0xa5e   : > { %v2603_v36 = vadd.f32 %v4532_v33, %v2602_v34  ;;  %v2714_v52 = vsel %vm1433_vm8, %v2703_v40, 0 }
 0xa5f   : > { %v5029_v25 = vpop.f32.mrf.mxu1 }
 0xa60   : > { %v2704_v37 = vpack.c.bf16 %v2603_v36, %v2603_v36 }
 0xa61   : > { %v2605_v39 = vpop.f32.mrf.mxu1 }
 0xa62   : > { %v2717_v42 = vsel %vm1433_vm8, %v2704_v37, 0  ;;  %v2606_v43 = vadd.f32 %v4532_v33, %v2605_v39  ;;  %5040 = vmatmul.mubr.msk.bf16.vlgmr.msra.gmra.mxu0 %vm1065_vm6, %v5824_v15  ;;  %5259 = vmatprep.subr.msk.bf16.mxu1 %vm1433_vm8, %v2704_v37 }
 0xa63   : > { %v5030_v45 = vpop.f32.mrf.mxu1  ;;  %5052 = vmatpush3.bf16.xpose.msra.mxu1 %v2717_v42  ;;  %5043 = vmatprep.mubr.msk.bf16.mxu0 %vm5502_vm7, %v5501_v28 }
 0xa64   : > { %5260 = vmatprep.subr.msk.bf16.mxu1 %vm1433_vm8, %v2703_v40  ;;  %v4543_v40 = vld [vmem:[%s5657_s0 + $0xa] ss:$0 sm:$0xff] }
 0xa65   : > { %v2610_v46 = vpop.f32.mrf.mxu1 }
 0xa66   : > { %v2611_v47 = vadd.f32 %v4532_v33, %v2610_v46 }
 0xa67   : > { %v5033_v48 = vpop.f32.mrf.mxu1 }
 0xa68   : > { %v2705_v49 = vpack.c.bf16 %v2611_v47, %v2606_v43 }
 0xa69   : > { %v2613_v50 = vpop.f32.mrf.mxu1 }
 0xa6a   : > { %v2614_v51 = vadd.f32 %v4532_v33, %v2613_v50  ;;  %5044 = vmatmul.mubr.msk.bf16.gmra.mxu0 %vm1065_vm6, %v5812_v1  ;;  %v2774_v33 = vsel %vm1433_vm8, %v2705_v49, 0 }
 0xa6b   : > { %v5034_v53 = vpop.f32.mrf.mxu1  ;;  %5054 = vmatpush3.bf16.xpose.msra.mxu1 %v2714_v52  ;;  %5047 = vmatprep.mubr.msk.bf16.mxu0 %vm5502_vm7, %v5501_v28 }
 0xa6c   : > { %v2706_v54 = vpack.c.bf16 %v2614_v51, %v2614_v51 }
 0xa6e   : > { %5261 = vmatprep.subr.msk.bf16.mxu1 %vm1433_vm8, %v2706_v54  ;;  %v2777_v24 = vsel %vm1433_vm8, %v2706_v54, 0 }
 0xa72   : > { %5048 = vmatmul.mubr.msk.bf16.gmra.mxu0 %vm1065_vm6, %v5822_v14 }
 0xaee   : > { %v6134_v55 = vpop.f32.mrf.mxu0 }
 0xaf0   : > { %v4979_v56 = vpop.f32.mrf.mxu0 }
 0xaf2   : > { %v6136_v59 = vpop.f32.mrf.mxu0 }
 0xaf4   : > { %v4980_v63 = vpop.f32.mrf.mxu0 }
 0xafa   : > { %v6138_v4 = vpop.f32.mrf.mxu0 }
 0xafc   : > { %v4983_v38 = vpop.f32.mrf.mxu0 }
 0xafe   : > { %v6140_v57 = vpop.f32.mrf.mxu0 }
 0xb00   : > { %v4984_v58 = vpop.f32.mrf.mxu0 }
 0xb02   : > { %v6142_v60 = vpop.f32.mrf.mxu0 }
 0xb04   : > { %v4987_v61 = vpop.f32.mrf.mxu0 }
 0xb06   : > { %v6144_v62 = vpop.f32.mrf.mxu0 }
 0xb08   : > { %v4988_v0 = vpop.f32.mrf.mxu0 }
 0xb0a   : > { %v2512_v3 = vpop.f32.mrf.mxu0 }
 0xb0b   : > { %v2513_v6 = vadd.f32 %v4521_v7, %v2512_v3 }
 0xb0c   : > { %v5009_v5 = vpop.f32.mrf.mxu0 }
 0xb0e   : > { %v2515_v41 = vpop.f32.mrf.mxu0 }
 0xb0f   : > { %v2516_v2 = vadd.f32 %v4521_v7, %v2515_v41 }
 0xb10   : > { %v5010_v8 = vpop.f32.mrf.mxu0 }
 0xb11   : > { %v2699_v44 = vpack.c.bf16 %v2516_v2, %v2513_v6  ;;  %v6161_v6 = vld [vmem:[#allocation3] sm:$0xff] }
 0xb12   : > { %v2520_v10 = vpop.f32.mrf.mxu0 }
 0xb13   : > { %v2521_v11 = vadd.f32 %v4521_v7, %v2520_v10  ;;  %5055 = vmatprep.mubr.msk.bf16.mxu1 %vm1433_vm8, %v2699_v44  ;;  %v6164_v44 = vld [vmem:[#allocation3 + $0x10] sm:$0xff] }
 0xb14   : > { %v5013_v16 = vpop.f32.mrf.mxu0 }
 0xb15   : > { %v2700_v20 = vpack.c.bf16 %v2521_v11, %v2521_v11 }
 0xb16   : > { %v2523_v21 = vpop.f32.mrf.mxu0 }
 0xb17   : > { %5056 = vmatmul.mubr.msk.bf16.vlgmr.msra.gmra.mxu1 %vm1433_vm8, %v2700_v20  ;;  %v2524_v29 = vadd.f32 %v4521_v7, %v2523_v21  ;;  %v6168_v20 = vld [vmem:[#allocation3 + $0x8] sm:$0xff] }
 0xb18   : > { %5060 = vmatpush3.bf16.xpose.msra.mxu1 %v2777_v24  ;;  %v5014_v26 = vpop.f32.mrf.mxu0 }
 0xb19   : > { %5262 = vmatprep.subr.msk.bf16.mxu1 %vm1433_vm8, %v2705_v49 }
 0xb1a   : > { %v2528_v17 = vpop.f32.mrf.mxu0 }
 0xb1b   : > { %v2529_v19 = vadd.f32 %v4521_v7, %v2528_v17 }
 0xb1c   : > { %v5017_v30 = vpop.f32.mrf.mxu0 }
 0xb1d   : > { %v2701_v31 = vpack.c.bf16 %v2529_v19, %v2524_v29 }
 0xb1e   : > { %v2531_v32 = vpop.f32.mrf.mxu0 }
 0xb1f   : > { %5063 = vmatprep.mubr.msk.bf16.mxu1 %vm1433_vm8, %v2701_v31  ;;  %v2532_v35 = vadd.f32 %v4521_v7, %v2531_v32 }
 0xb20   : > { %5062 = vmatpush3.bf16.xpose.msra.mxu1 %v2774_v33  ;;  %v5018_v34 = vpop.f32.mrf.mxu0 }
 0xb21   : > { %v2702_v27 = vpack.c.bf16 %v2532_v35, %v2532_v35 }
 0xb22   : > { %v2676_v36 = vpop.f32.mrf.mxu0 }
 0xb23   : > { %v2677_v47 = vadd.f32 %v4543_v40, %v2676_v36 }
 0xb24   : > { %v5041_v25 = vpop.f32.mrf.mxu0 }
 0xb26   : > { %v2679_v37 = vpop.f32.mrf.mxu0 }
 0xb27   : > { %5064 = vmatmul.mubr.msk.bf16.vlgmr.msra.gmra.mxu1 %vm1433_vm8, %v2702_v27  ;;  %v2680_v43 = vadd.f32 %v4543_v40, %v2679_v37 }
 0xb28   : > { %v5042_v39 = vpop.f32.mrf.mxu0 }
 0xb29   : > { %v2897_v50 = vpack.c.bf16 %v2680_v43, %v2677_v47 }
 0xb2a   : > { %v2684_v42 = vpop.f32.mrf.mxu0 }
 0xb2b   : > { %v2685_v45 = vadd.f32 %v4543_v40, %v2684_v42 }
 0xb2c   : > { %v5045_v46 = vpop.f32.mrf.mxu0 }
 0xb2d   : > { %v2898_v48 = vpack.c.bf16 %v2685_v45, %v2685_v45 }
 0xb2e   : > { %v2687_v49 = vpop.f32.mrf.mxu0 }
 0xb2f   : > { %v2908_v51 = vsel %vm1635_vm9, %v2898_v48, 0  ;;  %5263 = vmatprep.subr.msk.bf16.mxu0 %vm1635_vm9, %v2898_v48  ;;  %v2688_v61 = vadd.f32 %v4543_v40, %v2687_v49 }
 0xb30   : > { %v5046_v52 = vpop.f32.mrf.mxu0  ;;  %5068 = vmatpush3.bf16.msra.mxu0 %v2908_v51 }
 0xb31   : > { %5069 = vmatprep.subr.bf16.mxu0 %v2897_v50 }
 0xb32   : > { %v2692_v53 = vpop.f32.mrf.mxu0 }
 0xb33   : > { %v2693_v63 = vadd.f32 %v4543_v40, %v2692_v53 }
 0xb34   : > { %v5049_v54 = vpop.f32.mrf.mxu0  ;;  %5070 = vmatpush3.bf16.msra.mxu0 %v2897_v50 }
 0xb35   : > { %5083 = vmatprep.subr.bf16.mxu0 %v5501_v28  ;;  %v2899_v3 = vpack.c.bf16 %v2693_v63, %v2688_v61 }
 0xb36   : > { %v2695_v56 = vpop.f32.mrf.mxu0 }
 0xb37   : > { %v2696_v38 = vadd.f32 %v4543_v40, %v2695_v56 }
 0xb38   : > { %v5050_v58 = vpop.f32.mrf.mxu0 }
 0xb39   : > { %v2900_v0 = vpack.c.bf16 %v2696_v38, %v2696_v38 }
 0xb3b   : > { %v2965_v7 = vsel %vm1635_vm9, %v2900_v0, 0  ;;  %5264 = vmatprep.subr.msk.bf16.mxu1 %vm1635_vm9, %v2900_v0 }
 0xb3c   : > { %5076 = vmatpush3.bf16.msra.mxu1 %v2965_v7 }
 0xb3d   : > { %5077 = vmatprep.subr.bf16.mxu1 %v2899_v3 }
 0xb40   : > { %5078 = vmatpush3.bf16.msra.mxu1 %v2899_v3 }
 0xb41   : > { %5097 = vmatprep.subr.bf16.mxu1 %v5501_v28 }
 0xbd7   : > { %v5057_v5 = vpop.f32.mrf.mxu1 }
 0xbd8   : > { %v2762_v10 = vadd.f32 %v6164_v44, %v5057_v5 }
 0xbd9   : > { %v2753_v41 = vpop.f32.mrf.mxu1 }
 0xbda   : > { %v2754_v2 = vadd.f32 %v6161_v6, %v2753_v41  ;;  %v2833_v26 = vsel %vm1554_vm10, %v2762_v10, -inf }
 0xbdb   : > { %v5058_v8 = vpop.f32.mrf.mxu1 }
 0xbdc   : > { %v2827_v11 = vsel %vm1554_vm10, %v2754_v2, -inf }
 0xbdd   : > { %v2756_v16 = vpop.f32.mrf.mxu1  ;;  %2828 = vmax.xlane.f32.xlu0 %v2827_v11 }
 0xbde   : > { %v2757_v21 = vadd.f32 %v6168_v20, %v2756_v16 }
 0xbe0   : > { %v2830_v24 = vsel %vm1554_vm10, %v2757_v21, -inf }
 0xbe1   : > { %2831 = vmax.xlane.f32.xlu1 %v2830_v24  ;;  %2834 = vmax.xlane.f32.xlu0 %v2833_v26 }
 0xbe7   : > { %v5065_v17 = vpop.f32.mrf.mxu1 }
 0xbe8   : > { %v2822_v31 = vadd.f32 %v6164_v44, %v5065_v17 }
 0xbe9   : > { %v2813_v29 = vpop.f32.mrf.mxu1 }
 0xbea   : > { %v2814_v19 = vadd.f32 %v6161_v6, %v2813_v29  ;;  %v2842_v35 = vsel %vm1554_vm10, %v2822_v31, -inf }
 0xbeb   : > { %v5066_v30 = vpop.f32.mrf.mxu1 }
 0xbec   : > { %v2836_v32 = vsel %vm1554_vm10, %v2814_v19, -inf }
 0xbed   : > { %v2816_v33 = vpop.f32.mrf.mxu1  ;;  %2837 = vmax.xlane.f32.xlu1 %v2836_v32 }
 0xbee   : > { %v2817_v34 = vadd.f32 %v6168_v20, %v2816_v33 }
 0xbf0   : > { %v2839_v36 = vsel %vm1554_vm10, %v2817_v34, -inf }
 0xbf1   : > { %2843 = vmax.xlane.f32.xlu1 %v2842_v35  ;;  %2840 = vmax.xlane.f32.xlu0 %v2839_v36 }
 0xc66   : > { %v2829_v25 = vpop.xlane.xlu0 %2828 }
 0xc67   : > { %v2845_v27 = vsub.f32 %v2754_v2, %v2829_v25 }
 0xc69   : > { %v2851_v37 = vmul.f32 1.442695, %v2845_v27 }
 0xc6a   : > { %v2832_v39 = vpop.xlane.xlu1 %2831  ;;  %v2835_v40 = vpop.xlane.xlu0 %2834 }
 0xc6b   : > { %5395 = vpow2.f32 %v2851_v37  ;;  %v2846_v42 = vsub.f32 %v2757_v21, %v2832_v39  ;;  %v2847_v43 = vsub.f32 %v2762_v10, %v2835_v40 }
 0xc6d   : > { %v2853_v45 = vmul.f32 1.442695, %v2846_v42  ;;  %v2855_v46 = vmul.f32 1.442695, %v2847_v43 }
 0xc6f   : > { %5397 = vpow2.f32 %v2853_v45  ;;  %v5319_v45 = vld [vmem:[%s5648_s2 + $0x38] sm:$0xff]  }
 0xc70   : > { %5399 = vpow2.f32 %v2855_v46  ;;  %v5320_v46 = vld [vmem:[%s5648_s2 + $0x30] sm:$0xff]  }
 0xc76   : > { %v2838_v47 = vpop.xlane.xlu1 %2837 }
 0xc77   : > { %v2848_v48 = vsub.f32 %v2814_v19, %v2838_v47  ;;  %v5321_v47 = vld [vmem:[%s5648_s2 + $0xb8] sm:$0xff]  }
 0xc78   : > { %v5396_v49 = vpop.eup %5395 }
 0xc79   : > { %v2857_v50 = vmul.f32 1.442695, %v2848_v48  ;;  %v2863_v51 = vsel %vm1554_vm10, %v5396_v49, 0.0  ;;  %v5322_v48 = vld [vmem:[%s5648_s2 + $0xb0] sm:$0xff]  }
 0xc7a   : > { %v2844_v52 = vpop.xlane.xlu1 %2843  ;;  %v2841_v53 = vpop.xlane.xlu0 %2840  ;;  %2864 = vadd.xlane.f32.xlu0 %v2863_v51 }
 0xc7b   : > { %5401 = vpow2.f32 %v2857_v50  ;;  %v2850_v54 = vsub.f32 %v2822_v31, %v2844_v52  ;;  %v2849_v56 = vsub.f32 %v2817_v34, %v2841_v53 }
 0xc7c   : > { %v5398_v63 = vpop.eup %5397 }
 0xc7d   : > { %v5400_v38 = vpop.eup %5399  ;;  %v2861_v58 = vmul.f32 1.442695, %v2850_v54  ;;  %v2859_v61 = vmul.f32 1.442695, %v2849_v56  ;;  %v2866_v0 = vsel %vm1554_vm10, %v5398_v63, 0.0  ;;  %v5323_v56 = vld [vmem:[%s5648_s2 + $0x78] sm:$0xff]  }
 0xc7e   : > { %2867 = vadd.xlane.f32.xlu1 %v2866_v0  ;;  %v2869_v3 = vsel %vm1554_vm10, %v5400_v38, 0.0 }
 0xc7f   : > { %5403 = vpow2.f32 %v2861_v58  ;;  %2870 = vadd.xlane.f32.xlu0 %v2869_v3 }
 0xc80   : > { %5405 = vpow2.f32 %v2859_v61 }
 0xc88   : > { %v5402_v7 = vpop.eup %5401 }
 0xc89   : > { %v2872_v5 = vsel %vm1554_vm10, %v5402_v7, 0.0 }
 0xc8a   : > { %2873 = vadd.xlane.f32.xlu1 %v2872_v5 }
 0xc8c   : > { %v5404_v41 = vpop.eup %5403 }
 0xc8d   : > { %v5406_v2 = vpop.eup %5405  ;;  %v2878_v8 = vsel %vm1554_vm10, %v5404_v41, 0.0 }
 0xc8e   : > { %2879 = vadd.xlane.f32.xlu1 %v2878_v8  ;;  %v2875_v10 = vsel %vm1554_vm10, %v5406_v2, 0.0 }
 0xc8f   : > { %2876 = vadd.xlane.f32.xlu0 %v2875_v10 }
 0xd03   : > { %v2865_v11 = vpop.xlane.xlu0 %2864 }
 0xd04   : > { %5407 = vrcp.f32 %v2865_v11  ;;  %v4566_v11 = vld [vmem:[%s5657_s0 + $0x3] ss:$0 sm:$0xff] }
 0xd07   : > { %v2868_v16 = vpop.xlane.xlu1 %2867 }
 0xd08   : > { %5409 = vrcp.f32 %v2868_v16  ;;  %v2871_v21 = vpop.xlane.xlu0 %2870 }
 0xd09   : > { %5411 = vrcp.f32 %v2871_v21 }
 0xd11   : > { %v5408_v24 = vpop.eup %5407 }
 0xd12   : > { %v2887_v19 = vmul.f32 %v5408_v24, %v5396_v49  ;;  %v4557_v49 = vld [vmem:[%s6548_s10 + $0x8] sm:$0xf] }
 0xd13   : > { %v2874_v26 = vpop.xlane.xlu1 %2873  ;;  %v3030_v50 = vsel %vm1635_vm9, %v4557_v49, 0 }
 0xd14   : > { %5413 = vrcp.f32 %v2874_v26 }
 0xd15   : > { %v5410_v17 = vpop.eup %5409 }
 0xd16   : > { %v5412_v29 = vpop.eup %5411  ;;  %v2888_v30 = vmul.f32 %v5410_v17, %v5398_v63 }
 0xd17   : > { %v2889_v31 = vmul.f32 %v5412_v29, %v5400_v38  ;;  %v2880_v32 = vpop.xlane.xlu1 %2879  ;;  %v5324_v38 = vld [vmem:[%s5648_s2 + $0x70] sm:$0xff]  }
 0xd18   : > { %5415 = vrcp.f32 %v2880_v32  ;;  %v2877_v33 = vpop.xlane.xlu0 %2876  ;;  %v2893_v34 = vpack.c.bf16 %v2888_v30, %v2887_v19 }
 0xd19   : > { %v2894_v35 = vpack.c.bf16 %v2889_v31, %v2889_v31  ;;  %5417 = vrcp.f32 %v2877_v33 }
 0xd1a   : > { %5071 = vmatprep.mubr.msk.bf16.mxu0 %vm1554_vm10, %v2893_v34 }
 0xd1b   : > { %5072 = vmatmul.mubr.msk.bf16.vlgmr.msra.gmra.mxu0 %vm1554_vm10, %v2894_v35 }
 0xd1c   : > { %5085 = vmatprep.mubr.msk.bf16.mxu0 %vm5502_vm7, %v5501_v28  ;;  %5084 = vmatpush3.bf16.msra.mxu0 %v3030_v50 }
 0xd1d   : > { %5113 = vmatprep.subr.bf16.mxu0 %v5501_v28 }
 0xd21   : > { %v5414_v36 = vpop.eup %5413 }
 0xd22   : > { %v2890_v39 = vmul.f32 %v5414_v36, %v5402_v7 }
 0xd25   : > { %v5416_v25 = vpop.eup %5415 }
 0xd26   : > { %v5418_v27 = vpop.eup %5417  ;;  %v2892_v37 = vmul.f32 %v5416_v25, %v5404_v41 }
 0xd27   : > { %v2891_v40 = vmul.f32 %v5418_v27, %v5406_v2  ;;  %v6252_v27 = vld [vmem:[%s5657_s0 + $0xb] ss:$0 sm:$0xff] }
 0xd28   : > { %v2896_v42 = vpack.c.bf16 %v2892_v37, %v2892_v37 }
 0xd29   : > { %v2895_v43 = vpack.c.bf16 %v2891_v40, %v2890_v39 }
 0xd2b   : > { %5079 = vmatprep.mubr.msk.bf16.mxu1 %vm1554_vm10, %v2895_v43 }
 0xd2c   : > { %5080 = vmatmul.mubr.msk.bf16.vlgmr.msra.gmra.mxu1 %vm1554_vm10, %v2896_v42 }
 0xd2d   : > { %5098 = vmatpush3.bf16.msra.mxu1 %v5319_v45  ;;  %5101 = vmatprep.mubr.msk.bf16.mxu1 %vm5502_vm7, %v5501_v28 }
 0xd2e   : > { %5099 = vmatprep.subr.bf16.mxu1 %v5501_v28 }
 0xd31   : > { %5100 = vmatpush3.bf16.msra.mxu1 %v5320_v46 }
 0xd32   : > { %5129 = vmatprep.subr.bf16.mxu1 %v5501_v28 }
 0xd34   : > { %5102 = vmatmul.mubr.msk.bf16.vlgmr.msra.gmra.mxu1 %vm1065_vm6, %v5824_v15 }
 0xd35   : > { %5105 = vmatprep.mubr.msk.bf16.mxu1 %vm5502_vm7, %v5501_v28  ;;  %5130 = vmatpush3.bf16.msra.mxu1 %v5321_v47 }
 0xd36   : > { %5131 = vmatprep.subr.bf16.mxu1 %v5501_v28 }
 0xd39   : > { %5132 = vmatpush3.bf16.msra.mxu1 %v5322_v48 }
 0xd3c   : > { %5106 = vmatmul.mubr.msk.bf16.gmra.mxu1 %vm1065_vm6, %v5812_v1 }
 0xd3d   : > { %5109 = vmatprep.mubr.msk.bf16.mxu1 %vm5502_vm7, %v5501_v28 }
 0xd44   : > { %5110 = vmatmul.mubr.msk.bf16.gmra.mxu1 %vm1065_vm6, %v5822_v14 }
 0xd45   : > { %5133 = vmatprep.mubr.msk.bf16.mxu1 %vm5502_vm7, %v5501_v28 }
 0xd4c   : > { %5134 = vmatmul.mubr.msk.bf16.vlgmr.msra.gmra.mxu1 %vm1065_vm6, %v5824_v15 }
 0xd4d   : > { %5137 = vmatprep.mubr.msk.bf16.mxu1 %vm5502_vm7, %v5501_v28 }
 0xd54   : > { %5138 = vmatmul.mubr.msk.bf16.gmra.mxu1 %vm1065_vm6, %v5812_v1 }
 0xd55   : > { %5141 = vmatprep.mubr.msk.bf16.mxu1 %vm5502_vm7, %v5501_v28 }
 0xd5c   : > { %5142 = vmatmul.mubr.msk.bf16.gmra.mxu1 %vm1065_vm6, %v5822_v14 }
 0xddb   : > { %v5073_v51 = vpop.f32.mrf.mxu0 }
 0xddd   : > { %v2944_v52 = vpop.f32.mrf.mxu0 }
 0xddf   : > { %v5074_v53 = vpop.f32.mrf.mxu0 }
 0xde1   : > { %v2947_v54 = vpop.f32.mrf.mxu0 }
 0xde2   : > { %v3015_v63 = vpack.c.bf16 %v2947_v54, %v2944_v52 }
 0xde4   : > { %5086 = vmatmul.mubr.msk.bf16.vlgmr.msra.gmra.mxu0 %vm1433_vm8, %v3015_v63  ;;  %v2431_v63 = vadd.f32 %v6088_v9, %v6134_v55  ;;  %v2442_v9 = vadd.f32 %v6098_v23, %v6140_v57 }
 0xde5   : > { %5089 = vmatprep.mubr.msk.bf16.mxu0 %vm5502_vm7, %v5501_v28  ;;  %5114 = vmatpush3.bf16.msra.mxu0 %v5323_v56 }
 0xde6   : > { %5115 = vmatprep.subr.bf16.mxu0 %v5501_v28 }
 0xde9   : > { %5116 = vmatpush3.bf16.msra.mxu0 %v5324_v38 }
 0xdec   : > { %v5081_v58 = vpop.f32.mrf.mxu1 }
 0xdee   : > { %v3001_v61 = vpop.f32.mrf.mxu1 }
 0xdef   : > { %v3016_v0 = vpack.c.bf16 %v3001_v61, %v5073_v51 }
 0xdf0   : > { %v5082_v3 = vpop.f32.mrf.mxu1 }
 0xdf1   : > { %5090 = vmatmul.mubr.msk.bf16.gmra.mxu0 %vm1433_vm8, %v3016_v0  ;;  %v2434_v0 = vadd.f32 %v6090_v12, %v6136_v59  ;;  %v2447_v12 = vadd.f32 %v6106_v13, %v6142_v60 }
 0xdf2   : > { %v3004_v7 = vpop.f32.mrf.mxu1  ;;  %5093 = vmatprep.mubr.msk.bf16.mxu0 %vm5502_vm7, %v5501_v28 }
 0xdf3   : > { %v3017_v2 = vpack.c.bf16 %v5081_v58, %v3004_v7 }
 0xdf4   : > { %v3154_v5 = vpop.f32.mrf.mxu1 }
 0xdf5   : > { %v3155_v25 = vadd.f32 %v4566_v11, %v3154_v5 }
 0xdf6   : > { %v5103_v41 = vpop.f32.mrf.mxu1 }
 0xdf7   : > { %v2439_v41 = vadd.f32 %v6095_v18, %v6138_v4  ;;  %v2450_v18 = vadd.f32 %v6108_v22, %v6144_v62 }
 0xdf8   : > { %v3157_v8 = vpop.f32.mrf.mxu1 }
 0xdf9   : > { %5094 = vmatmul.mubr.msk.bf16.gmra.mxu0 %vm1433_vm8, %v3017_v2 }
 0xdfa   : > { %v5104_v10 = vpop.f32.mrf.mxu1  ;;  %5117 = vmatprep.mubr.msk.bf16.mxu0 %vm5502_vm7, %v5501_v28 }
 0xdfc   : > { %v3162_v16 = vpop.f32.mrf.mxu1 }
 0xdfd   : > { %v6238_v21 = vadd.f32 %v4566_v11, %v3162_v16 }
 0xdfe   : > { %v5107_v24 = vpop.f32.mrf.mxu1 }
 0xe00   : > { %v3165_v26 = vpop.f32.mrf.mxu1 }
 0xe01   : > { %5118 = vmatmul.mubr.msk.bf16.vlgmr.msra.gmra.mxu0 %vm1065_vm6, %v5824_v15  ;;  %v3166_v19 = vadd.f32 %v4566_v11, %v3165_v26  ;;  %v3158_v15 = vadd.f32 %v4566_v11, %v3157_v8 }
 0xe02   : > { %v5108_v17 = vpop.f32.mrf.mxu1  ;;  %5121 = vmatprep.mubr.msk.bf16.mxu0 %vm5502_vm7, %v5501_v28 }
 0xe03   : > { %v3341_v39 = vpack.c.bf16 %v3158_v15, %v3155_v25 }
 0xe04   : > { %v3170_v29 = vpop.f32.mrf.mxu1 }
 0xe05   : > { %v3171_v30 = vadd.f32 %v4566_v11, %v3170_v29 }
 0xe06   : > { %v5111_v31 = vpop.f32.mrf.mxu1 }
 0xe07   : > { %v3343_v32 = vpack.c.bf16 %v3171_v30, %v3166_v19  ;;  %v4577_v31 = vld [vmem:[%s5657_s0 + $0x7] ss:$0 sm:$0xff]  ;;  %s6552_s0 = sld [smem:[#allocation14_spill]] (!%p4630_p5) }
 0xe08   : > { %v3173_v33 = vpop.f32.mrf.mxu1 }
 0xe09   : > { %v6244_v34 = vadd.f32 %v4566_v11, %v3173_v33  ;;  %5122 = vmatmul.mubr.msk.bf16.gmra.mxu0 %vm1065_vm6, %v5812_v1  ;;  %5157 = vmatprep.mubr.msk.bf16.mxu1 %vm1433_vm8, %v3343_v32 }
 0xe0a   : > { %v5112_v35 = vpop.f32.mrf.mxu1  ;;  %5125 = vmatprep.mubr.msk.bf16.mxu0 %vm5502_vm7, %v5501_v28 }
 0xe0c   : > { %v3318_v36 = vpop.f32.mrf.mxu1 }
 0xe0d   : > { %v3319_v42 = vadd.f32 %v6252_v27, %v3318_v36 }
 0xe0e   : > { %v5135_v37 = vpop.f32.mrf.mxu1 }
 0xe10   : > { %v3321_v40 = vpop.f32.mrf.mxu1 }
 0xe11   : > { %v3322_v43 = vadd.f32 %v6252_v27, %v3321_v40  ;;  %5126 = vmatmul.mubr.msk.bf16.gmra.mxu0 %vm1065_vm6, %v5822_v14 }
 0xe12   : > { %v5136_v1 = vpop.f32.mrf.mxu1  ;;  %5149 = vmatprep.mubr.msk.bf16.mxu0 %vm1433_vm8, %v3341_v39 }
 0xe13   : > { %v6259_v45 = vpack.c.bf16 %v3322_v43, %v3319_v42 }
 0xe14   : > { %v3326_v46 = vpop.f32.mrf.mxu1 }
 0xe15   : > { %v3327_v39 = vadd.f32 %v6252_v27, %v3326_v46  ;;  %v3342_v46 = vpack.c.bf16 %v6238_v21, %v6238_v21  ;;  %v3344_v21 = vpack.c.bf16 %v6244_v34, %v6244_v34 }
 0xe16   : > { %v5139_v47 = vpop.f32.mrf.mxu1 }
 0xe17   : > { %v3540_v43 = vpack.c.bf16 %v3327_v39, %v3327_v39 }
 0xe18   : > { %v3329_v48 = vpop.f32.mrf.mxu1 }
 0xe19   : > { %v3330_v51 = vadd.f32 %v6252_v27, %v3329_v48 }
 0xe1a   : > { %v5140_v49 = vpop.f32.mrf.mxu1 }
 0xe1c   : > { %v3334_v50 = vpop.f32.mrf.mxu1 }
 0xe1d   : > { %v3335_v52 = vadd.f32 %v6252_v27, %v3334_v50 }
 0xe1e   : > { %v5143_v53 = vpop.f32.mrf.mxu1 }
 0xe1f   : > { %v6263_v54 = vpack.c.bf16 %v3335_v52, %v3330_v51 }
 0xe20   : > { %v6265_v56 = vpop.f32.mrf.mxu1 }
 0xe22   : > { %v5144_v14 = vpop.f32.mrf.mxu1 }
 0xe23   : > { %v3550_v14 = vsel %vm1635_vm9, %v3540_v43, 0 }
 0xea4   : > { %v3066_v38 = vpop.f32.mrf.mxu0 }
 0xea5   : > { %v6269_v58 = vadd.f32 %v3066_v38, %v2431_v63  ;;  %v3338_v63 = vadd.f32 %v6252_v27, %v6265_v56 }
 0xea6   : > { %v5087_v61 = vpop.f32.mrf.mxu0 }
 0xea7   : > { %v3542_v38 = vpack.c.bf16 %v3338_v63, %v3338_v63 }
 0xea8   : > { %v3069_v3 = vpop.f32.mrf.mxu0 }
 0xea9   : > { %v6273_v7 = vadd.f32 %v3069_v3, %v2434_v0  ;;  %v3607_v27 = vsel %vm1635_vm9, %v3542_v38, 0 }
 0xeaa   : > { %v5088_v5 = vpop.f32.mrf.mxu0 }
 0xeb1   : > { %v3074_v2 = vpop.f32.mrf.mxu0 }
 0xeb2   : > { %v6277_v8 = vadd.f32 %v3074_v2, %v2439_v41 }
 0xeb3   : > { %v5091_v10 = vpop.f32.mrf.mxu0 }
 0xeb5   : > { %v3077_v55 = vpop.f32.mrf.mxu0 }
 0xeb6   : > { %v6281_v11 = vadd.f32 %v3077_v55, %v2442_v9 }
 0xeb7   : > { %v5092_v16 = vpop.f32.mrf.mxu0 }
 0xeb9   : > { %v3082_v59 = vpop.f32.mrf.mxu0 }
 0xeba   : > { %v6285_v24 = vadd.f32 %v3082_v59, %v2447_v12 }
 0xebb   : > { %v5095_v26 = vpop.f32.mrf.mxu0 }
 0xebd   : > { %v3085_v4 = vpop.f32.mrf.mxu0 }
 0xebe   : > { %v6289_v17 = vadd.f32 %v3085_v4, %v2450_v18 }
 0xebf   : > { %v5096_v29 = vpop.f32.mrf.mxu0 }
 0xec1   : > { %v3236_v23 = vpop.f32.mrf.mxu0 }
 0xec2   : > { %v3237_v60 = vadd.f32 %v4577_v31, %v3236_v23 }
 0xec3   : > { %v5119_v57 = vpop.f32.mrf.mxu0 }
 0xec5   : > { %v3239_v19 = vpop.f32.mrf.mxu0 }
 0xec6   : > { %v3240_v33 = vadd.f32 %v4577_v31, %v3239_v19 }
 0xec7   : > { %v5120_v30 = vpop.f32.mrf.mxu0 }
 0xec8   : > { %v3345_v25 = vpack.c.bf16 %v3240_v33, %v3237_v60 }
 0xec9   : > { %v3244_v32 = vpop.f32.mrf.mxu0 }
 0xeca   : > { %v3245_v35 = vadd.f32 %v4577_v31, %v3244_v32  ;;  %v3356_v48 = vsel %vm1433_vm8, %v3345_v25, 0 }
 0xecb   : > { %v5123_v13 = vpop.f32.mrf.mxu0 }
 0xecc   : > { %v3346_v15 = vpack.c.bf16 %v3245_v35, %v3245_v35 }
 0xecd   : > { %v3247_v36 = vpop.f32.mrf.mxu0 }
 0xece   : > { %v3359_v37 = vsel %vm1433_vm8, %v3346_v15, 0  ;;  %5265 = vmatprep.subr.msk.bf16.mxu0 %vm1433_vm8, %v3346_v15  ;;  %v3248_v50 = vadd.f32 %v4577_v31, %v3247_v36 }
 0xecf   : > { %v5124_v22 = vpop.f32.mrf.mxu0  ;;  %5146 = vmatpush3.bf16.xpose.msra.mxu0 %v3359_v37 }
 0xed0   : > { %5266 = vmatprep.subr.msk.bf16.mxu0 %vm1433_vm8, %v3345_v25 }
 0xed1   : > { %v3252_v62 = vpop.f32.mrf.mxu0 }
 0xed2   : > { %v3253_v1 = vadd.f32 %v4577_v31, %v3252_v62 }
 0xed3   : > { %v5127_v40 = vpop.f32.mrf.mxu0 }
 0xed4   : > { %v3347_v52 = vpack.c.bf16 %v3253_v1, %v3248_v50 }
 0xed5   : > { %v3255_v42 = vpop.f32.mrf.mxu0 }
 0xed6   : > { %v3256_v47 = vadd.f32 %v4577_v31, %v3255_v42  ;;  %v3416_v61 = vsel %vm1433_vm8, %v3347_v52, 0 }
 0xed7   : > { %v5128_v49 = vpop.f32.mrf.mxu0  ;;  %5148 = vmatpush3.bf16.xpose.msra.mxu0 %v3356_v48 }
 0xed8   : > { %v3348_v51 = vpack.c.bf16 %v3256_v47, %v3256_v47  ;;  %5269 = vmatprep.subr.msk.bf16.mxu0 %vm1635_vm9, %v3540_v43 }
 0xeda   : > { %v3419_v53 = vsel %vm1433_vm8, %v3348_v51, 0  ;;  %5267 = vmatprep.subr.msk.bf16.mxu1 %vm1433_vm8, %v3348_v51 }
 0xedb   : > { %5154 = vmatpush3.bf16.xpose.msra.mxu1 %v3419_v53 }
 0xedc   : > { %5268 = vmatprep.subr.msk.bf16.mxu1 %vm1433_vm8, %v3347_v52 }
 0xede   : > { %5150 = vmatmul.mubr.msk.bf16.vlgmr.msra.gmra.mxu0 %vm1433_vm8, %v3342_v46 }
 0xedf   : > { %5162 = vmatpush3.bf16.msra.mxu0 %v3550_v14 }
 0xee0   : > { %5163 = vmatprep.subr.bf16.mxu0 %v6259_v45 }
 0xee3   : > { %5156 = vmatpush3.bf16.xpose.msra.mxu1 %v3416_v61  ;;  %5164 = vmatpush3.bf16.msra.mxu0 %v6259_v45 }
 0xee4   : > { %5270 = vmatprep.subr.msk.bf16.mxu1 %vm1635_vm9, %v3542_v38  ;;  %5177 = vmatprep.subr.bf16.mxu0 %v5501_v28 }
 0xeea   : > { %5158 = vmatmul.mubr.msk.bf16.vlgmr.msra.gmra.mxu1 %vm1433_vm8, %v3344_v21 }
 0xeeb   : > { %5170 = vmatpush3.bf16.msra.mxu1 %v3607_v27 }
 0xeec   : > { %5171 = vmatprep.subr.bf16.mxu1 %v6263_v54 }
 0xeef   : > { %5172 = vmatpush3.bf16.msra.mxu1 %v6263_v54 }
 0xef0   : > { %5191 = vmatprep.subr.bf16.mxu1 %v5501_v28 }
 0xf9e   : > { %v5151_v56 = vpop.f32.mrf.mxu0 }
 0xf9f   : > { %v3404_v5 = vadd.f32 %v6164_v44, %v5151_v56 }
 0xfa0   : > { %v3395_v45 = vpop.f32.mrf.mxu0 }
 0xfa1   : > { %v3396_v0 = vadd.f32 %v6161_v6, %v3395_v45  ;;  %v3475_v9 = vsel %vm1554_vm10, %v3404_v5, -inf }
 0xfa2   : > { %v5152_v3 = vpop.f32.mrf.mxu0 }
 0xfa3   : > { %v3469_v34 = vsel %vm1554_vm10, %v3396_v0, -inf }
 0xfa4   : > { %v3398_v41 = vpop.f32.mrf.mxu0  ;;  %3470 = vmax.xlane.f32.xlu0 %v3469_v34 }
 0xfa5   : > { %v3399_v2 = vadd.f32 %v6168_v20, %v3398_v41 }
 0xfa7   : > { %v3472_v10 = vsel %vm1554_vm10, %v3399_v2, -inf }
 0xfa8   : > { %3473 = vmax.xlane.f32.xlu1 %v3472_v10  ;;  %3476 = vmax.xlane.f32.xlu0 %v3475_v9 }
 0xfaa   : > { %v5159_v54 = vpop.f32.mrf.mxu1 }
 0xfab   : > { %v3464_v59 = vadd.f32 %v6164_v44, %v5159_v54 }
 0xfac   : > { %v3455_v55 = vpop.f32.mrf.mxu1 }
 0xfad   : > { %v3456_v16 = vadd.f32 %v6161_v6, %v3455_v55  ;;  %v3484_v29 = vsel %vm1554_vm10, %v3464_v59, -inf }
 0xfae   : > { %v5160_v12 = vpop.f32.mrf.mxu1 }
 0xfaf   : > { %v3478_v26 = vsel %vm1554_vm10, %v3456_v16, -inf }
 0xfb0   : > { %v3458_v18 = vpop.f32.mrf.mxu1  ;;  %3479 = vmax.xlane.f32.xlu1 %v3478_v26  ;;  %v4602_v26 = vld [vmem:[%s6548_s10 + $0xc] sm:$0xf] }
 0xfb1   : > { %v3459_v4 = vadd.f32 %v6168_v20, %v3458_v18  ;;  %v3672_v18 = vsel %vm1635_vm9, %v4602_v26, 0 }
 0xfb3   : > { %v3481_v23 = vsel %vm1554_vm10, %v3459_v4, -inf }
 0xfb4   : > { %3485 = vmax.xlane.f32.xlu1 %v3484_v29  ;;  %3482 = vmax.xlane.f32.xlu0 %v3481_v23 }
0x102d   : > { %v3471_v57 = vpop.xlane.xlu0 %3470 }
0x102e   : > { %v3487_v19 = vsub.f32 %v3396_v0, %v3471_v57 }
0x1030   : > { %v3493_v30 = vmul.f32 1.442695, %v3487_v19 }
0x1031   : > { %v3474_v31 = vpop.xlane.xlu1 %3473  ;;  %v3477_v6 = vpop.xlane.xlu0 %3476 }
0x1032   : > { %5419 = vpow2.f32 %v3493_v30  ;;  %v3488_v32 = vsub.f32 %v3399_v2, %v3474_v31  ;;  %v3489_v44 = vsub.f32 %v3404_v5, %v3477_v6 }
0x1034   : > { %v3495_v33 = vmul.f32 1.442695, %v3488_v32  ;;  %v3497_v35 = vmul.f32 1.442695, %v3489_v44 }
0x1036   : > { %5421 = vpow2.f32 %v3495_v33 }
0x1037   : > { %5423 = vpow2.f32 %v3497_v35 }
0x1039   : > { %v3480_v13 = vpop.xlane.xlu1 %3479 }
0x103a   : > { %v3490_v20 = vsub.f32 %v3456_v16, %v3480_v13  ;;  %v4606_v13 = vld [vmem:[%s6549_s20] ss:$0 sm:$0xff] }
0x103c   : > { %v3499_v60 = vmul.f32 1.442695, %v3490_v20 }
0x103d   : > { %v3486_v15 = vpop.xlane.xlu1 %3485  ;;  %v3483_v36 = vpop.xlane.xlu0 %3482 }
0x103e   : > { %5425 = vpow2.f32 %v3499_v60  ;;  %v3492_v25 = vsub.f32 %v3464_v59, %v3486_v15  ;;  %v3491_v37 = vsub.f32 %v3459_v4, %v3483_v36 }
0x103f   : > { %v5420_v22 = vpop.eup %5419 }
0x1040   : > { %v3503_v62 = vmul.f32 1.442695, %v3492_v25  ;;  %v3501_v39 = vmul.f32 1.442695, %v3491_v37  ;;  %v3505_v40 = vsel %vm1554_vm10, %v5420_v22, 0.0  ;;  %v5482_v25 = vld [vmem:[#allocation2] sm:$0xff] }
0x1041   : > { %3506 = vadd.xlane.f32.xlu0 %v3505_v40 }
0x1042   : > { %5427 = vpow2.f32 %v3503_v62 }
0x1043   : > { %v5422_v42 = vpop.eup %5421  ;;  %5429 = vpow2.f32 %v3501_v39 }
0x1044   : > { %v5424_v43 = vpop.eup %5423  ;;  %v3508_v1 = vsel %vm1554_vm10, %v5422_v42, 0.0 }
0x1045   : > { %3509 = vadd.xlane.f32.xlu1 %v3508_v1  ;;  %v3511_v47 = vsel %vm1554_vm10, %v5424_v43, 0.0 }
0x1046   : > { %3512 = vadd.xlane.f32.xlu0 %v3511_v47 }
0x104b   : > { %v5426_v48 = vpop.eup %5425 }
0x104c   : > { %v3514_v49 = vsel %vm1554_vm10, %v5426_v48, 0.0 }
0x104d   : > { %3515 = vadd.xlane.f32.xlu1 %v3514_v49 }
0x104f   : > { %v5428_v50 = vpop.eup %5427 }
0x1050   : > { %v5430_v51 = vpop.eup %5429  ;;  %v3520_v52 = vsel %vm1554_vm10, %v5428_v50, 0.0 }
0x1051   : > { %3521 = vadd.xlane.f32.xlu1 %v3520_v52  ;;  %v3517_v53 = vsel %vm1554_vm10, %v5430_v51, 0.0 }
0x1052   : > { %3518 = vadd.xlane.f32.xlu0 %v3517_v53 }
0x10ca   : > { %v3507_v46 = vpop.xlane.xlu0 %3506 }
0x10cb   : > { %5431 = vrcp.f32 %v3507_v46 }
0x10ce   : > { %v3510_v14 = vpop.xlane.xlu1 %3509 }
0x10cf   : > { %5433 = vrcp.f32 %v3510_v14  ;;  %v3513_v63 = vpop.xlane.xlu0 %3512 }
0x10d0   : > { %5435 = vrcp.f32 %v3513_v63 }
0x10d6   : > { %v3516_v38 = vpop.xlane.xlu1 %3515 }
0x10d7   : > { %5437 = vrcp.f32 %v3516_v38 }
0x10d8   : > { %v5432_v61 = vpop.eup %5431 }
0x10d9   : > { %v3529_v0 = vmul.f32 %v5432_v61, %v5420_v22 }
0x10da   : > { %v3522_v21 = vpop.xlane.xlu1 %3521 }
0x10db   : > { %5439 = vrcp.f32 %v3522_v21  ;;  %v3519_v27 = vpop.xlane.xlu0 %3518 }
0x10dc   : > { %v5434_v56 = vpop.eup %5433  ;;  %5441 = vrcp.f32 %v3519_v27 }
0x10dd   : > { %v5436_v45 = vpop.eup %5435  ;;  %v3530_v3 = vmul.f32 %v5434_v56, %v5422_v42  ;;  %v5483_v42 = vld [vmem:[#allocation2 + $0x8] sm:$0xff] }
0x10de   : > { %v3531_v5 = vmul.f32 %v5436_v45, %v5424_v43 }
0x10df   : > { %v3535_v34 = vpack.c.bf16 %v3530_v3, %v3529_v0 }
0x10e0   : > { %v3536_v41 = vpack.c.bf16 %v3531_v5, %v3531_v5 }
0x10e1   : > { %5165 = vmatprep.mubr.msk.bf16.mxu0 %vm1554_vm10, %v3535_v34 }
0x10e2   : > { %5166 = vmatmul.mubr.msk.bf16.vlgmr.msra.gmra.mxu0 %vm1554_vm10, %v3536_v41 }
0x10e3   : > { %5179 = vmatprep.mubr.msk.bf16.mxu0 %vm5502_vm7, %v5501_v28  ;;  %5178 = vmatpush3.bf16.msra.mxu0 %v3672_v18 }
0x10e4   : > { %v5438_v2 = vpop.eup %5437  ;;  %5207 = vmatprep.subr.bf16.mxu0 %v5501_v28 }
0x10e5   : > { %v3532_v55 = vmul.f32 %v5438_v2, %v5426_v48  ;;  %v5487_v2 = vld [vmem:[#allocation2 + $0x28] sm:$0xff] }
0x10e8   : > { %v5440_v10 = vpop.eup %5439 }
0x10e9   : > { %v5442_v9 = vpop.eup %5441  ;;  %v3534_v54 = vmul.f32 %v5440_v10, %v5428_v50 }
0x10ea   : > { %v3533_v16 = vmul.f32 %v5442_v9, %v5430_v51 }
0x10eb   : > { %v3538_v12 = vpack.c.bf16 %v3534_v54, %v3534_v54 }
0x10ec   : > { %v3537_v59 = vpack.c.bf16 %v3533_v16, %v3532_v55 }
0x10ee   : > { %5173 = vmatprep.mubr.msk.bf16.mxu1 %vm1554_vm10, %v3537_v59 }
0x10ef   : > { %5174 = vmatmul.mubr.msk.bf16.vlgmr.msra.gmra.mxu1 %vm1554_vm10, %v3538_v12 }
0x10f0   : > { %5195 = vmatprep.mubr.msk.bf16.mxu1 %vm5502_vm7, %v5501_v28 }
0x11a2   : > { %v5167_v4 = vpop.f32.mrf.mxu0 }
0x11a4   : > { %v3586_v29 = vpop.f32.mrf.mxu0 }
0x11a6   : > { %v5168_v23 = vpop.f32.mrf.mxu0 }
0x11a8   : > { %v3589_v57 = vpop.f32.mrf.mxu0 }
0x11a9   : > { %v3657_v19 = vpack.c.bf16 %v3589_v57, %v3586_v29 }
0x11ab   : > { %5180 = vmatmul.mubr.msk.bf16.vlgmr.msra.gmra.mxu0 %vm1433_vm8, %v3657_v19 }
0x11ac   : > { %5183 = vmatprep.mubr.msk.bf16.mxu0 %vm5502_vm7, %v5501_v28 }
0x11af   : > { %v5175_v30 = vpop.f32.mrf.mxu1 }
0x11b1   : > { %v3643_v31 = vpop.f32.mrf.mxu1 }
0x11b2   : > { %v3658_v6 = vpack.c.bf16 %v3643_v31, %v5167_v4 }
0x11b3   : > { %v5176_v32 = vpop.f32.mrf.mxu1 }
0x11b4   : > { %5184 = vmatmul.mubr.msk.bf16.gmra.mxu0 %vm1433_vm8, %v3658_v6 }
0x11b5   : > { %5187 = vmatprep.mubr.msk.bf16.mxu0 %vm5502_vm7, %v5501_v28  ;;  %v3646_v44 = vpop.f32.mrf.mxu1 }
0x11b6   : > { %v3659_v33 = vpack.c.bf16 %v5175_v30, %v3646_v44 }
0x11bc   : > { %5188 = vmatmul.mubr.msk.bf16.gmra.mxu0 %vm1433_vm8, %v3659_v33 }
0x11bd   : > { %5223 = vmatprep.mubr.msk.bf16.mxu0 %vm5502_vm7, %v5501_v28 }
0x126b   : > { %v3708_v35 = vpop.f32.mrf.mxu0 }
0x126c   : > { %v3731_v20 = vadd.f32 %v3708_v35, %v6269_v58 }
0x126d   : > { %v5181_v60 = vpop.f32.mrf.mxu0 }
0x126e   : > { %v3744_v15 = vadd.f32 %v4606_v13, %v3731_v20 }
0x126f   : > { %v3711_v36 = vpop.f32.mrf.mxu0 }
0x1270   : > { %v6363_v37 = vadd.f32 %v5482_v25, %v3744_v15  ;;  %v3732_v22 = vadd.f32 %v3711_v36, %v6273_v7  ;;  %v5484_v7 = vld [vmem:[#allocation2 + $0x10] sm:$0xff] }
0x1271   : > { %v5182_v62 = vpop.f32.mrf.mxu0 }
0x1272   : > { %v3745_v39 = vadd.f32 %v4606_v13, %v3732_v22  ;;  %v3758_v40 = vsel %vm1065_vm6, %v6363_v37, 0.0 }
0x1273   : > { %3759 = vadd.xlane.f32.xlu0 %v3758_v40  ;;  %v5325_v40 = vld [vmem:[%s5670_s3 + $0x8] sm:$0xff]  }
0x1274   : > { %v6368_v43 = vadd.f32 %v5483_v42, %v3745_v39  ;;  %v3716_v1 = vpop.f32.mrf.mxu0  ;;  %5192 = vmatpush3.bf16.msra.mxu1 %v5325_v40  ;;  %v5326_v42 = vld [vmem:[%s5670_s3] sm:$0xff]  }
0x1275   : > { %v3733_v58 = vadd.f32 %v3716_v1, %v6277_v8  ;;  %v5485_v8 = vld [vmem:[#allocation2 + $0x18] sm:$0xff]  ;;  %5193 = vmatprep.subr.bf16.mxu1 %v5501_v28  ;;  %v4609_v40 = vld [vmem:[%s808_s28] ss:$0 sm:$0xff] }
0x1276   : > { %v5185_v47 = vpop.f32.mrf.mxu0  ;;  %v3761_v48 = vsel %vm1065_vm6, %v6368_v43, 0.0 }
0x1277   : > { %v3746_v49 = vadd.f32 %v4606_v13, %v3733_v58  ;;  %3762 = vadd.xlane.f32.xlu1 %v3761_v48 }
0x1278   : > { %v3719_v50 = vpop.f32.mrf.mxu0  ;;  %5194 = vmatpush3.bf16.msra.mxu1 %v5326_v42 }
0x1279   : > { %v6373_v51 = vadd.f32 %v5484_v7, %v3746_v49  ;;  %v3734_v52 = vadd.f32 %v3719_v50, %v6281_v11  ;;  %v5486_v11 = vld [vmem:[#allocation2 + $0x20] sm:$0xff] }
0x127a   : > { %v5186_v53 = vpop.f32.mrf.mxu0 }
0x127b   : > { %v3747_v46 = vadd.f32 %v4606_v13, %v3734_v52  ;;  %v3764_v14 = vsel %vm1065_vm6, %v6373_v51, 0.0 }
0x127c   : > { %3765 = vadd.xlane.f32.xlu0 %v3764_v14  ;;  %v3724_v63 = vpop.f32.mrf.mxu0 }
0x127d   : > { %v6378_v38 = vadd.f32 %v5485_v8, %v3747_v46  ;;  %v3735_v61 = vadd.f32 %v3724_v63, %v6285_v24 }
0x127e   : > { %v5189_v21 = vpop.f32.mrf.mxu0 }
0x127f   : > { %v3748_v27 = vadd.f32 %v4606_v13, %v3735_v61  ;;  %v3767_v56 = vsel %vm1065_vm6, %v6378_v38, 0.0 }
0x1280   : > { %3768 = vadd.xlane.f32.xlu1 %v3767_v56  ;;  %v3727_v45 = vpop.f32.mrf.mxu0  ;;  %v4607_v56 = vld [vmem:[%s797_s23] ss:$0 sm:$0xff] }
0x1281   : > { %v6383_v0 = vadd.f32 %v5486_v11, %v3748_v27  ;;  %v3736_v3 = vadd.f32 %v3727_v45, %v6289_v17 }
0x1282   : > { %v5190_v5 = vpop.f32.mrf.mxu0 }
0x1283   : > { %v3749_v34 = vadd.f32 %v4606_v13, %v3736_v3  ;;  %v3770_v41 = vsel %vm1065_vm6, %v6383_v0, 0.0 }
0x1284   : > { %3771 = vadd.xlane.f32.xlu0 %v3770_v41 }
0x1285   : > { %v6388_v24 = vadd.f32 %v5487_v2, %v3749_v34 }
0x1287   : > { %v3773_v10 = vsel %vm1065_vm6, %v6388_v24, 0.0 }
0x1288   : > { %3774 = vadd.xlane.f32.xlu1 %v3773_v10  ;;  %v4608_v10 = vld [vmem:[%s800_s24] ss:$0 sm:$0xff]  ;;  %s6554_s24 = sld [smem:[#allocation17_spill]] (!%p4630_p5) }
0x12fc   : > { %v3760_v9 = vpop.xlane.xlu0 %3759 }
0x12fd   : > { %v3776_v54 = vmul.f32 0.03125, %v3760_v9 }
0x12ff   : > { %v3782_v55 = vsub.f32 %v6363_v37, %v3776_v54 }
0x1300   : > { %v3763_v16 = vpop.xlane.xlu1 %3762 }
0x1301   : > { %v3777_v12 = vmul.f32 0.03125, %v3763_v16  ;;  %v3788_v17 = vmul.f32 %v3782_v55, %v3782_v55 }
0x1303   : > { %v3783_v59 = vsub.f32 %v6368_v43, %v3777_v12  ;;  %v3794_v26 = vsel %vm1065_vm6, %v3788_v17, 0.0 }
0x1304   : > { %3795 = vadd.xlane.f32.xlu0 %v3794_v26 }
0x1305   : > { %v3766_v18 = vpop.xlane.xlu0 %3765  ;;  %v3789_v4 = vmul.f32 %v3783_v59, %v3783_v59 }
0x1306   : > { %v3778_v29 = vmul.f32 0.03125, %v3766_v18 }
0x1307   : > { %v3797_v23 = vsel %vm1065_vm6, %v3789_v4, 0.0 }
0x1308   : > { %v6397_v57 = vsub.f32 %v6373_v51, %v3778_v29  ;;  %3798 = vadd.xlane.f32.xlu1 %v3797_v23 }
0x1309   : > { %v3769_v19 = vpop.xlane.xlu1 %3768 }
0x130a   : > { %v3779_v30 = vmul.f32 0.03125, %v3769_v19  ;;  %v3790_v31 = vmul.f32 %v6397_v57, %v6397_v57 }
0x130c   : > { %v3785_v6 = vsub.f32 %v6378_v38, %v3779_v30  ;;  %v3800_v32 = vsel %vm1065_vm6, %v3790_v31, 0.0 }
0x130d   : > { %3801 = vadd.xlane.f32.xlu0 %v3800_v32  ;;  %v3772_v44 = vpop.xlane.xlu0 %3771 }
0x130e   : > { %v3780_v33 = vmul.f32 0.03125, %v3772_v44  ;;  %v3791_v35 = vmul.f32 %v3785_v6, %v3785_v6 }
0x1310   : > { %v3786_v13 = vsub.f32 %v6383_v0, %v3780_v33  ;;  %v3803_v20 = vsel %vm1065_vm6, %v3791_v35, 0.0 }
0x1311   : > { %3804 = vadd.xlane.f32.xlu1 %v3803_v20  ;;  %v3775_v60 = vpop.xlane.xlu1 %3774 }
0x1312   : > { %v3781_v15 = vmul.f32 0.03125, %v3775_v60  ;;  %v3792_v36 = vmul.f32 %v3786_v13, %v3786_v13  ;;  %v5328_v60 = vld [vmem:[%s5680_s8 + $0x30] sm:$0xff]  }
0x1314   : > { %v3787_v25 = vsub.f32 %v6388_v24, %v3781_v15  ;;  %v3806_v22 = vsel %vm1065_vm6, %v3792_v36, 0.0  ;;  %v5329_v15 = vld [vmem:[%s5680_s8 + $0x28] sm:$0xff]   ;;  %v5330_v36 = vld [vmem:[%s5680_s8 + $0x20] sm:$0xff]  }
0x1315   : > { %3807 = vadd.xlane.f32.xlu0 %v3806_v22  ;;  %v5332_v22 = vld [vmem:[%s5680_s8 + $0x10] sm:$0xff]  }
0x1316   : > { %v3793_v62 = vmul.f32 %v3787_v25, %v3787_v25 }
0x1318   : > { %v3809_v39 = vsel %vm1065_vm6, %v3793_v62, 0.0  ;;  %v5333_v62 = vld [vmem:[%s5680_s8 + $0x8] sm:$0xff]  }
0x1319   : > { %3810 = vadd.xlane.f32.xlu1 %v3809_v39  ;;  %v5334_v39 = vld [vmem:[%s5680_s8] sm:$0xff]  }
0x138d   : > { %v3796_v1 = vpop.xlane.xlu0 %3795 }
0x138e   : > { %v3812_v58 = vmul.f32 0.03125, %v3796_v1 }
0x1390   : > { %v3818_v47 = vadd.f32 1e-05, %v3812_v58 }
0x1391   : > { %v3799_v48 = vpop.xlane.xlu1 %3798 }
0x1392   : > { %5443 = vrsqrt.f32 %v3818_v47  ;;  %v3813_v49 = vmul.f32 0.03125, %v3799_v48 }
0x1394   : > { %v3819_v50 = vadd.f32 1e-05, %v3813_v49 }
0x1396   : > { %5445 = vrsqrt.f32 %v3819_v50  ;;  %v3802_v7 = vpop.xlane.xlu0 %3801 }
0x1397   : > { %v3814_v52 = vmul.f32 0.03125, %v3802_v7 }
0x1399   : > { %v3820_v53 = vadd.f32 1e-05, %v3814_v52 }
0x139a   : > { %v3805_v46 = vpop.xlane.xlu1 %3804 }
0x139b   : > { %5447 = vrsqrt.f32 %v3820_v53  ;;  %v3815_v14 = vmul.f32 0.03125, %v3805_v46 }
0x139d   : > { %v3821_v63 = vadd.f32 1e-05, %v3815_v14 }
0x139e   : > { %v3808_v8 = vpop.xlane.xlu0 %3807 }
0x139f   : > { %v5444_v61 = vpop.eup %5443  ;;  %5449 = vrsqrt.f32 %v3821_v63  ;;  %v3816_v21 = vmul.f32 0.03125, %v3808_v8 }
0x13a0   : > { %v3830_v27 = vmul.f32 %v5444_v61, %v3782_v55 }
0x13a1   : > { %v3822_v45 = vadd.f32 1e-05, %v3816_v21 }
0x13a2   : > { %v3811_v11 = vpop.xlane.xlu1 %3810  ;;  %v3842_v34 = vmul.f32 %v4607_v56, %v3830_v27 }
0x13a3   : > { %v5446_v3 = vpop.eup %5445  ;;  %5451 = vrsqrt.f32 %v3822_v45  ;;  %v3817_v5 = vmul.f32 0.03125, %v3811_v11 }
0x13a4   : > { %v3831_v41 = vmul.f32 %v5446_v3, %v3783_v59  ;;  %v3854_v55 = vadd.f32 %v4608_v10, %v3842_v34 }
0x13a5   : > { %v3823_v2 = vadd.f32 1e-05, %v3817_v5 }
0x13a6   : > { %v3843_v9 = vmul.f32 %v4607_v56, %v3831_v41 }
0x13a7   : > { %5453 = vrsqrt.f32 %v3823_v2 }
0x13a8   : > { %v5448_v54 = vpop.eup %5447  ;;  %v3855_v16 = vadd.f32 %v4608_v10, %v3843_v9 }
0x13a9   : > { %v3832_v12 = vmul.f32 %v5448_v54, %v6397_v57 }
0x13aa   : > { %v3865_v17 = vpack.c.bf16 %v3855_v16, %v3854_v55 }
0x13ab   : > { %v3844_v59 = vmul.f32 %v4607_v56, %v3832_v12 }
0x13ac   : > { %v5450_v26 = vpop.eup %5449  ;;  %5196 = vmatmul.mubr.msk.bf16.vlgmr.msra.gmra.mxu1 %vm1065_vm6, %v3865_v17 }
0x13ad   : > { %v3833_v18 = vmul.f32 %v5450_v26, %v3785_v6  ;;  %5199 = vmatprep.mubr.msk.bf16.mxu1 %vm5502_vm7, %v5501_v28  ;;  %v3856_v19 = vadd.f32 %v4608_v10, %v3844_v59 }
0x13af   : > { %v3845_v4 = vmul.f32 %v4607_v56, %v3833_v18 }
0x13b0   : > { %v5452_v29 = vpop.eup %5451 }
0x13b1   : > { %v3834_v23 = vmul.f32 %v5452_v29, %v3786_v13  ;;  %v3857_v30 = vadd.f32 %v4608_v10, %v3845_v4  ;;  %v5327_v13 = vld [vmem:[%s5680_s8 + $0x38] sm:$0xff]  }
0x13b2   : > { %5208 = vmatpush3.bf16.msra.mxu0 %v5327_v13 }
0x13b3   : > { %v3866_v31 = vpack.c.bf16 %v3857_v30, %v3856_v19  ;;  %v3846_v44 = vmul.f32 %v4607_v56, %v3834_v23  ;;  %5209 = vmatprep.subr.bf16.mxu0 %v5501_v28 }
0x13b4   : > { %v5454_v32 = vpop.eup %5453 }
0x13b5   : > { %v3835_v57 = vmul.f32 %v5454_v32, %v3787_v25  ;;  %5200 = vmatmul.mubr.msk.bf16.gmra.mxu1 %vm1065_vm6, %v3866_v31  ;;  %v3858_v33 = vadd.f32 %v4608_v10, %v3846_v44  ;;  %v5331_v25 = vld [vmem:[%s5680_s8 + $0x18] sm:$0xff]  }
0x13b6   : > { %5203 = vmatprep.mubr.msk.bf16.mxu1 %vm5502_vm7, %v5501_v28  ;;  %5210 = vmatpush3.bf16.msra.mxu0 %v5328_v60 }
0x13b7   : > { %v3847_v6 = vmul.f32 %v4607_v56, %v3835_v57  ;;  %5211 = vmatprep.subr.bf16.mxu0 %v5501_v28 }
0x13b9   : > { %v3859_v35 = vadd.f32 %v4608_v10, %v3847_v6 }
0x13ba   : > { %5212 = vmatpush3.bf16.msra.mxu0 %v5329_v15 }
0x13bb   : > { %v3867_v20 = vpack.c.bf16 %v3859_v35, %v3858_v33  ;;  %5213 = vmatprep.subr.bf16.mxu0 %v5501_v28 }
0x13bd   : > { %5204 = vmatmul.mubr.msk.bf16.gmra.mxu1 %vm1065_vm6, %v3867_v20 }
0x13be   : > { %5214 = vmatpush3.bf16.msra.mxu0 %v5330_v36 }
0x13bf   : > { %5215 = vmatprep.subr.bf16.mxu0 %v5501_v28 }
0x13c2   : > { %5216 = vmatpush3.bf16.msra.mxu0 %v5331_v25 }
0x13c3   : > { %5217 = vmatprep.subr.bf16.mxu0 %v5501_v28 }
0x13c6   : > { %5218 = vmatpush3.bf16.msra.mxu0 %v5332_v22 }
0x13c7   : > { %5219 = vmatprep.subr.bf16.mxu0 %v5501_v28 }
0x13ca   : > { %5220 = vmatpush3.bf16.msra.mxu0 %v5333_v62 }
0x13cb   : > { %5221 = vmatprep.subr.bf16.mxu0 %v5501_v28 }
0x13ce   : > { %5222 = vmatpush3.bf16.msra.mxu0 %v5334_v39 }
0x146c   : > { %v3929_v42 = vpop.f32.mrf.mxu1 }
0x146d   : > { %v3930_v1 = vadd.f32 %v4609_v40, %v3929_v42  ;;  %v4621_v42 = vld [vmem:[%s6550_s19] ss:$0 sm:$0xff] }
0x146e   : > { %v5197_v58 = vpop.f32.mrf.mxu1 }
0x146f   : > { %v4615_v47 = vmul.f32 -1.702, %v3930_v1 }
0x1470   : > { %v3932_v48 = vpop.f32.mrf.mxu1 }
0x1471   : > { %v3964_v49 = vmul.f32 1.442695, %v4615_v47  ;;  %v3933_v50 = vadd.f32 %v4609_v40, %v3932_v48 }
0x1472   : > { %v5198_v7 = vpop.f32.mrf.mxu1 }
0x1473   : > { %5455 = vpow2.f32 %v3964_v49  ;;  %v4616_v52 = vmul.f32 -1.702, %v3933_v50 }
0x1475   : > { %v3966_v53 = vmul.f32 1.442695, %v4616_v52  ;;  %v3937_v46 = vpop.f32.mrf.mxu1 }
0x1476   : > { %v3938_v14 = vadd.f32 %v4609_v40, %v3937_v46 }
0x1477   : > { %5457 = vpow2.f32 %v3966_v53  ;;  %v5201_v63 = vpop.f32.mrf.mxu1 }
0x1478   : > { %v4617_v8 = vmul.f32 -1.702, %v3938_v14 }
0x1479   : > { %v3940_v61 = vpop.f32.mrf.mxu1 }
0x147a   : > { %v3968_v21 = vmul.f32 1.442695, %v4617_v8  ;;  %v3941_v27 = vadd.f32 %v4609_v40, %v3940_v61 }
0x147b   : > { %v5202_v56 = vpop.f32.mrf.mxu1 }
0x147c   : > { %5459 = vpow2.f32 %v3968_v21  ;;  %v4618_v45 = vmul.f32 -1.702, %v3941_v27 }
0x147d   : > { %v3945_v11 = vpop.f32.mrf.mxu1 }
0x147e   : > { %v3970_v3 = vmul.f32 1.442695, %v4618_v45  ;;  %v3946_v5 = vadd.f32 %v4609_v40, %v3945_v11 }
0x147f   : > { %v5205_v34 = vpop.f32.mrf.mxu1 }
0x1480   : > { %v5456_v41 = vpop.eup %5455  ;;  %5461 = vpow2.f32 %v3970_v3  ;;  %v4619_v2 = vmul.f32 -1.702, %v3946_v5 }
0x1481   : > { %v3976_v10 = vadd.f32 1.0, %v5456_v41  ;;  %v3948_v9 = vpop.f32.mrf.mxu1 }
0x1482   : > { %v3972_v54 = vmul.f32 1.442695, %v4619_v2  ;;  %v3949_v55 = vadd.f32 %v4609_v40, %v3948_v9 }
0x1483   : > { %v5206_v16 = vpop.f32.mrf.mxu1 }
0x1484   : > { %v5458_v12 = vpop.eup %5457  ;;  %5463 = vpow2.f32 %v3972_v54  ;;  %v4620_v17 = vmul.f32 -1.702, %v3949_v55 }
0x1485   : > { %5465 = vrcp.f32 %v3976_v10  ;;  %v3977_v26 = vadd.f32 1.0, %v5458_v12 }
0x1486   : > { %v3974_v18 = vmul.f32 1.442695, %v4620_v17 }
0x1487   : > { %5467 = vrcp.f32 %v3977_v26 }
0x1488   : > { %5469 = vpow2.f32 %v3974_v18 }
0x1489   : > { %v5460_v59 = vpop.eup %5459 }
0x148a   : > { %v3978_v4 = vadd.f32 1.0, %v5460_v59 }
0x148c   : > { %5471 = vrcp.f32 %v3978_v4 }
0x148d   : > { %v5462_v29 = vpop.eup %5461 }
0x148e   : > { %v3979_v23 = vadd.f32 1.0, %v5462_v29 }
0x1490   : > { %5473 = vrcp.f32 %v3979_v23 }
0x1491   : > { %v5464_v19 = vpop.eup %5463 }
0x1492   : > { %v5466_v30 = vpop.eup %5465  ;;  %v3980_v31 = vadd.f32 1.0, %v5464_v19 }
0x1493   : > { %v3994_v44 = vmul.f32 %v5466_v30, %v3930_v1 }
0x1494   : > { %v5468_v32 = vpop.eup %5467  ;;  %5475 = vrcp.f32 %v3980_v31 }
0x1495   : > { %v5470_v57 = vpop.eup %5469  ;;  %v3995_v6 = vmul.f32 %v5468_v32, %v3933_v50 }
0x1496   : > { %v3981_v33 = vadd.f32 1.0, %v5470_v57 }
0x1497   : > { %v4017_v35 = vpack.c.bf16 %v3995_v6, %v3994_v44 }
0x1498   : > { %5477 = vrcp.f32 %v3981_v33 }
0x1499   : > { %5224 = vmatmul.mubr.bf16.vlgmr.msra.gmra.mxu0 %v4017_v35  ;;  %v5472_v20 = vpop.eup %5471 }
0x149a   : > { %5227 = vmatprep.mubr.msk.bf16.mxu0 %vm5502_vm7, %v5501_v28  ;;  %v3996_v60 = vmul.f32 %v5472_v20, %v3938_v14 }
0x149d   : > { %v5474_v13 = vpop.eup %5473 }
0x149e   : > { %v3997_v15 = vmul.f32 %v5474_v13, %v3941_v27 }
0x14a0   : > { %v4018_v36 = vpack.c.bf16 %v3997_v15, %v3996_v60 }
0x14a1   : > { %v5476_v25 = vpop.eup %5475 }
0x14a2   : > { %5228 = vmatmul.mubr.bf16.gmra.mxu0 %v4018_v36  ;;  %v3998_v62 = vmul.f32 %v5476_v25, %v3946_v5 }
0x14a3   : > { %5231 = vmatprep.mubr.msk.bf16.mxu0 %vm5502_vm7, %v5501_v28 }
0x14a5   : > { %v5478_v22 = vpop.eup %5477 }
0x14a6   : > { %v3999_v39 = vmul.f32 %v5478_v22, %v3949_v55 }
0x14a8   : > { %v4019_v40 = vpack.c.bf16 %v3999_v39, %v3998_v62 }
0x14aa   : > { %5232 = vmatmul.mubr.bf16.gmra.mxu0 %v4019_v40 }
0x1559   : > { %v4108_v1 = vpop.f32.mrf.mxu0 }
0x155a   : > { %v4109_v58 = vadd.f32 %v4621_v42, %v4108_v1 }
0x155b   : > { %v5225_v47 = vpop.f32.mrf.mxu0 }
0x155c   : > { %v4131_v48 = vadd.f32 %v4109_v58, %v6363_v37 }
0x155d   : > { %v4111_v49 = vpop.f32.mrf.mxu0 }
0x155e   : > { %4137 = vst.msk [vmem:[#allocation2] sm:$0xff] %vm1065_vm6, %v4131_v48  ;;  %v4112_v50 = vadd.f32 %v4621_v42, %v4111_v49 }
0x155f   : > { %v5226_v28 = vpop.f32.mrf.mxu0 }
0x1560   : > { %v4132_v7 = vadd.f32 %v4112_v50, %v6368_v43 }
0x1562   : > { %4138 = vst.msk [vmem:[#allocation2 + $0x8] sm:$0xff] %vm1065_vm6, %v4132_v7  ;;  %v4116_v52 = vpop.f32.mrf.mxu0 }
0x1563   : > { %v4117_v53 = vadd.f32 %v4621_v42, %v4116_v52 }
0x1564   : > { %v5229_v46 = vpop.f32.mrf.mxu0 }
0x1565   : > { %v4133_v14 = vadd.f32 %v4117_v53, %v6373_v51 }
0x1566   : > { %v4119_v63 = vpop.f32.mrf.mxu0 }
0x1567   : > { %4139 = vst.msk [vmem:[#allocation2 + $0x10] sm:$0xff] %vm1065_vm6, %v4133_v14  ;;  %v4120_v8 = vadd.f32 %v4621_v42, %v4119_v63 }
0x1568   : > { %v5230_v61 = vpop.f32.mrf.mxu0 }
0x1569   : > { %v4134_v37 = vadd.f32 %v4120_v8, %v6378_v38 }
0x156a   : > { %v4124_v21 = vpop.f32.mrf.mxu0 }
0x156b   : > { %4140 = vst.msk [vmem:[#allocation2 + $0x18] sm:$0xff] %vm1065_vm6, %v4134_v37  ;;  %v4125_v27 = vadd.f32 %v4621_v42, %v4124_v21 }
0x156c   : > { %v5233_v56 = vpop.f32.mrf.mxu0 }
0x156d   : > { %v4135_v43 = vadd.f32 %v4125_v27, %v6383_v0 }
0x156e   : > { %v4127_v45 = vpop.f32.mrf.mxu0 }
0x156f   : > { %4141 = vst.msk [vmem:[#allocation2 + $0x20] sm:$0xff] %vm1065_vm6, %v4135_v43  ;;  %v4128_v11 = vadd.f32 %v4621_v42, %v4127_v45  ;;  %4146 = sbr.rel (%p4630_p5) target bundleno = 6019 (0x1783), region = 112 }
0x1570   : > { %v5234_v3 = vpop.f32.mrf.mxu0 }
0x1571   : > { %v4136_v51 = vadd.f32 %v4128_v11, %v6388_v24 }
0x1573   : > { %4142 = vst.msk [vmem:[#allocation2 + $0x28] sm:$0xff] %vm1065_vm6, %v4136_v51 }
0x1574   : > { %v4147_v38 = vld [vmem:[#allocation2] sm:$0xff]  ;;  %v4148_v5 = vld [vmem:[#allocation2 + $0x18] sm:$0xff]  ;;  %vm4154_vm11 = vcmask 1041409   ;;  %vm4157_vm12 = vcmask 254976   ;;  %v5488_v18 = vld [vmem:[%s6551_s21 + $0x8] sm:$0xff]   ;;  %v5503_v59 = vmov 0.0  }
0x1575   : > { %v4153_v34 = vrot.slane %v4148_v5, 7  ;;  %5235 = vmatprep.subr.bf16.mxu0 %v5503_v59  ;;  %vm5504_vm13 = vmmov 0   ;;  %v5489_v4 = vld [vmem:[%s6551_s21] sm:$0xff]  }
0x1576   : > { %5239 = vmatprep.mubr.msk.bf16.mxu0 %vm5504_vm13, %v5503_v59  ;;  %5236 = vmatpush3.bf16.msra.mxu0 %v5488_v18  ;;  %v4631_v31 = vld [vmem:[%s6552_s0] ss:$0 sm:$0xff] }
0x1577   : > { %v4155_v41 = vsel %vm4154_vm11, %v4153_v34, %v4147_v38  ;;  %5237 = vmatprep.subr.bf16.mxu0 %v5503_v59  ;;  %v4632_v44 = vld [vmem:[%s6553_s1] ss:$0 sm:$0xff] }
0x1578   : > { %v4158_v0 = vsel %vm4157_vm12, %v4155_v41, 0.0 }
0x1579   : > { %4159 = vadd.xlane.f32.xlu0 %v4158_v0 }
0x157a   : > { %5238 = vmatpush3.bf16.msra.mxu0 %v5489_v4 }
0x1602   : > { %v4160_v2 = vpop.xlane.xlu0 %4159 }
0x1603   : > { %v4161_v10 = vmul.f32 0.03125, %v4160_v2 }
0x1605   : > { %v4163_v9 = vrot.slane %v4161_v10, 1  ;;  %v4166_v54 = vsub.f32 %v4147_v38, %v4161_v10 }
0x1607   : > { %v4167_v24 = vsub.f32 %v4148_v5, %v4163_v9  ;;  %v4168_v16 = vmul.f32 %v4166_v54, %v4166_v54 }
0x1609   : > { %v4169_v55 = vmul.f32 %v4167_v24, %v4167_v24 }
0x160b   : > { %v4172_v12 = vrot.slane %v4169_v55, 7 }
0x160d   : > { %v4173_v17 = vsel %vm4154_vm11, %v4172_v12, %v4168_v16 }
0x160e   : > { %v4175_v26 = vsel %vm4157_vm12, %v4173_v17, 0.0 }
0x160f   : > { %4176 = vadd.xlane.f32.xlu0 %v4175_v26 }
0x1698   : > { %v4177_v29 = vpop.xlane.xlu0 %4176 }
0x1699   : > { %v4178_v23 = vmul.f32 0.03125, %v4177_v29 }
0x169b   : > { %v4179_v19 = vadd.f32 1e-05, %v4178_v23 }
0x169d   : > { %5490 = vrsqrt.f32 %v4179_v19 }
0x16aa   : > { %v5491_v30 = vpop.eup %5490 }
0x16ab   : > { %v4182_v32 = vrot.slane %v5491_v30, 1  ;;  %v4185_v57 = vmul.f32 %v5491_v30, %v4166_v54 }
0x16ad   : > { %v4186_v6 = vmul.f32 %v4182_v32, %v4167_v24  ;;  %v4193_v33 = vmul.f32 %v4631_v31, %v4185_v57 }
0x16af   : > { %v4194_v35 = vmul.f32 %v4631_v31, %v4186_v6  ;;  %v4201_v20 = vadd.f32 %v4632_v44, %v4193_v33 }
0x16b1   : > { %v4202_v13 = vadd.f32 %v4632_v44, %v4194_v35  ;;  %v4207_v60 = vpack.c.bf16 %v4201_v20, %v4201_v20 }
0x16b3   : > { %v4208_v15 = vpack.c.bf16 %v4202_v13, %v4202_v13  ;;  %v4211_v25 = vunpack.c.l.b16 %v4207_v60 }
0x16b5   : > { %v4212_v36 = vunpack.c.l.b16 %v4208_v15 }
0x16b7   : > { %v4213_v22 = vrot.slane %v4212_v36, 7 }
0x16b9   : > { %v4214_v62 = vsel %vm4154_vm11, %v4213_v22, %v4211_v25 }
0x16ba   : > { %v4215_v39 = vpack.c.b16 %v4214_v62, %v4214_v62 }
0x16bc   : > { %5240 = vmatmul.mubr.msk.bf16.vlgmr.msra.gmra.mxu0 %vm1065_vm6, %v4215_v39 }
0x177c   : > { %v4265_v40 = vpop.f32.mrf.mxu0 }
0x177d   : > { %4271 = vst.msk [vmem:[%s6554_s24] sm:$0x3] %vm4157_vm12, %v4265_v40 }
0x177e   : > { %v5241_v42 = vpop.f32.mrf.mxu0 }
0x1780   : > { %v4268_v1 = vpop.f32.mrf.mxu0 }
0x1782   : > { %v5242_v58 = vpop.f32.mrf.mxu0 }
0x1783 PF: > { %s6555_s23 = sld [smem:[#allocation4_spill]] }
0x1789   : > { %s31_s2 = sadd.s32 1, %s6555_s23  }
0x178a   : > { %p28_p6 = scmp.ge.s32.totalorder %s31_s2, 4  }
0x178c   :  { %30 = sbr.rel (!%p28_p6) target bundleno = 13 (0xd), region = 196 }

// kernel: custom_clip_forward.3
= control target key start
LH: loop header
LB: loop body
LE: loop exit
PB: predicated region body
PF: predicated region fallthrough
CT: control target
= control target key end

     0   :  { %s6719_s0 = inlined_call_operand.vmem [shape: f32[3,16,32], index: 0, kind: input, shape index: {}]   ;;  %s6720_s1 = inlined_call_operand.vmem [shape: f32[16,32], index: 1, kind: input, shape index: {}]   ;;  %s6721_s2 = inlined_call_operand.vmem [shape: f32[2,1,32], index: 2, kind: input, shape index: {}]   ;;  %s6722_s3 = inlined_call_operand.vmem [shape: f32[2,1,32], index: 3, kind: input, shape index: {}]   ;;  %s6723_s4 = inlined_call_operand.vmem [shape: bf16[2,12,32,8], index: 4, kind: input, shape index: {}]   ;;  %s6724_s5 = inlined_call_operand.vmem [shape: f32[2,12,1,8], index: 5, kind: input, shape index: {}]   ;;  %s6725_s6 = inlined_call_operand.vmem [shape: bf16[2,4,8,32], index: 6, kind: input, shape index: {}]   ;;  %s6726_s7 = inlined_call_operand.vmem [shape: f32[2,1,32], index: 7, kind: input, shape index: {}]   ;;  %s6727_s8 = inlined_call_operand.vmem [shape: f32[2,1,32], index: 8, kind: input, shape index: {}]   ;;  %s6728_s9 = inlined_call_operand.vmem [shape: f32[2,1,32], index: 9, kind: input, shape index: {}]   ;;  %s6729_s10 = inlined_call_operand.vmem [shape: bf16[2,32,128], index: 10, kind: input, shape index: {}]   ;;  %s6730_s11 = inlined_call_operand.vmem [shape: f32[2,1,128], index: 11, kind: input, shape index: {}]   ;;  %s6731_s12 = inlined_call_operand.vmem [shape: bf16[2,128,32], index: 12, kind: input, shape index: {}]   ;;  %s6732_s13 = inlined_call_operand.vmem [shape: f32[2,1,32], index: 13, kind: input, shape index: {}]   ;;  %s6733_s14 = inlined_call_operand.vmem [shape: f32[1,32], index: 14, kind: input, shape index: {}]   ;;  %s6734_s15 = inlined_call_operand.vmem [shape: f32[1,32], index: 15, kind: input, shape index: {}]   ;;  %s6735_s16 = inlined_call_operand.vmem [shape: bf16[32,32], index: 16, kind: input, shape index: {}]   ;;  %s6736_s17 = inlined_call_operand.vmem [shape: f32[3,16], index: 17, kind: input, shape index: {}]   ;;  %s6737_s18 = inlined_call_operand.vmem [shape: f32[2,32], index: 18, kind: input, shape index: {}]   ;;  %s6738_s19 = inlined_call_operand.<no memory space> [shape: f32[1,1], index: 19, kind: input, shape index: {}]   ;;  %s6739_s20 = inlined_call_operand.hbm [shape: f32[2,3], index: 20, kind: output, shape index: {}]  }
   0x1   :  { %6744 = sst [smem:[#allocation9_spill]] %s6719_s0 }
   0x2   :  { %6745 = sst [smem:[#allocation10_spill]] %s6720_s1 }
   0x3   :  { %6746 = sst [smem:[#allocation11_spill]] %s6721_s2 }
   0x4   :  { %6747 = sst [smem:[#allocation12_spill]] %s6722_s3 }
   0x5   :  { %6748 = sst [smem:[#allocation13_spill]] %s6723_s4 }
   0x6   :  { %6749 = sst [smem:[#allocation14_spill]] %s6725_s6 }
   0x7   :  { %6750 = sst [smem:[#allocation15_spill]] %s6733_s14 }
   0x8   :  { %6751 = sst [smem:[#allocation16_spill]] %s6734_s15 }
   0x9   :  { %6752 = sst [smem:[#allocation17_spill]] %s6735_s16 }
   0xa   :  { %6753 = sst [smem:[#allocation18_spill]] %s6737_s18 }
   0xb   :  { %6754 = sst [smem:[#allocation19_spill]] %s6739_s20 }
   0xc   :  { %25 = sst [smem:[#allocation4]] %s6738_s19 }
   0xd   :  { %26 = vsyncpa [#allocation6], 0  ;;  %s5762_s23 = smov 0  }
   0xe LB: > { %6755 = sst [smem:[#allocation8_spill]] %s5646_s23  ;;  %s5768_s24 = sadd.s32 4294967295, %s5646_s23   ;;  %s5646_s23 = sphi %s5762_s23, %s32_s23  }
   0xf   : > { %p4570_p0 = scmp.ge.s32.totalorder %s5646_s23, 1  ;;  %p654_p1 = scmp.lt.s32.totalorder %s5646_s23, 3 }
  0x11   : > { %p655_p2 = pnand %p4570_p0, %p654_p1 }
  0x12   : > { %p747_p3 = scmp.lt.s32.totalorder (!%p655_p2), %s5768_s24, 1  ;;  %s6758_s6 = sld [smem:[#allocation14_spill]] (!%p655_p2) }
  0x13   : > { %658 = sbr.rel (%p655_p2) target bundleno = 5878 (0x16f6), region = 100  ;;  %s6759_s20 = sld [smem:[#allocation13_spill]] (!%p655_p2) }
  0x14   : > { %p4578_p4 = scmp.ne.s32.totalorder (!%p655_p2), %s5768_s24, 0 }
  0x18   : > { %s5774_s19 = scalar_select %p747_p3, %s5768_s24, 1 }
  0x19   : > { %s6760_s23 = sld [smem:[#allocation9_spill]] (!%p4578_p4) }
  0x1a   : > { %s5384_s30 = smul.u32 192, %s5774_s19  ;;  %s4783_s0 = sshll.u32 %s5774_s19, 4 }
  0x1b   : > { %s5385_s21 = smul.u32 12, %s5774_s19  ;;  %s5790_s2 = scalar_lea.vmem %s6758_s6, %s4783_s0 }
  0x1c   : > { %s5795_s18 = scalar_lea.vmem %s6759_s20, %s5384_s30  ;;  %s772_s1 = scalar_lea.vmem %s6727_s8, %s5774_s19 }
  0x1d   : > { %s5804_s28 = scalar_lea.vmem %s6724_s5, %s5385_s21  ;;  %s5817_s30 = scalar_lea.vmem %s6729_s10, %s4783_s0 }
  0x1e   : > { %s4785_s26 = sshll.u32 %s5774_s19, 6  ;;  %s791_s6 = scalar_lea.vmem %s6732_s13, %s5774_s19 }
  0x1f   : > { %s5827_s3 = scalar_lea.vmem %s6731_s12, %s4785_s26  ;;  %796 = sbr.rel (%p4578_p4) target bundleno = 45 (0x2d), region = 104 }
  0x20   : > { %s6761_s20 = smov (!%p4578_p4), %s6760_s23  ;;  %s6762_s15 = sld [smem:[#allocation10_spill]] (!%p4578_p4) }
  0x24   : > { %v797_v0 = vld [vmem:[%s6760_s23] sm:$0xff]  ;;  %vm811_vm0 = vcmask 261120   ;;  %v798_v2 = vld [vmem:[%s6761_s20 + $0x8] sm:$0xff]  ;;  %v818_v3 = vlaneseq  ;;  %v799_v6 = vld [vmem:[%s6761_s20 + $0x10] sm:$0xff]  ;;  %vm827_vm1 = vcmask 130048   ;;  %v5648_v18 = vmov 0.0  }
  0x25   : > { %v800_v7 = vld [vmem:[%s6761_s20 + $0x18] sm:$0xff]  ;;  %v801_v11 = vld [vmem:[%s6761_s20 + $0x20] sm:$0xff]  ;;  %v802_v12 = vld [vmem:[%s6761_s20 + $0x28] sm:$0xff] }
  0x26   : > { %v803_v1 = vld [vmem:[%s6762_s15] sm:$0xff]  ;;  %v804_v5 = vld [vmem:[%s6762_s15 + $0x8] sm:$0xff]  ;;  %v819_v13 = vshrl.u32 %v818_v3, 7  ;;  %v822_v16 = vand.u32 127, %v818_v3 }
  0x27   : > { %v805_v4 = vadd.f32 %v803_v1, %v797_v0  ;;  %v806_v8 = vadd.f32 %v804_v5, %v798_v2  ;;  %v807_v9 = vadd.f32 %v803_v1, %v799_v6  ;;  %v808_v10 = vadd.f32 %v804_v5, %v800_v7 }
  0x28   : > { %v809_v14 = vadd.f32 %v803_v1, %v801_v11  ;;  %v810_v15 = vadd.f32 %v804_v5, %v802_v12  ;;  %v820_v17 = vadd.s32 8, %v819_v13  ;;  %vm823_vm2 = vcmp.gt.s32.totalorder %v822_v16, %v819_v13 }
  0x29   : > { %812 = vst.msk [vmem:[#allocation2] sm:$0xff] %vm811_vm0, %v805_v4  ;;  %813 = vst.msk [vmem:[#allocation2 + $0x8] sm:$0xff] %vm811_vm0, %v806_v8  ;;  %v825_v19 = vsel %vm823_vm2, -1e+09, %v5648_v18 }
  0x2a   : > { %814 = vst.msk [vmem:[#allocation2 + $0x10] sm:$0xff] %vm811_vm0, %v807_v9  ;;  %815 = vst.msk [vmem:[#allocation2 + $0x18] sm:$0xff] %vm811_vm0, %v808_v10  ;;  %vm824_vm3 = vcmp.gt.s32.totalorder %v822_v16, %v820_v17 }
  0x2b   : > { %816 = vst.msk [vmem:[#allocation2 + $0x20] sm:$0xff] %vm811_vm0, %v809_v14  ;;  %817 = vst.msk [vmem:[#allocation2 + $0x28] sm:$0xff] %vm811_vm0, %v810_v15  ;;  %v826_v20 = vsel %vm824_vm3, -1e+09, %v5648_v18 }
  0x2c   : > { %828 = vst.msk [vmem:[#allocation3] sm:$0xff] %vm827_vm1, %v825_v19  ;;  %829 = vst.msk [vmem:[#allocation3 + $0x8] sm:$0xff] %vm827_vm1, %v826_v20 }
  0x2d PF: > { %vm840_vm4 = vcmask 261120   ;;  %v5406_v63 = vld [vmem:[%s5795_s18 + $0x8] sm:$0xff]   ;;  %v5649_v0 = vmov 0.0   ;;  %v5407_v1 = vld [vmem:[%s5795_s18] sm:$0xff]   ;;  %vm5650_vm5 = vmmov 0   ;;  %s6763_s27 = sld [smem:[#allocation11_spill]]  ;;  %s6768_s21 = scalar_lea.vmem %s6728_s9, %s5774_s19 }
  0x2e   : > { %4931 = vmatprep.subr.bf16.mxu0 %v5649_v0  ;;  %5380 = vmatprep.subr.bf16.mxu1 %v5649_v0  ;;  %v5408_v2 = vld [vmem:[%s5795_s18 + $0x48] sm:$0xff]   ;;  %v5409_v3 = vld [vmem:[%s5795_s18 + $0x40] sm:$0xff]   ;;  %s6765_s0 = sld [smem:[#allocation12_spill]]  ;;  %vm1206_vm6 = vcmask 64512   ;;  %vm1348_vm7 = vcmask 130048   ;;  %vm2168_vm8 = vcmask 1043456  }
  0x2f   : > { %4932 = vmatpush3.bf16.msra.mxu0 %v5406_v63  ;;  %4935 = vmatprep.mubr.msk.bf16.mxu0 %vm5650_vm5, %v5649_v0  ;;  %p4771_p5 = scmp.ne.s32.totalorder %s5768_s24, 1 }
  0x30   : > { %v830_v21 = vld [vmem:[#allocation2] sm:$0xff]  ;;  %v831_v23 = vld [vmem:[#allocation2 + $0x8] sm:$0xff]  ;;  %4933 = vmatprep.subr.bf16.mxu0 %v5649_v0  ;;  %4959 = vmatprep.mubr.msk.bf16.mxu1 %vm5650_vm5, %v5649_v0  ;;  %s6772_s14 = sld [smem:[#allocation16_spill]] (!%p4771_p5) }
  0x31   : > { %v832_v22 = vld [vmem:[#allocation2 + $0x10] sm:$0xff]  ;;  %v841_v24 = vsel %vm840_vm4, %v830_v21, 0.0  ;;  %v833_v26 = vld [vmem:[#allocation2 + $0x18] sm:$0xff]  ;;  %v844_v29 = vsel %vm840_vm4, %v831_v23, 0.0  ;;  %5382 = vmatpush3.bf16.msra.mxu1 %v5408_v2  ;;  %s6773_s26 = sld [smem:[#allocation18_spill]] (!%p4771_p5) }
  0x32   : > { %v847_v25 = vsel %vm840_vm4, %v832_v22, 0.0  ;;  %v834_v27 = vld [vmem:[#allocation2 + $0x20] sm:$0xff]  ;;  %v835_v28 = vld [vmem:[#allocation2 + $0x28] sm:$0xff]  ;;  %842 = vadd.xlane.f32.xlu0 %v841_v24  ;;  %v850_v30 = vsel %vm840_vm4, %v833_v26, 0.0  ;;  %5381 = vmatprep.subr.bf16.mxu1 %v5649_v0 }
  0x33   : > { %848 = vadd.xlane.f32.xlu1 %v847_v25  ;;  %v853_v31 = vsel %vm840_vm4, %v834_v27, 0.0  ;;  %v856_v32 = vsel %vm840_vm4, %v835_v28, 0.0  ;;  %4934 = vmatpush3.bf16.msra.mxu0 %v5407_v1  ;;  %s6764_s29 = scalar_lea.vmem %s6763_s27, %s5774_s19  ;;  %s6769_s27 = scalar_lea.vmem %s6730_s11, %s5774_s19 }
  0x34   : > { %4947 = vmatprep.subr.bf16.mxu0 %v5649_v0  ;;  %v4579_v24 = vld [vmem:[%s6764_s29] ss:$0 sm:$0xff]  ;;  %s6766_s16 = scalar_lea.vmem %s6765_s0, %s5774_s19  ;;  %s6770_s0 = sld [smem:[#allocation17_spill]] (!%p4771_p5) }
  0x35   : > { %5383 = vmatpush3.bf16.msra.mxu1 %v5409_v3 }
  0x36   : > { %845 = vadd.xlane.f32.xlu0 %v844_v29  ;;  %4979 = vmatprep.subr.bf16.mxu1 %v5649_v0  ;;  %v4580_v29 = vld [vmem:[%s6766_s16] ss:$0 sm:$0xff] }
  0x37   : > { %851 = vadd.xlane.f32.xlu1 %v850_v30 }
  0x3a   : > { %854 = vadd.xlane.f32.xlu0 %v853_v31 }
  0x3b   : > { %857 = vadd.xlane.f32.xlu1 %v856_v32 }
  0xbb   : > { %v843_v33 = vpop.xlane.xlu0 %842 }
  0xbc   : > { %v849_v34 = vpop.xlane.xlu1 %848  ;;  %v860_v35 = vmul.f32 0.03125, %v843_v33 }
  0xbd   : > { %v862_v36 = vmul.f32 0.03125, %v849_v34 }
  0xbe   : > { %v5870_v37 = vsub.f32 %v830_v21, %v860_v35 }
  0xbf   : > { %v5872_v38 = vsub.f32 %v832_v22, %v862_v36  ;;  %v846_v39 = vpop.xlane.xlu0 %845 }
  0xc0   : > { %v852_v40 = vpop.xlane.xlu1 %851  ;;  %v861_v41 = vmul.f32 0.03125, %v846_v39  ;;  %v872_v43 = vmul.f32 %v5870_v37, %v5870_v37 }
  0xc1   : > { %v863_v42 = vmul.f32 0.03125, %v852_v40  ;;  %v874_v44 = vmul.f32 %v5872_v38, %v5872_v38 }
  0xc2   : > { %v5878_v45 = vsub.f32 %v831_v23, %v861_v41  ;;  %v878_v47 = vsel %vm840_vm4, %v872_v43, 0.0 }
  0xc3   : > { %v5880_v46 = vsub.f32 %v833_v26, %v863_v42  ;;  %879 = vadd.xlane.f32.xlu0 %v878_v47  ;;  %v855_v48 = vpop.xlane.xlu0 %854  ;;  %v884_v50 = vsel %vm840_vm4, %v874_v44, 0.0 }
  0xc4   : > { %v858_v49 = vpop.xlane.xlu1 %857  ;;  %v864_v51 = vmul.f32 0.03125, %v855_v48  ;;  %v873_v53 = vmul.f32 %v5878_v45, %v5878_v45 }
  0xc5   : > { %v865_v52 = vmul.f32 0.03125, %v858_v49  ;;  %v875_v54 = vmul.f32 %v5880_v46, %v5880_v46 }
  0xc6   : > { %v5888_v55 = vsub.f32 %v834_v27, %v864_v51  ;;  %v881_v57 = vsel %vm840_vm4, %v873_v53, 0.0  ;;  %v5410_v51 = vld [vmem:[%s5795_s18 + $0x88] sm:$0xff]  }
  0xc7   : > { %v5890_v56 = vsub.f32 %v835_v28, %v865_v52  ;;  %885 = vadd.xlane.f32.xlu0 %v884_v50  ;;  %882 = vadd.xlane.f32.xlu1 %v881_v57  ;;  %v887_v58 = vsel %vm840_vm4, %v875_v54, 0.0  ;;  %v5411_v52 = vld [vmem:[%s5795_s18 + $0x80] sm:$0xff]  }
  0xc8   : > { %v876_v59 = vmul.f32 %v5888_v55, %v5888_v55 }
  0xc9   : > { %v877_v60 = vmul.f32 %v5890_v56, %v5890_v56 }
  0xca   : > { %v890_v61 = vsel %vm840_vm4, %v876_v59, 0.0 }
  0xcb   : > { %888 = vadd.xlane.f32.xlu1 %v887_v58  ;;  %891 = vadd.xlane.f32.xlu0 %v890_v61  ;;  %v893_v62 = vsel %vm840_vm4, %v877_v60, 0.0 }
  0xcf   : > { %894 = vadd.xlane.f32.xlu1 %v893_v62 }
 0x14c   : > { %v880_v4 = vpop.xlane.xlu0 %879 }
 0x14d   : > { %v896_v5 = vmul.f32 0.03125, %v880_v4 }
 0x14f   : > { %v902_v6 = vadd.f32 1e-05, %v896_v5 }
 0x150   : > { %v883_v7 = vpop.xlane.xlu1 %882  ;;  %v886_v8 = vpop.xlane.xlu0 %885 }
 0x151   : > { %5440 = vrsqrt.f32 %v902_v6  ;;  %v897_v9 = vmul.f32 0.03125, %v883_v7  ;;  %v898_v10 = vmul.f32 0.03125, %v886_v8  ;;  %v4592_v8 = vld [vmem:[%s5804_s28 + $0x4] ss:$0 sm:$0xff] }
 0x153   : > { %v903_v11 = vadd.f32 1e-05, %v897_v9  ;;  %v904_v12 = vadd.f32 1e-05, %v898_v10 }
 0x154   : > { %v889_v13 = vpop.xlane.xlu1 %888  ;;  %v892_v14 = vpop.xlane.xlu0 %891 }
 0x155   : > { %5442 = vrsqrt.f32 %v903_v11  ;;  %v899_v15 = vmul.f32 0.03125, %v889_v13  ;;  %v900_v16 = vmul.f32 0.03125, %v892_v14 }
 0x156   : > { %5444 = vrsqrt.f32 %v904_v12 }
 0x157   : > { %v905_v17 = vadd.f32 1e-05, %v899_v15  ;;  %v906_v18 = vadd.f32 1e-05, %v900_v16  ;;  %v4581_v16 = vld [vmem:[%s5804_s28] ss:$0 sm:$0xff] }
 0x158   : > { %v895_v19 = vpop.xlane.xlu1 %894 }
 0x159   : > { %5446 = vrsqrt.f32 %v905_v17  ;;  %v901_v20 = vmul.f32 0.03125, %v895_v19 }
 0x15a   : > { %5448 = vrsqrt.f32 %v906_v18 }
 0x15b   : > { %v907_v21 = vadd.f32 1e-05, %v901_v20 }
 0x15d   : > { %5450 = vrsqrt.f32 %v907_v21 }
 0x15e   : > { %v5441_v22 = vpop.eup %5440 }
 0x15f   : > { %v914_v23 = vmul.f32 %v5441_v22, %v5870_v37 }
 0x161   : > { %v926_v26 = vmul.f32 %v4579_v24, %v914_v23 }
 0x162   : > { %v5443_v25 = vpop.eup %5442 }
 0x163   : > { %v915_v27 = vmul.f32 %v5443_v25, %v5878_v45  ;;  %v5445_v28 = vpop.eup %5444  ;;  %v938_v33 = vadd.f32 %v4580_v29, %v926_v26 }
 0x164   : > { %v916_v35 = vmul.f32 %v5445_v28, %v5872_v38 }
 0x165   : > { %v927_v30 = vmul.f32 %v4579_v24, %v915_v27 }
 0x166   : > { %v5447_v31 = vpop.eup %5446  ;;  %v928_v42 = vmul.f32 %v4579_v24, %v916_v35 }
 0x167   : > { %v5449_v32 = vpop.eup %5448  ;;  %v939_v34 = vadd.f32 %v4580_v29, %v927_v30  ;;  %v917_v36 = vmul.f32 %v5447_v31, %v5880_v46 }
 0x168   : > { %v918_v37 = vmul.f32 %v5449_v32, %v5888_v55  ;;  %v940_v46 = vadd.f32 %v4580_v29, %v928_v42 }
 0x169   : > { %v5929_v39 = vpack.c.bf16 %v939_v34, %v938_v33  ;;  %v929_v40 = vmul.f32 %v4579_v24, %v917_v36 }
 0x16a   : > { %v5451_v41 = vpop.eup %5450  ;;  %v930_v43 = vmul.f32 %v4579_v24, %v918_v37 }
 0x16b   : > { %v919_v44 = vmul.f32 %v5451_v41, %v5890_v56  ;;  %4936 = vmatmul.mubr.msk.bf16.vlgmr.msra.gmra.mxu0 %vm840_vm4, %v5929_v39  ;;  %v941_v38 = vadd.f32 %v4580_v29, %v929_v40 }
 0x16c   : > { %4939 = vmatprep.mubr.msk.bf16.mxu0 %vm5650_vm5, %v5649_v0  ;;  %4948 = vmatpush3.bf16.msra.mxu0 %v5408_v2  ;;  %v942_v47 = vadd.f32 %v4580_v29, %v930_v43 }
 0x16d   : > { %v931_v45 = vmul.f32 %v4579_v24, %v919_v44  ;;  %4949 = vmatprep.subr.bf16.mxu0 %v5649_v0  ;;  %v5937_v49 = vpack.c.bf16 %v941_v38, %v940_v46 }
 0x16f   : > { %v943_v48 = vadd.f32 %v4580_v29, %v931_v45  ;;  %v4603_v29 = vld [vmem:[%s5804_s28 + $0x8] ss:$0 sm:$0xff] }
 0x170   : > { %4950 = vmatpush3.bf16.msra.mxu0 %v5409_v3 }
 0x171   : > { %v5939_v50 = vpack.c.bf16 %v943_v48, %v942_v47  ;;  %4963 = vmatprep.subr.bf16.mxu0 %v5649_v0 }
 0x173   : > { %4940 = vmatmul.mubr.msk.bf16.gmra.mxu0 %vm840_vm4, %v5937_v49  ;;  %4960 = vmatmul.mubr.msk.bf16.vlgmr.msra.gmra.mxu1 %vm840_vm4, %v5939_v50 }
 0x174   : > { %4943 = vmatprep.mubr.msk.bf16.mxu0 %vm5650_vm5, %v5649_v0  ;;  %4981 = vmatprep.mubr.msk.bf16.mxu1 %vm5650_vm5, %v5649_v0 }
 0x17b   : > { %4944 = vmatmul.mubr.msk.bf16.gmra.mxu0 %vm840_vm4, %v5939_v50 }
 0x17c   : > { %4951 = vmatprep.mubr.msk.bf16.mxu0 %vm5650_vm5, %v5649_v0 }
 0x183   : > { %4952 = vmatmul.mubr.msk.bf16.vlgmr.msra.gmra.mxu0 %vm840_vm4, %v5929_v39 }
 0x184   : > { %4955 = vmatprep.mubr.msk.bf16.mxu0 %vm5650_vm5, %v5649_v0  ;;  %4964 = vmatpush3.bf16.msra.mxu0 %v5410_v51 }
 0x185   : > { %4965 = vmatprep.subr.bf16.mxu0 %v5649_v0 }
 0x188   : > { %4966 = vmatpush3.bf16.msra.mxu0 %v5411_v52 }
 0x189   : > { %4997 = vmatprep.subr.bf16.mxu0 %v5649_v0 }
 0x18b   : > { %4956 = vmatmul.mubr.msk.bf16.gmra.mxu0 %vm840_vm4, %v5937_v49 }
 0x18c   : > { %4967 = vmatprep.mubr.msk.bf16.mxu0 %vm5650_vm5, %v5649_v0 }
 0x193   : > { %4968 = vmatmul.mubr.msk.bf16.vlgmr.msra.gmra.mxu0 %vm840_vm4, %v5929_v39 }
 0x194   : > { %4971 = vmatprep.mubr.msk.bf16.mxu0 %vm5650_vm5, %v5649_v0 }
 0x19b   : > { %4972 = vmatmul.mubr.msk.bf16.gmra.mxu0 %vm840_vm4, %v5937_v49 }
 0x19c   : > { %4975 = vmatprep.mubr.msk.bf16.mxu0 %vm5650_vm5, %v5649_v0 }
 0x1a3   : > { %4976 = vmatmul.mubr.msk.bf16.gmra.mxu0 %vm840_vm4, %v5939_v50 }
 0x1a4   : > { %4999 = vmatprep.mubr.msk.bf16.mxu0 %vm5650_vm5, %v5649_v0 }
 0x22b   : > { %v1013_v53 = vpop.f32.mrf.mxu0 }
 0x22c   : > { %v1014_v20 = vadd.f32 %v4581_v16, %v1013_v53 }
 0x22d   : > { %v4937_v54 = vpop.f32.mrf.mxu0 }
 0x22f   : > { %v1016_v55 = vpop.f32.mrf.mxu0 }
 0x230   : > { %v1017_v18 = vadd.f32 %v4581_v16, %v1016_v55 }
 0x231   : > { %v4938_v56 = vpop.f32.mrf.mxu0 }
 0x232   : > { %v1200_v24 = vpack.c.bf16 %v1017_v18, %v1014_v20 }
 0x233   : > { %v1021_v57 = vpop.f32.mrf.mxu0  ;;  %v1111_v58 = vpop.f32.mrf.mxu1 }
 0x234   : > { %v1112_v31 = vadd.f32 %v4592_v8, %v1111_v58  ;;  %v1022_v34 = vadd.f32 %v4581_v16, %v1021_v57 }
 0x235   : > { %v4941_v59 = vpop.f32.mrf.mxu0  ;;  %v4961_v60 = vpop.f32.mrf.mxu1 }
 0x237   : > { %v1024_v61 = vpop.f32.mrf.mxu0  ;;  %v1114_v62 = vpop.f32.mrf.mxu1 }
 0x238   : > { %v1115_v27 = vadd.f32 %v4592_v8, %v1114_v62  ;;  %v1025_v32 = vadd.f32 %v4581_v16, %v1024_v61  ;;  %v6004_v62 = vld [vmem:[#allocation3] sm:$0xff] }
 0x239   : > { %v4942_v63 = vpop.f32.mrf.mxu0  ;;  %v4962_v1 = vpop.f32.mrf.mxu1 }
 0x23a   : > { %v1205_v35 = vpack.c.bf16 %v1115_v27, %v1112_v31  ;;  %v1201_v41 = vpack.c.bf16 %v1025_v32, %v1022_v34 }
 0x23b   : > { %v1029_v2 = vpop.f32.mrf.mxu0 }
 0x23c   : > { %v1305_v44 = vsel %vm1206_vm6, %v1205_v35, 0  ;;  %v1030_v47 = vadd.f32 %v4581_v16, %v1029_v2 }
 0x23d   : > { %v4945_v3 = vpop.f32.mrf.mxu0 }
 0x23e   : > { %v6007_v3 = vld [vmem:[#allocation3 + $0x8] sm:$0xff] }
 0x23f   : > { %v1032_v4 = vpop.f32.mrf.mxu0 }
 0x240   : > { %v1033_v45 = vadd.f32 %v4581_v16, %v1032_v4 }
 0x241   : > { %v4946_v5 = vpop.f32.mrf.mxu0 }
 0x242   : > { %v1202_v53 = vpack.c.bf16 %v1033_v45, %v1030_v47 }
 0x243   : > { %v1095_v6 = vpop.f32.mrf.mxu0 }
 0x244   : > { %v1096_v10 = vadd.f32 %v4592_v8, %v1095_v6 }
 0x245   : > { %v4953_v7 = vpop.f32.mrf.mxu0 }
 0x247   : > { %v1098_v9 = vpop.f32.mrf.mxu0 }
 0x248   : > { %v1099_v11 = vadd.f32 %v4592_v8, %v1098_v9 }
 0x249   : > { %v4954_v12 = vpop.f32.mrf.mxu0 }
 0x24a   : > { %v1203_v13 = vpack.c.bf16 %v1099_v11, %v1096_v10 }
 0x24b   : > { %v1103_v14 = vpop.f32.mrf.mxu0 }
 0x24c   : > { %v1211_v15 = vsel %vm1206_vm6, %v1203_v13, 0  ;;  %v1104_v21 = vadd.f32 %v4592_v8, %v1103_v14 }
 0x24d   : > { %v4957_v17 = vpop.f32.mrf.mxu0  ;;  %4980 = vmatpush3.bf16.xpose.msra.mxu1 %v1211_v15 }
 0x24e   : > { %4985 = vmatprep.subr.bf16.mxu1 %v5649_v0 }
 0x24f   : > { %v1106_v19 = vpop.f32.mrf.mxu0 }
 0x250   : > { %v1107_v22 = vadd.f32 %v4592_v8, %v1106_v19 }
 0x251   : > { %v4958_v23 = vpop.f32.mrf.mxu0 }
 0x252   : > { %v1204_v25 = vpack.c.bf16 %v1107_v22, %v1104_v21 }
 0x253   : > { %v1177_v26 = vpop.f32.mrf.mxu0 }
 0x254   : > { %4982 = vmatmul.mubr.msk.bf16.vlgmr.msra.gmra.mxu1 %vm1206_vm6, %v1200_v24  ;;  %v1258_v28 = vsel %vm1206_vm6, %v1204_v25, 0  ;;  %v1178_v36 = vadd.f32 %v4603_v29, %v1177_v26 }
 0x255   : > { %v4969_v30 = vpop.f32.mrf.mxu0  ;;  %4986 = vmatpush3.bf16.xpose.msra.mxu1 %v1258_v28  ;;  %4987 = vmatprep.mubr.msk.bf16.mxu1 %vm5650_vm5, %v5649_v0 }
 0x256   : > { %4991 = vmatprep.subr.bf16.mxu1 %v5649_v0 }
 0x257   : > { %v1180_v33 = vpop.f32.mrf.mxu0 }
 0x258   : > { %v1181_v37 = vadd.f32 %v4603_v29, %v1180_v33 }
 0x259   : > { %v4970_v40 = vpop.f32.mrf.mxu0 }
 0x25a   : > { %v1418_v42 = vpack.c.bf16 %v1181_v37, %v1178_v36 }
 0x25b   : > { %v1185_v43 = vpop.f32.mrf.mxu0 }
 0x25c   : > { %4988 = vmatmul.mubr.msk.bf16.vlgmr.msra.gmra.mxu1 %vm1206_vm6, %v1201_v41  ;;  %4998 = vmatpush3.bf16.msra.mxu0 %v1418_v42  ;;  %v1186_v48 = vadd.f32 %v4603_v29, %v1185_v43 }
 0x25d   : > { %v4973_v38 = vpop.f32.mrf.mxu0  ;;  %4992 = vmatpush3.bf16.xpose.msra.mxu1 %v1305_v44  ;;  %4993 = vmatprep.mubr.msk.bf16.mxu1 %vm5650_vm5, %v5649_v0 }
 0x25e   : > { %5003 = vmatprep.subr.bf16.mxu1 %v5649_v0  ;;  %5009 = vmatprep.subr.bf16.mxu0 %v5649_v0 }
 0x25f   : > { %v1188_v46 = vpop.f32.mrf.mxu0 }
 0x260   : > { %v1189_v51 = vadd.f32 %v4603_v29, %v1188_v46 }
 0x261   : > { %v4974_v52 = vpop.f32.mrf.mxu0 }
 0x262   : > { %v1419_v54 = vpack.c.bf16 %v1189_v51, %v1186_v48 }
 0x263   : > { %v1193_v55 = vpop.f32.mrf.mxu0 }
 0x264   : > { %v5994_v56 = vadd.f32 %v4603_v29, %v1193_v55  ;;  %4994 = vmatmul.mubr.msk.bf16.vlgmr.msra.gmra.mxu1 %vm1206_vm6, %v1202_v53 }
 0x265   : > { %v4977_v57 = vpop.f32.mrf.mxu0  ;;  %5004 = vmatpush3.bf16.msra.mxu1 %v1419_v54  ;;  %5005 = vmatprep.mubr.msk.bf16.mxu1 %vm5650_vm5, %v5649_v0 }
 0x266   : > { %5015 = vmatprep.subr.bf16.mxu1 %v5649_v0 }
 0x267   : > { %v1196_v58 = vpop.f32.mrf.mxu0 }
 0x268   : > { %v6000_v59 = vadd.f32 %v4603_v29, %v1196_v58 }
 0x269   : > { %v4978_v60 = vpop.f32.mrf.mxu0 }
 0x26a   : > { %v1420_v61 = vpack.c.bf16 %v6000_v59, %v5994_v56 }
 0x314   : > { %v1247_v63 = vpop.f32.mrf.mxu1 }
 0x315   : > { %v1248_v1 = vadd.f32 %v1247_v63, %v6004_v62 }
 0x316   : > { %v4983_v2 = vpop.f32.mrf.mxu1 }
 0x317   : > { %v1349_v4 = vsel %vm1348_vm7, %v1248_v1, -inf }
 0x318   : > { %1350 = vmax.xlane.f32.xlu0 %v1349_v4  ;;  %v1250_v5 = vpop.f32.mrf.mxu1 }
 0x319   : > { %v1251_v6 = vadd.f32 %v1250_v5, %v6007_v3 }
 0x31a   : > { %v4984_v7 = vpop.f32.mrf.mxu1 }
 0x31b   : > { %v1352_v8 = vsel %vm1348_vm7, %v1251_v6, -inf }
 0x31c   : > { %1353 = vmax.xlane.f32.xlu1 %v1352_v8  ;;  %v1294_v9 = vpop.f32.mrf.mxu1 }
 0x31d   : > { %v1295_v16 = vadd.f32 %v1294_v9, %v6004_v62 }
 0x31e   : > { %v4989_v10 = vpop.f32.mrf.mxu1 }
 0x31f   : > { %v1355_v22 = vsel %vm1348_vm7, %v1295_v16, -inf }
 0x320   : > { %v1297_v11 = vpop.f32.mrf.mxu1 }
 0x321   : > { %v1298_v21 = vadd.f32 %v1297_v11, %v6007_v3 }
 0x322   : > { %v4990_v12 = vpop.f32.mrf.mxu1 }
 0x323   : > { %v1358_v24 = vsel %vm1348_vm7, %v1298_v21, -inf }
 0x324   : > { %v1341_v13 = vpop.f32.mrf.mxu1 }
 0x325   : > { %v1342_v14 = vadd.f32 %v1341_v13, %v6004_v62 }
 0x326   : > { %v4995_v15 = vpop.f32.mrf.mxu1 }
 0x327   : > { %v1361_v17 = vsel %vm1348_vm7, %v1342_v14, -inf }
 0x328   : > { %1362 = vmax.xlane.f32.xlu0 %v1361_v17  ;;  %v1344_v18 = vpop.f32.mrf.mxu1 }
 0x329   : > { %v1345_v19 = vadd.f32 %v1344_v18, %v6007_v3 }
 0x32a   : > { %v4996_v20 = vpop.f32.mrf.mxu1 }
 0x32b   : > { %v1364_v23 = vsel %vm1348_vm7, %v1345_v19, -inf }
 0x32c   : > { %1356 = vmax.xlane.f32.xlu0 %v1355_v22  ;;  %1365 = vmax.xlane.f32.xlu1 %v1364_v23  ;;  %v5416_v22 = vld [vmem:[%s5795_s18 + $0x98] sm:$0xff]   ;;  %v5417_v23 = vld [vmem:[%s5795_s18 + $0x90] sm:$0xff]  }
 0x330   : > { %1359 = vmax.xlane.f32.xlu1 %v1358_v24 }
 0x3a1   : > { %v1351_v25 = vpop.xlane.xlu0 %1350 }
 0x3a2   : > { %v1367_v26 = vsub.f32 %v1248_v1, %v1351_v25 }
 0x3a4   : > { %v1373_v27 = vmul.f32 1.442695, %v1367_v26 }
 0x3a5   : > { %v1354_v28 = vpop.xlane.xlu1 %1353 }
 0x3a6   : > { %5452 = vpow2.f32 %v1373_v27  ;;  %v1368_v29 = vsub.f32 %v1251_v6, %v1354_v28 }
 0x3a8   : > { %v1375_v30 = vmul.f32 1.442695, %v1368_v29 }
 0x3aa   : > { %5454 = vpow2.f32 %v1375_v30 }
 0x3b1   : > { %v1363_v31 = vpop.xlane.xlu0 %1362 }
 0x3b2   : > { %v1371_v32 = vsub.f32 %v1342_v14, %v1363_v31 }
 0x3b3   : > { %v5453_v33 = vpop.eup %5452 }
 0x3b4   : > { %v1381_v34 = vmul.f32 1.442695, %v1371_v32  ;;  %v1385_v35 = vsel %vm1348_vm7, %v5453_v33, 0.0 }
 0x3b5   : > { %1386 = vadd.xlane.f32.xlu0 %v1385_v35  ;;  %v1357_v36 = vpop.xlane.xlu0 %1356  ;;  %v1366_v37 = vpop.xlane.xlu1 %1365 }
 0x3b6   : > { %5456 = vpow2.f32 %v1381_v34  ;;  %v1369_v40 = vsub.f32 %v1295_v16, %v1357_v36  ;;  %v1372_v41 = vsub.f32 %v1345_v19, %v1366_v37  ;;  %v5412_v16 = vld [vmem:[%s5795_s18 + $0x58] sm:$0xff]   ;;  %v5414_v19 = vld [vmem:[%s5795_s18 + $0x50] sm:$0xff]  }
 0x3b7   : > { %v5455_v42 = vpop.eup %5454 }
 0x3b8   : > { %v1377_v43 = vmul.f32 1.442695, %v1369_v40  ;;  %v1383_v44 = vmul.f32 1.442695, %v1372_v41  ;;  %v1388_v38 = vsel %vm1348_vm7, %v5455_v42, 0.0 }
 0x3b9   : > { %1389 = vadd.xlane.f32.xlu1 %v1388_v38  ;;  %v1360_v45 = vpop.xlane.xlu1 %1359  ;;  %v4631_v41 = vld [vmem:[%s5804_s28 + $0x5] ss:$0 sm:$0xff] }
 0x3ba   : > { %5458 = vpow2.f32 %v1377_v43  ;;  %v1370_v46 = vsub.f32 %v1298_v21, %v1360_v45  ;;  %v5415_v21 = vld [vmem:[%s5795_s18 + $0x10] sm:$0xff]  }
 0x3bb   : > { %5460 = vpow2.f32 %v1383_v44 }
 0x3bc   : > { %v1379_v47 = vmul.f32 1.442695, %v1370_v46 }
 0x3be   : > { %5462 = vpow2.f32 %v1379_v47 }
 0x3c3   : > { %v5457_v48 = vpop.eup %5456 }
 0x3c4   : > { %v1397_v51 = vsel %vm1348_vm7, %v5457_v48, 0.0 }
 0x3c5   : > { %1398 = vadd.xlane.f32.xlu0 %v1397_v51 }
 0x3c7   : > { %v5459_v52 = vpop.eup %5458 }
 0x3c8   : > { %v5461_v53 = vpop.eup %5460  ;;  %v1391_v54 = vsel %vm1348_vm7, %v5459_v52, 0.0 }
 0x3c9   : > { %1392 = vadd.xlane.f32.xlu0 %v1391_v54  ;;  %v1400_v55 = vsel %vm1348_vm7, %v5461_v53, 0.0 }
 0x3ca   : > { %1401 = vadd.xlane.f32.xlu1 %v1400_v55  ;;  %v4620_v55 = vld [vmem:[%s5804_s28 + $0x1] ss:$0 sm:$0xff] }
 0x3cb   : > { %v5463_v57 = vpop.eup %5462 }
 0x3cc   : > { %v1394_v58 = vsel %vm1348_vm7, %v5463_v57, 0.0 }
 0x3ce   : > { %1395 = vadd.xlane.f32.xlu1 %v1394_v58 }
 0x43e   : > { %v1387_v60 = vpop.xlane.xlu0 %1386 }
 0x43f   : > { %5464 = vrcp.f32 %v1387_v60 }
 0x442   : > { %v1390_v63 = vpop.xlane.xlu1 %1389 }
 0x443   : > { %5466 = vrcp.f32 %v1390_v63 }
 0x44c   : > { %v5465_v1 = vpop.eup %5464 }
 0x44d   : > { %v1409_v5 = vmul.f32 %v5465_v1, %v5453_v33 }
 0x44e   : > { %v1399_v2 = vpop.xlane.xlu0 %1398 }
 0x44f   : > { %5468 = vrcp.f32 %v1399_v2 }
 0x450   : > { %v5467_v4 = vpop.eup %5466 }
 0x451   : > { %v1410_v6 = vmul.f32 %v5467_v4, %v5455_v42 }
 0x452   : > { %v1393_v8 = vpop.xlane.xlu0 %1392 }
 0x453   : > { %v1415_v7 = vpack.c.bf16 %v1410_v6, %v1409_v5  ;;  %v1402_v9 = vpop.xlane.xlu1 %1401 }
 0x454   : > { %5470 = vrcp.f32 %v1402_v9 }
 0x455   : > { %5000 = vmatmul.mubr.msk.bf16.vlgmr.msra.gmra.mxu0 %vm1348_vm7, %v1415_v7  ;;  %5472 = vrcp.f32 %v1393_v8 }
 0x456   : > { %5010 = vmatpush3.bf16.msra.mxu0 %v1420_v61  ;;  %5011 = vmatprep.mubr.msk.bf16.mxu0 %vm5650_vm5, %v5649_v0  ;;  %v5413_v61 = vld [vmem:[%s5795_s18 + $0x18] sm:$0xff]  }
 0x457   : > { %v1396_v10 = vpop.xlane.xlu1 %1395  ;;  %5031 = vmatprep.subr.bf16.mxu0 %v5649_v0 }
 0x458   : > { %5474 = vrcp.f32 %v1396_v10 }
 0x45c   : > { %v5469_v11 = vpop.eup %5468 }
 0x45d   : > { %v1413_v13 = vmul.f32 %v5469_v11, %v5457_v48 }
 0x461   : > { %v5471_v12 = vpop.eup %5470 }
 0x462   : > { %v1414_v14 = vmul.f32 %v5471_v12, %v5461_v53  ;;  %v5473_v15 = vpop.eup %5472 }
 0x463   : > { %v1411_v56 = vmul.f32 %v5473_v15, %v5459_v52 }
 0x464   : > { %v1417_v17 = vpack.c.bf16 %v1414_v14, %v1413_v13 }
 0x465   : > { %v5475_v18 = vpop.eup %5474 }
 0x466   : > { %5012 = vmatmul.mubr.msk.bf16.vlgmr.msra.gmra.mxu0 %vm1348_vm7, %v1417_v17  ;;  %v1412_v59 = vmul.f32 %v5475_v18, %v5463_v57 }
 0x467   : > { %5032 = vmatpush3.bf16.msra.mxu0 %v5412_v16  ;;  %5035 = vmatprep.mubr.msk.bf16.mxu0 %vm5650_vm5, %v5649_v0 }
 0x468   : > { %v1416_v20 = vpack.c.bf16 %v1412_v59, %v1411_v56  ;;  %5033 = vmatprep.subr.bf16.mxu0 %v5649_v0 }
 0x46a   : > { %5006 = vmatmul.mubr.msk.bf16.vlgmr.msra.gmra.mxu1 %vm1348_vm7, %v1416_v20 }
 0x46b   : > { %5016 = vmatpush3.bf16.msra.mxu1 %v5413_v61  ;;  %5034 = vmatpush3.bf16.msra.mxu0 %v5414_v19 }
 0x46c   : > { %5017 = vmatprep.subr.bf16.mxu1 %v5649_v0  ;;  %5019 = vmatprep.mubr.msk.bf16.mxu1 %vm5650_vm5, %v5649_v0 }
 0x46d   : > { %5063 = vmatprep.subr.bf16.mxu0 %v5649_v0 }
 0x46e   : > { %5036 = vmatmul.mubr.msk.bf16.vlgmr.msra.gmra.mxu0 %vm840_vm4, %v5929_v39 }
 0x46f   : > { %5018 = vmatpush3.bf16.msra.mxu1 %v5415_v21  ;;  %5039 = vmatprep.mubr.msk.bf16.mxu0 %vm5650_vm5, %v5649_v0 }
 0x470   : > { %5047 = vmatprep.subr.bf16.mxu1 %v5649_v0 }
 0x472   : > { %5020 = vmatmul.mubr.msk.bf16.vlgmr.msra.gmra.mxu1 %vm840_vm4, %v5929_v39 }
 0x473   : > { %5023 = vmatprep.mubr.msk.bf16.mxu1 %vm5650_vm5, %v5649_v0  ;;  %5048 = vmatpush3.bf16.msra.mxu1 %v5416_v22 }
 0x474   : > { %5049 = vmatprep.subr.bf16.mxu1 %v5649_v0 }
 0x476   : > { %5040 = vmatmul.mubr.msk.bf16.gmra.mxu0 %vm840_vm4, %v5937_v49 }
 0x477   : > { %5043 = vmatprep.mubr.msk.bf16.mxu0 %vm5650_vm5, %v5649_v0  ;;  %5050 = vmatpush3.bf16.msra.mxu1 %v5417_v23 }
 0x478   : > { %5081 = vmatprep.subr.bf16.mxu1 %v5649_v0 }
 0x47a   : > { %5024 = vmatmul.mubr.msk.bf16.gmra.mxu1 %vm840_vm4, %v5937_v49 }
 0x47b   : > { %5027 = vmatprep.mubr.msk.bf16.mxu1 %vm5650_vm5, %v5649_v0 }
 0x47e   : > { %5044 = vmatmul.mubr.msk.bf16.gmra.mxu0 %vm840_vm4, %v5939_v50 }
 0x47f   : > { %5065 = vmatprep.mubr.msk.bf16.mxu0 %vm5650_vm5, %v5649_v0 }
 0x482   : > { %5028 = vmatmul.mubr.msk.bf16.gmra.mxu1 %vm840_vm4, %v5939_v50 }
 0x483   : > { %5051 = vmatprep.mubr.msk.bf16.mxu1 %vm5650_vm5, %v5649_v0 }
 0x48a   : > { %5052 = vmatmul.mubr.msk.bf16.vlgmr.msra.gmra.mxu1 %vm840_vm4, %v5929_v39 }
 0x48b   : > { %5055 = vmatprep.mubr.msk.bf16.mxu1 %vm5650_vm5, %v5649_v0 }
 0x492   : > { %5056 = vmatmul.mubr.msk.bf16.gmra.mxu1 %vm840_vm4, %v5937_v49 }
 0x493   : > { %5059 = vmatprep.mubr.msk.bf16.mxu1 %vm5650_vm5, %v5649_v0 }
 0x49a   : > { %5060 = vmatmul.mubr.msk.bf16.gmra.mxu1 %vm840_vm4, %v5939_v50 }
 0x49b   : > { %5083 = vmatprep.mubr.msk.bf16.mxu1 %vm5650_vm5, %v5649_v0 }
 0x515   : > { %v6087_v24 = vpop.f32.mrf.mxu0 }
 0x517   : > { %v5001_v25 = vpop.f32.mrf.mxu0 }
 0x519   : > { %v6089_v26 = vpop.f32.mrf.mxu0 }
 0x51a   : > { %v1553_v27 = vpack.c.bf16 %v6089_v26, %v6087_v24  ;;  %v4654_v24 = vld [vmem:[%s5790_s2 + $0x4] sm:$0xf] }
 0x51b   : > { %v5002_v28 = vpop.f32.mrf.mxu0  ;;  %v2170_v26 = vsel %vm2168_vm8, %v4654_v24, 0 }
 0x526   : > { %v6093_v29 = vpop.f32.mrf.mxu0 }
 0x528   : > { %v5013_v30 = vpop.f32.mrf.mxu0 }
 0x52a   : > { %v6095_v31 = vpop.f32.mrf.mxu1  ;;  %v6097_v32 = vpop.f32.mrf.mxu0 }
 0x52b   : > { %v1555_v33 = vpack.c.bf16 %v6097_v32, %v6093_v29  ;;  %v5420_v32 = vld [vmem:[%s5795_s18 + $0x28] sm:$0xff]  }
 0x52c   : > { %v5007_v34 = vpop.f32.mrf.mxu1  ;;  %v5014_v35 = vpop.f32.mrf.mxu0 }
 0x52d   : > { %v4642_v35 = vld [vmem:[%s5804_s28 + $0x9] ss:$0 sm:$0xff] }
 0x52e   : > { %v6101_v36 = vpop.f32.mrf.mxu1  ;;  %v1698_v37 = vpop.f32.mrf.mxu0 }
 0x52f   : > { %v1554_v40 = vpack.c.bf16 %v6101_v36, %v6095_v31  ;;  %v1699_v45 = vadd.f32 %v4631_v41, %v1698_v37 }
 0x530   : > { %v5008_v42 = vpop.f32.mrf.mxu1  ;;  %v5037_v43 = vpop.f32.mrf.mxu0 }
 0x532   : > { %v1616_v44 = vpop.f32.mrf.mxu1  ;;  %v1701_v38 = vpop.f32.mrf.mxu0 }
 0x533   : > { %v1702_v46 = vadd.f32 %v4631_v41, %v1701_v38  ;;  %v1617_v2 = vadd.f32 %v4620_v55, %v1616_v44 }
 0x534   : > { %v5021_v47 = vpop.f32.mrf.mxu1  ;;  %v5038_v48 = vpop.f32.mrf.mxu0 }
 0x535   : > { %v1806_v51 = vpack.c.bf16 %v1702_v46, %v1699_v45 }
 0x536   : > { %v1619_v52 = vpop.f32.mrf.mxu1  ;;  %v1706_v53 = vpop.f32.mrf.mxu0 }
 0x537   : > { %v1813_v54 = vsel %vm1206_vm6, %v1806_v51, 0  ;;  %v1620_v60 = vadd.f32 %v4620_v55, %v1619_v52  ;;  %v1707_v4 = vadd.f32 %v4631_v41, %v1706_v53 }
 0x538   : > { %v5022_v57 = vpop.f32.mrf.mxu1  ;;  %v5041_v58 = vpop.f32.mrf.mxu0  ;;  %5064 = vmatpush3.bf16.xpose.msra.mxu0 %v1813_v54 }
 0x539   : > { %5069 = vmatprep.subr.bf16.mxu0 %v5649_v0  ;;  %v1803_v8 = vpack.c.bf16 %v1620_v60, %v1617_v2 }
 0x53a   : > { %v1624_v63 = vpop.f32.mrf.mxu1  ;;  %v1709_v1 = vpop.f32.mrf.mxu0 }
 0x53b   : > { %v1710_v5 = vadd.f32 %v4631_v41, %v1709_v1  ;;  %v1625_v18 = vadd.f32 %v4620_v55, %v1624_v63 }
 0x53c   : > { %v5025_v6 = vpop.f32.mrf.mxu1  ;;  %v5042_v7 = vpop.f32.mrf.mxu0 }
 0x53d   : > { %v1807_v9 = vpack.c.bf16 %v1710_v5, %v1707_v4 }
 0x53e   : > { %v1627_v10 = vpop.f32.mrf.mxu1  ;;  %v1714_v11 = vpop.f32.mrf.mxu0 }
 0x53f   : > { %5066 = vmatmul.mubr.msk.bf16.vlgmr.msra.gmra.mxu0 %vm1206_vm6, %v1803_v8  ;;  %v1860_v12 = vsel %vm1206_vm6, %v1807_v9, 0  ;;  %v1628_v15 = vadd.f32 %v4620_v55, %v1627_v10  ;;  %v1715_v56 = vadd.f32 %v4631_v41, %v1714_v11 }
 0x540   : > { %v5026_v13 = vpop.f32.mrf.mxu1  ;;  %v5045_v14 = vpop.f32.mrf.mxu0  ;;  %5070 = vmatpush3.bf16.xpose.msra.mxu0 %v1860_v12  ;;  %5071 = vmatprep.mubr.msk.bf16.mxu0 %vm5650_vm5, %v5649_v0 }
 0x541   : > { %5075 = vmatprep.subr.bf16.mxu0 %v5649_v0  ;;  %v1804_v20 = vpack.c.bf16 %v1628_v15, %v1625_v18 }
 0x542   : > { %v1632_v16 = vpop.f32.mrf.mxu1  ;;  %v1717_v17 = vpop.f32.mrf.mxu0 }
 0x543   : > { %v1718_v59 = vadd.f32 %v4631_v41, %v1717_v17  ;;  %v1633_v34 = vadd.f32 %v4620_v55, %v1632_v16 }
 0x544   : > { %v5029_v61 = vpop.f32.mrf.mxu1  ;;  %v5046_v19 = vpop.f32.mrf.mxu0 }
 0x545   : > { %v1808_v21 = vpack.c.bf16 %v1718_v59, %v1715_v56 }
 0x546   : > { %v1635_v22 = vpop.f32.mrf.mxu1 }
 0x547   : > { %5072 = vmatmul.mubr.msk.bf16.vlgmr.msra.gmra.mxu0 %vm1206_vm6, %v1804_v20  ;;  %v1907_v23 = vsel %vm1206_vm6, %v1808_v21, 0  ;;  %v1636_v28 = vadd.f32 %v4620_v55, %v1635_v22 }
 0x548   : > { %v5030_v25 = vpop.f32.mrf.mxu1  ;;  %5076 = vmatpush3.bf16.xpose.msra.mxu0 %v1907_v23  ;;  %5077 = vmatprep.mubr.msk.bf16.mxu0 %vm5650_vm5, %v5649_v0 }
 0x549   : > { %5087 = vmatprep.subr.bf16.mxu0 %v5649_v0  ;;  %v1805_v41 = vpack.c.bf16 %v1636_v28, %v1633_v34 }
 0x54a   : > { %v1780_v30 = vpop.f32.mrf.mxu1 }
 0x54b   : > { %v1781_v43 = vadd.f32 %v4642_v35, %v1780_v30 }
 0x54c   : > { %v5053_v37 = vpop.f32.mrf.mxu1 }
 0x54e   : > { %v1783_v42 = vpop.f32.mrf.mxu1 }
 0x54f   : > { %v1784_v44 = vadd.f32 %v4642_v35, %v1783_v42  ;;  %5078 = vmatmul.mubr.msk.bf16.vlgmr.msra.gmra.mxu0 %vm1206_vm6, %v1805_v41 }
 0x550   : > { %v5054_v38 = vpop.f32.mrf.mxu1  ;;  %5089 = vmatprep.mubr.msk.bf16.mxu0 %vm5650_vm5, %v5649_v0 }
 0x551   : > { %v2019_v45 = vpack.c.bf16 %v1784_v44, %v1781_v43 }
 0x552   : > { %v1788_v46 = vpop.f32.mrf.mxu1 }
 0x553   : > { %5082 = vmatpush3.bf16.msra.mxu1 %v2019_v45  ;;  %v1789_v51 = vadd.f32 %v4642_v35, %v1788_v46 }
 0x554   : > { %v5057_v47 = vpop.f32.mrf.mxu1  ;;  %5093 = vmatprep.subr.bf16.mxu1 %v5649_v0 }
 0x556   : > { %v1791_v48 = vpop.f32.mrf.mxu1 }
 0x557   : > { %v1792_v52 = vadd.f32 %v4642_v35, %v1791_v48 }
 0x558   : > { %v5058_v53 = vpop.f32.mrf.mxu1 }
 0x559   : > { %v2020_v54 = vpack.c.bf16 %v1792_v52, %v1789_v51 }
 0x55a   : > { %v1796_v55 = vpop.f32.mrf.mxu1 }
 0x55b   : > { %v6124_v57 = vadd.f32 %v4642_v35, %v1796_v55  ;;  %5088 = vmatpush3.bf16.msra.mxu0 %v2020_v54 }
 0x55c   : > { %v5061_v58 = vpop.f32.mrf.mxu1  ;;  %5099 = vmatprep.subr.bf16.mxu0 %v5649_v0 }
 0x55e   : > { %v1799_v60 = vpop.f32.mrf.mxu1 }
 0x55f   : > { %v6127_v63 = vadd.f32 %v4642_v35, %v1799_v60 }
 0x560   : > { %v5062_v1 = vpop.f32.mrf.mxu1 }
 0x561   : > { %v2021_v2 = vpack.c.bf16 %v6127_v63, %v6124_v57  ;;  %v1556_v57 = vld [vmem:[%s5790_s2] sm:$0xf] }
 0x5ff   : > { %v1849_v4 = vpop.f32.mrf.mxu0 }
 0x600   : > { %v1850_v5 = vadd.f32 %v1849_v4, %v6004_v62 }
 0x601   : > { %v5067_v6 = vpop.f32.mrf.mxu0 }
 0x602   : > { %v1950_v7 = vsel %vm1348_vm7, %v1850_v5, -inf }
 0x603   : > { %1951 = vmax.xlane.f32.xlu0 %v1950_v7  ;;  %v1852_v8 = vpop.f32.mrf.mxu0 }
 0x604   : > { %v1853_v9 = vadd.f32 %v1852_v8, %v6007_v3 }
 0x605   : > { %v5068_v10 = vpop.f32.mrf.mxu0 }
 0x606   : > { %v1953_v11 = vsel %vm1348_vm7, %v1853_v9, -inf }
 0x607   : > { %1954 = vmax.xlane.f32.xlu1 %v1953_v11  ;;  %v1896_v12 = vpop.f32.mrf.mxu0 }
 0x608   : > { %v1897_v13 = vadd.f32 %v1896_v12, %v6004_v62 }
 0x609   : > { %v5073_v14 = vpop.f32.mrf.mxu0 }
 0x60a   : > { %v1956_v15 = vsel %vm1348_vm7, %v1897_v13, -inf }
 0x60b   : > { %1957 = vmax.xlane.f32.xlu0 %v1956_v15  ;;  %v1899_v16 = vpop.f32.mrf.mxu0 }
 0x60c   : > { %v1900_v17 = vadd.f32 %v1899_v16, %v6007_v3 }
 0x60d   : > { %v5074_v18 = vpop.f32.mrf.mxu0 }
 0x60e   : > { %v1959_v56 = vsel %vm1348_vm7, %v1900_v17, -inf }
 0x60f   : > { %1960 = vmax.xlane.f32.xlu1 %v1959_v56  ;;  %v1943_v59 = vpop.f32.mrf.mxu0 }
 0x610   : > { %v1944_v61 = vadd.f32 %v1943_v59, %v6004_v62 }
 0x611   : > { %v5079_v19 = vpop.f32.mrf.mxu0 }
 0x612   : > { %v1962_v20 = vsel %vm1348_vm7, %v1944_v61, -inf }
 0x613   : > { %1963 = vmax.xlane.f32.xlu0 %v1962_v20  ;;  %v1946_v21 = vpop.f32.mrf.mxu0 }
 0x614   : > { %v1947_v22 = vadd.f32 %v1946_v21, %v6007_v3 }
 0x615   : > { %v5080_v23 = vpop.f32.mrf.mxu0 }
 0x616   : > { %v1965_v25 = vsel %vm1348_vm7, %v1947_v22, -inf }
 0x617   : > { %1966 = vmax.xlane.f32.xlu1 %v1965_v25 }
 0x68c   : > { %v1952_v28 = vpop.xlane.xlu0 %1951 }
 0x68d   : > { %v1968_v30 = vsub.f32 %v1850_v5, %v1952_v28 }
 0x68f   : > { %v1974_v34 = vmul.f32 1.442695, %v1968_v30  ;;  %v2239_v30 = vsel %vm2168_vm8, %v1556_v57, 0 }
 0x690   : > { %v1955_v35 = vpop.xlane.xlu1 %1954 }
 0x691   : > { %5476 = vpow2.f32 %v1974_v34  ;;  %v1969_v37 = vsub.f32 %v1853_v9, %v1955_v35  ;;  %v5418_v34 = vld [vmem:[%s5795_s18 + $0x68] sm:$0xff]   ;;  %v5419_v35 = vld [vmem:[%s5795_s18 + $0x60] sm:$0xff]  }
 0x693   : > { %v1976_v41 = vmul.f32 1.442695, %v1969_v37  ;;  %v5421_v37 = vld [vmem:[%s5795_s18 + $0x20] sm:$0xff]  }
 0x694   : > { %v1958_v42 = vpop.xlane.xlu0 %1957 }
 0x695   : > { %5478 = vpow2.f32 %v1976_v41  ;;  %v1970_v62 = vsub.f32 %v1897_v13, %v1958_v42 }
 0x697   : > { %v1978_v43 = vmul.f32 1.442695, %v1970_v62 }
 0x698   : > { %v1961_v44 = vpop.xlane.xlu1 %1960 }
 0x699   : > { %5480 = vpow2.f32 %v1978_v43  ;;  %v1971_v38 = vsub.f32 %v1900_v17, %v1961_v44 }
 0x69b   : > { %v1980_v45 = vmul.f32 1.442695, %v1971_v38 }
 0x69c   : > { %v1964_v3 = vpop.xlane.xlu0 %1963 }
 0x69d   : > { %5482 = vpow2.f32 %v1980_v45  ;;  %v1972_v46 = vsub.f32 %v1944_v61, %v1964_v3 }
 0x69e   : > { %v5477_v47 = vpop.eup %5476 }
 0x69f   : > { %v1982_v48 = vmul.f32 1.442695, %v1972_v46  ;;  %v1986_v51 = vsel %vm1348_vm7, %v5477_v47, 0.0 }
 0x6a0   : > { %1987 = vadd.xlane.f32.xlu0 %v1986_v51  ;;  %v1967_v52 = vpop.xlane.xlu1 %1966 }
 0x6a1   : > { %5484 = vpow2.f32 %v1982_v48  ;;  %v1973_v53 = vsub.f32 %v1947_v22, %v1967_v52  ;;  %v5422_v52 = vld [vmem:[%s5795_s18 + $0xa8] sm:$0xff]  }
 0x6a2   : > { %v5479_v54 = vpop.eup %5478 }
 0x6a3   : > { %v1984_v55 = vmul.f32 1.442695, %v1973_v53  ;;  %v1989_v58 = vsel %vm1348_vm7, %v5479_v54, 0.0 }
 0x6a4   : > { %1990 = vadd.xlane.f32.xlu1 %v1989_v58 }
 0x6a5   : > { %5486 = vpow2.f32 %v1984_v55  ;;  %v5423_v55 = vld [vmem:[%s5795_s18 + $0xa0] sm:$0xff]  }
 0x6a6   : > { %v5481_v60 = vpop.eup %5480 }
 0x6a7   : > { %v1992_v1 = vsel %vm1348_vm7, %v5481_v60, 0.0 }
 0x6a8   : > { %1993 = vadd.xlane.f32.xlu0 %v1992_v1 }
 0x6aa   : > { %v5483_v4 = vpop.eup %5482 }
 0x6ab   : > { %v1995_v5 = vsel %vm1348_vm7, %v5483_v4, 0.0 }
 0x6ac   : > { %1996 = vadd.xlane.f32.xlu1 %v1995_v5 }
 0x6ae   : > { %v5485_v6 = vpop.eup %5484 }
 0x6af   : > { %v1998_v7 = vsel %vm1348_vm7, %v5485_v6, 0.0 }
 0x6b0   : > { %1999 = vadd.xlane.f32.xlu0 %v1998_v7 }
 0x6b2   : > { %v5487_v8 = vpop.eup %5486 }
 0x6b3   : > { %v2001_v9 = vsel %vm1348_vm7, %v5487_v8, 0.0 }
 0x6b4   : > { %2002 = vadd.xlane.f32.xlu1 %v2001_v9  ;;  %v4677_v9 = vld [vmem:[%s5804_s28 + $0x6] ss:$0 sm:$0xff] }
 0x729   : > { %v1988_v10 = vpop.xlane.xlu0 %1987 }
 0x72a   : > { %5488 = vrcp.f32 %v1988_v10 }
 0x72d   : > { %v1991_v11 = vpop.xlane.xlu1 %1990 }
 0x72e   : > { %5490 = vrcp.f32 %v1991_v11 }
 0x731   : > { %v1994_v12 = vpop.xlane.xlu0 %1993 }
 0x732   : > { %5492 = vrcp.f32 %v1994_v12 }
 0x735   : > { %v1997_v13 = vpop.xlane.xlu1 %1996 }
 0x736   : > { %5494 = vrcp.f32 %v1997_v13 }
 0x737   : > { %v5489_v14 = vpop.eup %5488 }
 0x738   : > { %v2010_v17 = vmul.f32 %v5489_v14, %v5477_v47 }
 0x739   : > { %v2000_v15 = vpop.xlane.xlu0 %1999 }
 0x73a   : > { %5496 = vrcp.f32 %v2000_v15 }
 0x73b   : > { %v5491_v16 = vpop.eup %5490 }
 0x73c   : > { %v2011_v18 = vmul.f32 %v5491_v16, %v5479_v54 }
 0x73d   : > { %v2003_v56 = vpop.xlane.xlu1 %2002 }
 0x73e   : > { %v2016_v59 = vpack.c.bf16 %v2011_v18, %v2010_v17  ;;  %5498 = vrcp.f32 %v2003_v56 }
 0x73f   : > { %v5493_v61 = vpop.eup %5492 }
 0x740   : > { %5084 = vmatmul.mubr.msk.bf16.vlgmr.msra.gmra.mxu1 %vm1348_vm7, %v2016_v59  ;;  %v2012_v20 = vmul.f32 %v5493_v61, %v5481_v60 }
 0x741   : > { %5094 = vmatpush3.bf16.msra.mxu1 %v2021_v2  ;;  %5095 = vmatprep.mubr.msk.bf16.mxu1 %vm5650_vm5, %v5649_v0 }
 0x742   : > { %5113 = vmatprep.subr.bf16.mxu1 %v5649_v0 }
 0x743   : > { %v5495_v19 = vpop.eup %5494 }
 0x744   : > { %v2013_v21 = vmul.f32 %v5495_v19, %v5483_v4 }
 0x746   : > { %v2017_v22 = vpack.c.bf16 %v2013_v21, %v2012_v20 }
 0x747   : > { %v5497_v23 = vpop.eup %5496 }
 0x748   : > { %5090 = vmatmul.mubr.msk.bf16.vlgmr.msra.gmra.mxu0 %vm1348_vm7, %v2017_v22  ;;  %v2014_v63 = vmul.f32 %v5497_v23, %v5485_v6 }
 0x749   : > { %5101 = vmatprep.mubr.msk.bf16.mxu0 %vm5650_vm5, %v5649_v0  ;;  %5100 = vmatpush3.bf16.msra.mxu0 %v2170_v26 }
 0x74a   : > { %5127 = vmatprep.subr.bf16.mxu0 %v5649_v0 }
 0x74b   : > { %v5499_v25 = vpop.eup %5498 }
 0x74c   : > { %v2015_v2 = vmul.f32 %v5499_v25, %v5487_v8 }
 0x74e   : > { %v2018_v28 = vpack.c.bf16 %v2015_v2, %v2014_v63 }
 0x750   : > { %5096 = vmatmul.mubr.msk.bf16.vlgmr.msra.gmra.mxu1 %vm1348_vm7, %v2018_v28 }
 0x751   : > { %5114 = vmatpush3.bf16.msra.mxu1 %v2239_v30  ;;  %5115 = vmatprep.mubr.msk.bf16.mxu1 %vm5650_vm5, %v5649_v0 }
 0x752   : > { %5143 = vmatprep.subr.bf16.mxu1 %v5649_v0 }
 0x758   : > { %5116 = vmatmul.mubr.msk.bf16.vlgmr.msra.gmra.mxu1 %vm1206_vm6, %v1553_v27 }
 0x759   : > { %5119 = vmatprep.mubr.msk.bf16.mxu1 %vm5650_vm5, %v5649_v0  ;;  %5144 = vmatpush3.bf16.msra.mxu1 %v5418_v34 }
 0x75a   : > { %5145 = vmatprep.subr.bf16.mxu1 %v5649_v0 }
 0x75d   : > { %5146 = vmatpush3.bf16.msra.mxu1 %v5419_v35 }
 0x75e   : > { %5175 = vmatprep.subr.bf16.mxu1 %v5649_v0 }
 0x760   : > { %5120 = vmatmul.mubr.msk.bf16.gmra.mxu1 %vm1206_vm6, %v1554_v40 }
 0x761   : > { %5123 = vmatprep.mubr.msk.bf16.mxu1 %vm5650_vm5, %v5649_v0 }
 0x768   : > { %5124 = vmatmul.mubr.msk.bf16.gmra.mxu1 %vm1206_vm6, %v1555_v33 }
 0x769   : > { %5147 = vmatprep.mubr.msk.bf16.mxu1 %vm5650_vm5, %v5649_v0 }
 0x770   : > { %5148 = vmatmul.mubr.msk.bf16.vlgmr.msra.gmra.mxu1 %vm840_vm4, %v5929_v39 }
 0x771   : > { %5151 = vmatprep.mubr.msk.bf16.mxu1 %vm5650_vm5, %v5649_v0 }
 0x778   : > { %5152 = vmatmul.mubr.msk.bf16.gmra.mxu1 %vm840_vm4, %v5937_v49 }
 0x779   : > { %5155 = vmatprep.mubr.msk.bf16.mxu1 %vm5650_vm5, %v5649_v0 }
 0x780   : > { %5156 = vmatmul.mubr.msk.bf16.gmra.mxu1 %vm840_vm4, %v5939_v50 }
 0x781   : > { %5177 = vmatprep.mubr.msk.bf16.mxu1 %vm5650_vm5, %v5649_v0 }
 0x800   : > { %v2059_v27 = vpop.f32.mrf.mxu1 }
 0x802   : > { %v5085_v29 = vpop.f32.mrf.mxu1 }
 0x804   : > { %v2062_v31 = vpop.f32.mrf.mxu1 }
 0x805   : > { %v2154_v33 = vpack.c.bf16 %v2062_v31, %v2059_v27 }
 0x806   : > { %v5086_v36 = vpop.f32.mrf.mxu1 }
 0x807   : > { %5102 = vmatmul.mubr.msk.bf16.vlgmr.msra.gmra.mxu0 %vm1206_vm6, %v2154_v33 }
 0x808   : > { %v2103_v40 = vpop.f32.mrf.mxu0  ;;  %5105 = vmatprep.mubr.msk.bf16.mxu0 %vm5650_vm5, %v5649_v0  ;;  %5128 = vmatpush3.bf16.msra.mxu0 %v5420_v32 }
 0x809   : > { %5129 = vmatprep.subr.bf16.mxu0 %v5649_v0 }
 0x80a   : > { %v5091_v41 = vpop.f32.mrf.mxu0 }
 0x80c   : > { %v2106_v42 = vpop.f32.mrf.mxu0  ;;  %5130 = vmatpush3.bf16.msra.mxu0 %v5421_v37  ;;  %v4666_v37 = vld [vmem:[%s5804_s28 + $0x2] ss:$0 sm:$0xff] }
 0x80d   : > { %v2155_v62 = vpack.c.bf16 %v2106_v42, %v2103_v40  ;;  %5159 = vmatprep.subr.bf16.mxu0 %v5649_v0 }
 0x80e   : > { %v5092_v43 = vpop.f32.mrf.mxu0 }
 0x80f   : > { %5106 = vmatmul.mubr.msk.bf16.gmra.mxu0 %vm1206_vm6, %v2155_v62 }
 0x810   : > { %v2147_v44 = vpop.f32.mrf.mxu1  ;;  %5109 = vmatprep.mubr.msk.bf16.mxu0 %vm5650_vm5, %v5649_v0 }
 0x812   : > { %v5097_v38 = vpop.f32.mrf.mxu1 }
 0x814   : > { %v2150_v45 = vpop.f32.mrf.mxu1 }
 0x815   : > { %v2156_v3 = vpack.c.bf16 %v2150_v45, %v2147_v44 }
 0x816   : > { %v5098_v46 = vpop.f32.mrf.mxu1 }
 0x817   : > { %5110 = vmatmul.mubr.msk.bf16.gmra.mxu0 %vm1206_vm6, %v2156_v3 }
 0x818   : > { %v6213_v47 = vpop.f32.mrf.mxu1  ;;  %5131 = vmatprep.mubr.msk.bf16.mxu0 %vm5650_vm5, %v5649_v0 }
 0x81a   : > { %v5117_v48 = vpop.f32.mrf.mxu1 }
 0x81c   : > { %v6217_v51 = vpop.f32.mrf.mxu1 }
 0x81e   : > { %v5118_v53 = vpop.f32.mrf.mxu1 }
 0x81f   : > { %5132 = vmatmul.mubr.msk.bf16.vlgmr.msra.gmra.mxu0 %vm840_vm4, %v5929_v39 }
 0x820   : > { %v6222_v54 = vpop.f32.mrf.mxu1  ;;  %5135 = vmatprep.mubr.msk.bf16.mxu0 %vm5650_vm5, %v5649_v0  ;;  %5160 = vmatpush3.bf16.msra.mxu0 %v5422_v52 }
 0x821   : > { %5161 = vmatprep.subr.bf16.mxu0 %v5649_v0 }
 0x822   : > { %v5121_v58 = vpop.f32.mrf.mxu1 }
 0x824   : > { %v6228_v60 = vpop.f32.mrf.mxu1  ;;  %5162 = vmatpush3.bf16.msra.mxu0 %v5423_v55 }
 0x825   : > { %5193 = vmatprep.subr.bf16.mxu0 %v5649_v0 }
 0x826   : > { %v5122_v1 = vpop.f32.mrf.mxu1 }
 0x827   : > { %5136 = vmatmul.mubr.msk.bf16.gmra.mxu0 %vm840_vm4, %v5937_v49 }
 0x828   : > { %v6233_v4 = vpop.f32.mrf.mxu1  ;;  %5139 = vmatprep.mubr.msk.bf16.mxu0 %vm5650_vm5, %v5649_v0 }
 0x82a   : > { %v5125_v5 = vpop.f32.mrf.mxu1 }
 0x82c   : > { %v6237_v6 = vpop.f32.mrf.mxu1 }
 0x82e   : > { %v5126_v7 = vpop.f32.mrf.mxu1 }
 0x82f   : > { %5140 = vmatmul.mubr.msk.bf16.gmra.mxu0 %vm840_vm4, %v5939_v50 }
 0x830   : > { %v2439_v8 = vpop.f32.mrf.mxu1  ;;  %5163 = vmatprep.mubr.msk.bf16.mxu0 %vm5650_vm5, %v5649_v0 }
 0x831   : > { %v2440_v12 = vadd.f32 %v4677_v9, %v2439_v8 }
 0x832   : > { %v5149_v10 = vpop.f32.mrf.mxu1 }
 0x834   : > { %v2442_v11 = vpop.f32.mrf.mxu1 }
 0x835   : > { %v2443_v13 = vadd.f32 %v4677_v9, %v2442_v11 }
 0x836   : > { %v5150_v14 = vpop.f32.mrf.mxu1 }
 0x837   : > { %v2547_v15 = vpack.c.bf16 %v2443_v13, %v2440_v12  ;;  %5164 = vmatmul.mubr.msk.bf16.vlgmr.msra.gmra.mxu0 %vm840_vm4, %v5929_v39  ;;  %v4688_v14 = vld [vmem:[%s5804_s28 + $0xa] ss:$0 sm:$0xff] }
 0x838   : > { %v2447_v16 = vpop.f32.mrf.mxu1  ;;  %5167 = vmatprep.mubr.msk.bf16.mxu0 %vm5650_vm5, %v5649_v0 }
 0x839   : > { %v2448_v17 = vadd.f32 %v4677_v9, %v2447_v16  ;;  %v2554_v18 = vsel %vm1206_vm6, %v2547_v15, 0 }
 0x83a   : > { %v5153_v56 = vpop.f32.mrf.mxu1  ;;  %5176 = vmatpush3.bf16.xpose.msra.mxu1 %v2554_v18 }
 0x83b   : > { %5181 = vmatprep.subr.bf16.mxu1 %v5649_v0 }
 0x83c   : > { %v2450_v59 = vpop.f32.mrf.mxu1 }
 0x83d   : > { %v2451_v61 = vadd.f32 %v4677_v9, %v2450_v59 }
 0x83e   : > { %v5154_v19 = vpop.f32.mrf.mxu1 }
 0x83f   : > { %v2548_v20 = vpack.c.bf16 %v2451_v61, %v2448_v17  ;;  %5168 = vmatmul.mubr.msk.bf16.gmra.mxu0 %vm840_vm4, %v5937_v49 }
 0x840   : > { %v2455_v21 = vpop.f32.mrf.mxu1  ;;  %5171 = vmatprep.mubr.msk.bf16.mxu0 %vm5650_vm5, %v5649_v0 }
 0x841   : > { %v2456_v22 = vadd.f32 %v4677_v9, %v2455_v21  ;;  %v2601_v3 = vsel %vm1206_vm6, %v2548_v20, 0 }
 0x842   : > { %v5157_v23 = vpop.f32.mrf.mxu1 }
 0x844   : > { %v2458_v25 = vpop.f32.mrf.mxu1 }
 0x845   : > { %v2459_v57 = vadd.f32 %v4677_v9, %v2458_v25 }
 0x846   : > { %v5158_v63 = vpop.f32.mrf.mxu1 }
 0x847   : > { %v2549_v2 = vpack.c.bf16 %v2459_v57, %v2456_v22  ;;  %5172 = vmatmul.mubr.msk.bf16.gmra.mxu0 %vm840_vm4, %v5939_v50 }
 0x848   : > { %5195 = vmatprep.mubr.msk.bf16.mxu0 %vm5650_vm5, %v5649_v0 }
 0x849   : > { %v2648_v5 = vsel %vm1206_vm6, %v2549_v2, 0 }
 0x8c7   : > { %v6258_v28 = vpop.f32.mrf.mxu0 }
 0x8c9   : > { %v5103_v30 = vpop.f32.mrf.mxu0 }
 0x8cb   : > { %v6260_v34 = vpop.f32.mrf.mxu0 }
 0x8cd   : > { %v5104_v35 = vpop.f32.mrf.mxu0 }
 0x8cf   : > { %v6262_v24 = vpop.f32.mrf.mxu0 }
 0x8d1   : > { %v5107_v26 = vpop.f32.mrf.mxu0 }
 0x8d3   : > { %v6264_v27 = vpop.f32.mrf.mxu0 }
 0x8d5   : > { %v5108_v29 = vpop.f32.mrf.mxu0 }
 0x8d7   : > { %v6266_v31 = vpop.f32.mrf.mxu0 }
 0x8d9   : > { %v5111_v32 = vpop.f32.mrf.mxu0 }
 0x8db   : > { %v6268_v33 = vpop.f32.mrf.mxu0 }
 0x8dd   : > { %v5112_v36 = vpop.f32.mrf.mxu0 }
 0x8de   : > { %v6293_v36 = vld [vmem:[#allocation3] sm:$0xff] }
 0x8df   : > { %v2357_v40 = vpop.f32.mrf.mxu0 }
 0x8e0   : > { %v2358_v62 = vadd.f32 %v4666_v37, %v2357_v40 }
 0x8e1   : > { %v5133_v41 = vpop.f32.mrf.mxu0 }
 0x8e3   : > { %v2360_v42 = vpop.f32.mrf.mxu0 }
 0x8e4   : > { %v2361_v43 = vadd.f32 %v4666_v37, %v2360_v42 }
 0x8e5   : > { %v5134_v44 = vpop.f32.mrf.mxu0 }
 0x8e6   : > { %v2544_v38 = vpack.c.bf16 %v2361_v43, %v2358_v62  ;;  %v6297_v62 = vld [vmem:[#allocation3 + $0x8] sm:$0xff] }
 0x8e7   : > { %v2365_v45 = vpop.f32.mrf.mxu0 }
 0x8e8   : > { %5178 = vmatmul.mubr.msk.bf16.vlgmr.msra.gmra.mxu1 %vm1206_vm6, %v2544_v38  ;;  %v2366_v52 = vadd.f32 %v4666_v37, %v2365_v45 }
 0x8e9   : > { %5182 = vmatpush3.bf16.xpose.msra.mxu1 %v2601_v3  ;;  %v5137_v46 = vpop.f32.mrf.mxu0  ;;  %5183 = vmatprep.mubr.msk.bf16.mxu1 %vm5650_vm5, %v5649_v0 }
 0x8ea   : > { %5187 = vmatprep.subr.bf16.mxu1 %v5649_v0 }
 0x8eb   : > { %v2368_v48 = vpop.f32.mrf.mxu0 }
 0x8ec   : > { %v2369_v53 = vadd.f32 %v4666_v37, %v2368_v48 }
 0x8ed   : > { %v5138_v55 = vpop.f32.mrf.mxu0 }
 0x8ee   : > { %v2545_v58 = vpack.c.bf16 %v2369_v53, %v2366_v52 }
 0x8ef   : > { %v2373_v1 = vpop.f32.mrf.mxu0 }
 0x8f0   : > { %5184 = vmatmul.mubr.msk.bf16.vlgmr.msra.gmra.mxu1 %vm1206_vm6, %v2545_v58  ;;  %v2374_v9 = vadd.f32 %v4666_v37, %v2373_v1 }
 0x8f1   : > { %5188 = vmatpush3.bf16.xpose.msra.mxu1 %v2648_v5  ;;  %v5141_v7 = vpop.f32.mrf.mxu0  ;;  %5189 = vmatprep.mubr.msk.bf16.mxu1 %vm5650_vm5, %v5649_v0 }
 0x8f2   : > { %5199 = vmatprep.subr.bf16.mxu1 %v5649_v0 }
 0x8f3   : > { %v2376_v8 = vpop.f32.mrf.mxu0 }
 0x8f4   : > { %v2377_v10 = vadd.f32 %v4666_v37, %v2376_v8 }
 0x8f5   : > { %v5142_v11 = vpop.f32.mrf.mxu0 }
 0x8f6   : > { %v2546_v12 = vpack.c.bf16 %v2377_v10, %v2374_v9 }
 0x8f7   : > { %v2521_v13 = vpop.f32.mrf.mxu0 }
 0x8f8   : > { %5190 = vmatmul.mubr.msk.bf16.vlgmr.msra.gmra.mxu1 %vm1206_vm6, %v2546_v12  ;;  %v2522_v17 = vadd.f32 %v4688_v14, %v2521_v13 }
 0x8f9   : > { %v5165_v15 = vpop.f32.mrf.mxu0  ;;  %5201 = vmatprep.mubr.msk.bf16.mxu1 %vm5650_vm5, %v5649_v0 }
 0x8fb   : > { %v2524_v16 = vpop.f32.mrf.mxu0 }
 0x8fc   : > { %v2525_v18 = vadd.f32 %v4688_v14, %v2524_v16 }
 0x8fd   : > { %v5166_v56 = vpop.f32.mrf.mxu0 }
 0x8fe   : > { %v2760_v59 = vpack.c.bf16 %v2525_v18, %v2522_v17 }
 0x8ff   : > { %v2529_v61 = vpop.f32.mrf.mxu0 }
 0x900   : > { %5194 = vmatpush3.bf16.msra.mxu0 %v2760_v59  ;;  %v2530_v21 = vadd.f32 %v4688_v14, %v2529_v61 }
 0x901   : > { %v5169_v19 = vpop.f32.mrf.mxu0  ;;  %5205 = vmatprep.subr.bf16.mxu0 %v5649_v0 }
 0x903   : > { %v2532_v20 = vpop.f32.mrf.mxu0 }
 0x904   : > { %v2533_v22 = vadd.f32 %v4688_v14, %v2532_v20 }
 0x905   : > { %v5170_v23 = vpop.f32.mrf.mxu0 }
 0x906   : > { %v2761_v25 = vpack.c.bf16 %v2533_v22, %v2530_v21 }
 0x907   : > { %v2537_v57 = vpop.f32.mrf.mxu0 }
 0x908   : > { %v6286_v63 = vadd.f32 %v4688_v14, %v2537_v57  ;;  %5200 = vmatpush3.bf16.msra.mxu1 %v2761_v25 }
 0x909   : > { %v5173_v2 = vpop.f32.mrf.mxu0  ;;  %5211 = vmatprep.subr.bf16.mxu1 %v5649_v0 }
 0x90b   : > { %v2540_v30 = vpop.f32.mrf.mxu0 }
 0x90c   : > { %v6289_v35 = vadd.f32 %v4688_v14, %v2540_v30 }
 0x90d   : > { %v5174_v26 = vpop.f32.mrf.mxu0 }
 0x90e   : > { %v2762_v29 = vpack.c.bf16 %v6289_v35, %v6286_v63 }
 0x9a8   : > { %v2590_v32 = vpop.f32.mrf.mxu1 }
 0x9a9   : > { %v2591_v40 = vadd.f32 %v6293_v36, %v2590_v32 }
 0x9aa   : > { %v5179_v37 = vpop.f32.mrf.mxu1 }
 0x9ab   : > { %v2691_v41 = vsel %vm1348_vm7, %v2591_v40, -inf }
 0x9ac   : > { %2692 = vmax.xlane.f32.xlu0 %v2691_v41  ;;  %v2593_v42 = vpop.f32.mrf.mxu1 }
 0x9ad   : > { %v2594_v43 = vadd.f32 %v6297_v62, %v2593_v42 }
 0x9ae   : > { %v5180_v44 = vpop.f32.mrf.mxu1 }
 0x9af   : > { %v2694_v38 = vsel %vm1348_vm7, %v2594_v43, -inf }
 0x9b0   : > { %2695 = vmax.xlane.f32.xlu1 %v2694_v38  ;;  %v2637_v45 = vpop.f32.mrf.mxu1 }
 0x9b1   : > { %v2638_v3 = vadd.f32 %v6293_v36, %v2637_v45 }
 0x9b2   : > { %v5185_v46 = vpop.f32.mrf.mxu1 }
 0x9b3   : > { %v2697_v48 = vsel %vm1348_vm7, %v2638_v3, -inf }
 0x9b4   : > { %2698 = vmax.xlane.f32.xlu0 %v2697_v48  ;;  %v2640_v52 = vpop.f32.mrf.mxu1 }
 0x9b5   : > { %v2641_v53 = vadd.f32 %v6297_v62, %v2640_v52 }
 0x9b6   : > { %v5186_v55 = vpop.f32.mrf.mxu1 }
 0x9b7   : > { %v2700_v58 = vsel %vm1348_vm7, %v2641_v53, -inf }
 0x9b8   : > { %2701 = vmax.xlane.f32.xlu1 %v2700_v58  ;;  %v2684_v1 = vpop.f32.mrf.mxu1 }
 0x9b9   : > { %v2685_v5 = vadd.f32 %v6293_v36, %v2684_v1 }
 0x9ba   : > { %v5191_v7 = vpop.f32.mrf.mxu1 }
 0x9bb   : > { %v2703_v8 = vsel %vm1348_vm7, %v2685_v5, -inf }
 0x9bc   : > { %2704 = vmax.xlane.f32.xlu0 %v2703_v8  ;;  %v2687_v9 = vpop.f32.mrf.mxu1 }
 0x9bd   : > { %v2688_v10 = vadd.f32 %v6297_v62, %v2687_v9 }
 0x9be   : > { %v5192_v11 = vpop.f32.mrf.mxu1 }
 0x9bf   : > { %v2706_v12 = vsel %vm1348_vm7, %v2688_v10, -inf }
 0x9c0   : > { %2707 = vmax.xlane.f32.xlu1 %v2706_v12 }
 0xa35   : > { %v2693_v13 = vpop.xlane.xlu0 %2692 }
 0xa36   : > { %v2709_v14 = vsub.f32 %v2591_v40, %v2693_v13 }
 0xa38   : > { %v2715_v15 = vmul.f32 1.442695, %v2709_v14 }
 0xa39   : > { %v2696_v16 = vpop.xlane.xlu1 %2695 }
 0xa3a   : > { %5500 = vpow2.f32 %v2715_v15  ;;  %v2710_v17 = vsub.f32 %v2594_v43, %v2696_v16 }
 0xa3c   : > { %v2717_v18 = vmul.f32 1.442695, %v2710_v17 }
 0xa3d   : > { %v2699_v56 = vpop.xlane.xlu0 %2698 }
 0xa3e   : > { %5502 = vpow2.f32 %v2717_v18  ;;  %v2711_v59 = vsub.f32 %v2638_v3, %v2699_v56  ;;  %v5425_v56 = vld [vmem:[%s5795_s18 + $0x30] sm:$0xff]  }
 0xa40   : > { %v2719_v61 = vmul.f32 1.442695, %v2711_v59  ;;  %v5426_v59 = vld [vmem:[%s5795_s18 + $0xb8] sm:$0xff]  }
 0xa41   : > { %v2702_v19 = vpop.xlane.xlu1 %2701 }
 0xa42   : > { %5504 = vpow2.f32 %v2719_v61  ;;  %v2712_v20 = vsub.f32 %v2641_v53, %v2702_v19  ;;  %v5427_v61 = vld [vmem:[%s5795_s18 + $0xb0] sm:$0xff]   ;;  %v4700_v19 = vld [vmem:[%s5790_s2 + $0x8] sm:$0xf] }
 0xa44   : > { %v2721_v21 = vmul.f32 1.442695, %v2712_v20  ;;  %v2910_v20 = vsel %vm2168_vm8, %v4700_v19, 0 }
 0xa45   : > { %v2705_v22 = vpop.xlane.xlu0 %2704 }
 0xa46   : > { %5506 = vpow2.f32 %v2721_v21  ;;  %v2713_v23 = vsub.f32 %v2685_v5, %v2705_v22 }
 0xa47   : > { %v5501_v25 = vpop.eup %5500 }
 0xa48   : > { %v2723_v57 = vmul.f32 1.442695, %v2713_v23  ;;  %v2727_v2 = vsel %vm1348_vm7, %v5501_v25, 0.0 }
 0xa49   : > { %2728 = vadd.xlane.f32.xlu0 %v2727_v2  ;;  %v2708_v30 = vpop.xlane.xlu1 %2707 }
 0xa4a   : > { %5508 = vpow2.f32 %v2723_v57  ;;  %v2714_v26 = vsub.f32 %v2688_v10, %v2708_v30 }
 0xa4b   : > { %v5503_v32 = vpop.eup %5502 }
 0xa4c   : > { %v2725_v40 = vmul.f32 1.442695, %v2714_v26  ;;  %v2730_v37 = vsel %vm1348_vm7, %v5503_v32, 0.0  ;;  %v5429_v26 = vld [vmem:[%s5795_s18 + $0x70] sm:$0xff]  }
 0xa4d   : > { %2731 = vadd.xlane.f32.xlu1 %v2730_v37 }
 0xa4e   : > { %5510 = vpow2.f32 %v2725_v40 }
 0xa4f   : > { %v5505_v41 = vpop.eup %5504 }
 0xa50   : > { %v2733_v42 = vsel %vm1348_vm7, %v5505_v41, 0.0 }
 0xa51   : > { %2734 = vadd.xlane.f32.xlu0 %v2733_v42 }
 0xa53   : > { %v5507_v43 = vpop.eup %5506 }
 0xa54   : > { %v2736_v44 = vsel %vm1348_vm7, %v5507_v43, 0.0 }
 0xa55   : > { %2737 = vadd.xlane.f32.xlu1 %v2736_v44 }
 0xa57   : > { %v5509_v38 = vpop.eup %5508 }
 0xa58   : > { %v2739_v45 = vsel %vm1348_vm7, %v5509_v38, 0.0 }
 0xa59   : > { %2740 = vadd.xlane.f32.xlu0 %v2739_v45 }
 0xa5b   : > { %v5511_v3 = vpop.eup %5510 }
 0xa5c   : > { %v2742_v46 = vsel %vm1348_vm7, %v5511_v3, 0.0 }
 0xa5d   : > { %2743 = vadd.xlane.f32.xlu1 %v2742_v46  ;;  %v4709_v46 = vld [vmem:[%s5804_s28 + $0x3] ss:$0 sm:$0xff] }
 0xad2   : > { %v2729_v48 = vpop.xlane.xlu0 %2728 }
 0xad3   : > { %5512 = vrcp.f32 %v2729_v48 }
 0xad6   : > { %v2732_v52 = vpop.xlane.xlu1 %2731 }
 0xad7   : > { %5514 = vrcp.f32 %v2732_v52 }
 0xada   : > { %v2735_v53 = vpop.xlane.xlu0 %2734 }
 0xadb   : > { %5516 = vrcp.f32 %v2735_v53 }
 0xade   : > { %v2738_v55 = vpop.xlane.xlu1 %2737 }
 0xadf   : > { %5518 = vrcp.f32 %v2738_v55 }
 0xae0   : > { %v5513_v58 = vpop.eup %5512 }
 0xae1   : > { %v2751_v7 = vmul.f32 %v5513_v58, %v5501_v25  ;;  %v5428_v25 = vld [vmem:[%s5795_s18 + $0x78] sm:$0xff]  }
 0xae2   : > { %v2741_v1 = vpop.xlane.xlu0 %2740 }
 0xae3   : > { %5520 = vrcp.f32 %v2741_v1 }
 0xae4   : > { %v5515_v5 = vpop.eup %5514 }
 0xae5   : > { %v2752_v8 = vmul.f32 %v5515_v5, %v5503_v32 }
 0xae6   : > { %v2744_v9 = vpop.xlane.xlu1 %2743 }
 0xae7   : > { %v2757_v10 = vpack.c.bf16 %v2752_v8, %v2751_v7  ;;  %5522 = vrcp.f32 %v2744_v9 }
 0xae8   : > { %v5517_v11 = vpop.eup %5516 }
 0xae9   : > { %5196 = vmatmul.mubr.msk.bf16.vlgmr.msra.gmra.mxu0 %vm1348_vm7, %v2757_v10  ;;  %v2753_v13 = vmul.f32 %v5517_v11, %v5505_v41 }
 0xaea   : > { %5206 = vmatpush3.bf16.msra.mxu0 %v2762_v29  ;;  %5207 = vmatprep.mubr.msk.bf16.mxu0 %vm5650_vm5, %v5649_v0  ;;  %v5424_v29 = vld [vmem:[%s5795_s18 + $0x38] sm:$0xff]  }
 0xaeb   : > { %5225 = vmatprep.subr.bf16.mxu0 %v5649_v0 }
 0xaec   : > { %v5519_v12 = vpop.eup %5518 }
 0xaed   : > { %v2754_v14 = vmul.f32 %v5519_v12, %v5507_v43 }
 0xaef   : > { %v2758_v15 = vpack.c.bf16 %v2754_v14, %v2753_v13 }
 0xaf0   : > { %v5521_v16 = vpop.eup %5520 }
 0xaf1   : > { %5202 = vmatmul.mubr.msk.bf16.vlgmr.msra.gmra.mxu1 %vm1348_vm7, %v2758_v15  ;;  %v2755_v63 = vmul.f32 %v5521_v16, %v5509_v38 }
 0xaf2   : > { %5213 = vmatprep.mubr.msk.bf16.mxu1 %vm5650_vm5, %v5649_v0  ;;  %5212 = vmatpush3.bf16.msra.mxu1 %v2910_v20 }
 0xaf3   : > { %5241 = vmatprep.subr.bf16.mxu1 %v5649_v0 }
 0xaf4   : > { %v5523_v17 = vpop.eup %5522 }
 0xaf5   : > { %v2756_v35 = vmul.f32 %v5523_v17, %v5511_v3 }
 0xaf7   : > { %v2759_v18 = vpack.c.bf16 %v2756_v35, %v2755_v63 }
 0xaf9   : > { %5208 = vmatmul.mubr.msk.bf16.vlgmr.msra.gmra.mxu0 %vm1348_vm7, %v2759_v18 }
 0xafa   : > { %5226 = vmatpush3.bf16.msra.mxu0 %v5424_v29  ;;  %5229 = vmatprep.mubr.msk.bf16.mxu0 %vm5650_vm5, %v5649_v0 }
 0xafb   : > { %5227 = vmatprep.subr.bf16.mxu0 %v5649_v0 }
 0xafe   : > { %5228 = vmatpush3.bf16.msra.mxu0 %v5425_v56 }
 0xaff   : > { %5257 = vmatprep.subr.bf16.mxu0 %v5649_v0 }
 0xb01   : > { %5230 = vmatmul.mubr.msk.bf16.vlgmr.msra.gmra.mxu0 %vm840_vm4, %v5929_v39 }
 0xb02   : > { %5233 = vmatprep.mubr.msk.bf16.mxu0 %vm5650_vm5, %v5649_v0  ;;  %5258 = vmatpush3.bf16.msra.mxu0 %v5426_v59 }
 0xb03   : > { %5259 = vmatprep.subr.bf16.mxu0 %v5649_v0 }
 0xb06   : > { %5260 = vmatpush3.bf16.msra.mxu0 %v5427_v61 }
 0xb07   : > { %5279 = vmatprep.subr.bf16.mxu0 %v5649_v0 }
 0xb09   : > { %5234 = vmatmul.mubr.msk.bf16.gmra.mxu0 %vm840_vm4, %v5937_v49 }
 0xb0a   : > { %5237 = vmatprep.mubr.msk.bf16.mxu0 %vm5650_vm5, %v5649_v0 }
 0xb11   : > { %5238 = vmatmul.mubr.msk.bf16.gmra.mxu0 %vm840_vm4, %v5939_v50 }
 0xb12   : > { %5261 = vmatprep.mubr.msk.bf16.mxu0 %vm5650_vm5, %v5649_v0 }
 0xb19   : > { %5262 = vmatmul.mubr.msk.bf16.vlgmr.msra.gmra.mxu0 %vm840_vm4, %v5929_v39 }
 0xb1a   : > { %5265 = vmatprep.mubr.msk.bf16.mxu0 %vm5650_vm5, %v5649_v0 }
 0xb21   : > { %5266 = vmatmul.mubr.msk.bf16.gmra.mxu0 %vm840_vm4, %v5937_v49 }
 0xb22   : > { %5269 = vmatprep.mubr.msk.bf16.mxu0 %vm5650_vm5, %v5649_v0 }
 0xb29   : > { %5270 = vmatmul.mubr.msk.bf16.gmra.mxu0 %vm840_vm4, %v5939_v50 }
 0xb2a   : > { %5281 = vmatprep.mubr.msk.bf16.mxu0 %vm5650_vm5, %v5649_v0 }
 0xba9   : > { %v2800_v21 = vpop.f32.mrf.mxu0 }
 0xbab   : > { %v5197_v22 = vpop.f32.mrf.mxu0 }
 0xbad   : > { %v2803_v23 = vpop.f32.mrf.mxu0 }
 0xbae   : > { %v2895_v57 = vpack.c.bf16 %v2803_v23, %v2800_v21 }
 0xbaf   : > { %v5198_v2 = vpop.f32.mrf.mxu0 }
 0xbb0   : > { %5214 = vmatmul.mubr.msk.bf16.vlgmr.msra.gmra.mxu1 %vm1206_vm6, %v2895_v57 }
 0xbb1   : > { %v2844_v30 = vpop.f32.mrf.mxu1  ;;  %5217 = vmatprep.mubr.msk.bf16.mxu1 %vm5650_vm5, %v5649_v0  ;;  %5242 = vmatpush3.bf16.msra.mxu1 %v5428_v25 }
 0xbb2   : > { %5243 = vmatprep.subr.bf16.mxu1 %v5649_v0 }
 0xbb3   : > { %v5203_v32 = vpop.f32.mrf.mxu1 }
 0xbb5   : > { %v2847_v40 = vpop.f32.mrf.mxu1  ;;  %5244 = vmatpush3.bf16.msra.mxu1 %v5429_v26 }
 0xbb6   : > { %v2896_v37 = vpack.c.bf16 %v2847_v40, %v2844_v30  ;;  %5273 = vmatprep.subr.bf16.mxu1 %v5649_v0 }
 0xbb7   : > { %v5204_v41 = vpop.f32.mrf.mxu1 }
 0xbb8   : > { %5218 = vmatmul.mubr.msk.bf16.gmra.mxu1 %vm1206_vm6, %v2896_v37 }
 0xbb9   : > { %v2888_v42 = vpop.f32.mrf.mxu0  ;;  %5221 = vmatprep.mubr.msk.bf16.mxu1 %vm5650_vm5, %v5649_v0 }
 0xbbb   : > { %v5209_v43 = vpop.f32.mrf.mxu0 }
 0xbbd   : > { %v2891_v44 = vpop.f32.mrf.mxu0 }
 0xbbe   : > { %v2897_v38 = vpack.c.bf16 %v2891_v44, %v2888_v42  ;;  %v2276_v42 = vadd.f32 %v6213_v47, %v6258_v28  ;;  %v2287_v47 = vadd.f32 %v6228_v60, %v6264_v27  ;;  %v4720_v60 = vld [vmem:[%s5804_s28 + $0x7] ss:$0 sm:$0xff] }
 0xbbf   : > { %v5210_v45 = vpop.f32.mrf.mxu0 }
 0xbc0   : > { %5222 = vmatmul.mubr.msk.bf16.gmra.mxu1 %vm1206_vm6, %v2897_v38  ;;  %v2279_v45 = vadd.f32 %v6217_v51, %v6260_v34  ;;  %v2292_v51 = vadd.f32 %v6233_v4, %v6266_v31 }
 0xbc1   : > { %v3034_v3 = vpop.f32.mrf.mxu0  ;;  %5245 = vmatprep.mubr.msk.bf16.mxu1 %vm5650_vm5, %v5649_v0 }
 0xbc2   : > { %v6377_v53 = vadd.f32 %v4709_v46, %v3034_v3 }
 0xbc3   : > { %v5231_v48 = vpop.f32.mrf.mxu0 }
 0xbc5   : > { %v3037_v52 = vpop.f32.mrf.mxu0 }
 0xbc6   : > { %v6379_v55 = vadd.f32 %v4709_v46, %v3037_v52  ;;  %v2284_v52 = vadd.f32 %v6222_v54, %v6262_v24  ;;  %v2295_v54 = vadd.f32 %v6237_v6, %v6268_v33 }
 0xbc7   : > { %v5232_v58 = vpop.f32.mrf.mxu0 }
 0xbc8   : > { %v3221_v1 = vpack.c.bf16 %v6379_v55, %v6377_v53  ;;  %5246 = vmatmul.mubr.msk.bf16.vlgmr.msra.gmra.mxu1 %vm840_vm4, %v5929_v39 }
 0xbc9   : > { %v3042_v5 = vpop.f32.mrf.mxu0  ;;  %5249 = vmatprep.mubr.msk.bf16.mxu1 %vm5650_vm5, %v5649_v0 }
 0xbca   : > { %v6387_v9 = vadd.f32 %v4709_v46, %v3042_v5 }
 0xbcb   : > { %v5235_v7 = vpop.f32.mrf.mxu0 }
 0xbcd   : > { %v3045_v8 = vpop.f32.mrf.mxu0 }
 0xbce   : > { %v6389_v10 = vadd.f32 %v4709_v46, %v3045_v8 }
 0xbcf   : > { %v5236_v11 = vpop.f32.mrf.mxu0 }
 0xbd0   : > { %v3222_v12 = vpack.c.bf16 %v6389_v10, %v6387_v9  ;;  %5250 = vmatmul.mubr.msk.bf16.gmra.mxu1 %vm840_vm4, %v5937_v49  ;;  %v4731_v49 = vld [vmem:[%s5804_s28 + $0xb] ss:$0 sm:$0xff]  ;;  %s6767_s28 = scalar_lea.vmem %s6726_s7, %s5774_s19 }
 0xbd1   : > { %v3050_v13 = vpop.f32.mrf.mxu0  ;;  %5253 = vmatprep.mubr.msk.bf16.mxu1 %vm5650_vm5, %v5649_v0 }
 0xbd2   : > { %v6397_v15 = vadd.f32 %v4709_v46, %v3050_v13 }
 0xbd3   : > { %v5239_v39 = vpop.f32.mrf.mxu0 }
 0xbd5   : > { %v3053_v14 = vpop.f32.mrf.mxu0 }
 0xbd6   : > { %v6399_v16 = vadd.f32 %v4709_v46, %v3053_v14 }
 0xbd7   : > { %v5240_v17 = vpop.f32.mrf.mxu0 }
 0xbd8   : > { %v3223_v63 = vpack.c.bf16 %v6399_v16, %v6397_v15  ;;  %5254 = vmatmul.mubr.msk.bf16.gmra.mxu1 %vm840_vm4, %v5939_v50 }
 0xbd9   : > { %v3198_v35 = vpop.f32.mrf.mxu0  ;;  %5275 = vmatprep.mubr.msk.bf16.mxu1 %vm5650_vm5, %v5649_v0 }
 0xbda   : > { %v6408_v56 = vadd.f32 %v4731_v49, %v3198_v35 }
 0xbdb   : > { %v5263_v29 = vpop.f32.mrf.mxu0 }
 0xbdd   : > { %v3201_v18 = vpop.f32.mrf.mxu0 }
 0xbde   : > { %v6410_v59 = vadd.f32 %v4731_v49, %v3201_v18 }
 0xbdf   : > { %v5264_v61 = vpop.f32.mrf.mxu0 }
 0xbe0   : > { %v3437_v19 = vpack.c.bf16 %v6410_v59, %v6408_v56 }
 0xbe1   : > { %v3206_v20 = vpop.f32.mrf.mxu0 }
 0xbe2   : > { %v6414_v23 = vadd.f32 %v4731_v49, %v3206_v20 }
 0xbe3   : > { %v5267_v21 = vpop.f32.mrf.mxu0 }
 0xbe5   : > { %v3209_v22 = vpop.f32.mrf.mxu0 }
 0xbe6   : > { %v6416_v50 = vadd.f32 %v4731_v49, %v3209_v22 }
 0xbe7   : > { %v5268_v25 = vpop.f32.mrf.mxu0 }
 0xbe8   : > { %v3438_v57 = vpack.c.bf16 %v6416_v50, %v6414_v23 }
 0xbe9   : > { %v3214_v2 = vpop.f32.mrf.mxu0 }
 0xbea   : > { %v6420_v30 = vadd.f32 %v4731_v49, %v3214_v2 }
 0xbeb   : > { %v5271_v26 = vpop.f32.mrf.mxu0 }
 0xbed   : > { %v3217_v32 = vpop.f32.mrf.mxu0 }
 0xbee   : > { %v6422_v40 = vadd.f32 %v4731_v49, %v3217_v32 }
 0xbef   : > { %v5272_v37 = vpop.f32.mrf.mxu0 }
 0xbf0   : > { %v3439_v41 = vpack.c.bf16 %v6422_v40, %v6420_v30 }
 0xc70   : > { %v2946_v43 = vpop.f32.mrf.mxu1 }
 0xc71   : > { %v6428_v44 = vadd.f32 %v2946_v43, %v2276_v42 }
 0xc72   : > { %v5215_v38 = vpop.f32.mrf.mxu1 }
 0xc74   : > { %v2949_v3 = vpop.f32.mrf.mxu1 }
 0xc75   : > { %v6432_v46 = vadd.f32 %v2949_v3, %v2279_v45 }
 0xc76   : > { %v5216_v48 = vpop.f32.mrf.mxu1 }
 0xc78   : > { %v2954_v58 = vpop.f32.mrf.mxu1 }
 0xc79   : > { %v6436_v5 = vadd.f32 %v2954_v58, %v2284_v52 }
 0xc7a   : > { %v5219_v7 = vpop.f32.mrf.mxu1 }
 0xc7c   : > { %v2957_v28 = vpop.f32.mrf.mxu1 }
 0xc7d   : > { %v6440_v8 = vadd.f32 %v2957_v28, %v2287_v47 }
 0xc7e   : > { %v5220_v11 = vpop.f32.mrf.mxu1 }
 0xc80   : > { %v2962_v34 = vpop.f32.mrf.mxu1 }
 0xc81   : > { %v6444_v13 = vadd.f32 %v2962_v34, %v2292_v51 }
 0xc82   : > { %v5223_v39 = vpop.f32.mrf.mxu1 }
 0xc84   : > { %v2965_v24 = vpop.f32.mrf.mxu1 }
 0xc85   : > { %v6448_v14 = vadd.f32 %v2965_v24, %v2295_v54 }
 0xc86   : > { %v5224_v17 = vpop.f32.mrf.mxu1 }
 0xc88   : > { %v3116_v35 = vpop.f32.mrf.mxu1 }
 0xc89   : > { %v3117_v29 = vadd.f32 %v4720_v60, %v3116_v35 }
 0xc8a   : > { %v5247_v27 = vpop.f32.mrf.mxu1 }
 0xc8c   : > { %v3119_v49 = vpop.f32.mrf.mxu1 }
 0xc8d   : > { %v3120_v18 = vadd.f32 %v4720_v60, %v3119_v49 }
 0xc8e   : > { %v5248_v61 = vpop.f32.mrf.mxu1 }
 0xc8f   : > { %v3224_v20 = vpack.c.bf16 %v3120_v18, %v3117_v29 }
 0xc90   : > { %v3124_v4 = vpop.f32.mrf.mxu1 }
 0xc91   : > { %v3231_v31 = vsel %vm1206_vm6, %v3224_v20, 0  ;;  %v3125_v33 = vadd.f32 %v4720_v60, %v3124_v4 }
 0xc92   : > { %v5251_v21 = vpop.f32.mrf.mxu1  ;;  %5274 = vmatpush3.bf16.xpose.msra.mxu1 %v3231_v31 }
 0xc93   : > { %5285 = vmatprep.subr.bf16.mxu1 %v5649_v0 }
 0xc94   : > { %v3127_v6 = vpop.f32.mrf.mxu1 }
 0xc95   : > { %v3128_v22 = vadd.f32 %v4720_v60, %v3127_v6 }
 0xc96   : > { %v5252_v25 = vpop.f32.mrf.mxu1 }
 0xc97   : > { %v3225_v2 = vpack.c.bf16 %v3128_v22, %v3125_v33 }
 0xc98   : > { %v3132_v26 = vpop.f32.mrf.mxu1 }
 0xc99   : > { %5276 = vmatmul.mubr.msk.bf16.vlgmr.msra.gmra.mxu1 %vm1206_vm6, %v3221_v1  ;;  %v3278_v32 = vsel %vm1206_vm6, %v3225_v2, 0  ;;  %v3133_v43 = vadd.f32 %v4720_v60, %v3132_v26 }
 0xc9a   : > { %v5255_v37 = vpop.f32.mrf.mxu1  ;;  %5280 = vmatpush3.bf16.xpose.msra.mxu0 %v3278_v32  ;;  %5287 = vmatprep.mubr.msk.bf16.mxu1 %vm5650_vm5, %v5649_v0 }
 0xc9b   : > { %5291 = vmatprep.subr.bf16.mxu0 %v5649_v0 }
 0xc9c   : > { %v3135_v42 = vpop.f32.mrf.mxu1 }
 0xc9d   : > { %v3136_v38 = vadd.f32 %v4720_v60, %v3135_v42 }
 0xc9e   : > { %v5256_v45 = vpop.f32.mrf.mxu1 }
 0xc9f   : > { %v3226_v3 = vpack.c.bf16 %v3136_v38, %v3133_v43 }
 0xca1   : > { %5282 = vmatmul.mubr.msk.bf16.vlgmr.msra.gmra.mxu0 %vm1206_vm6, %v3222_v12  ;;  %v3325_v53 = vsel %vm1206_vm6, %v3226_v3, 0 }
 0xca2   : > { %5286 = vmatpush3.bf16.xpose.msra.mxu1 %v3325_v53  ;;  %5292 = vmatpush3.bf16.msra.mxu0 %v3437_v19 }
 0xca3   : > { %5297 = vmatprep.subr.bf16.mxu1 %v5649_v0  ;;  %5293 = vmatprep.mubr.msk.bf16.mxu0 %vm5650_vm5, %v5649_v0 }
 0xca4   : > { %5303 = vmatprep.subr.bf16.mxu0 %v5649_v0 }
 0xca9   : > { %5288 = vmatmul.mubr.msk.bf16.vlgmr.msra.gmra.mxu1 %vm1206_vm6, %v3223_v63 }
 0xcaa   : > { %5298 = vmatpush3.bf16.msra.mxu1 %v3438_v57  ;;  %5299 = vmatprep.mubr.msk.bf16.mxu1 %vm5650_vm5, %v5649_v0 }
 0xcab   : > { %5309 = vmatprep.subr.bf16.mxu1 %v5649_v0 }
 0xd59   : > { %v3267_v55 = vpop.f32.mrf.mxu1 }
 0xd5a   : > { %v3268_v1 = vadd.f32 %v6293_v36, %v3267_v55 }
 0xd5b   : > { %v5277_v9 = vpop.f32.mrf.mxu1 }
 0xd5c   : > { %v3368_v10 = vsel %vm1348_vm7, %v3268_v1, -inf }
 0xd5d   : > { %3369 = vmax.xlane.f32.xlu0 %v3368_v10  ;;  %v3270_v12 = vpop.f32.mrf.mxu1 }
 0xd5e   : > { %v3271_v15 = vadd.f32 %v6297_v62, %v3270_v12 }
 0xd5f   : > { %v5278_v16 = vpop.f32.mrf.mxu1 }
 0xd60   : > { %v3371_v63 = vsel %vm1348_vm7, %v3271_v15, -inf }
 0xd61   : > { %3372 = vmax.xlane.f32.xlu1 %v3371_v63  ;;  %v3314_v56 = vpop.f32.mrf.mxu0 }
 0xd62   : > { %v3315_v59 = vadd.f32 %v6293_v36, %v3314_v56 }
 0xd63   : > { %v5283_v19 = vpop.f32.mrf.mxu0 }
 0xd64   : > { %v3374_v23 = vsel %vm1348_vm7, %v3315_v59, -inf }
 0xd65   : > { %3375 = vmax.xlane.f32.xlu0 %v3374_v23  ;;  %v3317_v50 = vpop.f32.mrf.mxu0 }
 0xd66   : > { %v3318_v57 = vadd.f32 %v6297_v62, %v3317_v50 }
 0xd67   : > { %v5284_v48 = vpop.f32.mrf.mxu0 }
 0xd68   : > { %v3377_v52 = vsel %vm1348_vm7, %v3318_v57, -inf }
 0xd69   : > { %v3361_v58 = vpop.f32.mrf.mxu1  ;;  %3378 = vmax.xlane.f32.xlu1 %v3377_v52 }
 0xd6a   : > { %v3362_v7 = vadd.f32 %v6293_v36, %v3361_v58 }
 0xd6b   : > { %v5289_v47 = vpop.f32.mrf.mxu1 }
 0xd6c   : > { %v3380_v28 = vsel %vm1348_vm7, %v3362_v7, -inf }
 0xd6d   : > { %v3364_v11 = vpop.f32.mrf.mxu1  ;;  %3381 = vmax.xlane.f32.xlu0 %v3380_v28 }
 0xd6e   : > { %v3365_v51 = vadd.f32 %v6297_v62, %v3364_v11 }
 0xd6f   : > { %v5290_v34 = vpop.f32.mrf.mxu1 }
 0xd70   : > { %v3383_v39 = vsel %vm1348_vm7, %v3365_v51, -inf }
 0xd71   : > { %3384 = vmax.xlane.f32.xlu1 %v3383_v39 }
 0xde6   : > { %v3370_v54 = vpop.xlane.xlu0 %3369 }
 0xde7   : > { %v3386_v24 = vsub.f32 %v3268_v1, %v3370_v54 }
 0xde9   : > { %v3392_v17 = vmul.f32 1.442695, %v3386_v24 }
 0xdea   : > { %v3373_v35 = vpop.xlane.xlu1 %3372 }
 0xdeb   : > { %5524 = vpow2.f32 %v3392_v17  ;;  %v3387_v60 = vsub.f32 %v3271_v15, %v3373_v35 }
 0xded   : > { %v3394_v27 = vmul.f32 1.442695, %v3387_v60 }
 0xdee   : > { %v3376_v49 = vpop.xlane.xlu0 %3375 }
 0xdef   : > { %5526 = vpow2.f32 %v3394_v27  ;;  %v3388_v36 = vsub.f32 %v3315_v59, %v3376_v49 }
 0xdf1   : > { %v3396_v29 = vmul.f32 1.442695, %v3388_v36 }
 0xdf2   : > { %v3379_v18 = vpop.xlane.xlu1 %3378 }
 0xdf3   : > { %5528 = vpow2.f32 %v3396_v29  ;;  %v3389_v61 = vsub.f32 %v3318_v57, %v3379_v18 }
 0xdf5   : > { %v3398_v20 = vmul.f32 1.442695, %v3389_v61 }
 0xdf6   : > { %v3382_v62 = vpop.xlane.xlu0 %3381 }
 0xdf7   : > { %5530 = vpow2.f32 %v3398_v20  ;;  %v3390_v4 = vsub.f32 %v3362_v7, %v3382_v62  ;;  %v4747_v62 = vld [vmem:[%s6767_s28] ss:$0 sm:$0xff] }
 0xdf8   : > { %v5525_v31 = vpop.eup %5524 }
 0xdf9   : > { %v3400_v21 = vmul.f32 1.442695, %v3390_v4  ;;  %v3404_v6 = vsel %vm1348_vm7, %v5525_v31, 0.0 }
 0xdfa   : > { %3405 = vadd.xlane.f32.xlu0 %v3404_v6  ;;  %v3385_v33 = vpop.xlane.xlu1 %3384 }
 0xdfb   : > { %5532 = vpow2.f32 %v3400_v21  ;;  %v3391_v22 = vsub.f32 %v3365_v51, %v3385_v33  ;;  %v5586_v33 = vld [vmem:[#allocation2] sm:$0xff] }
 0xdfc   : > { %v5527_v25 = vpop.eup %5526 }
 0xdfd   : > { %v3402_v2 = vmul.f32 1.442695, %v3391_v22  ;;  %v3407_v26 = vsel %vm1348_vm7, %v5527_v25, 0.0 }
 0xdfe   : > { %3408 = vadd.xlane.f32.xlu1 %v3407_v26 }
 0xdff   : > { %5534 = vpow2.f32 %v3402_v2 }
 0xe00   : > { %v5529_v32 = vpop.eup %5528 }
 0xe01   : > { %v3410_v37 = vsel %vm1348_vm7, %v5529_v32, 0.0 }
 0xe02   : > { %3411 = vadd.xlane.f32.xlu0 %v3410_v37 }
 0xe04   : > { %v5531_v42 = vpop.eup %5530 }
 0xe05   : > { %v3413_v43 = vsel %vm1348_vm7, %v5531_v42, 0.0 }
 0xe06   : > { %3414 = vadd.xlane.f32.xlu1 %v3413_v43 }
 0xe08   : > { %v5533_v38 = vpop.eup %5532 }
 0xe09   : > { %v3416_v45 = vsel %vm1348_vm7, %v5533_v38, 0.0 }
 0xe0a   : > { %3417 = vadd.xlane.f32.xlu0 %v3416_v45 }
 0xe0c   : > { %v5535_v3 = vpop.eup %5534 }
 0xe0d   : > { %v3419_v53 = vsel %vm1348_vm7, %v5535_v3, 0.0 }
 0xe0e   : > { %3420 = vadd.xlane.f32.xlu1 %v3419_v53 }
 0xe83   : > { %v3406_v55 = vpop.xlane.xlu0 %3405 }
 0xe84   : > { %5536 = vrcp.f32 %v3406_v55 }
 0xe87   : > { %v3409_v1 = vpop.xlane.xlu1 %3408 }
 0xe88   : > { %5538 = vrcp.f32 %v3409_v1 }
 0xe8b   : > { %v3412_v9 = vpop.xlane.xlu0 %3411 }
 0xe8c   : > { %5540 = vrcp.f32 %v3412_v9 }
 0xe8f   : > { %v3415_v10 = vpop.xlane.xlu1 %3414 }
 0xe90   : > { %5542 = vrcp.f32 %v3415_v10 }
 0xe91   : > { %v5537_v12 = vpop.eup %5536 }
 0xe92   : > { %v3428_v63 = vmul.f32 %v5537_v12, %v5525_v31 }
 0xe93   : > { %v3418_v15 = vpop.xlane.xlu0 %3417 }
 0xe94   : > { %5544 = vrcp.f32 %v3418_v15 }
 0xe95   : > { %v5539_v16 = vpop.eup %5538 }
 0xe96   : > { %v3429_v56 = vmul.f32 %v5539_v16, %v5527_v25 }
 0xe97   : > { %v3421_v59 = vpop.xlane.xlu1 %3420 }
 0xe98   : > { %v3434_v19 = vpack.c.bf16 %v3429_v56, %v3428_v63  ;;  %5546 = vrcp.f32 %v3421_v59 }
 0xe99   : > { %v5541_v23 = vpop.eup %5540 }
 0xe9a   : > { %5294 = vmatmul.mubr.msk.bf16.vlgmr.msra.gmra.mxu0 %vm1348_vm7, %v3434_v19  ;;  %v3430_v57 = vmul.f32 %v5541_v23, %v5529_v32 }
 0xe9b   : > { %5304 = vmatpush3.bf16.msra.mxu0 %v3439_v41  ;;  %5305 = vmatprep.mubr.msk.bf16.mxu0 %vm5650_vm5, %v5649_v0  ;;  %v4743_v41 = vld [vmem:[%s5790_s2 + $0xc] sm:$0xf] }
 0xe9c   : > { %5323 = vmatprep.subr.bf16.mxu0 %v5649_v0  ;;  %v3587_v28 = vsel %vm2168_vm8, %v4743_v41, 0 }
 0xe9d   : > { %v5543_v50 = vpop.eup %5542 }
 0xe9e   : > { %v3431_v48 = vmul.f32 %v5543_v50, %v5531_v42  ;;  %v5587_v42 = vld [vmem:[#allocation2 + $0x8] sm:$0xff] }
 0xea0   : > { %v3435_v52 = vpack.c.bf16 %v3431_v48, %v3430_v57 }
 0xea1   : > { %v5545_v58 = vpop.eup %5544 }
 0xea2   : > { %5300 = vmatmul.mubr.msk.bf16.vlgmr.msra.gmra.mxu1 %vm1348_vm7, %v3435_v52  ;;  %v3432_v47 = vmul.f32 %v5545_v58, %v5533_v38 }
 0xea3   : > { %5311 = vmatprep.mubr.msk.bf16.mxu1 %vm5650_vm5, %v5649_v0  ;;  %5310 = vmatpush3.bf16.msra.mxu1 %v3587_v28 }
 0xea4   : > { %5339 = vmatprep.subr.bf16.mxu1 %v5649_v0 }
 0xea5   : > { %v5547_v7 = vpop.eup %5546 }
 0xea6   : > { %v3433_v30 = vmul.f32 %v5547_v7, %v5535_v3  ;;  %v5591_v7 = vld [vmem:[#allocation2 + $0x28] sm:$0xff] }
 0xea8   : > { %v3436_v40 = vpack.c.bf16 %v3433_v30, %v3432_v47 }
 0xeaa   : > { %5306 = vmatmul.mubr.msk.bf16.vlgmr.msra.gmra.mxu0 %vm1348_vm7, %v3436_v40 }
 0xeab   : > { %5327 = vmatprep.mubr.msk.bf16.mxu0 %vm5650_vm5, %v5649_v0 }
 0xf5a   : > { %v3477_v11 = vpop.f32.mrf.mxu0 }
 0xf5c   : > { %v5295_v51 = vpop.f32.mrf.mxu0 }
 0xf5e   : > { %v3480_v34 = vpop.f32.mrf.mxu0 }
 0xf5f   : > { %v3572_v39 = vpack.c.bf16 %v3480_v34, %v3477_v11 }
 0xf60   : > { %v5296_v54 = vpop.f32.mrf.mxu0 }
 0xf61   : > { %5312 = vmatmul.mubr.msk.bf16.vlgmr.msra.gmra.mxu1 %vm1206_vm6, %v3572_v39 }
 0xf62   : > { %v3521_v24 = vpop.f32.mrf.mxu1  ;;  %5315 = vmatprep.mubr.msk.bf16.mxu1 %vm5650_vm5, %v5649_v0 }
 0xf64   : > { %v5301_v17 = vpop.f32.mrf.mxu1 }
 0xf66   : > { %v3524_v35 = vpop.f32.mrf.mxu1 }
 0xf67   : > { %v3573_v60 = vpack.c.bf16 %v3524_v35, %v3521_v24 }
 0xf68   : > { %v5302_v27 = vpop.f32.mrf.mxu1 }
 0xf69   : > { %5316 = vmatmul.mubr.msk.bf16.gmra.mxu1 %vm1206_vm6, %v3573_v60 }
 0xf6a   : > { %v3565_v49 = vpop.f32.mrf.mxu0  ;;  %5319 = vmatprep.mubr.msk.bf16.mxu1 %vm5650_vm5, %v5649_v0 }
 0xf6c   : > { %v5307_v36 = vpop.f32.mrf.mxu0 }
 0xf6e   : > { %v3568_v29 = vpop.f32.mrf.mxu0 }
 0xf6f   : > { %v3574_v18 = vpack.c.bf16 %v3568_v29, %v3565_v49 }
 0xf70   : > { %v5308_v61 = vpop.f32.mrf.mxu0 }
 0xf71   : > { %5320 = vmatmul.mubr.msk.bf16.gmra.mxu1 %vm1206_vm6, %v3574_v18 }
 0xf72   : > { %5355 = vmatprep.mubr.msk.bf16.mxu1 %vm5650_vm5, %v5649_v0 }
0x1021   : > { %v3623_v20 = vpop.f32.mrf.mxu1 }
0x1022   : > { %v3646_v4 = vadd.f32 %v3623_v20, %v6428_v44 }
0x1023   : > { %v5313_v31 = vpop.f32.mrf.mxu1 }
0x1024   : > { %v3659_v21 = vadd.f32 %v4747_v62, %v3646_v4 }
0x1025   : > { %v3626_v6 = vpop.f32.mrf.mxu1 }
0x1026   : > { %v6532_v22 = vadd.f32 %v5586_v33, %v3659_v21  ;;  %v3647_v25 = vadd.f32 %v3626_v6, %v6432_v46  ;;  %v5588_v46 = vld [vmem:[#allocation2 + $0x10] sm:$0xff] }
0x1027   : > { %v5314_v2 = vpop.f32.mrf.mxu1 }
0x1028   : > { %v3660_v26 = vadd.f32 %v4747_v62, %v3647_v25  ;;  %v3673_v32 = vsel %vm840_vm4, %v6532_v22, 0.0 }
0x1029   : > { %3674 = vadd.xlane.f32.xlu0 %v3673_v32  ;;  %v3631_v37 = vpop.f32.mrf.mxu1  ;;  %v5430_v32 = vld [vmem:[%s5817_s30 + $0x8] sm:$0xff]  }
0x102a   : > { %v6537_v43 = vadd.f32 %v5587_v42, %v3660_v26  ;;  %v3648_v44 = vadd.f32 %v3631_v37, %v6436_v5  ;;  %v5589_v5 = vld [vmem:[#allocation2 + $0x18] sm:$0xff]  ;;  %5324 = vmatpush3.bf16.msra.mxu0 %v5430_v32  ;;  %v5431_v37 = vld [vmem:[%s5817_s30] sm:$0xff]   ;;  %s6771_s30 = sld [smem:[#allocation15_spill]] (!%p4771_p5) }
0x102b   : > { %v5317_v38 = vpop.f32.mrf.mxu1  ;;  %5325 = vmatprep.subr.bf16.mxu0 %v5649_v0  ;;  %v4750_v32 = vld [vmem:[%s6769_s27] ss:$0 sm:$0xff]  ;;  %s4403_s27 = sld [smem:[#allocation4]] (!%p4771_p5) }
0x102c   : > { %v3661_v45 = vadd.f32 %v4747_v62, %v3648_v44  ;;  %v3676_v3 = vsel %vm840_vm4, %v6537_v43, 0.0 }
0x102d   : > { %3677 = vadd.xlane.f32.xlu1 %v3676_v3  ;;  %v3634_v53 = vpop.f32.mrf.mxu1 }
0x102e   : > { %v6542_v55 = vadd.f32 %v5588_v46, %v3661_v45  ;;  %v3649_v1 = vadd.f32 %v3634_v53, %v6440_v8  ;;  %v5590_v8 = vld [vmem:[#allocation2 + $0x20] sm:$0xff]  ;;  %5326 = vmatpush3.bf16.msra.mxu0 %v5431_v37 }
0x102f   : > { %v5318_v9 = vpop.f32.mrf.mxu1 }
0x1030   : > { %v3662_v10 = vadd.f32 %v4747_v62, %v3649_v1  ;;  %v3679_v12 = vsel %vm840_vm4, %v6542_v55, 0.0 }
0x1031   : > { %3680 = vadd.xlane.f32.xlu0 %v3679_v12  ;;  %v3639_v15 = vpop.f32.mrf.mxu1 }
0x1032   : > { %v6547_v16 = vadd.f32 %v5589_v5, %v3662_v10  ;;  %v3650_v63 = vadd.f32 %v3639_v15, %v6444_v13 }
0x1033   : > { %v5321_v56 = vpop.f32.mrf.mxu1 }
0x1034   : > { %v3663_v59 = vadd.f32 %v4747_v62, %v3650_v63  ;;  %v3682_v19 = vsel %vm840_vm4, %v6547_v16, 0.0 }
0x1035   : > { %3683 = vadd.xlane.f32.xlu1 %v3682_v19  ;;  %v3642_v23 = vpop.f32.mrf.mxu1 }
0x1036   : > { %v6552_v50 = vadd.f32 %v5590_v8, %v3663_v59  ;;  %v3651_v57 = vadd.f32 %v3642_v23, %v6448_v14  ;;  %v4748_v23 = vld [vmem:[%s772_s1] ss:$0 sm:$0xff] }
0x1037   : > { %v5322_v48 = vpop.f32.mrf.mxu1 }
0x1038   : > { %v3664_v52 = vadd.f32 %v4747_v62, %v3651_v57  ;;  %v3685_v58 = vsel %vm840_vm4, %v6552_v50, 0.0 }
0x1039   : > { %3686 = vadd.xlane.f32.xlu0 %v3685_v58 }
0x103a   : > { %v6557_v13 = vadd.f32 %v5591_v7, %v3664_v52 }
0x103c   : > { %v3688_v47 = vsel %vm840_vm4, %v6557_v13, 0.0 }
0x103d   : > { %3689 = vadd.xlane.f32.xlu1 %v3688_v47  ;;  %v4749_v47 = vld [vmem:[%s6768_s21] ss:$0 sm:$0xff] }
0x10b2   : > { %v3675_v30 = vpop.xlane.xlu0 %3674 }
0x10b3   : > { %v3691_v40 = vmul.f32 0.03125, %v3675_v30 }
0x10b5   : > { %v3697_v41 = vsub.f32 %v6532_v22, %v3691_v40 }
0x10b6   : > { %v3678_v28 = vpop.xlane.xlu1 %3677 }
0x10b7   : > { %v3692_v11 = vmul.f32 0.03125, %v3678_v28  ;;  %v3703_v14 = vmul.f32 %v3697_v41, %v3697_v41 }
0x10b9   : > { %v3698_v51 = vsub.f32 %v6537_v43, %v3692_v11  ;;  %v3709_v34 = vsel %vm840_vm4, %v3703_v14, 0.0 }
0x10ba   : > { %v3681_v39 = vpop.xlane.xlu0 %3680  ;;  %3710 = vadd.xlane.f32.xlu0 %v3709_v34 }
0x10bb   : > { %v3693_v54 = vmul.f32 0.03125, %v3681_v39  ;;  %v3704_v24 = vmul.f32 %v3698_v51, %v3698_v51 }
0x10bd   : > { %v3699_v17 = vsub.f32 %v6542_v55, %v3693_v54  ;;  %v3712_v35 = vsel %vm840_vm4, %v3704_v24, 0.0 }
0x10be   : > { %v3684_v60 = vpop.xlane.xlu1 %3683  ;;  %3713 = vadd.xlane.f32.xlu1 %v3712_v35 }
0x10bf   : > { %v3694_v27 = vmul.f32 0.03125, %v3684_v60  ;;  %v3705_v49 = vmul.f32 %v3699_v17, %v3699_v17 }
0x10c1   : > { %v3700_v36 = vsub.f32 %v6547_v16, %v3694_v27  ;;  %v3715_v29 = vsel %vm840_vm4, %v3705_v49, 0.0 }
0x10c2   : > { %3716 = vadd.xlane.f32.xlu0 %v3715_v29  ;;  %v3687_v18 = vpop.xlane.xlu0 %3686 }
0x10c3   : > { %v3695_v61 = vmul.f32 0.03125, %v3687_v18  ;;  %v3706_v20 = vmul.f32 %v3700_v36, %v3700_v36 }
0x10c5   : > { %v3701_v62 = vsub.f32 %v6552_v50, %v3695_v61  ;;  %v3718_v4 = vsel %vm840_vm4, %v3706_v20, 0.0 }
0x10c6   : > { %3719 = vadd.xlane.f32.xlu1 %v3718_v4  ;;  %v3690_v31 = vpop.xlane.xlu1 %3689 }
0x10c7   : > { %v3696_v21 = vmul.f32 0.03125, %v3690_v31  ;;  %v3707_v6 = vmul.f32 %v3701_v62, %v3701_v62  ;;  %v5433_v31 = vld [vmem:[%s5827_s3 + $0x30] sm:$0xff]  }
0x10c9   : > { %v3702_v33 = vsub.f32 %v6557_v13, %v3696_v21  ;;  %v3721_v25 = vsel %vm840_vm4, %v3707_v6, 0.0  ;;  %v5434_v21 = vld [vmem:[%s5827_s3 + $0x28] sm:$0xff]   ;;  %v5435_v6 = vld [vmem:[%s5827_s3 + $0x20] sm:$0xff]  }
0x10ca   : > { %3722 = vadd.xlane.f32.xlu0 %v3721_v25  ;;  %v5437_v25 = vld [vmem:[%s5827_s3 + $0x10] sm:$0xff]  }
0x10cb   : > { %v3708_v2 = vmul.f32 %v3702_v33, %v3702_v33 }
0x10cd   : > { %v3724_v26 = vsel %vm840_vm4, %v3708_v2, 0.0  ;;  %v5438_v2 = vld [vmem:[%s5827_s3 + $0x8] sm:$0xff]  }
0x10ce   : > { %3725 = vadd.xlane.f32.xlu1 %v3724_v26  ;;  %v5439_v26 = vld [vmem:[%s5827_s3] sm:$0xff]  }
0x1143   : > { %v3711_v42 = vpop.xlane.xlu0 %3710 }
0x1144   : > { %v3727_v44 = vmul.f32 0.03125, %v3711_v42 }
0x1146   : > { %v3733_v38 = vadd.f32 1e-05, %v3727_v44 }
0x1147   : > { %v3714_v45 = vpop.xlane.xlu1 %3713 }
0x1148   : > { %5548 = vrsqrt.f32 %v3733_v38  ;;  %v3728_v3 = vmul.f32 0.03125, %v3714_v45 }
0x114a   : > { %v3734_v53 = vadd.f32 1e-05, %v3728_v3 }
0x114b   : > { %v3717_v46 = vpop.xlane.xlu0 %3716 }
0x114c   : > { %5550 = vrsqrt.f32 %v3734_v53  ;;  %v3729_v1 = vmul.f32 0.03125, %v3717_v46 }
0x114e   : > { %v3735_v9 = vadd.f32 1e-05, %v3729_v1 }
0x114f   : > { %v3720_v10 = vpop.xlane.xlu1 %3719 }
0x1150   : > { %5552 = vrsqrt.f32 %v3735_v9  ;;  %v3730_v12 = vmul.f32 0.03125, %v3720_v10 }
0x1152   : > { %v3736_v15 = vadd.f32 1e-05, %v3730_v12 }
0x1153   : > { %v3723_v5 = vpop.xlane.xlu0 %3722 }
0x1154   : > { %5554 = vrsqrt.f32 %v3736_v15  ;;  %v3731_v63 = vmul.f32 0.03125, %v3723_v5 }
0x1155   : > { %v5549_v56 = vpop.eup %5548 }
0x1156   : > { %v3745_v59 = vmul.f32 %v5549_v56, %v3697_v41  ;;  %v3737_v19 = vadd.f32 1e-05, %v3731_v63 }
0x1157   : > { %v3726_v8 = vpop.xlane.xlu1 %3725 }
0x1158   : > { %5556 = vrsqrt.f32 %v3737_v19  ;;  %v3732_v57 = vmul.f32 0.03125, %v3726_v8  ;;  %v3757_v52 = vmul.f32 %v4748_v23, %v3745_v59 }
0x1159   : > { %v5551_v48 = vpop.eup %5550 }
0x115a   : > { %v3746_v58 = vmul.f32 %v5551_v48, %v3698_v51  ;;  %v3738_v7 = vadd.f32 1e-05, %v3732_v57  ;;  %v3769_v28 = vadd.f32 %v4749_v47, %v3757_v52 }
0x115c   : > { %v3758_v30 = vmul.f32 %v4748_v23, %v3746_v58  ;;  %5558 = vrsqrt.f32 %v3738_v7 }
0x115d   : > { %v5553_v40 = vpop.eup %5552 }
0x115e   : > { %v3747_v41 = vmul.f32 %v5553_v40, %v3699_v17  ;;  %v3770_v11 = vadd.f32 %v4749_v47, %v3758_v30 }
0x1160   : > { %v3780_v14 = vpack.c.bf16 %v3770_v11, %v3769_v28  ;;  %v3759_v54 = vmul.f32 %v4748_v23, %v3747_v41 }
0x1161   : > { %v5555_v34 = vpop.eup %5554 }
0x1162   : > { %v3748_v39 = vmul.f32 %v5555_v34, %v3700_v36  ;;  %5328 = vmatmul.mubr.msk.bf16.vlgmr.msra.gmra.mxu0 %vm840_vm4, %v3780_v14  ;;  %v3771_v60 = vadd.f32 %v4749_v47, %v3759_v54 }
0x1163   : > { %5331 = vmatprep.mubr.msk.bf16.mxu0 %vm5650_vm5, %v5649_v0 }
0x1164   : > { %v3760_v51 = vmul.f32 %v4748_v23, %v3748_v39 }
0x1165   : > { %v5557_v24 = vpop.eup %5556 }
0x1166   : > { %v3749_v35 = vmul.f32 %v5557_v24, %v3701_v62  ;;  %v3772_v27 = vadd.f32 %v4749_v47, %v3760_v51  ;;  %v5432_v62 = vld [vmem:[%s5827_s3 + $0x38] sm:$0xff]  }
0x1167   : > { %5340 = vmatpush3.bf16.msra.mxu1 %v5432_v62 }
0x1168   : > { %v3781_v49 = vpack.c.bf16 %v3772_v27, %v3771_v60  ;;  %v3761_v36 = vmul.f32 %v4748_v23, %v3749_v35  ;;  %5341 = vmatprep.subr.bf16.mxu1 %v5649_v0 }
0x1169   : > { %v5559_v17 = vpop.eup %5558 }
0x116a   : > { %v3750_v29 = vmul.f32 %v5559_v17, %v3702_v33  ;;  %5332 = vmatmul.mubr.msk.bf16.gmra.mxu0 %vm840_vm4, %v3781_v49  ;;  %v3773_v61 = vadd.f32 %v4749_v47, %v3761_v36  ;;  %v5436_v33 = vld [vmem:[%s5827_s3 + $0x18] sm:$0xff]  }
0x116b   : > { %5335 = vmatprep.mubr.msk.bf16.mxu0 %vm5650_vm5, %v5649_v0  ;;  %5342 = vmatpush3.bf16.msra.mxu1 %v5433_v31 }
0x116c   : > { %v3762_v18 = vmul.f32 %v4748_v23, %v3750_v29  ;;  %5343 = vmatprep.subr.bf16.mxu1 %v5649_v0 }
0x116e   : > { %v3774_v20 = vadd.f32 %v4749_v47, %v3762_v18 }
0x116f   : > { %5344 = vmatpush3.bf16.msra.mxu1 %v5434_v21 }
0x1170   : > { %v3782_v4 = vpack.c.bf16 %v3774_v20, %v3773_v61  ;;  %5345 = vmatprep.subr.bf16.mxu1 %v5649_v0 }
0x1172   : > { %5336 = vmatmul.mubr.msk.bf16.gmra.mxu0 %vm840_vm4, %v3782_v4 }
0x1173   : > { %5346 = vmatpush3.bf16.msra.mxu1 %v5435_v6 }
0x1174   : > { %5347 = vmatprep.subr.bf16.mxu1 %v5649_v0 }
0x1177   : > { %5348 = vmatpush3.bf16.msra.mxu1 %v5436_v33 }
0x1178   : > { %5349 = vmatprep.subr.bf16.mxu1 %v5649_v0 }
0x117b   : > { %5350 = vmatpush3.bf16.msra.mxu1 %v5437_v25 }
0x117c   : > { %5351 = vmatprep.subr.bf16.mxu1 %v5649_v0 }
0x117f   : > { %5352 = vmatpush3.bf16.msra.mxu1 %v5438_v2 }
0x1180   : > { %5353 = vmatprep.subr.bf16.mxu1 %v5649_v0 }
0x1183   : > { %5354 = vmatpush3.bf16.msra.mxu1 %v5439_v26 }
0x1222   : > { %v3844_v37 = vpop.f32.mrf.mxu0 }
0x1223   : > { %v3845_v42 = vadd.f32 %v4750_v32, %v3844_v37  ;;  %v4762_v37 = vld [vmem:[%s791_s6] ss:$0 sm:$0xff] }
0x1224   : > { %v5329_v44 = vpop.f32.mrf.mxu0 }
0x1225   : > { %v4756_v38 = vmul.f32 -1.702, %v3845_v42 }
0x1226   : > { %v3847_v45 = vpop.f32.mrf.mxu0 }
0x1227   : > { %v3879_v3 = vmul.f32 1.442695, %v4756_v38  ;;  %v3848_v53 = vadd.f32 %v4750_v32, %v3847_v45 }
0x1228   : > { %v5330_v46 = vpop.f32.mrf.mxu0 }
0x1229   : > { %5560 = vpow2.f32 %v3879_v3  ;;  %v4757_v1 = vmul.f32 -1.702, %v3848_v53 }
0x122a   : > { %v3852_v9 = vpop.f32.mrf.mxu0 }
0x122b   : > { %v3881_v10 = vmul.f32 1.442695, %v4757_v1  ;;  %v3853_v12 = vadd.f32 %v4750_v32, %v3852_v9 }
0x122c   : > { %v5333_v15 = vpop.f32.mrf.mxu0 }
0x122d   : > { %5562 = vpow2.f32 %v3881_v10  ;;  %v4758_v5 = vmul.f32 -1.702, %v3853_v12 }
0x122e   : > { %v3855_v63 = vpop.f32.mrf.mxu0 }
0x122f   : > { %v3883_v56 = vmul.f32 1.442695, %v4758_v5  ;;  %v3856_v59 = vadd.f32 %v4750_v32, %v3855_v63 }
0x1230   : > { %v5334_v19 = vpop.f32.mrf.mxu0 }
0x1231   : > { %5564 = vpow2.f32 %v3883_v56  ;;  %v4759_v23 = vmul.f32 -1.702, %v3856_v59 }
0x1232   : > { %v3860_v8 = vpop.f32.mrf.mxu0 }
0x1233   : > { %v3885_v57 = vmul.f32 1.442695, %v4759_v23  ;;  %v3861_v48 = vadd.f32 %v4750_v32, %v3860_v8 }
0x1234   : > { %v5337_v52 = vpop.f32.mrf.mxu0 }
0x1235   : > { %5566 = vpow2.f32 %v3885_v57  ;;  %v4760_v58 = vmul.f32 -1.702, %v3861_v48 }
0x1236   : > { %v5561_v7 = vpop.eup %5560  ;;  %v3863_v47 = vpop.f32.mrf.mxu0 }
0x1237   : > { %v3891_v30 = vadd.f32 1.0, %v5561_v7  ;;  %v3887_v40 = vmul.f32 1.442695, %v4760_v58  ;;  %v3864_v41 = vadd.f32 %v4750_v32, %v3863_v47 }
0x1238   : > { %v5338_v28 = vpop.f32.mrf.mxu0 }
0x1239   : > { %v4761_v11 = vmul.f32 -1.702, %v3864_v41  ;;  %5568 = vpow2.f32 %v3887_v40 }
0x123a   : > { %v5563_v14 = vpop.eup %5562  ;;  %5570 = vrcp.f32 %v3891_v30 }
0x123b   : > { %v3892_v34 = vadd.f32 1.0, %v5563_v14  ;;  %v3889_v39 = vmul.f32 1.442695, %v4761_v11 }
0x123d   : > { %5572 = vrcp.f32 %v3892_v34 }
0x123e   : > { %v5565_v54 = vpop.eup %5564  ;;  %5574 = vpow2.f32 %v3889_v39 }
0x123f   : > { %v3893_v51 = vadd.f32 1.0, %v5565_v54 }
0x1241   : > { %5576 = vrcp.f32 %v3893_v51 }
0x1242   : > { %v5567_v24 = vpop.eup %5566 }
0x1243   : > { %v3894_v35 = vadd.f32 1.0, %v5567_v24 }
0x1245   : > { %5578 = vrcp.f32 %v3894_v35 }
0x1246   : > { %v5569_v60 = vpop.eup %5568 }
0x1247   : > { %v5571_v27 = vpop.eup %5570  ;;  %v3895_v49 = vadd.f32 1.0, %v5569_v60 }
0x1248   : > { %v3909_v36 = vmul.f32 %v5571_v27, %v3845_v42 }
0x1249   : > { %5580 = vrcp.f32 %v3895_v49 }
0x124a   : > { %v5573_v17 = vpop.eup %5572 }
0x124b   : > { %v5575_v29 = vpop.eup %5574  ;;  %v3910_v18 = vmul.f32 %v5573_v17, %v3848_v53 }
0x124c   : > { %v3896_v61 = vadd.f32 1.0, %v5575_v29 }
0x124d   : > { %v3932_v20 = vpack.c.bf16 %v3910_v18, %v3909_v36 }
0x124e   : > { %5582 = vrcp.f32 %v3896_v61  ;;  %v5577_v4 = vpop.eup %5576 }
0x124f   : > { %5356 = vmatmul.mubr.bf16.vlgmr.msra.gmra.mxu1 %v3932_v20  ;;  %v3911_v31 = vmul.f32 %v5577_v4, %v3853_v12 }
0x1250   : > { %5359 = vmatprep.mubr.msk.bf16.mxu1 %vm5650_vm5, %v5649_v0 }
0x1252   : > { %v5579_v62 = vpop.eup %5578 }
0x1253   : > { %v3912_v21 = vmul.f32 %v5579_v62, %v3856_v59 }
0x1255   : > { %v3933_v6 = vpack.c.bf16 %v3912_v21, %v3911_v31 }
0x1256   : > { %v5581_v33 = vpop.eup %5580 }
0x1257   : > { %5360 = vmatmul.mubr.bf16.gmra.mxu1 %v3933_v6  ;;  %v3913_v2 = vmul.f32 %v5581_v33, %v3861_v48 }
0x1258   : > { %5363 = vmatprep.mubr.msk.bf16.mxu1 %vm5650_vm5, %v5649_v0 }
0x125b   : > { %v5583_v25 = vpop.eup %5582 }
0x125c   : > { %v3914_v26 = vmul.f32 %v5583_v25, %v3864_v41 }
0x125e   : > { %v3934_v32 = vpack.c.bf16 %v3914_v26, %v3913_v2 }
0x1260   : > { %5364 = vmatmul.mubr.bf16.gmra.mxu1 %v3934_v32 }
0x130f   : > { %v4023_v42 = vpop.f32.mrf.mxu1 }
0x1310   : > { %v4024_v44 = vadd.f32 %v4762_v37, %v4023_v42 }
0x1311   : > { %v5357_v38 = vpop.f32.mrf.mxu1 }
0x1312   : > { %v4046_v45 = vadd.f32 %v4024_v44, %v6532_v22 }
0x1313   : > { %v4026_v3 = vpop.f32.mrf.mxu1 }
0x1314   : > { %4052 = vst.msk [vmem:[#allocation2] sm:$0xff] %vm840_vm4, %v4046_v45  ;;  %v4027_v0 = vadd.f32 %v4762_v37, %v4026_v3 }
0x1315   : > { %v5358_v53 = vpop.f32.mrf.mxu1 }
0x1316   : > { %v4047_v46 = vadd.f32 %v4027_v0, %v6537_v43 }
0x1317   : > { %v4031_v1 = vpop.f32.mrf.mxu1 }
0x1318   : > { %4053 = vst.msk [vmem:[#allocation2 + $0x8] sm:$0xff] %vm840_vm4, %v4047_v46  ;;  %v4032_v9 = vadd.f32 %v4762_v37, %v4031_v1 }
0x1319   : > { %v5361_v10 = vpop.f32.mrf.mxu1 }
0x131a   : > { %v4048_v12 = vadd.f32 %v4032_v9, %v6542_v55 }
0x131b   : > { %v4034_v15 = vpop.f32.mrf.mxu1 }
0x131c   : > { %4054 = vst.msk [vmem:[#allocation2 + $0x10] sm:$0xff] %vm840_vm4, %v4048_v12  ;;  %v4035_v5 = vadd.f32 %v4762_v37, %v4034_v15 }
0x131d   : > { %v5362_v63 = vpop.f32.mrf.mxu1 }
0x131e   : > { %v4049_v22 = vadd.f32 %v4035_v5, %v6547_v16 }
0x1320   : > { %4055 = vst.msk [vmem:[#allocation2 + $0x18] sm:$0xff] %vm840_vm4, %v4049_v22  ;;  %v4039_v56 = vpop.f32.mrf.mxu1 }
0x1321   : > { %v4040_v59 = vadd.f32 %v4762_v37, %v4039_v56 }
0x1322   : > { %v5365_v19 = vpop.f32.mrf.mxu1 }
0x1323   : > { %v4050_v43 = vadd.f32 %v4040_v59, %v6552_v50 }
0x1324   : > { %v4042_v23 = vpop.f32.mrf.mxu1 }
0x1325   : > { %4056 = vst.msk [vmem:[#allocation2 + $0x20] sm:$0xff] %vm840_vm4, %v4050_v43  ;;  %v4043_v8 = vadd.f32 %v4762_v37, %v4042_v23  ;;  %4061 = sbr.rel (%p4771_p5) target bundleno = 5857 (0x16e1), region = 108 }
0x1326   : > { %v5366_v57 = vpop.f32.mrf.mxu1 }
0x1327   : > { %v4051_v55 = vadd.f32 %v4043_v8, %v6557_v13 }
0x1329   : > { %4057 = vst.msk [vmem:[#allocation2 + $0x28] sm:$0xff] %vm840_vm4, %v4051_v55 }
0x132a   : > { %v4062_v16 = vld [vmem:[#allocation2] sm:$0xff]  ;;  %v4064_v48 = vld [vmem:[#allocation2 + $0x10] sm:$0xff]  ;;  %v4063_v52 = vld [vmem:[#allocation2 + $0x8] sm:$0xff]  ;;  %v4173_v26 = vlaneseq  ;;  %v5651_v15 = vmov 0.0   ;;  %vm5652_vm9 = vmmov 0   ;;  %vm4252_vm10 = vcmask 1041409  }
0x132b   : > { %v4070_v58 = vsel %vm840_vm4, %v4062_v16, 0.0  ;;  %v4076_v7 = vsel %vm840_vm4, %v4064_v48, 0.0  ;;  %v4065_v50 = vld [vmem:[#allocation2 + $0x18] sm:$0xff]  ;;  %v4073_v47 = vsel %vm840_vm4, %v4063_v52, 0.0  ;;  %v4172_v42 = vld [vmem:[%s6736_s17] sm:$0x7]  ;;  %5367 = vmatprep.subr.bf16.mxu0 %v5651_v15  ;;  %5375 = vmatprep.subr.mxu1 %v5651_v15 }
0x132c   : > { %4071 = vadd.xlane.f32.xlu0 %v4070_v58  ;;  %4077 = vadd.xlane.f32.xlu1 %v4076_v7  ;;  %v4079_v30 = vsel %vm840_vm4, %v4065_v50, 0.0  ;;  %v4066_v13 = vld [vmem:[#allocation2 + $0x20] sm:$0xff]  ;;  %v4174_v32 = vshrl.u32 %v4173_v26, 7  ;;  %v5592_v12 = vld [vmem:[%s6770_s0 + $0x8] sm:$0xff]   ;;  %vm4254_vm11 = vcmask 1042434   ;;  %vm4314_vm12 = vcmask 254976  }
0x132d   : > { %v4082_v41 = vsel %vm840_vm4, %v4066_v13, 0.0  ;;  %5368 = vmatpush3.bf16.msra.mxu0 %v5592_v12  ;;  %v5593_v5 = vld [vmem:[%s6770_s0] sm:$0xff]   ;;  %5371 = vmatprep.mubr.msk.bf16.mxu0 %vm5652_vm9, %v5651_v15  ;;  %vm4321_vm13 = vcmask 256000   ;;  %vm4408_vm14 = vcmask 17408  }
0x132e   : > { %v4175_v37 = vsub.s32 0, %v4174_v32  ;;  %v4186_v38 = vsub.s32 1, %v4174_v32  ;;  %v4197_v3 = vsub.s32 2, %v4174_v32  ;;  %5369 = vmatprep.subr.bf16.mxu0 %v5651_v15  ;;  %5377 = vmatprep.mubr.msk.f32.mxu1 %vm5652_vm9, %v5651_v15 }
0x1330   : > { %v4067_v40 = vld [vmem:[#allocation2 + $0x28] sm:$0xff]  ;;  %4074 = vadd.xlane.f32.xlu0 %v4073_v47  ;;  %4080 = vadd.xlane.f32.xlu1 %v4079_v30  ;;  %v4176_v44 = vrot.slane %v4172_v42, %v4175_v37  ;;  %v4187_v45 = vrot.slane %v4172_v42, %v4186_v38  ;;  %v4198_v0 = vrot.slane %v4172_v42, %v4197_v3 }
0x1331   : > { %v4085_v28 = vsel %vm840_vm4, %v4067_v40, 0.0  ;;  %5370 = vmatpush3.bf16.msra.mxu0 %v5593_v5 }
0x1334   : > { %4083 = vadd.xlane.f32.xlu0 %v4082_v41  ;;  %4086 = vadd.xlane.f32.xlu1 %v4085_v28 }
0x13b5   : > { %v4072_v11 = vpop.xlane.xlu0 %4071  ;;  %v4078_v14 = vpop.xlane.xlu1 %4077 }
0x13b6   : > { %v4088_v34 = vmul.f32 0.03125, %v4072_v11  ;;  %v4090_v39 = vmul.f32 0.03125, %v4078_v14 }
0x13b8   : > { %v6641_v54 = vsub.f32 %v4062_v16, %v4088_v34  ;;  %v6643_v51 = vsub.f32 %v4064_v48, %v4090_v39  ;;  %v4772_v34 = vld [vmem:[%s6771_s30] ss:$0 sm:$0xff] }
0x13b9   : > { %v4075_v24 = vpop.xlane.xlu0 %4074  ;;  %v4081_v35 = vpop.xlane.xlu1 %4080 }
0x13ba   : > { %v4089_v60 = vmul.f32 0.03125, %v4075_v24  ;;  %v4091_v27 = vmul.f32 0.03125, %v4081_v35  ;;  %v4100_v49 = vmul.f32 %v6641_v54, %v6641_v54  ;;  %v4102_v17 = vmul.f32 %v6643_v51, %v6643_v51 }
0x13bc   : > { %v6649_v29 = vsub.f32 %v4063_v52, %v4089_v60  ;;  %v6651_v36 = vsub.f32 %v4065_v50, %v4091_v27  ;;  %v4106_v18 = vsel %vm840_vm4, %v4100_v49, 0.0  ;;  %v4112_v4 = vsel %vm840_vm4, %v4102_v17, 0.0  ;;  %v4773_v49 = vld [vmem:[%s6772_s14] ss:$0 sm:$0xff] }
0x13bd   : > { %4107 = vadd.xlane.f32.xlu0 %v4106_v18  ;;  %v4084_v61 = vpop.xlane.xlu0 %4083  ;;  %v4087_v53 = vpop.xlane.xlu1 %4086 }
0x13be   : > { %v4092_v20 = vmul.f32 0.03125, %v4084_v61  ;;  %v4101_v62 = vmul.f32 %v6649_v29, %v6649_v29  ;;  %v4103_v31 = vmul.f32 %v6651_v36, %v6651_v36  ;;  %v4093_v46 = vmul.f32 0.03125, %v4087_v53 }
0x13c0   : > { %v6659_v21 = vsub.f32 %v4066_v13, %v4092_v20  ;;  %v4109_v6 = vsel %vm840_vm4, %v4101_v62, 0.0  ;;  %v4115_v33 = vsel %vm840_vm4, %v4103_v31, 0.0  ;;  %v6669_v1 = vsub.f32 %v4067_v40, %v4093_v46 }
0x13c1   : > { %4113 = vadd.xlane.f32.xlu0 %v4112_v4  ;;  %4110 = vadd.xlane.f32.xlu1 %v4109_v6 }
0x13c2   : > { %v4104_v25 = vmul.f32 %v6659_v21, %v6659_v21  ;;  %v4105_v9 = vmul.f32 %v6669_v1, %v6669_v1 }
0x13c4   : > { %v4118_v2 = vsel %vm840_vm4, %v4104_v25, 0.0  ;;  %v4121_v10 = vsel %vm840_vm4, %v4105_v9, 0.0 }
0x13c5   : > { %4116 = vadd.xlane.f32.xlu1 %v4115_v33  ;;  %4119 = vadd.xlane.f32.xlu0 %v4118_v2 }
0x13d6   : > { %4182 = vbcast.lane.b32.xlu1 %v4176_v44, 264 }
0x13da   : > { %4189 = vbcast.lane.b32.xlu1 %v4187_v45, 256 }
0x13db   : > { %4178 = vbcast.lane.b32.xlu0 %v4176_v44, 256 }
0x13de   : > { %4193 = vbcast.lane.b32.xlu1 %v4187_v45, 264 }
0x13df   : > { %4200 = vbcast.lane.b32.xlu0 %v4198_v0, 256 }
0x1402   : > { %4122 = vadd.xlane.f32.xlu1 %v4121_v10 }
0x1413   : > { %4204 = vbcast.lane.b32.xlu1 %v4198_v0, 264 }
0x1446   : > { %v4108_v22 = vpop.xlane.xlu0 %4107 }
0x1447   : > { %v4124_v8 = vmul.f32 0.03125, %v4108_v22 }
0x1449   : > { %v4130_v48 = vadd.f32 1e-05, %v4124_v8 }
0x144a   : > { %v4111_v63 = vpop.xlane.xlu1 %4110  ;;  %v4114_v59 = vpop.xlane.xlu0 %4113 }
0x144b   : > { %v4125_v43 = vmul.f32 0.03125, %v4111_v63  ;;  %v4126_v23 = vmul.f32 0.03125, %v4114_v59 }
0x144d   : > { %v4131_v55 = vadd.f32 1e-05, %v4125_v43  ;;  %v4132_v16 = vadd.f32 1e-05, %v4126_v23 }
0x144e   : > { %v4117_v56 = vpop.xlane.xlu1 %4116  ;;  %v4120_v52 = vpop.xlane.xlu0 %4119 }
0x144f   : > { %v4127_v19 = vmul.f32 0.03125, %v4117_v56  ;;  %v4128_v50 = vmul.f32 0.03125, %v4120_v52 }
0x1451   : > { %v4133_v57 = vadd.f32 1e-05, %v4127_v19  ;;  %v4134_v28 = vadd.f32 1e-05, %v4128_v50 }
0x1452   : > { %v4183_v58 = vpop.permute.xlu1 %4182  ;;  %v4179_v62 = vpop.permute.xlu0 %4178 }
0x1453   : > { %5594 = vrsqrt.f32 %v4133_v57 }
0x1454   : > { %5596 = vrsqrt.f32 %v4131_v55 }
0x1455   : > { %5598 = vrsqrt.f32 %v4132_v16 }
0x1456   : > { %5600 = vrsqrt.f32 %v4130_v48  ;;  %v4190_v13 = vpop.permute.xlu1 %4189  ;;  %v4201_v15 = vpop.permute.xlu0 %4200 }
0x1457   : > { %5602 = vrsqrt.f32 %v4134_v28 }
0x145a   : > { %v4194_v27 = vpop.permute.xlu1 %4193 }
0x1460   : > { %v5595_v7 = vpop.eup %5594 }
0x1461   : > { %v5597_v47 = vpop.eup %5596  ;;  %v4145_v40 = vmul.f32 %v5595_v7, %v6651_v36 }
0x1462   : > { %v5599_v30 = vpop.eup %5598  ;;  %v4143_v11 = vmul.f32 %v5597_v47, %v6649_v29 }
0x1463   : > { %v5601_v41 = vpop.eup %5600  ;;  %v4144_v14 = vmul.f32 %v5599_v30, %v6643_v51  ;;  %v4157_v39 = vmul.f32 %v4772_v34, %v4145_v40 }
0x1464   : > { %v4142_v24 = vmul.f32 %v5601_v41, %v6641_v54  ;;  %v4155_v35 = vmul.f32 %v4772_v34, %v4143_v11  ;;  %v5603_v2 = vpop.eup %5602 }
0x1465   : > { %v4156_v60 = vmul.f32 %v4772_v34, %v4144_v14  ;;  %v4169_v17 = vadd.f32 %v4773_v49, %v4157_v39  ;;  %v4146_v38 = vmul.f32 %v5603_v2, %v6659_v21 }
0x1466   : > { %v4154_v36 = vmul.f32 %v4772_v34, %v4142_v24  ;;  %v4167_v29 = vadd.f32 %v4773_v49, %v4155_v35 }
0x1467   : > { %v4168_v18 = vadd.f32 %v4773_v49, %v4156_v60  ;;  %v4209_v20 = vmul.f32 %v4194_v27, %v4169_v17  ;;  %v4158_v0 = vmul.f32 %v4772_v34, %v4146_v38  ;;  %v4312_v60 = vld [vmem:[%s6773_s26] sm:$0x3] }
0x1468   : > { %v4166_v4 = vadd.f32 %v4773_v49, %v4154_v36  ;;  %v4207_v6 = vmul.f32 %v4183_v58, %v4167_v29  ;;  %v4313_v27 = vmul.f32 %v4312_v60, %v4312_v60 }
0x1469   : > { %v4208_v54 = vmul.f32 %v4190_v13, %v4168_v18  ;;  %v4222_v33 = vsel %vm840_vm4, %v4209_v20, 0.0  ;;  %v4170_v10 = vadd.f32 %v4773_v49, %v4158_v0 }
0x146a   : > { %v4206_v25 = vmul.f32 %v4179_v62, %v4166_v4  ;;  %v4213_v26 = vsel %vm840_vm4, %v4207_v6, 0.0 }
0x146b   : > { %v4221_v32 = vsel %vm840_vm4, %v4208_v54, 0.0  ;;  %v4210_v59 = vmul.f32 %v4201_v15, %v4170_v10 }
0x146c   : > { %v4223_v37 = vadd.f32 %v4222_v33, %v4221_v32  ;;  %v4212_v42 = vsel %vm840_vm4, %v4206_v25, 0.0  ;;  %v4404_v33 = vstv %s4403_s27 }
0x146d   : > { %v4214_v44 = vadd.f32 %v4213_v26, %v4212_v42  ;;  %v4230_v21 = vsel %vm840_vm4, %v4210_v59, 0.0  ;;  %v4405_v25 = vmul.f32 1.442695, %v4404_v33 }
0x146e   : > { %v4224_v45 = vrot.slane %v4223_v37, 4 }
0x146f   : > { %v4215_v3 = vrot.slane %v4214_v44, 4 }
0x1470   : > { %v4225_v53 = vadd.f32 %v4224_v45, %v4223_v37 }
0x1471   : > { %v4216_v9 = vadd.f32 %v4215_v3, %v4214_v44 }
0x1472   : > { %v4226_v5 = vrot.slane %v4225_v53, 2 }
0x1473   : > { %v4217_v56 = vrot.slane %v4216_v9, 2 }
0x1474   : > { %v4227_v43 = vadd.f32 %v4226_v5, %v4225_v53 }
0x1475   : > { %v4218_v8 = vadd.f32 %v4217_v56, %v4216_v9 }
0x1476   : > { %v4228_v16 = vrot.slane %v4227_v43, 1 }
0x1477   : > { %v4219_v52 = vrot.slane %v4218_v8, 1 }
0x1479   : > { %v4220_v50 = vadd.f32 %v4219_v52, %v4218_v8 }
0x147b   : > { %v4243_v40 = vpack.c.bf16 %v4220_v50, %v4220_v50 }
0x147d   : > { %v4249_v14 = vunpack.c.l.b16 %v4243_v40 }
0x148b   : > { %v4123_v51 = vpop.xlane.xlu1 %4122 }
0x148c   : > { %v4129_v61 = vmul.f32 0.03125, %v4123_v51 }
0x148e   : > { %v4135_v31 = vadd.f32 1e-05, %v4129_v61 }
0x148f   : > { %v4205_v22 = vpop.permute.xlu1 %4204 }
0x1490   : > { %5604 = vrsqrt.f32 %v4135_v31 }
0x149d   : > { %v5605_v46 = vpop.eup %5604 }
0x149e   : > { %v4147_v12 = vmul.f32 %v5605_v46, %v6669_v1  ;;  %v4229_v1 = vadd.f32 %v4228_v16, %v4227_v43 }
0x14a0   : > { %v4159_v63 = vmul.f32 %v4772_v34, %v4147_v12  ;;  %v4244_v30 = vpack.c.bf16 %v4229_v1, %v4229_v1 }
0x14a2   : > { %v4171_v19 = vadd.f32 %v4773_v49, %v4159_v63  ;;  %v4250_v28 = vunpack.c.l.b16 %v4244_v30  ;;  %v4315_v49 = vsel %vm4314_vm12, %v4313_v27, 0.0 }
0x14a3   : > { %4316 = vadd.xlane.f32.xlu1 %v4315_v49 }
0x14a4   : > { %v4211_v23 = vmul.f32 %v4205_v22, %v4171_v19  ;;  %v4253_v39 = vsel %vm4252_vm10, %v4250_v28, %v4249_v14 }
0x14a6   : > { %v4231_v57 = vsel %vm840_vm4, %v4211_v23, 0.0 }
0x14a7   : > { %v4232_v55 = vadd.f32 %v4231_v57, %v4230_v21 }
0x14a9   : > { %v4233_v48 = vrot.slane %v4232_v55, 4 }
0x14ab   : > { %v4234_v58 = vadd.f32 %v4233_v48, %v4232_v55 }
0x14ad   : > { %v4235_v7 = vrot.slane %v4234_v58, 2 }
0x14af   : > { %v4236_v47 = vadd.f32 %v4235_v7, %v4234_v58 }
0x14b1   : > { %v4237_v13 = vrot.slane %v4236_v47, 1 }
0x14b3   : > { %v4238_v41 = vadd.f32 %v4237_v13, %v4236_v47 }
0x14b5   : > { %v4245_v11 = vpack.c.bf16 %v4238_v41, %v4238_v41 }
0x14b7   : > { %v4251_v34 = vunpack.c.l.b16 %v4245_v11 }
0x14b9   : > { %v4255_v24 = vsel %vm4254_vm11, %v4251_v34, %v4253_v39 }
0x14ba   : > { %v4256_v35 = vpack.c.b16 %v4255_v24, %v4255_v24 }
0x14bc   : > { %5372 = vmatmul.mubr.msk.bf16.vlgmr.msra.gmra.mxu0 %vm840_vm4, %v4256_v35 }
0x152c   : > { %v4317_v20 = vpop.xlane.xlu1 %4316 }
0x152d   : > { %5606 = vrsqrt.f32 %v4317_v20 }
0x153a   : > { %v5607_v62 = vpop.eup %5606 }
0x153b   : > { %v4319_v54 = vmul.f32 %v5607_v62, %v4312_v60 }
0x157c   : > { %v4306_v17 = vpop.f32.mrf.mxu0 }
0x157d   : > { %v4320_v36 = vmul.f32 %v4306_v17, %v4306_v17 }
0x157e   : > { %v5373_v29 = vpop.f32.mrf.mxu0 }
0x157f   : > { %v4322_v18 = vsel %vm4321_vm13, %v4320_v36, 0.0 }
0x1580   : > { %4323 = vadd.xlane.f32.xlu0 %v4322_v18  ;;  %v4309_v51 = vpop.f32.mrf.mxu0 }
0x1582   : > { %v5374_v61 = vpop.f32.mrf.mxu0 }
0x1609   : > { %v4324_v4 = vpop.xlane.xlu0 %4323 }
0x160a   : > { %5608 = vrsqrt.f32 %v4324_v4 }
0x160b   : > { %5610 = vpow2.f32 %v4405_v25 }
0x1617   : > { %v5609_v31 = vpop.eup %5608 }
0x1618   : > { %v4326_v6 = vmul.f32 %v5609_v31, %v4306_v17  ;;  %v5611_v2 = vpop.eup %5610 }
0x161a   : > { %5376 = vmatpush3.xpose.msk.msra.mxu1 %vm840_vm4, %v4326_v6 }
0x161d   : > { %5378 = vmatmul.mubr.msk.f32.vlgmr.msra.gmra.mxu1 %vm840_vm4, %v4319_v54 }
0x16dd   : > { %v4399_v26 = vpop.f32.mrf.mxu1 }
0x16de   : > { %v4407_v32 = vmul.f32 %v5611_v2, %v4399_v26 }
0x16df   : > { %v5379_v37 = vpop.f32.mrf.mxu1 }
0x16e0   : > { %4409 = vst.msk [vmem:[#allocation5] sm:$0x3] %vm4408_vm14, %v4407_v32 }
0x16e1 PF: > { %p5390_p6 = scmp.eq.s32.totalorder %s5768_s24, 1  ;;  %s5653_s3 = smov [#allocation5]  }
0x16e2   : > { %s4417_s29 = sshll.u32 %s5653_s3, 4  ;;  %s4418_s29 = int_to_ptr.vmem [resolvable:$true] %s4417_s29 }
0x16e3   : > { %s5612_s19 = scalar_lea.vmem %s4418_s29, 32  ;;  %p5619_p10 = scmp.lt.s32.totalorder %s4418_s29, %s4418_s29 }
0x16e4   : > { %p5613_p7 = scmp.ne.s32.totalorder %s4418_s29, %s5612_s19  ;;  %p5620_p11 = scmp.lt.s32.totalorder %s5612_s19, %s5612_s19 }
0x16e6   : > { %p5614_p8 = pnand %p5613_p7, %p5390_p6  ;;  %p5621_p12 = por %p5620_p11, %p5619_p10 }
0x16e8   : > { %p5615_p9 = pneg %p5614_p8 }
0x16ea   : > { %p5622_p13 = pnand %p5621_p12, %p5615_p9 }
0x16ec   : > { %5625 = shalt.err (!%p5622_p13)
}
0x16ed   : > { %s6774_s22 = sld [smem:[#allocation19_spill]] }
0x16f3   : > { %5387 = dma.vmem_to_hbm [thread:$0]  (%p5390_p6), %s4418_s29, 32, %s6774_s22, [#allocation6]  }
0x16f4   : > { %5641 = dma.done.wait (%p5390_p6), [#allocation6], 32  }
0x16f5   : > { %5643 = vsyncadd (%p5390_p6), [#allocation6], 4294967264 }
0x16f6 PF: > { %s6775_s16 = sld [smem:[#allocation8_spill]] }
0x16fc   : > { %s32_s23 = sadd.s32 1, %s6775_s16  }
0x16fd   : > { %p29_p0 = scmp.ge.s32.totalorder %s32_s23, 4  }
0x16ff   :  { %31 = sbr.rel (!%p29_p0) target bundleno = 14 (0xe), region = 193 }
0x1704   :  { %4430 = vsyncpa [#allocation6], 1 }
0x1705   :  { %4432 = vsyncpa [#allocation6 + $0x1], 1 }

</bundles_post_ra>
